<compile_context>
chip_gen: v6e
topology: v6e:2x2x1
jax: 0.10.0
libtpu: 0.0.40
codegen_flags: <defaults>
</compile_context>

<pallas_src>
import math
import functools

import jax
import jax.numpy as jnp
from jax.experimental import pallas as pl
from jax.experimental.pallas import tpu as pltpu

DIM = 512          # word / compound feature dim
EMBED_DIM = 128    # gnn embedding dim / co-attention dim
NHEAD = 8
LAYER_COA = 1
LN_EPS = 1e-5
BN_EPS = 1e-5


# ----------------------------- Pallas kernels ------------------------------

def _linear_kernel(x_ref, wt_ref, b_ref, o_ref, *, relu):
    # y = x @ w_t + b   (w_t already stored transposed: [K, O])
    y = jnp.dot(x_ref[...], wt_ref[...], preferred_element_type=jnp.float32)
    y = y + b_ref[...]
    if relu:
        y = jnp.maximum(y, 0.0)
    o_ref[...] = y


def linear(x, wt, b2, relu=False):
    """x:[M,K], wt:[K,O] (pre-transposed), b2:[1,O] -> [M,O]."""
    M = x.shape[0]
    O = wt.shape[1]
    return pl.pallas_call(
        functools.partial(_linear_kernel, relu=relu),
        out_shape=jax.ShapeDtypeStruct((M, O), jnp.float32),
    )(x, wt, b2)


def _sage_update_kernel(a_ref, x_ref, wa_ref, wx_ref, o_ref):
    # relu(cat([aggr, x]) @ Wu.T)  ==  relu(aggr @ Wu_a + x @ Wu_x)
    y = (jnp.dot(a_ref[...], wa_ref[...], preferred_element_type=jnp.float32)
         + jnp.dot(x_ref[...], wx_ref[...], preferred_element_type=jnp.float32))
    o_ref[...] = jnp.maximum(y, 0.0)


def sage_update(aggr, x, wa_t, wx_t):
    M = x.shape[0]
    O = wa_t.shape[1]
    return pl.pallas_call(
        _sage_update_kernel,
        out_shape=jax.ShapeDtypeStruct((M, O), jnp.float32),
    )(aggr, x, wa_t, wx_t)


def _attn_block_kernel(x_ref, y_ref, wq_ref, bq_ref, wkv_ref, bkv_ref,
                       wm_ref, bm_ref, g_ref, be_ref, o_ref, *, nhead, eps):
    # Fused MHAtt + residual + LayerNorm.
    #   q from x (query source), k/v from y (key/value source).
    # Head split is done with per-head lane masks on the 128-wide hidden dim
    # (no in-kernel reshape / transpose); mask=None, dropout = eval identity.
    x = x_ref[...]                        # [Lq, D]
    y = y_ref[...]                        # [Lk, D]
    D = x.shape[-1]
    dh = D // nhead
    scale = 1.0 / math.sqrt(dh)

    # scale folded into q (bias included — same as scaling the scores)
    q = (jnp.dot(x, wq_ref[...], preferred_element_type=jnp.float32)
         + bq_ref[...]) * scale
    kv = (jnp.dot(y, wkv_ref[...], preferred_element_type=jnp.float32)
          + bkv_ref[...])                 # [Lk, 2D]
    k = kv[:, :D]
    v = kv[:, D:]

    lane = jax.lax.broadcasted_iota(jnp.int32, (1, D), 1)
    att = jnp.zeros_like(x)               # accumulates per-head outputs
    for h in range(nhead):
        m_h = ((lane >= h * dh) & (lane < (h + 1) * dh)).astype(jnp.float32)
        # full-128 contraction per head; masked q selects head-h columns
        s = jnp.einsum("qd,kd->qk", q * m_h, k,
                       preferred_element_type=jnp.float32)   # [Lq, Lk]
        s = s - jnp.max(s, axis=-1, keepdims=True)
        p = jnp.exp(s)
        p = p * pl.reciprocal(jnp.sum(p, axis=-1, keepdims=True), approx=True)
        # masked v keeps head-h output in its own column block
        att = att + jnp.dot(p, v * m_h, preferred_element_type=jnp.float32)

    z = x + (jnp.dot(att, wm_ref[...], preferred_element_type=jnp.float32)
             + bm_ref[...])
    mu = jnp.mean(z, axis=-1, keepdims=True)
    var = jnp.mean((z - mu) ** 2, axis=-1, keepdims=True)
    zn = (z - mu) * jax.lax.rsqrt(var + eps)
    o_ref[...] = zn * g_ref[...] + be_ref[...]


def attn_block(p, x_query, y_keyval):
    """SA block: attn_block(p, x, x); DPA block: attn_block(p, x, y)."""
    Lq, D = x_query.shape
    return pl.pallas_call(
        functools.partial(_attn_block_kernel, nhead=NHEAD, eps=LN_EPS),
        out_shape=jax.ShapeDtypeStruct((Lq, D), jnp.float32),
    )(x_query, y_keyval, p["wq_t"], p["bq"], p["wkv_t"], p["bkv"],
      p["wm_t"], p["bm"], p["ln_g"], p["ln_b"])


def _pcnn_kernel(x_ref, w1_ref, b1_ref, a1_ref, w2_ref, b2_ref, a2_ref,
                 w3_ref, b3_ref, a3_ref, o_ref, y1_scr, y2_scr,
                 *, k1, k2, k3):
    # Three valid Conv1d layers as shifted matmuls (channels-last), each
    # followed by relu and the eval-mode BatchNorm per-channel affine.
    L = x_ref.shape[0]
    L1 = L - k1 + 1
    L2 = L1 - k2 + 1
    L3 = L2 - k3 + 1

    acc = jnp.dot(x_ref[0:L1, :], w1_ref[0], preferred_element_type=jnp.float32)
    for j in range(1, k1):
        acc = acc + jnp.dot(x_ref[j:j + L1, :], w1_ref[j],
                            preferred_element_type=jnp.float32)
    y1 = jnp.maximum(acc + b1_ref[...], 0.0)
    y1_scr[...] = y1 * a1_ref[0:1, :] + a1_ref[1:2, :]

    acc = jnp.dot(y1_scr[0:L2, :], w2_ref[0], preferred_element_type=jnp.float32)
    for j in range(1, k2):
        acc = acc + jnp.dot(y1_scr[j:j + L2, :], w2_ref[j],
                            preferred_element_type=jnp.float32)
    y2 = jnp.maximum(acc + b2_ref[...], 0.0)
    y2_scr[...] = y2 * a2_ref[0:1, :] + a2_ref[1:2, :]

    acc = jnp.dot(y2_scr[0:L3, :], w3_ref[0], preferred_element_type=jnp.float32)
    for j in range(1, k3):
        acc = acc + jnp.dot(y2_scr[j:j + L3, :], w3_ref[j],
                            preferred_element_type=jnp.float32)
    y3 = jnp.maximum(acc + b3_ref[...], 0.0)
    o_ref[...] = y3 * a3_ref[0:1, :] + a3_ref[1:2, :]


def protein_cnn(p, x_cl):
    """x_cl:[L,512] channels-last -> [L3,128] (still channels-last)."""
    L = x_cl.shape[0]
    k1 = p["c1w_t"].shape[0]
    k2 = p["c2w_t"].shape[0]
    k3 = p["c3w_t"].shape[0]
    c1 = p["c1w_t"].shape[2]
    c2 = p["c2w_t"].shape[2]
    c3 = p["c3w_t"].shape[2]
    L1 = L - k1 + 1
    L2 = L1 - k2 + 1
    L3 = L2 - k3 + 1
    return pl.pallas_call(
        functools.partial(_pcnn_kernel, k1=k1, k2=k2, k3=k3),
        out_shape=jax.ShapeDtypeStruct((L3, c3), jnp.float32),
        scratch_shapes=[pltpu.VMEM((L1, c1), jnp.float32),
                        pltpu.VMEM((L2, c2), jnp.float32)],
    )(x_cl, p["c1w_t"], p["c1b"], p["bn1"],
      p["c2w_t"], p["c2b"], p["bn2"],
      p["c3w_t"], p["c3b"], p["bn3"])


def _head_kernel(cb0_ref, comp_ref, prot_ref,
                 wlin_ref, blin_ref, wlin2_ref, blin2_ref,
                 w64c_ref, w64p_ref, b64_ref, wint_ref, bint_ref, o_ref):
    # CLS chain: 768 -> 512 -> 64 (bert_l already folded into lin2 weights)
    cls = (jnp.dot(cb0_ref[...], wlin_ref[...],
                   preferred_element_type=jnp.float32) + blin_ref[...])
    cls = (jnp.dot(cls, wlin2_ref[...],
                   preferred_element_type=jnp.float32) + blin2_ref[...])   # [1,128]
    # mean pooling of the co-attended vectors (done in-kernel)
    c_mean = jnp.mean(comp_ref[...], axis=0, keepdims=True)                # [1,128]
    p_mean = jnp.mean(prot_ref[...], axis=0, keepdims=True)                # [1,128]
    # lin64 on the [c_mean | p_mean] concat, expressed as two half matmuls
    coa = (jnp.dot(c_mean, w64c_ref[...], preferred_element_type=jnp.float32)
           + jnp.dot(p_mean, w64p_ref[...], preferred_element_type=jnp.float32)
           + b64_ref[...])                                                 # [1,128]
    coa = jnp.tanh(coa + cls)
    o_ref[...] = (jnp.dot(coa, wint_ref[...],
                          preferred_element_type=jnp.float32) + bint_ref[...])


def head_block(p, compound_bert_row0, compound128, protein128):
    return pl.pallas_call(
        _head_kernel,
        out_shape=jax.ShapeDtypeStruct((1, p["wint_t"].shape[1]), jnp.float32),
    )(compound_bert_row0, compound128, protein128,
      p["wlin_t"], p["blin"], p["wlin2_t"], p["blin2"],
      p["w64c_t"], p["w64p_t"], p["b64"], p["wint_t"], p["bint"])


# --------------------------- parameter creation -----------------------------

def init_linear_params(key, out_f, in_f, bias=True):
    kw, kb = jax.random.split(key)
    w = jax.random.normal(kw, (out_f, in_f), jnp.float32) / math.sqrt(in_f)
    b = (jax.random.normal(kb, (out_f,), jnp.float32) * 0.01 if bias
         else jnp.zeros((out_f,), jnp.float32))
    return {"w": w, "b": b}


def init_mhatt(key, hid_dim):
    ks = jax.random.split(key, 4)
    return {"v": init_linear_params(ks[0], hid_dim, hid_dim),
            "k": init_linear_params(ks[1], hid_dim, hid_dim),
            "q": init_linear_params(ks[2], hid_dim, hid_dim),
            "merge": init_linear_params(ks[3], hid_dim, hid_dim)}


def init_sa(key, hid_dim):
    return {"mhatt": init_mhatt(key, hid_dim),
            "ln_g": jnp.ones((hid_dim,), jnp.float32),
            "ln_b": jnp.zeros((hid_dim,), jnp.float32)}


def init_sage(key, in_ch, out_ch):
    k1, k2 = jax.random.split(key)
    return {"lin": init_linear_params(k1, out_ch, in_ch),
            "update": init_linear_params(k2, in_ch, in_ch + out_ch, bias=False)}


def init_raw_params(key, n_fingerprint=20, n_word=25, dim=DIM,
                    layer_coa=LAYER_COA):
    ks = iter(jax.random.split(key, 40))
    bn_s = jnp.full((128,), 1.0 / math.sqrt(1.0 + BN_EPS), jnp.float32)  # eval BN
    bn_t = jnp.zeros((128,), jnp.float32)
    return {
        "gnn": {
            "embed": jax.random.normal(next(ks), (n_fingerprint, EMBED_DIM),
                                       jnp.float32) * 0.1,
            "conv1": init_sage(next(ks), EMBED_DIM, 128),
            "conv2": init_sage(next(ks), 128, 128),
            "lin": init_linear_params(next(ks), 512, 128),
        },
        "lin768": init_linear_params(next(ks), 768, dim),
        "lin128": init_linear_params(next(ks), 128, dim),
        "embed_word": jax.random.normal(next(ks), (n_word, dim),
                                        jnp.float32) * 0.1,
        "pcnn": {
            "c1w": jax.random.normal(next(ks), (128, dim, 3),
                                     jnp.float32) / math.sqrt(dim * 3),
            "c1b": jax.random.normal(next(ks), (128,), jnp.float32) * 0.01,
            "c2w": jax.random.normal(next(ks), (128, 128, 6),
                                     jnp.float32) / math.sqrt(128 * 6),
            "c2b": jax.random.normal(next(ks), (128,), jnp.float32) * 0.01,
            "c3w": jax.random.normal(next(ks), (128, 128, 9),
                                     jnp.float32) / math.sqrt(128 * 9),
            "c3b": jax.random.normal(next(ks), (128,), jnp.float32) * 0.01,
            "bn1s": bn_s, "bn1t": bn_t, "bn2s": bn_s, "bn2t": bn_t,
            "bn3s": bn_s, "bn3t": bn_t,
        },
        "linbert": init_linear_params(next(ks), 768, 128),
        "lin": init_linear_params(next(ks), 512, 768),
        "lin2": init_linear_params(next(ks), 64, 512),
        "encoder_coa": {
            "encoder_layers": [init_sa(next(ks), 128) for _ in range(layer_coa)],
            "decoder_sa": [init_sa(next(ks), 128) for _ in range(layer_coa)],
            "decoder_coa": [init_sa(next(ks), 128) for _ in range(layer_coa)],
        },
        "lin64": init_linear_params(next(ks), 64, 256),
        "W_interaction": init_linear_params(next(ks), 2, 64),
        "bert_l": 0.5,
    }


def prepare_params(raw):
    """Pack PyTorch-layout params into kernel-ready (transposed/fused/padded)
    arrays once, outside the jitted forward."""

    def pack_lin(lin, out_pad=None, scale=None):
        w = jnp.asarray(lin["w"], jnp.float32)          # [O, K]
        b = jnp.asarray(lin["b"], jnp.float32)          # [O]
        if scale is not None:
            w = w * scale
            b = b * scale
        o = w.shape[0]
        wt = w.T                                        # [K, O]
        if out_pad is not None and out_pad > o:
            wt = jnp.pad(wt, ((0, 0), (0, out_pad - o)))
            b = jnp.pad(b, (0, out_pad - o))
        return wt, b.reshape(1, -1)

    def pack_attn(sa):
        m = sa["mhatt"]
        wq_t, bq = pack_lin(m["q"])
        wk_t, bk = pack_lin(m["k"])
        wv_t, bv = pack_lin(m["v"])
        wm_t, bm = pack_lin(m["merge"])
        return {"wq_t": wq_t, "bq": bq,
                "wkv_t": jnp.concatenate([wk_t, wv_t], axis=1),   # [D, 2D]
                "bkv": jnp.concatenate([bk, bv], axis=1),         # [1, 2D]
                "wm_t": wm_t, "bm": bm,
                "ln_g": sa["ln_g"].reshape(1, -1),
                "ln_b": sa["ln_b"].reshape(1, -1)}

    def pack_sage(s):
        wl_t, bl = pack_lin(s["lin"])
        out_ch = s["lin"]["w"].shape[0]
        wu_t = jnp.asarray(s["update"]["w"], jnp.float32).T       # [out+in, in]
        return {"wl_t": wl_t, "bl": bl,
                "wua_t": wu_t[:out_ch, :],                        # aggr half
                "wux_t": wu_t[out_ch:, :]}                        # x half

    def pack_conv(w, b):
        # [C_out, C_in, k] -> per-tap [k, C_in, C_out]
        return (jnp.transpose(jnp.asarray(w, jnp.float32), (2, 1, 0)),
                jnp.asarray(b, jnp.float32).reshape(1, -1))

    g = raw["gnn"]
    lin_wt, lin_b = pack_lin(g["lin"])
    pc = raw["pcnn"]
    c1w_t, c1b = pack_conv(pc["c1w"], pc["c1b"])
    c2w_t, c2b = pack_conv(pc["c2w"], pc["c2b"])
    c3w_t, c3b = pack_conv(pc["c3w"], pc["c3b"])

    lin768_wt, lin768_b = pack_lin(raw["lin768"])
    lin128_wt, lin128_b = pack_lin(raw["lin128"])
    linbert_wt, linbert_b = pack_lin(raw["linbert"])

    # Scalar head chain: pad O=64 / O=2 outputs to 128 lanes, fold bert_l
    # into lin2 (bert_l * lin2(x) == x @ (bert_l*W2).T + bert_l*b2).
    wlin_t, blin = pack_lin(raw["lin"])                            # 768 -> 512
    wlin2_t, blin2 = pack_lin(raw["lin2"], out_pad=128,
                              scale=raw["bert_l"])                 # 512 -> 64(->128)
    w64_t, b64 = pack_lin(raw["lin64"], out_pad=128)               # 256 -> 64(->128)
    w_int = jnp.asarray(raw["W_interaction"]["w"], jnp.float32)    # [2, 64]
    b_int = jnp.asarray(raw["W_interaction"]["b"], jnp.float32)    # [2]
    wint_t = jnp.zeros((128, 128), jnp.float32)
    wint_t = wint_t.at[:w_int.shape[1], :w_int.shape[0]].set(w_int.T)
    bint = jnp.zeros((1, 128), jnp.float32).at[0, :b_int.shape[0]].set(b_int)

    enc = raw["encoder_coa"]
    return {
        "gnn": {"embed": g["embed"],
                "conv1": pack_sage(g["conv1"]),
                "conv2": pack_sage(g["conv2"]),
                "lin_wt": lin_wt, "lin_b": lin_b},
        "lin768_wt": lin768_wt, "lin768_b": lin768_b,
        "lin128_wt": lin128_wt, "lin128_b": lin128_b,
        "embed_word": raw["embed_word"],
        "pcnn": {"c1w_t": c1w_t, "c1b": c1b,
                 "bn1": jnp.stack([pc["bn1s"], pc["bn1t"]]),
                 "c2w_t": c2w_t, "c2b": c2b,
                 "bn2": jnp.stack([pc["bn2s"], pc["bn2t"]]),
                 "c3w_t": c3w_t, "c3b": c3b,
                 "bn3": jnp.stack([pc["bn3s"], pc["bn3t"]])},
        "linbert_wt": linbert_wt, "linbert_b": linbert_b,
        "encoder_coa": {
            "encoder_layers": [pack_attn(l) for l in enc["encoder_layers"]],
            "decoder_sa": [pack_attn(l) for l in enc["decoder_sa"]],
            "decoder_coa": [pack_attn(l) for l in enc["decoder_coa"]],
        },
        "head": {"wlin_t": wlin_t, "blin": blin,
                 "wlin2_t": wlin2_t, "blin2": blin2,
                 "w64c_t": w64_t[:128, :], "w64p_t": w64_t[128:, :],
                 "b64": b64, "wint_t": wint_t, "bint": bint},
    }


# ------------------------------ model blocks --------------------------------

def sage_conv(conv, x, src, dst, num_nodes):
    # message: relu(lin(x_j)); aggr='max'; update: relu(update_lin([aggr,x]))
    m = linear(x, conv["wl_t"], conv["bl"], relu=True)
    msgs = m[src]                                            # gather (XLA glue)
    aggr = jax.ops.segment_max(msgs, dst, num_segments=num_nodes)
    return sage_update(aggr, x, conv["wua_t"], conv["wux_t"])


def gnn_forward(p, node_idx, edge_index):
    # gcn_pooling=False path: embed -> SAGE1 -> relu -> SAGE2 -> relu -> lin
    x = p["embed"][node_idx]                                 # [N,128]
    n = x.shape[0]
    # remove_self_loops is a semantic no-op under max aggregation; add one
    # self loop per node as PyG add_self_loops does (guarantees non-empty
    # segments for segment_max -- do not remove).
    loops = jnp.arange(n, dtype=edge_index.dtype)
    src = jnp.concatenate([edge_index[0], loops])
    dst = jnp.concatenate([edge_index[1], loops])
    x = jnp.maximum(sage_conv(p["conv1"], x, src, dst, n), 0.0)
    x = jnp.maximum(sage_conv(p["conv2"], x, src, dst, n), 0.0)
    return linear(x, p["lin_wt"], p["lin_b"])                # [N,512]


def dtis_forward(params, graph_x, graph_edge_index, proteins):
    # --- Compound vector with GNN ---
    compound = gnn_forward(params["gnn"], graph_x, graph_edge_index)  # [N,512]
    compound_bert = linear(compound, params["lin768_wt"],
                           params["lin768_b"])                        # [N,768]
    compound128 = linear(compound, params["lin128_wt"],
                         params["lin128_b"])                          # [N,128]

    # --- Protein vector with CNN (fused 3-conv kernel) ---
    pv = params["embed_word"][proteins]                               # [L,512]
    pv = protein_cnn(params["pcnn"], pv)                              # [L3,128]
    # PyTorch does v.view(1, L3, C) on the NCL tensor: a raw memory reshape,
    # NOT a transpose.  Reproduce that exactly from our [L3, C] layout:
    L3, C = pv.shape
    pv = pv.T.reshape(L3, C)

    # --- BERT branch ---
    # (N + L3 <= 512 here, so the simple concat branch of the reference runs.)
    # TODO(synk): self.bert is an external huggingface BERT never defined in
    # __init__; substituted with identity over inputs_embeds (outputs[0]),
    # so CLS == compound_bert[0].  protein_bert is dead under that identity
    # and gets DCE'd by XLA, but kept here for structural fidelity.
    _protein_bert = linear(pv, params["linbert_wt"], params["linbert_b"])
    cls_src = compound_bert[0:1, :]                                   # [1,768]

    # --- Co-attention ('encoder' path), layer_coa layers ---
    enc = params["encoder_coa"]
    for layer in enc["encoder_layers"]:
        compound128 = attn_block(layer, compound128, compound128)     # SA
    for sa_l, dpa_l in zip(enc["decoder_sa"], enc["decoder_coa"]):
        pv = attn_block(sa_l, pv, pv)                                 # SA
        pv = attn_block(dpa_l, pv, compound128)                       # DPA

    # --- Fused scalar head (means, lin/lin2, lin64, tanh, W_interaction) ---
    out_pad = head_block(params["head"], cls_src, compound128, pv)    # [1,128]
    return out_pad[:, :2]                                             # [1,2]


dtis_forward_jit = jax.jit(dtis_forward)


# ---------------------------------- main -------------------------------------

if __name__ == "__main__":
    key = jax.random.PRNGKey(0)
    kp, kx, ks, kd, kw = jax.random.split(key, 5)
    raw = init_raw_params(kp, n_fingerprint=20, n_word=25, dim=DIM,
                          layer_coa=LAYER_COA)
    params = prepare_params(raw)

    N = 16   # compound graph nodes
    E = 40   # directed edges
    L = 31   # protein sequence length -> 16 positions after the three convs

    graph_x = jax.random.randint(kx, (N,), 0, 20)            # fingerprint ids
    edge_index = jnp.stack([jax.random.randint(ks, (E,), 0, N),
                            jax.random.randint(kd, (E,), 0, N)])
    proteins = jax.random.randint(kw, (L,), 0, 25)            # word ids

    out = dtis_forward_jit(params, graph_x, edge_index, proteins)
    out = jax.block_until_ready(out)
    assert out.shape == (1, 2) and out.dtype == jnp.float32
    print("KERNEL_OK")
</pallas_src>

<mosaic_0001>
module attributes {stable_mosaic.version = 11 : i64} {
  func.func @_linear_kernel(%arg0: memref<16x128xf32, #tpu.memory_space<vmem>>, %arg1: memref<128x128xf32, #tpu.memory_space<vmem>>, %arg2: memref<1x128xf32, #tpu.memory_space<vmem>>, %arg3: memref<16x128xf32, #tpu.memory_space<vmem>>) attributes {dimension_semantics = [], scalar_prefetch = 0 : i64, scratch_operands = 0 : i64, tpu.core_type = #tpu.core_type<tc>} {
    %c0 = arith.constant 0 : index
    %c0_0 = arith.constant 0 : index
    %0 = vector.load %arg0[%c0, %c0_0] : memref<16x128xf32, #tpu.memory_space<vmem>>, vector<16x128xf32>
    %c0_1 = arith.constant 0 : index
    %c0_2 = arith.constant 0 : index
    %1 = vector.load %arg1[%c0_1, %c0_2] : memref<128x128xf32, #tpu.memory_space<vmem>>, vector<128x128xf32>
    %cst = arith.constant dense<0.000000e+00> : vector<16x128xf32>
    %2 = tpu.matmul %0, %1, %cst {dimension_numbers = #tpu.dot_dimension_numbers<[1], [0], [0], [1], [0, 0, 1, 1], [], []>} : vector<16x128xf32>, vector<128x128xf32>, vector<16x128xf32> -> vector<16x128xf32>
    %c0_3 = arith.constant 0 : index
    %c0_4 = arith.constant 0 : index
    %3 = vector.load %arg2[%c0_3, %c0_4] : memref<1x128xf32, #tpu.memory_space<vmem>>, vector<1x128xf32>
    %4 = vector.broadcast %3 : vector<1x128xf32> to vector<16x128xf32>
    %5 = arith.addf %2, %4 : vector<16x128xf32>
    %cst_5 = arith.constant 0.000000e+00 : f32
    %6 = vector.broadcast %cst_5 : f32 to vector<16x128xf32>
    %7 = arith.maximumf %5, %6 : vector<16x128xf32>
    %c0_6 = arith.constant 0 : index
    %c0_7 = arith.constant 0 : index
    %8 = vector.load %arg3[%c0_6, %c0_7] : memref<16x128xf32, #tpu.memory_space<vmem>>, vector<16x128xf32>
    tpu.vector_store %arg3[%c0_6, %c0_7], %7 {strides = array<i32>} : memref<16x128xf32, #tpu.memory_space<vmem>>, vector<16x128xf32>,
    return
  }
}

module attributes {stable_mosaic.version = 11 : i64} {
  func.func @_sage_update_kernel(%arg0: memref<16x128xf32, #tpu.memory_space<vmem>>, %arg1: memref<16x128xf32, #tpu.memory_space<vmem>>, %arg2: memref<128x128xf32, #tpu.memory_space<vmem>>, %arg3: memref<128x128xf32, #tpu.memory_space<vmem>>, %arg4: memref<16x128xf32, #tpu.memory_space<vmem>>) attributes {dimension_semantics = [], scalar_prefetch = 0 : i64, scratch_operands = 0 : i64, tpu.core_type = #tpu.core_type<tc>} {
    %c0 = arith.constant 0 : index
    %c0_0 = arith.constant 0 : index
    %0 = vector.load %arg0[%c0, %c0_0] : memref<16x128xf32, #tpu.memory_space<vmem>>, vector<16x128xf32>
    %c0_1 = arith.constant 0 : index
    %c0_2 = arith.constant 0 : index
    %1 = vector.load %arg2[%c0_1, %c0_2] : memref<128x128xf32, #tpu.memory_space<vmem>>, vector<128x128xf32>
    %cst = arith.constant dense<0.000000e+00> : vector<16x128xf32>
    %2 = tpu.matmul %0, %1, %cst {dimension_numbers = #tpu.dot_dimension_numbers<[1], [0], [0], [1], [0, 0, 1, 1], [], []>} : vector<16x128xf32>, vector<128x128xf32>, vector<16x128xf32> -> vector<16x128xf32>
    %c0_3 = arith.constant 0 : index
    %c0_4 = arith.constant 0 : index
    %3 = vector.load %arg1[%c0_3, %c0_4] : memref<16x128xf32, #tpu.memory_space<vmem>>, vector<16x128xf32>
    %c0_5 = arith.constant 0 : index
    %c0_6 = arith.constant 0 : index
    %4 = vector.load %arg3[%c0_5, %c0_6] : memref<128x128xf32, #tpu.memory_space<vmem>>, vector<128x128xf32>
    %cst_7 = arith.constant dense<0.000000e+00> : vector<16x128xf32>
    %5 = tpu.matmul %3, %4, %cst_7 {dimension_numbers = #tpu.dot_dimension_numbers<[1], [0], [0], [1], [0, 0, 1, 1], [], []>} : vector<16x128xf32>, vector<128x128xf32>, vector<16x128xf32> -> vector<16x128xf32>
    %6 = arith.addf %2, %5 : vector<16x128xf32>
    %cst_8 = arith.constant 0.000000e+00 : f32
    %7 = vector.broadcast %cst_8 : f32 to vector<16x128xf32>
    %8 = arith.maximumf %6, %7 : vector<16x128xf32>
    %c0_9 = arith.constant 0 : index
    %c0_10 = arith.constant 0 : index
    %9 = vector.load %arg4[%c0_9, %c0_10] : memref<16x128xf32, #tpu.memory_space<vmem>>, vector<16x128xf32>
    tpu.vector_store %arg4[%c0_9, %c0_10], %8 {strides = array<i32>} : memref<16x128xf32, #tpu.memory_space<vmem>>, vector<16x128xf32>,
    return
  }
}

module attributes {stable_mosaic.version = 11 : i64} {
  func.func @_linear_kernel(%arg0: memref<16x128xf32, #tpu.memory_space<vmem>>, %arg1: memref<128x512xf32, #tpu.memory_space<vmem>>, %arg2: memref<1x512xf32, #tpu.memory_space<vmem>>, %arg3: memref<16x512xf32, #tpu.memory_space<vmem>>) attributes {dimension_semantics = [], scalar_prefetch = 0 : i64, scratch_operands = 0 : i64, tpu.core_type = #tpu.core_type<tc>} {
    %c0 = arith.constant 0 : index
    %c0_0 = arith.constant 0 : index
    %0 = vector.load %arg0[%c0, %c0_0] : memref<16x128xf32, #tpu.memory_space<vmem>>, vector<16x128xf32>
    %c0_1 = arith.constant 0 : index
    %c0_2 = arith.constant 0 : index
    %1 = vector.load %arg1[%c0_1, %c0_2] : memref<128x512xf32, #tpu.memory_space<vmem>>, vector<128x512xf32>
    %cst = arith.constant dense<0.000000e+00> : vector<16x512xf32>
    %2 = tpu.matmul %0, %1, %cst {dimension_numbers = #tpu.dot_dimension_numbers<[1], [0], [0], [1], [0, 0, 1, 1], [], []>} : vector<16x128xf32>, vector<128x512xf32>, vector<16x512xf32> -> vector<16x512xf32>
    %c0_3 = arith.constant 0 : index
    %c0_4 = arith.constant 0 : index
    %3 = vector.load %arg2[%c0_3, %c0_4] : memref<1x512xf32, #tpu.memory_space<vmem>>, vector<1x512xf32>
    %4 = vector.broadcast %3 : vector<1x512xf32> to vector<16x512xf32>
    %5 = arith.addf %2, %4 : vector<16x512xf32>
    %c0_5 = arith.constant 0 : index
    %c0_6 = arith.constant 0 : index
    %6 = vector.load %arg3[%c0_5, %c0_6] : memref<16x512xf32, #tpu.memory_space<vmem>>, vector<16x512xf32>
    tpu.vector_store %arg3[%c0_5, %c0_6], %5 {strides = array<i32>} : memref<16x512xf32, #tpu.memory_space<vmem>>, vector<16x512xf32>,
    return
  }
}

module attributes {stable_mosaic.version = 11 : i64} {
  func.func @_linear_kernel(%arg0: memref<16x512xf32, #tpu.memory_space<vmem>>, %arg1: memref<512x768xf32, #tpu.memory_space<vmem>>, %arg2: memref<1x768xf32, #tpu.memory_space<vmem>>, %arg3: memref<16x768xf32, #tpu.memory_space<vmem>>) attributes {dimension_semantics = [], scalar_prefetch = 0 : i64, scratch_operands = 0 : i64, tpu.core_type = #tpu.core_type<tc>} {
    %c0 = arith.constant 0 : index
    %c0_0 = arith.constant 0 : index
    %0 = vector.load %arg0[%c0, %c0_0] : memref<16x512xf32, #tpu.memory_space<vmem>>, vector<16x512xf32>
    %c0_1 = arith.constant 0 : index
    %c0_2 = arith.constant 0 : index
    %1 = vector.load %arg1[%c0_1, %c0_2] : memref<512x768xf32, #tpu.memory_space<vmem>>, vector<512x768xf32>
    %cst = arith.constant dense<0.000000e+00> : vector<16x768xf32>
    %2 = tpu.matmul %0, %1, %cst {dimension_numbers = #tpu.dot_dimension_numbers<[1], [0], [0], [1], [0, 0, 1, 1], [], []>} : vector<16x512xf32>, vector<512x768xf32>, vector<16x768xf32> -> vector<16x768xf32>
    %c0_3 = arith.constant 0 : index
    %c0_4 = arith.constant 0 : index
    %3 = vector.load %arg2[%c0_3, %c0_4] : memref<1x768xf32, #tpu.memory_space<vmem>>, vector<1x768xf32>
    %4 = vector.broadcast %3 : vector<1x768xf32> to vector<16x768xf32>
    %5 = arith.addf %2, %4 : vector<16x768xf32>
    %c0_5 = arith.constant 0 : index
    %c0_6 = arith.constant 0 : index
    %6 = vector.load %arg3[%c0_5, %c0_6] : memref<16x768xf32, #tpu.memory_space<vmem>>, vector<16x768xf32>
    tpu.vector_store %arg3[%c0_5, %c0_6], %5 {strides = array<i32>} : memref<16x768xf32, #tpu.memory_space<vmem>>, vector<16x768xf32>,
    return
  }
}

module attributes {stable_mosaic.version = 11 : i64} {
  func.func @_linear_kernel(%arg0: memref<16x512xf32, #tpu.memory_space<vmem>>, %arg1: memref<512x128xf32, #tpu.memory_space<vmem>>, %arg2: memref<1x128xf32, #tpu.memory_space<vmem>>, %arg3: memref<16x128xf32, #tpu.memory_space<vmem>>) attributes {dimension_semantics = [], scalar_prefetch = 0 : i64, scratch_operands = 0 : i64, tpu.core_type = #tpu.core_type<tc>} {
    %c0 = arith.constant 0 : index
    %c0_0 = arith.constant 0 : index
    %0 = vector.load %arg0[%c0, %c0_0] : memref<16x512xf32, #tpu.memory_space<vmem>>, vector<16x512xf32>
    %c0_1 = arith.constant 0 : index
    %c0_2 = arith.constant 0 : index
    %1 = vector.load %arg1[%c0_1, %c0_2] : memref<512x128xf32, #tpu.memory_space<vmem>>, vector<512x128xf32>
    %cst = arith.constant dense<0.000000e+00> : vector<16x128xf32>
    %2 = tpu.matmul %0, %1, %cst {dimension_numbers = #tpu.dot_dimension_numbers<[1], [0], [0], [1], [0, 0, 1, 1], [], []>} : vector<16x512xf32>, vector<512x128xf32>, vector<16x128xf32> -> vector<16x128xf32>
    %c0_3 = arith.constant 0 : index
    %c0_4 = arith.constant 0 : index
    %3 = vector.load %arg2[%c0_3, %c0_4] : memref<1x128xf32, #tpu.memory_space<vmem>>, vector<1x128xf32>
    %4 = vector.broadcast %3 : vector<1x128xf32> to vector<16x128xf32>
    %5 = arith.addf %2, %4 : vector<16x128xf32>
    %c0_5 = arith.constant 0 : index
    %c0_6 = arith.constant 0 : index
    %6 = vector.load %arg3[%c0_5, %c0_6] : memref<16x128xf32, #tpu.memory_space<vmem>>, vector<16x128xf32>
    tpu.vector_store %arg3[%c0_5, %c0_6], %5 {strides = array<i32>} : memref<16x128xf32, #tpu.memory_space<vmem>>, vector<16x128xf32>,
    return
  }
}

module attributes {stable_mosaic.version = 11 : i64} {
  func.func @_attn_block_kernel(%arg0: memref<16x128xf32, #tpu.memory_space<vmem>>, %arg1: memref<16x128xf32, #tpu.memory_space<vmem>>, %arg2: memref<128x128xf32, #tpu.memory_space<vmem>>, %arg3: memref<1x128xf32, #tpu.memory_space<vmem>>, %arg4: memref<128x256xf32, #tpu.memory_space<vmem>>, %arg5: memref<1x256xf32, #tpu.memory_space<vmem>>, %arg6: memref<128x128xf32, #tpu.memory_space<vmem>>, %arg7: memref<1x128xf32, #tpu.memory_space<vmem>>, %arg8: memref<1x128xf32, #tpu.memory_space<vmem>>, %arg9: memref<1x128xf32, #tpu.memory_space<vmem>>, %arg10: memref<16x128xf32, #tpu.memory_space<vmem>>) attributes {dimension_semantics = [], scalar_prefetch = 0 : i64, scratch_operands = 0 : i64, tpu.core_type = #tpu.core_type<tc>} {
    %c0 = arith.constant 0 : index
    %c0_0 = arith.constant 0 : index
    %0 = vector.load %arg0[%c0, %c0_0] : memref<16x128xf32, #tpu.memory_space<vmem>>, vector<16x128xf32>
    %c0_1 = arith.constant 0 : index
    %c0_2 = arith.constant 0 : index
    %1 = vector.load %arg1[%c0_1, %c0_2] : memref<16x128xf32, #tpu.memory_space<vmem>>, vector<16x128xf32>
    %c0_3 = arith.constant 0 : index
    %c0_4 = arith.constant 0 : index
    %2 = vector.load %arg2[%c0_3, %c0_4] : memref<128x128xf32, #tpu.memory_space<vmem>>, vector<128x128xf32>
    %cst = arith.constant dense<0.000000e+00> : vector<16x128xf32>
    %3 = tpu.matmul %0, %2, %cst {dimension_numbers = #tpu.dot_dimension_numbers<[1], [0], [0], [1], [0, 0, 1, 1], [], []>} : vector<16x128xf32>, vector<128x128xf32>, vector<16x128xf32> -> vector<16x128xf32>
    %c0_5 = arith.constant 0 : index
    %c0_6 = arith.constant 0 : index
    %4 = vector.load %arg3[%c0_5, %c0_6] : memref<1x128xf32, #tpu.memory_space<vmem>>, vector<1x128xf32>
    %5 = vector.broadcast %4 : vector<1x128xf32> to vector<16x128xf32>
    %6 = arith.addf %3, %5 : vector<16x128xf32>
    %cst_7 = arith.constant 2.500000e-01 : f32
    %7 = vector.broadcast %cst_7 : f32 to vector<16x128xf32>
    %8 = arith.mulf %6, %7 : vector<16x128xf32>
    %c0_8 = arith.constant 0 : index
    %c0_9 = arith.constant 0 : index
    %9 = vector.load %arg4[%c0_8, %c0_9] : memref<128x256xf32, #tpu.memory_space<vmem>>, vector<128x256xf32>
    %cst_10 = arith.constant dense<0.000000e+00> : vector<16x256xf32>
    %10 = tpu.matmul %1, %9, %cst_10 {dimension_numbers = #tpu.dot_dimension_numbers<[1], [0], [0], [1], [0, 0, 1, 1], [], []>} : vector<16x128xf32>, vector<128x256xf32>, vector<16x256xf32> -> vector<16x256xf32>
    %c0_11 = arith.constant 0 : index
    %c0_12 = arith.constant 0 : index
    %11 = vector.load %arg5[%c0_11, %c0_12] : memref<1x256xf32, #tpu.memory_space<vmem>>, vector<1x256xf32>
    %12 = vector.broadcast %11 : vector<1x256xf32> to vector<16x256xf32>
    %13 = arith.addf %10, %12 : vector<16x256xf32>
    %14 = vector.extract_strided_slice %13 {offsets = [0, 0], sizes = [16, 128], strides = [1, 1]} : vector<16x256xf32> to vector<16x128xf32>
    %15 = vector.extract_strided_slice %13 {offsets = [0, 128], sizes = [16, 128], strides = [1, 1]} : vector<16x256xf32> to vector<16x128xf32>
    %16 = tpu.iota {dimensions = array<i32: 1>} : vector<1x128xi32>
    %cst_13 = arith.constant 0.000000e+00 : f32
    %17 = vector.broadcast %cst_13 : f32 to vector<16x128xf32>
    %c0_i32 = arith.constant 0 : i32
    %18 = vector.broadcast %c0_i32 : i32 to vector<1x128xi32>
    %19 = arith.cmpi sge, %16, %18 : vector<1x128xi32>
    %c16_i32 = arith.constant 16 : i32
    %20 = vector.broadcast %c16_i32 : i32 to vector<1x128xi32>
    %21 = arith.cmpi slt, %16, %20 : vector<1x128xi32>
    %22 = arith.andi %19, %21 : vector<1x128xi1>
    %23 = arith.extui %22 : vector<1x128xi1> to vector<1x128xi32>
    %24 = arith.sitofp %23 : vector<1x128xi32> to vector<1x128xf32>
    %25 = vector.broadcast %24 : vector<1x128xf32> to vector<16x128xf32>
    %26 = arith.mulf %8, %25 : vector<16x128xf32>
    "tpu.trace_start"() <{level = 10 : i32, message = "qd,kd->qk"}> : () -> ()
    %cst_14 = arith.constant dense<0.000000e+00> : vector<16x16xf32>
    %27 = tpu.matmul %26, %14, %cst_14 {dimension_numbers = #tpu.dot_dimension_numbers<[1], [1], [0], [0], [0, 0, 1, 0], [], []>} : vector<16x128xf32>, vector<16x128xf32>, vector<16x16xf32> -> vector<16x16xf32>
    "tpu.trace_stop"() : () -> ()
    %cst_15 = arith.constant dense<0xFF800000> : vector<16xf32>
    %28 = vector.multi_reduction <maximumf>, %27, %cst_15 [1] : vector<16x16xf32> to vector<16xf32>
    %29 = vector.shape_cast %28 : vector<16xf32> to vector<16x1xf32>
    %30 = vector.broadcast %29 : vector<16x1xf32> to vector<16x16xf32>
    %31 = arith.subf %27, %30 : vector<16x16xf32>
    %32 = math.exp %31 : vector<16x16xf32>
    %cst_16 = arith.constant dense<0.000000e+00> : vector<16xf32>
    %33 = vector.multi_reduction <add>, %32, %cst_16 [1] : vector<16x16xf32> to vector<16xf32>
    %34 = vector.shape_cast %33 : vector<16xf32> to vector<16x1xf32>
    %35 = tpu.reciprocal %34 {approx = true} : vector<16x1xf32> -> vector<16x1xf32>
    %36 = vector.broadcast %35 : vector<16x1xf32> to vector<16x16xf32>
    %37 = arith.mulf %32, %36 : vector<16x16xf32>
    %38 = vector.broadcast %24 : vector<1x128xf32> to vector<16x128xf32>
    %39 = arith.mulf %15, %38 : vector<16x128xf32>
    %cst_17 = arith.constant dense<0.000000e+00> : vector<16x128xf32>
    %40 = tpu.matmul %37, %39, %cst_17 {dimension_numbers = #tpu.dot_dimension_numbers<[1], [0], [0], [1], [0, 0, 1, 1], [], []>} : vector<16x16xf32>, vector<16x128xf32>, vector<16x128xf32> -> vector<16x128xf32>
    %41 = arith.addf %17, %40 : vector<16x128xf32>
    %c16_i32_18 = arith.constant 16 : i32
    %42 = vector.broadcast %c16_i32_18 : i32 to vector<1x128xi32>
    %43 = arith.cmpi sge, %16, %42 : vector<1x128xi32>
    %c32_i32 = arith.constant 32 : i32
    %44 = vector.broadcast %c32_i32 : i32 to vector<1x128xi32>
    %45 = arith.cmpi slt, %16, %44 : vector<1x128xi32>
    %46 = arith.andi %43, %45 : vector<1x128xi1>
    %47 = arith.extui %46 : vector<1x128xi1> to vector<1x128xi32>
    %48 = arith.sitofp %47 : vector<1x128xi32> to vector<1x128xf32>
    %49 = vector.broadcast %48 : vector<1x128xf32> to vector<16x128xf32>
    %50 = arith.mulf %8, %49 : vector<16x128xf32>
    "tpu.trace_start"() <{level = 10 : i32, message = "qd,kd->qk"}> : () -> ()
    %cst_19 = arith.constant dense<0.000000e+00> : vector<16x16xf32>
    %51 = tpu.matmul %50, %14, %cst_19 {dimension_numbers = #tpu.dot_dimension_numbers<[1], [1], [0], [0], [0, 0, 1, 0], [], []>} : vector<16x128xf32>, vector<16x128xf32>, vector<16x16xf32> -> vector<16x16xf32>
    "tpu.trace_stop"() : () -> ()
    %cst_20 = arith.constant dense<0xFF800000> : vector<16xf32>
    %52 = vector.multi_reduction <maximumf>, %51, %cst_20 [1] : vector<16x16xf32> to vector<16xf32>
    %53 = vector.shape_cast %52 : vector<16xf32> to vector<16x1xf32>
    %54 = vector.broadcast %53 : vector<16x1xf32> to vector<16x16xf32>
    %55 = arith.subf %51, %54 : vector<16x16xf32>
    %56 = math.exp %55 : vector<16x16xf32>
    %cst_21 = arith.constant dense<0.000000e+00> : vector<16xf32>
    %57 = vector.multi_reduction <add>, %56, %cst_21 [1] : vector<16x16xf32> to vector<16xf32>
    %58 = vector.shape_cast %57 : vector<16xf32> to vector<16x1xf32>
    %59 = tpu.reciprocal %58 {approx = true} : vector<16x1xf32> -> vector<16x1xf32>
    %60 = vector.broadcast %59 : vector<16x1xf32> to vector<16x16xf32>
    %61 = arith.mulf %56, %60 : vector<16x16xf32>
    %62 = vector.broadcast %48 : vector<1x128xf32> to vector<16x128xf32>
    %63 = arith.mulf %15, %62 : vector<16x128xf32>
    %cst_22 = arith.constant dense<0.000000e+00> : vector<16x128xf32>
    %64 = tpu.matmul %61, %63, %cst_22 {dimension_numbers = #tpu.dot_dimension_numbers<[1], [0], [0], [1], [0, 0, 1, 1], [], []>} : vector<16x16xf32>, vector<16x128xf32>, vector<16x128xf32> -> vector<16x128xf32>
    %65 = arith.addf %41, %64 : vector<16x128xf32>
    %c32_i32_23 = arith.constant 32 : i32
    %66 = vector.broadcast %c32_i32_23 : i32 to vector<1x128xi32>
    %67 = arith.cmpi sge, %16, %66 : vector<1x128xi32>
    %c48_i32 = arith.constant 48 : i32
    %68 = vector.broadcast %c48_i32 : i32 to vector<1x128xi32>
    %69 = arith.cmpi slt, %16, %68 : vector<1x128xi32>
    %70 = arith.andi %67, %69 : vector<1x128xi1>
    %71 = arith.extui %70 : vector<1x128xi1> to vector<1x128xi32>
    %72 = arith.sitofp %71 : vector<1x128xi32> to vector<1x128xf32>
    %73 = vector.broadcast %72 : vector<1x128xf32> to vector<16x128xf32>
    %74 = arith.mulf %8, %73 : vector<16x128xf32>
    "tpu.trace_start"() <{level = 10 : i32, message = "qd,kd->qk"}> : () -> ()
    %cst_24 = arith.constant dense<0.000000e+00> : vector<16x16xf32>
    %75 = tpu.matmul %74, %14, %cst_24 {dimension_numbers = #tpu.dot_dimension_numbers<[1], [1], [0], [0], [0, 0, 1, 0], [], []>} : vector<16x128xf32>, vector<16x128xf32>, vector<16x16xf32> -> vector<16x16xf32>
    "tpu.trace_stop"() : () -> ()
    %cst_25 = arith.constant dense<0xFF800000> : vector<16xf32>
    %76 = vector.multi_reduction <maximumf>, %75, %cst_25 [1] : vector<16x16xf32> to vector<16xf32>
    %77 = vector.shape_cast %76 : vector<16xf32> to vector<16x1xf32>
    %78 = vector.broadcast %77 : vector<16x1xf32> to vector<16x16xf32>
    %79 = arith.subf %75, %78 : vector<16x16xf32>
    %80 = math.exp %79 : vector<16x16xf32>
    %cst_26 = arith.constant dense<0.000000e+00> : vector<16xf32>
    %81 = vector.multi_reduction <add>, %80, %cst_26 [1] : vector<16x16xf32> to vector<16xf32>
    %82 = vector.shape_cast %81 : vector<16xf32> to vector<16x1xf32>
    %83 = tpu.reciprocal %82 {approx = true} : vector<16x1xf32> -> vector<16x1xf32>
    %84 = vector.broadcast %83 : vector<16x1xf32> to vector<16x16xf32>
    %85 = arith.mulf %80, %84 : vector<16x16xf32>
    %86 = vector.broadcast %72 : vector<1x128xf32> to vector<16x128xf32>
    %87 = arith.mulf %15, %86 : vector<16x128xf32>
    %cst_27 = arith.constant dense<0.000000e+00> : vector<16x128xf32>
    %88 = tpu.matmul %85, %87, %cst_27 {dimension_numbers = #tpu.dot_dimension_numbers<[1], [0], [0], [1], [0, 0, 1, 1], [], []>} : vector<16x16xf32>, vector<16x128xf32>, vector<16x128xf32> -> vector<16x128xf32>
    %89 = arith.addf %65, %88 : vector<16x128xf32>
    %c48_i32_28 = arith.constant 48 : i32
    %90 = vector.broadcast %c48_i32_28 : i32 to vector<1x128xi32>
    %91 = arith.cmpi sge, %16, %90 : vector<1x128xi32>
    %c64_i32 = arith.constant 64 : i32
    %92 = vector.broadcast %c64_i32 : i32 to vector<1x128xi32>
    %93 = arith.cmpi slt, %16, %92 : vector<1x128xi32>
    %94 = arith.andi %91, %93 : vector<1x128xi1>
    %95 = arith.extui %94 : vector<1x128xi1> to vector<1x128xi32>
    %96 = arith.sitofp %95 : vector<1x128xi32> to vector<1x128xf32>
    %97 = vector.broadcast %96 : vector<1x128xf32> to vector<16x128xf32>
    %98 = arith.mulf %8, %97 : vector<16x128xf32>
    "tpu.trace_start"() <{level = 10 : i32, message = "qd,kd->qk"}> : () -> ()
    %cst_29 = arith.constant dense<0.000000e+00> : vector<16x16xf32>
    %99 = tpu.matmul %98, %14, %cst_29 {dimension_numbers = #tpu.dot_dimension_numbers<[1], [1], [0], [0], [0, 0, 1, 0], [], []>} : vector<16x128xf32>, vector<16x128xf32>, vector<16x16xf32> -> vector<16x16xf32>
    "tpu.trace_stop"() : () -> ()
    %cst_30 = arith.constant dense<0xFF800000> : vector<16xf32>
    %100 = vector.multi_reduction <maximumf>, %99, %cst_30 [1] : vector<16x16xf32> to vector<16xf32>
    %101 = vector.shape_cast %100 : vector<16xf32> to vector<16x1xf32>
    %102 = vector.broadcast %101 : vector<16x1xf32> to vector<16x16xf32>
    %103 = arith.subf %99, %102 : vector<16x16xf32>
    %104 = math.exp %103 : vector<16x16xf32>
    %cst_31 = arith.constant dense<0.000000e+00> : vector<16xf32>
    %105 = vector.multi_reduction <add>, %104, %cst_31 [1] : vector<16x16xf32> to vector<16xf32>
    %106 = vector.shape_cast %105 : vector<16xf32> to vector<16x1xf32>
    %107 = tpu.reciprocal %106 {approx = true} : vector<16x1xf32> -> vector<16x1xf32>
    %108 = vector.broadcast %107 : vector<16x1xf32> to vector<16x16xf32>
    %109 = arith.mulf %104, %108 : vector<16x16xf32>
    %110 = vector.broadcast %96 : vector<1x128xf32> to vector<16x128xf32>
    %111 = arith.mulf %15, %110 : vector<16x128xf32>
    %cst_32 = arith.constant dense<0.000000e+00> : vector<16x128xf32>
    %112 = tpu.matmul %109, %111, %cst_32 {dimension_numbers = #tpu.dot_dimension_numbers<[1], [0], [0], [1], [0, 0, 1, 1], [], []>} : vector<16x16xf32>, vector<16x128xf32>, vector<16x128xf32> -> vector<16x128xf32>
    %113 = arith.addf %89, %112 : vector<16x128xf32>
    %c64_i32_33 = arith.constant 64 : i32
    %114 = vector.broadcast %c64_i32_33 : i32 to vector<1x128xi32>
    %115 = arith.cmpi sge, %16, %114 : vector<1x128xi32>
    %c80_i32 = arith.constant 80 : i32
    %116 = vector.broadcast %c80_i32 : i32 to vector<1x128xi32>
    %117 = arith.cmpi slt, %16, %116 : vector<1x128xi32>
    %118 = arith.andi %115, %117 : vector<1x128xi1>
    %119 = arith.extui %118 : vector<1x128xi1> to vector<1x128xi32>
    %120 = arith.sitofp %119 : vector<1x128xi32> to vector<1x128xf32>
    %121 = vector.broadcast %120 : vector<1x128xf32> to vector<16x128xf32>
    %122 = arith.mulf %8, %121 : vector<16x128xf32>
    "tpu.trace_start"() <{level = 10 : i32, message = "qd,kd->qk"}> : () -> ()
    %cst_34 = arith.constant dense<0.000000e+00> : vector<16x16xf32>
    %123 = tpu.matmul %122, %14, %cst_34 {dimension_numbers = #tpu.dot_dimension_numbers<[1], [1], [0], [0], [0, 0, 1, 0], [], []>} : vector<16x128xf32>, vector<16x128xf32>, vector<16x16xf32> -> vector<16x16xf32>
    "tpu.trace_stop"() : () -> ()
    %cst_35 = arith.constant dense<0xFF800000> : vector<16xf32>
    %124 = vector.multi_reduction <maximumf>, %123, %cst_35 [1] : vector<16x16xf32> to vector<16xf32>
    %125 = vector.shape_cast %124 : vector<16xf32> to vector<16x1xf32>
    %126 = vector.broadcast %125 : vector<16x1xf32> to vector<16x16xf32>
    %127 = arith.subf %123, %126 : vector<16x16xf32>
    %128 = math.exp %127 : vector<16x16xf32>
    %cst_36 = arith.constant dense<0.000000e+00> : vector<16xf32>
    %129 = vector.multi_reduction <add>, %128, %cst_36 [1] : vector<16x16xf32> to vector<16xf32>
    %130 = vector.shape_cast %129 : vector<16xf32> to vector<16x1xf32>
    %131 = tpu.reciprocal %130 {approx = true} : vector<16x1xf32> -> vector<16x1xf32>
    %132 = vector.broadcast %131 : vector<16x1xf32> to vector<16x16xf32>
    %133 = arith.mulf %128, %132 : vector<16x16xf32>
    %134 = vector.broadcast %120 : vector<1x128xf32> to vector<16x128xf32>
    %135 = arith.mulf %15, %134 : vector<16x128xf32>
    %cst_37 = arith.constant dense<0.000000e+00> : vector<16x128xf32>
    %136 = tpu.matmul %133, %135, %cst_37 {dimension_numbers = #tpu.dot_dimension_numbers<[1], [0], [0], [1], [0, 0, 1, 1], [], []>} : vector<16x16xf32>, vector<16x128xf32>, vector<16x128xf32> -> vector<16x128xf32>
    %137 = arith.addf %113, %136 : vector<16x128xf32>
    %c80_i32_38 = arith.constant 80 : i32
    %138 = vector.broadcast %c80_i32_38 : i32 to vector<1x128xi32>
    %139 = arith.cmpi sge, %16, %138 : vector<1x128xi32>
    %c96_i32 = arith.constant 96 : i32
    %140 = vector.broadcast %c96_i32 : i32 to vector<1x128xi32>
    %141 = arith.cmpi slt, %16, %140 : vector<1x128xi32>
    %142 = arith.andi %139, %141 : vector<1x128xi1>
    %143 = arith.extui %142 : vector<1x128xi1> to vector<1x128xi32>
    %144 = arith.sitofp %143 : vector<1x128xi32> to vector<1x128xf32>
    %145 = vector.broadcast %144 : vector<1x128xf32> to vector<16x128xf32>
    %146 = arith.mulf %8, %145 : vector<16x128xf32>
    "tpu.trace_start"() <{level = 10 : i32, message = "qd,kd->qk"}> : () -> ()
    %cst_39 = arith.constant dense<0.000000e+00> : vector<16x16xf32>
    %147 = tpu.matmul %146, %14, %cst_39 {dimension_numbers = #tpu.dot_dimension_numbers<[1], [1], [0], [0], [0, 0, 1, 0], [], []>} : vector<16x128xf32>, vector<16x128xf32>, vector<16x16xf32> -> vector<16x16xf32>
    "tpu.trace_stop"() : () -> ()
    %cst_40 = arith.constant dense<0xFF800000> : vector<16xf32>
    %148 = vector.multi_reduction <maximumf>, %147, %cst_40 [1] : vector<16x16xf32> to vector<16xf32>
    %149 = vector.shape_cast %148 : vector<16xf32> to vector<16x1xf32>
    %150 = vector.broadcast %149 : vector<16x1xf32> to vector<16x16xf32>
    %151 = arith.subf %147, %150 : vector<16x16xf32>
    %152 = math.exp %151 : vector<16x16xf32>
    %cst_41 = arith.constant dense<0.000000e+00> : vector<16xf32>
    %153 = vector.multi_reduction <add>, %152, %cst_41 [1] : vector<16x16xf32> to vector<16xf32>
    %154 = vector.shape_cast %153 : vector<16xf32> to vector<16x1xf32>
    %155 = tpu.reciprocal %154 {approx = true} : vector<16x1xf32> -> vector<16x1xf32>
    %156 = vector.broadcast %155 : vector<16x1xf32> to vector<16x16xf32>
    %157 = arith.mulf %152, %156 : vector<16x16xf32>
    %158 = vector.broadcast %144 : vector<1x128xf32> to vector<16x128xf32>
    %159 = arith.mulf %15, %158 : vector<16x128xf32>
    %cst_42 = arith.constant dense<0.000000e+00> : vector<16x128xf32>
    %160 = tpu.matmul %157, %159, %cst_42 {dimension_numbers = #tpu.dot_dimension_numbers<[1], [0], [0], [1], [0, 0, 1, 1], [], []>} : vector<16x16xf32>, vector<16x128xf32>, vector<16x128xf32> -> vector<16x128xf32>
    %161 = arith.addf %137, %160 : vector<16x128xf32>
    %c96_i32_43 = arith.constant 96 : i32
    %162 = vector.broadcast %c96_i32_43 : i32 to vector<1x128xi32>
    %163 = arith.cmpi sge, %16, %162 : vector<1x128xi32>
    %c112_i32 = arith.constant 112 : i32
    %164 = vector.broadcast %c112_i32 : i32 to vector<1x128xi32>
    %165 = arith.cmpi slt, %16, %164 : vector<1x128xi32>
    %166 = arith.andi %163, %165 : vector<1x128xi1>
    %167 = arith.extui %166 : vector<1x128xi1> to vector<1x128xi32>
    %168 = arith.sitofp %167 : vector<1x128xi32> to vector<1x128xf32>
    %169 = vector.broadcast %168 : vector<1x128xf32> to vector<16x128xf32>
    %170 = arith.mulf %8, %169 : vector<16x128xf32>
    "tpu.trace_start"() <{level = 10 : i32, message = "qd,kd->qk"}> : () -> ()
    %cst_44 = arith.constant dense<0.000000e+00> : vector<16x16xf32>
    %171 = tpu.matmul %170, %14, %cst_44 {dimension_numbers = #tpu.dot_dimension_numbers<[1], [1], [0], [0], [0, 0, 1, 0], [], []>} : vector<16x128xf32>, vector<16x128xf32>, vector<16x16xf32> -> vector<16x16xf32>
    "tpu.trace_stop"() : () -> ()
    %cst_45 = arith.constant dense<0xFF800000> : vector<16xf32>
    %172 = vector.multi_reduction <maximumf>, %171, %cst_45 [1] : vector<16x16xf32> to vector<16xf32>
    %173 = vector.shape_cast %172 : vector<16xf32> to vector<16x1xf32>
    %174 = vector.broadcast %173 : vector<16x1xf32> to vector<16x16xf32>
    %175 = arith.subf %171, %174 : vector<16x16xf32>
    %176 = math.exp %175 : vector<16x16xf32>
    %cst_46 = arith.constant dense<0.000000e+00> : vector<16xf32>
    %177 = vector.multi_reduction <add>, %176, %cst_46 [1] : vector<16x16xf32> to vector<16xf32>
    %178 = vector.shape_cast %177 : vector<16xf32> to vector<16x1xf32>
    %179 = tpu.reciprocal %178 {approx = true} : vector<16x1xf32> -> vector<16x1xf32>
    %180 = vector.broadcast %179 : vector<16x1xf32> to vector<16x16xf32>
    %181 = arith.mulf %176, %180 : vector<16x16xf32>
    %182 = vector.broadcast %168 : vector<1x128xf32> to vector<16x128xf32>
    %183 = arith.mulf %15, %182 : vector<16x128xf32>
    %cst_47 = arith.constant dense<0.000000e+00> : vector<16x128xf32>
    %184 = tpu.matmul %181, %183, %cst_47 {dimension_numbers = #tpu.dot_dimension_numbers<[1], [0], [0], [1], [0, 0, 1, 1], [], []>} : vector<16x16xf32>, vector<16x128xf32>, vector<16x128xf32> -> vector<16x128xf32>
    %185 = arith.addf %161, %184 : vector<16x128xf32>
    %c112_i32_48 = arith.constant 112 : i32
    %186 = vector.broadcast %c112_i32_48 : i32 to vector<1x128xi32>
    %187 = arith.cmpi sge, %16, %186 : vector<1x128xi32>
    %c128_i32 = arith.constant 128 : i32
    %188 = vector.broadcast %c128_i32 : i32 to vector<1x128xi32>
    %189 = arith.cmpi slt, %16, %188 : vector<1x128xi32>
    %190 = arith.andi %187, %189 : vector<1x128xi1>
    %191 = arith.extui %190 : vector<1x128xi1> to vector<1x128xi32>
    %192 = arith.sitofp %191 : vector<1x128xi32> to vector<1x128xf32>
    %193 = vector.broadcast %192 : vector<1x128xf32> to vector<16x128xf32>
    %194 = arith.mulf %8, %193 : vector<16x128xf32>
    "tpu.trace_start"() <{level = 10 : i32, message = "qd,kd->qk"}> : () -> ()
    %cst_49 = arith.constant dense<0.000000e+00> : vector<16x16xf32>
    %195 = tpu.matmul %194, %14, %cst_49 {dimension_numbers = #tpu.dot_dimension_numbers<[1], [1], [0], [0], [0, 0, 1, 0], [], []>} : vector<16x128xf32>, vector<16x128xf32>, vector<16x16xf32> -> vector<16x16xf32>
    "tpu.trace_stop"() : () -> ()
    %cst_50 = arith.constant dense<0xFF800000> : vector<16xf32>
    %196 = vector.multi_reduction <maximumf>, %195, %cst_50 [1] : vector<16x16xf32> to vector<16xf32>
    %197 = vector.shape_cast %196 : vector<16xf32> to vector<16x1xf32>
    %198 = vector.broadcast %197 : vector<16x1xf32> to vector<16x16xf32>
    %199 = arith.subf %195, %198 : vector<16x16xf32>
    %200 = math.exp %199 : vector<16x16xf32>
    %cst_51 = arith.constant dense<0.000000e+00> : vector<16xf32>
    %201 = vector.multi_reduction <add>, %200, %cst_51 [1] : vector<16x16xf32> to vector<16xf32>
    %202 = vector.shape_cast %201 : vector<16xf32> to vector<16x1xf32>
    %203 = tpu.reciprocal %202 {approx = true} : vector<16x1xf32> -> vector<16x1xf32>
    %204 = vector.broadcast %203 : vector<16x1xf32> to vector<16x16xf32>
    %205 = arith.mulf %200, %204 : vector<16x16xf32>
    %206 = vector.broadcast %192 : vector<1x128xf32> to vector<16x128xf32>
    %207 = arith.mulf %15, %206 : vector<16x128xf32>
    %cst_52 = arith.constant dense<0.000000e+00> : vector<16x128xf32>
    %208 = tpu.matmul %205, %207, %cst_52 {dimension_numbers = #tpu.dot_dimension_numbers<[1], [0], [0], [1], [0, 0, 1, 1], [], []>} : vector<16x16xf32>, vector<16x128xf32>, vector<16x128xf32> -> vector<16x128xf32>
    %209 = arith.addf %185, %208 : vector<16x128xf32>
    %c0_53 = arith.constant 0 : index
    %c0_54 = arith.constant 0 : index
    %210 = vector.load %arg6[%c0_53, %c0_54] : memref<128x128xf32, #tpu.memory_space<vmem>>, vector<128x128xf32>
    %cst_55 = arith.constant dense<0.000000e+00> : vector<16x128xf32>
    %211 = tpu.matmul %209, %210, %cst_55 {dimension_numbers = #tpu.dot_dimension_numbers<[1], [0], [0], [1], [0, 0, 1, 1], [], []>} : vector<16x128xf32>, vector<128x128xf32>, vector<16x128xf32> -> vector<16x128xf32>
    %c0_56 = arith.constant 0 : index
    %c0_57 = arith.constant 0 : index
    %212 = vector.load %arg7[%c0_56, %c0_57] : memref<1x128xf32, #tpu.memory_space<vmem>>, vector<1x128xf32>
    %213 = vector.broadcast %212 : vector<1x128xf32> to vector<16x128xf32>
    %214 = arith.addf %211, %213 : vector<16x128xf32>
    %215 = arith.addf %0, %214 : vector<16x128xf32>
    %cst_58 = arith.constant dense<0.000000e+00> : vector<16xf32>
    %216 = vector.multi_reduction <add>, %215, %cst_58 [1] : vector<16x128xf32> to vector<16xf32>
    %217 = vector.shape_cast %216 : vector<16xf32> to vector<16x1xf32>
    %cst_59 = arith.constant 1.280000e+02 : f32
    %218 = vector.broadcast %cst_59 : f32 to vector<16x1xf32>
    %219 = arith.divf %217, %218 : vector<16x1xf32>
    %220 = vector.broadcast %219 : vector<16x1xf32> to vector<16x128xf32>
    %221 = arith.subf %215, %220 : vector<16x128xf32>
    %222 = arith.mulf %221, %221 : vector<16x128xf32>
    %cst_60 = arith.constant dense<0.000000e+00> : vector<16xf32>
    %223 = vector.multi_reduction <add>, %222, %cst_60 [1] : vector<16x128xf32> to vector<16xf32>
    %224 = vector.shape_cast %223 : vector<16xf32> to vector<16x1xf32>
    %cst_61 = arith.constant 1.280000e+02 : f32
    %225 = vector.broadcast %cst_61 : f32 to vector<16x1xf32>
    %226 = arith.divf %224, %225 : vector<16x1xf32>
    %227 = vector.broadcast %219 : vector<16x1xf32> to vector<16x128xf32>
    %228 = arith.subf %215, %227 : vector<16x128xf32>
    %cst_62 = arith.constant 9.99999974E-6 : f32
    %229 = vector.broadcast %cst_62 : f32 to vector<16x1xf32>
    %230 = arith.addf %226, %229 : vector<16x1xf32>
    %231 = math.rsqrt %230 : vector<16x1xf32>
    %232 = vector.broadcast %231 : vector<16x1xf32> to vector<16x128xf32>
    %233 = arith.mulf %228, %232 : vector<16x128xf32>
    %c0_63 = arith.constant 0 : index
    %c0_64 = arith.constant 0 : index
    %234 = vector.load %arg8[%c0_63, %c0_64] : memref<1x128xf32, #tpu.memory_space<vmem>>, vector<1x128xf32>
    %235 = vector.broadcast %234 : vector<1x128xf32> to vector<16x128xf32>
    %236 = arith.mulf %233, %235 : vector<16x128xf32>
    %c0_65 = arith.constant 0 : index
    %c0_66 = arith.constant 0 : index
    %237 = vector.load %arg9[%c0_65, %c0_66] : memref<1x128xf32, #tpu.memory_space<vmem>>, vector<1x128xf32>
    %238 = vector.broadcast %237 : vector<1x128xf32> to vector<16x128xf32>
    %239 = arith.addf %236, %238 : vector<16x128xf32>
    %c0_67 = arith.constant 0 : index
    %c0_68 = arith.constant 0 : index
    %240 = vector.load %arg10[%c0_67, %c0_68] : memref<16x128xf32, #tpu.memory_space<vmem>>, vector<16x128xf32>
    tpu.vector_store %arg10[%c0_67, %c0_68], %239 {strides = array<i32>} : memref<16x128xf32, #tpu.memory_space<vmem>>, vector<16x128xf32>,
    return
  }
}

module attributes {stable_mosaic.version = 11 : i64} {
  func.func @_pcnn_kernel(%arg0: memref<31x512xf32, #tpu.memory_space<vmem>>, %arg1: memref<3x512x128xf32, #tpu.memory_space<vmem>>, %arg2: memref<1x128xf32, #tpu.memory_space<vmem>>, %arg3: memref<2x128xf32, #tpu.memory_space<vmem>>, %arg4: memref<6x128x128xf32, #tpu.memory_space<vmem>>, %arg5: memref<1x128xf32, #tpu.memory_space<vmem>>, %arg6: memref<2x128xf32, #tpu.memory_space<vmem>>, %arg7: memref<9x128x128xf32, #tpu.memory_space<vmem>>, %arg8: memref<1x128xf32, #tpu.memory_space<vmem>>, %arg9: memref<2x128xf32, #tpu.memory_space<vmem>>, %arg10: memref<16x128xf32, #tpu.memory_space<vmem>>, %arg11: memref<29x128xf32, #tpu.memory_space<vmem>>, %arg12: memref<24x128xf32, #tpu.memory_space<vmem>>) attributes {dimension_semantics = [], scalar_prefetch = 0 : i64, scratch_operands = 2 : i64, tpu.core_type = #tpu.core_type<tc>} {
    %c0 = arith.constant 0 : index
    %c0_0 = arith.constant 0 : index
    %0 = vector.load %arg0[%c0, %c0_0] : memref<31x512xf32, #tpu.memory_space<vmem>>, vector<29x512xf32>
    %c0_1 = arith.constant 0 : index
    %c0_2 = arith.constant 0 : index
    %c0_3 = arith.constant 0 : index
    %1 = vector.load %arg1[%c0_1, %c0_2, %c0_3] : memref<3x512x128xf32, #tpu.memory_space<vmem>>, vector<1x512x128xf32>
    %2 = vector.shape_cast %1 : vector<1x512x128xf32> to vector<512x128xf32>
    %cst = arith.constant dense<0.000000e+00> : vector<29x128xf32>
    %3 = tpu.matmul %0, %2, %cst {dimension_numbers = #tpu.dot_dimension_numbers<[1], [0], [0], [1], [0, 0, 1, 1], [], []>} : vector<29x512xf32>, vector<512x128xf32>, vector<29x128xf32> -> vector<29x128xf32>
    %c1 = arith.constant 1 : index
    %c0_4 = arith.constant 0 : index
    %4 = vector.load %arg0[%c1, %c0_4] : memref<31x512xf32, #tpu.memory_space<vmem>>, vector<29x512xf32>
    %c1_5 = arith.constant 1 : index
    %c0_6 = arith.constant 0 : index
    %c0_7 = arith.constant 0 : index
    %5 = vector.load %arg1[%c1_5, %c0_6, %c0_7] : memref<3x512x128xf32, #tpu.memory_space<vmem>>, vector<1x512x128xf32>
    %6 = vector.shape_cast %5 : vector<1x512x128xf32> to vector<512x128xf32>
    %cst_8 = arith.constant dense<0.000000e+00> : vector<29x128xf32>
    %7 = tpu.matmul %4, %6, %cst_8 {dimension_numbers = #tpu.dot_dimension_numbers<[1], [0], [0], [1], [0, 0, 1, 1], [], []>} : vector<29x512xf32>, vector<512x128xf32>, vector<29x128xf32> -> vector<29x128xf32>
    %8 = arith.addf %3, %7 : vector<29x128xf32>
    %c2 = arith.constant 2 : index
    %c0_9 = arith.constant 0 : index
    %9 = vector.load %arg0[%c2, %c0_9] : memref<31x512xf32, #tpu.memory_space<vmem>>, vector<29x512xf32>
    %c2_10 = arith.constant 2 : index
    %c0_11 = arith.constant 0 : index
    %c0_12 = arith.constant 0 : index
    %10 = vector.load %arg1[%c2_10, %c0_11, %c0_12] : memref<3x512x128xf32, #tpu.memory_space<vmem>>, vector<1x512x128xf32>
    %11 = vector.shape_cast %10 : vector<1x512x128xf32> to vector<512x128xf32>
    %cst_13 = arith.constant dense<0.000000e+00> : vector<29x128xf32>
    %12 = tpu.matmul %9, %11, %cst_13 {dimension_numbers = #tpu.dot_dimension_numbers<[1], [0], [0], [1], [0, 0, 1, 1], [], []>} : vector<29x512xf32>, vector<512x128xf32>, vector<29x128xf32> -> vector<29x128xf32>
    %13 = arith.addf %8, %12 : vector<29x128xf32>
    %c0_14 = arith.constant 0 : index
    %c0_15 = arith.constant 0 : index
    %14 = vector.load %arg2[%c0_14, %c0_15] : memref<1x128xf32, #tpu.memory_space<vmem>>, vector<1x128xf32>
    %15 = vector.broadcast %14 : vector<1x128xf32> to vector<29x128xf32>
    %16 = arith.addf %13, %15 : vector<29x128xf32>
    %cst_16 = arith.constant 0.000000e+00 : f32
    %17 = vector.broadcast %cst_16 : f32 to vector<29x128xf32>
    %18 = arith.maximumf %16, %17 : vector<29x128xf32>
    %c0_17 = arith.constant 0 : index
    %c0_18 = arith.constant 0 : index
    %19 = vector.load %arg3[%c0_17, %c0_18] : memref<2x128xf32, #tpu.memory_space<vmem>>, vector<1x128xf32>
    %20 = vector.broadcast %19 : vector<1x128xf32> to vector<29x128xf32>
    %21 = arith.mulf %18, %20 : vector<29x128xf32>
    %c1_19 = arith.constant 1 : index
    %c0_20 = arith.constant 0 : index
    %22 = vector.load %arg3[%c1_19, %c0_20] : memref<2x128xf32, #tpu.memory_space<vmem>>, vector<1x128xf32>
    %23 = vector.broadcast %22 : vector<1x128xf32> to vector<29x128xf32>
    %24 = arith.addf %21, %23 : vector<29x128xf32>
    %c0_21 = arith.constant 0 : index
    %c0_22 = arith.constant 0 : index
    %25 = vector.load %arg11[%c0_21, %c0_22] : memref<29x128xf32, #tpu.memory_space<vmem>>, vector<29x128xf32>
    tpu.vector_store %arg11[%c0_21, %c0_22], %24 {strides = array<i32>} : memref<29x128xf32, #tpu.memory_space<vmem>>, vector<29x128xf32>,
    %c0_23 = arith.constant 0 : index
    %c0_24 = arith.constant 0 : index
    %26 = vector.load %arg11[%c0_23, %c0_24] : memref<29x128xf32, #tpu.memory_space<vmem>>, vector<24x128xf32>
    %c0_25 = arith.constant 0 : index
    %c0_26 = arith.constant 0 : index
    %c0_27 = arith.constant 0 : index
    %27 = vector.load %arg4[%c0_25, %c0_26, %c0_27] : memref<6x128x128xf32, #tpu.memory_space<vmem>>, vector<1x128x128xf32>
    %28 = vector.shape_cast %27 : vector<1x128x128xf32> to vector<128x128xf32>
    %cst_28 = arith.constant dense<0.000000e+00> : vector<24x128xf32>
    %29 = tpu.matmul %26, %28, %cst_28 {dimension_numbers = #tpu.dot_dimension_numbers<[1], [0], [0], [1], [0, 0, 1, 1], [], []>} : vector<24x128xf32>, vector<128x128xf32>, vector<24x128xf32> -> vector<24x128xf32>
    %c1_29 = arith.constant 1 : index
    %c0_30 = arith.constant 0 : index
    %30 = vector.load %arg11[%c1_29, %c0_30] : memref<29x128xf32, #tpu.memory_space<vmem>>, vector<24x128xf32>
    %c1_31 = arith.constant 1 : index
    %c0_32 = arith.constant 0 : index
    %c0_33 = arith.constant 0 : index
    %31 = vector.load %arg4[%c1_31, %c0_32, %c0_33] : memref<6x128x128xf32, #tpu.memory_space<vmem>>, vector<1x128x128xf32>
    %32 = vector.shape_cast %31 : vector<1x128x128xf32> to vector<128x128xf32>
    %cst_34 = arith.constant dense<0.000000e+00> : vector<24x128xf32>
    %33 = tpu.matmul %30, %32, %cst_34 {dimension_numbers = #tpu.dot_dimension_numbers<[1], [0], [0], [1], [0, 0, 1, 1], [], []>} : vector<24x128xf32>, vector<128x128xf32>, vector<24x128xf32> -> vector<24x128xf32>
    %34 = arith.addf %29, %33 : vector<24x128xf32>
    %c2_35 = arith.constant 2 : index
    %c0_36 = arith.constant 0 : index
    %35 = vector.load %arg11[%c2_35, %c0_36] : memref<29x128xf32, #tpu.memory_space<vmem>>, vector<24x128xf32>
    %c2_37 = arith.constant 2 : index
    %c0_38 = arith.constant 0 : index
    %c0_39 = arith.constant 0 : index
    %36 = vector.load %arg4[%c2_37, %c0_38, %c0_39] : memref<6x128x128xf32, #tpu.memory_space<vmem>>, vector<1x128x128xf32>
    %37 = vector.shape_cast %36 : vector<1x128x128xf32> to vector<128x128xf32>
    %cst_40 = arith.constant dense<0.000000e+00> : vector<24x128xf32>
    %38 = tpu.matmul %35, %37, %cst_40 {dimension_numbers = #tpu.dot_dimension_numbers<[1], [0], [0], [1], [0, 0, 1, 1], [], []>} : vector<24x128xf32>, vector<128x128xf32>, vector<24x128xf32> -> vector<24x128xf32>
    %39 = arith.addf %34, %38 : vector<24x128xf32>
    %c3 = arith.constant 3 : index
    %c0_41 = arith.constant 0 : index
    %40 = vector.load %arg11[%c3, %c0_41] : memref<29x128xf32, #tpu.memory_space<vmem>>, vector<24x128xf32>
    %c3_42 = arith.constant 3 : index
    %c0_43 = arith.constant 0 : index
    %c0_44 = arith.constant 0 : index
    %41 = vector.load %arg4[%c3_42, %c0_43, %c0_44] : memref<6x128x128xf32, #tpu.memory_space<vmem>>, vector<1x128x128xf32>
    %42 = vector.shape_cast %41 : vector<1x128x128xf32> to vector<128x128xf32>
    %cst_45 = arith.constant dense<0.000000e+00> : vector<24x128xf32>
    %43 = tpu.matmul %40, %42, %cst_45 {dimension_numbers = #tpu.dot_dimension_numbers<[1], [0], [0], [1], [0, 0, 1, 1], [], []>} : vector<24x128xf32>, vector<128x128xf32>, vector<24x128xf32> -> vector<24x128xf32>
    %44 = arith.addf %39, %43 : vector<24x128xf32>
    %c4 = arith.constant 4 : index
    %c0_46 = arith.constant 0 : index
    %45 = vector.load %arg11[%c4, %c0_46] : memref<29x128xf32, #tpu.memory_space<vmem>>, vector<24x128xf32>
    %c4_47 = arith.constant 4 : index
    %c0_48 = arith.constant 0 : index
    %c0_49 = arith.constant 0 : index
    %46 = vector.load %arg4[%c4_47, %c0_48, %c0_49] : memref<6x128x128xf32, #tpu.memory_space<vmem>>, vector<1x128x128xf32>
    %47 = vector.shape_cast %46 : vector<1x128x128xf32> to vector<128x128xf32>
    %cst_50 = arith.constant dense<0.000000e+00> : vector<24x128xf32>
    %48 = tpu.matmul %45, %47, %cst_50 {dimension_numbers = #tpu.dot_dimension_numbers<[1], [0], [0], [1], [0, 0, 1, 1], [], []>} : vector<24x128xf32>, vector<128x128xf32>, vector<24x128xf32> -> vector<24x128xf32>
    %49 = arith.addf %44, %48 : vector<24x128xf32>
    %c5 = arith.constant 5 : index
    %c0_51 = arith.constant 0 : index
    %50 = vector.load %arg11[%c5, %c0_51] : memref<29x128xf32, #tpu.memory_space<vmem>>, vector<24x128xf32>
    %c5_52 = arith.constant 5 : index
    %c0_53 = arith.constant 0 : index
    %c0_54 = arith.constant 0 : index
    %51 = vector.load %arg4[%c5_52, %c0_53, %c0_54] : memref<6x128x128xf32, #tpu.memory_space<vmem>>, vector<1x128x128xf32>
    %52 = vector.shape_cast %51 : vector<1x128x128xf32> to vector<128x128xf32>
    %cst_55 = arith.constant dense<0.000000e+00> : vector<24x128xf32>
    %53 = tpu.matmul %50, %52, %cst_55 {dimension_numbers = #tpu.dot_dimension_numbers<[1], [0], [0], [1], [0, 0, 1, 1], [], []>} : vector<24x128xf32>, vector<128x128xf32>, vector<24x128xf32> -> vector<24x128xf32>
    %54 = arith.addf %49, %53 : vector<24x128xf32>
    %c0_56 = arith.constant 0 : index
    %c0_57 = arith.constant 0 : index
    %55 = vector.load %arg5[%c0_56, %c0_57] : memref<1x128xf32, #tpu.memory_space<vmem>>, vector<1x128xf32>
    %56 = vector.broadcast %55 : vector<1x128xf32> to vector<24x128xf32>
    %57 = arith.addf %54, %56 : vector<24x128xf32>
    %cst_58 = arith.constant 0.000000e+00 : f32
    %58 = vector.broadcast %cst_58 : f32 to vector<24x128xf32>
    %59 = arith.maximumf %57, %58 : vector<24x128xf32>
    %c0_59 = arith.constant 0 : index
    %c0_60 = arith.constant 0 : index
    %60 = vector.load %arg6[%c0_59, %c0_60] : memref<2x128xf32, #tpu.memory_space<vmem>>, vector<1x128xf32>
    %61 = vector.broadcast %60 : vector<1x128xf32> to vector<24x128xf32>
    %62 = arith.mulf %59, %61 : vector<24x128xf32>
    %c1_61 = arith.constant 1 : index
    %c0_62 = arith.constant 0 : index
    %63 = vector.load %arg6[%c1_61, %c0_62] : memref<2x128xf32, #tpu.memory_space<vmem>>, vector<1x128xf32>
    %64 = vector.broadcast %63 : vector<1x128xf32> to vector<24x128xf32>
    %65 = arith.addf %62, %64 : vector<24x128xf32>
    %c0_63 = arith.constant 0 : index
    %c0_64 = arith.constant 0 : index
    %66 = vector.load %arg12[%c0_63, %c0_64] : memref<24x128xf32, #tpu.memory_space<vmem>>, vector<24x128xf32>
    tpu.vector_store %arg12[%c0_63, %c0_64], %65 {strides = array<i32>} : memref<24x128xf32, #tpu.memory_space<vmem>>, vector<24x128xf32>,
    %c0_65 = arith.constant 0 : index
    %c0_66 = arith.constant 0 : index
    %67 = vector.load %arg12[%c0_65, %c0_66] : memref<24x128xf32, #tpu.memory_space<vmem>>, vector<16x128xf32>
    %c0_67 = arith.constant 0 : index
    %c0_68 = arith.constant 0 : index
    %c0_69 = arith.constant 0 : index
    %68 = vector.load %arg7[%c0_67, %c0_68, %c0_69] : memref<9x128x128xf32, #tpu.memory_space<vmem>>, vector<1x128x128xf32>
    %69 = vector.shape_cast %68 : vector<1x128x128xf32> to vector<128x128xf32>
    %cst_70 = arith.constant dense<0.000000e+00> : vector<16x128xf32>
    %70 = tpu.matmul %67, %69, %cst_70 {dimension_numbers = #tpu.dot_dimension_numbers<[1], [0], [0], [1], [0, 0, 1, 1], [], []>} : vector<16x128xf32>, vector<128x128xf32>, vector<16x128xf32> -> vector<16x128xf32>
    %c1_71 = arith.constant 1 : index
    %c0_72 = arith.constant 0 : index
    %71 = vector.load %arg12[%c1_71, %c0_72] : memref<24x128xf32, #tpu.memory_space<vmem>>, vector<16x128xf32>
    %c1_73 = arith.constant 1 : index
    %c0_74 = arith.constant 0 : index
    %c0_75 = arith.constant 0 : index
    %72 = vector.load %arg7[%c1_73, %c0_74, %c0_75] : memref<9x128x128xf32, #tpu.memory_space<vmem>>, vector<1x128x128xf32>
    %73 = vector.shape_cast %72 : vector<1x128x128xf32> to vector<128x128xf32>
    %cst_76 = arith.constant dense<0.000000e+00> : vector<16x128xf32>
    %74 = tpu.matmul %71, %73, %cst_76 {dimension_numbers = #tpu.dot_dimension_numbers<[1], [0], [0], [1], [0, 0, 1, 1], [], []>} : vector<16x128xf32>, vector<128x128xf32>, vector<16x128xf32> -> vector<16x128xf32>
    %75 = arith.addf %70, %74 : vector<16x128xf32>
    %c2_77 = arith.constant 2 : index
    %c0_78 = arith.constant 0 : index
    %76 = vector.load %arg12[%c2_77, %c0_78] : memref<24x128xf32, #tpu.memory_space<vmem>>, vector<16x128xf32>
    %c2_79 = arith.constant 2 : index
    %c0_80 = arith.constant 0 : index
    %c0_81 = arith.constant 0 : index
    %77 = vector.load %arg7[%c2_79, %c0_80, %c0_81] : memref<9x128x128xf32, #tpu.memory_space<vmem>>, vector<1x128x128xf32>
    %78 = vector.shape_cast %77 : vector<1x128x128xf32> to vector<128x128xf32>
    %cst_82 = arith.constant dense<0.000000e+00> : vector<16x128xf32>
    %79 = tpu.matmul %76, %78, %cst_82 {dimension_numbers = #tpu.dot_dimension_numbers<[1], [0], [0], [1], [0, 0, 1, 1], [], []>} : vector<16x128xf32>, vector<128x128xf32>, vector<16x128xf32> -> vector<16x128xf32>
    %80 = arith.addf %75, %79 : vector<16x128xf32>
    %c3_83 = arith.constant 3 : index
    %c0_84 = arith.constant 0 : index
    %81 = vector.load %arg12[%c3_83, %c0_84] : memref<24x128xf32, #tpu.memory_space<vmem>>, vector<16x128xf32>
    %c3_85 = arith.constant 3 : index
    %c0_86 = arith.constant 0 : index
    %c0_87 = arith.constant 0 : index
    %82 = vector.load %arg7[%c3_85, %c0_86, %c0_87] : memref<9x128x128xf32, #tpu.memory_space<vmem>>, vector<1x128x128xf32>
    %83 = vector.shape_cast %82 : vector<1x128x128xf32> to vector<128x128xf32>
    %cst_88 = arith.constant dense<0.000000e+00> : vector<16x128xf32>
    %84 = tpu.matmul %81, %83, %cst_88 {dimension_numbers = #tpu.dot_dimension_numbers<[1], [0], [0], [1], [0, 0, 1, 1], [], []>} : vector<16x128xf32>, vector<128x128xf32>, vector<16x128xf32> -> vector<16x128xf32>
    %85 = arith.addf %80, %84 : vector<16x128xf32>
    %c4_89 = arith.constant 4 : index
    %c0_90 = arith.constant 0 : index
    %86 = vector.load %arg12[%c4_89, %c0_90] : memref<24x128xf32, #tpu.memory_space<vmem>>, vector<16x128xf32>
    %c4_91 = arith.constant 4 : index
    %c0_92 = arith.constant 0 : index
    %c0_93 = arith.constant 0 : index
    %87 = vector.load %arg7[%c4_91, %c0_92, %c0_93] : memref<9x128x128xf32, #tpu.memory_space<vmem>>, vector<1x128x128xf32>
    %88 = vector.shape_cast %87 : vector<1x128x128xf32> to vector<128x128xf32>
    %cst_94 = arith.constant dense<0.000000e+00> : vector<16x128xf32>
    %89 = tpu.matmul %86, %88, %cst_94 {dimension_numbers = #tpu.dot_dimension_numbers<[1], [0], [0], [1], [0, 0, 1, 1], [], []>} : vector<16x128xf32>, vector<128x128xf32>, vector<16x128xf32> -> vector<16x128xf32>
    %90 = arith.addf %85, %89 : vector<16x128xf32>
    %c5_95 = arith.constant 5 : index
    %c0_96 = arith.constant 0 : index
    %91 = vector.load %arg12[%c5_95, %c0_96] : memref<24x128xf32, #tpu.memory_space<vmem>>, vector<16x128xf32>
    %c5_97 = arith.constant 5 : index
    %c0_98 = arith.constant 0 : index
    %c0_99 = arith.constant 0 : index
    %92 = vector.load %arg7[%c5_97, %c0_98, %c0_99] : memref<9x128x128xf32, #tpu.memory_space<vmem>>, vector<1x128x128xf32>
    %93 = vector.shape_cast %92 : vector<1x128x128xf32> to vector<128x128xf32>
    %cst_100 = arith.constant dense<0.000000e+00> : vector<16x128xf32>
    %94 = tpu.matmul %91, %93, %cst_100 {dimension_numbers = #tpu.dot_dimension_numbers<[1], [0], [0], [1], [0, 0, 1, 1], [], []>} : vector<16x128xf32>, vector<128x128xf32>, vector<16x128xf32> -> vector<16x128xf32>
    %95 = arith.addf %90, %94 : vector<16x128xf32>
    %c6 = arith.constant 6 : index
    %c0_101 = arith.constant 0 : index
    %96 = vector.load %arg12[%c6, %c0_101] : memref<24x128xf32, #tpu.memory_space<vmem>>, vector<16x128xf32>
    %c6_102 = arith.constant 6 : index
    %c0_103 = arith.constant 0 : index
    %c0_104 = arith.constant 0 : index
    %97 = vector.load %arg7[%c6_102, %c0_103, %c0_104] : memref<9x128x128xf32, #tpu.memory_space<vmem>>, vector<1x128x128xf32>
    %98 = vector.shape_cast %97 : vector<1x128x128xf32> to vector<128x128xf32>
    %cst_105 = arith.constant dense<0.000000e+00> : vector<16x128xf32>
    %99 = tpu.matmul %96, %98, %cst_105 {dimension_numbers = #tpu.dot_dimension_numbers<[1], [0], [0], [1], [0, 0, 1, 1], [], []>} : vector<16x128xf32>, vector<128x128xf32>, vector<16x128xf32> -> vector<16x128xf32>
    %100 = arith.addf %95, %99 : vector<16x128xf32>
    %c7 = arith.constant 7 : index
    %c0_106 = arith.constant 0 : index
    %101 = vector.load %arg12[%c7, %c0_106] : memref<24x128xf32, #tpu.memory_space<vmem>>, vector<16x128xf32>
    %c7_107 = arith.constant 7 : index
    %c0_108 = arith.constant 0 : index
    %c0_109 = arith.constant 0 : index
    %102 = vector.load %arg7[%c7_107, %c0_108, %c0_109] : memref<9x128x128xf32, #tpu.memory_space<vmem>>, vector<1x128x128xf32>
    %103 = vector.shape_cast %102 : vector<1x128x128xf32> to vector<128x128xf32>
    %cst_110 = arith.constant dense<0.000000e+00> : vector<16x128xf32>
    %104 = tpu.matmul %101, %103, %cst_110 {dimension_numbers = #tpu.dot_dimension_numbers<[1], [0], [0], [1], [0, 0, 1, 1], [], []>} : vector<16x128xf32>, vector<128x128xf32>, vector<16x128xf32> -> vector<16x128xf32>
    %105 = arith.addf %100, %104 : vector<16x128xf32>
    %c8 = arith.constant 8 : index
    %c0_111 = arith.constant 0 : index
    %106 = vector.load %arg12[%c8, %c0_111] : memref<24x128xf32, #tpu.memory_space<vmem>>, vector<16x128xf32>
    %c8_112 = arith.constant 8 : index
    %c0_113 = arith.constant 0 : index
    %c0_114 = arith.constant 0 : index
    %107 = vector.load %arg7[%c8_112, %c0_113, %c0_114] : memref<9x128x128xf32, #tpu.memory_space<vmem>>, vector<1x128x128xf32>
    %108 = vector.shape_cast %107 : vector<1x128x128xf32> to vector<128x128xf32>
    %cst_115 = arith.constant dense<0.000000e+00> : vector<16x128xf32>
    %109 = tpu.matmul %106, %108, %cst_115 {dimension_numbers = #tpu.dot_dimension_numbers<[1], [0], [0], [1], [0, 0, 1, 1], [], []>} : vector<16x128xf32>, vector<128x128xf32>, vector<16x128xf32> -> vector<16x128xf32>
    %110 = arith.addf %105, %109 : vector<16x128xf32>
    %c0_116 = arith.constant 0 : index
    %c0_117 = arith.constant 0 : index
    %111 = vector.load %arg8[%c0_116, %c0_117] : memref<1x128xf32, #tpu.memory_space<vmem>>, vector<1x128xf32>
    %112 = vector.broadcast %111 : vector<1x128xf32> to vector<16x128xf32>
    %113 = arith.addf %110, %112 : vector<16x128xf32>
    %cst_118 = arith.constant 0.000000e+00 : f32
    %114 = vector.broadcast %cst_118 : f32 to vector<16x128xf32>
    %115 = arith.maximumf %113, %114 : vector<16x128xf32>
    %c0_119 = arith.constant 0 : index
    %c0_120 = arith.constant 0 : index
    %116 = vector.load %arg9[%c0_119, %c0_120] : memref<2x128xf32, #tpu.memory_space<vmem>>, vector<1x128xf32>
    %117 = vector.broadcast %116 : vector<1x128xf32> to vector<16x128xf32>
    %118 = arith.mulf %115, %117 : vector<16x128xf32>
    %c1_121 = arith.constant 1 : index
    %c0_122 = arith.constant 0 : index
    %119 = vector.load %arg9[%c1_121, %c0_122] : memref<2x128xf32, #tpu.memory_space<vmem>>, vector<1x128xf32>
    %120 = vector.broadcast %119 : vector<1x128xf32> to vector<16x128xf32>
    %121 = arith.addf %118, %120 : vector<16x128xf32>
    %c0_123 = arith.constant 0 : index
    %c0_124 = arith.constant 0 : index
    %122 = vector.load %arg10[%c0_123, %c0_124] : memref<16x128xf32, #tpu.memory_space<vmem>>, vector<16x128xf32>
    tpu.vector_store %arg10[%c0_123, %c0_124], %121 {strides = array<i32>} : memref<16x128xf32, #tpu.memory_space<vmem>>, vector<16x128xf32>,
    return
  }
}

module attributes {stable_mosaic.version = 11 : i64} {
  func.func @_head_kernel(%arg0: memref<1x768xf32, #tpu.memory_space<vmem>>, %arg1: memref<16x128xf32, #tpu.memory_space<vmem>>, %arg2: memref<16x128xf32, #tpu.memory_space<vmem>>, %arg3: memref<768x512xf32, #tpu.memory_space<vmem>>, %arg4: memref<1x512xf32, #tpu.memory_space<vmem>>, %arg5: memref<512x128xf32, #tpu.memory_space<vmem>>, %arg6: memref<1x128xf32, #tpu.memory_space<vmem>>, %arg7: memref<128x128xf32, #tpu.memory_space<vmem>>, %arg8: memref<128x128xf32, #tpu.memory_space<vmem>>, %arg9: memref<1x128xf32, #tpu.memory_space<vmem>>, %arg10: memref<128x128xf32, #tpu.memory_space<vmem>>, %arg11: memref<1x128xf32, #tpu.memory_space<vmem>>, %arg12: memref<1x128xf32, #tpu.memory_space<vmem>>) attributes {dimension_semantics = [], scalar_prefetch = 0 : i64, scratch_operands = 0 : i64, tpu.core_type = #tpu.core_type<tc>} {
    %c0 = arith.constant 0 : index
    %c0_0 = arith.constant 0 : index
    %0 = vector.load %arg0[%c0, %c0_0] : memref<1x768xf32, #tpu.memory_space<vmem>>, vector<1x768xf32>
    %c0_1 = arith.constant 0 : index
    %c0_2 = arith.constant 0 : index
    %1 = vector.load %arg3[%c0_1, %c0_2] : memref<768x512xf32, #tpu.memory_space<vmem>>, vector<768x512xf32>
    %cst = arith.constant dense<0.000000e+00> : vector<1x512xf32>
    %2 = tpu.matmul %0, %1, %cst {dimension_numbers = #tpu.dot_dimension_numbers<[1], [0], [0], [1], [0, 0, 1, 1], [], []>} : vector<1x768xf32>, vector<768x512xf32>, vector<1x512xf32> -> vector<1x512xf32>
    %c0_3 = arith.constant 0 : index
    %c0_4 = arith.constant 0 : index
    %3 = vector.load %arg4[%c0_3, %c0_4] : memref<1x512xf32, #tpu.memory_space<vmem>>, vector<1x512xf32>
    %4 = arith.addf %2, %3 : vector<1x512xf32>
    %c0_5 = arith.constant 0 : index
    %c0_6 = arith.constant 0 : index
    %5 = vector.load %arg5[%c0_5, %c0_6] : memref<512x128xf32, #tpu.memory_space<vmem>>, vector<512x128xf32>
    %cst_7 = arith.constant dense<0.000000e+00> : vector<1x128xf32>
    %6 = tpu.matmul %4, %5, %cst_7 {dimension_numbers = #tpu.dot_dimension_numbers<[1], [0], [0], [1], [0, 0, 1, 1], [], []>} : vector<1x512xf32>, vector<512x128xf32>, vector<1x128xf32> -> vector<1x128xf32>
    %c0_8 = arith.constant 0 : index
    %c0_9 = arith.constant 0 : index
    %7 = vector.load %arg6[%c0_8, %c0_9] : memref<1x128xf32, #tpu.memory_space<vmem>>, vector<1x128xf32>
    %8 = arith.addf %6, %7 : vector<1x128xf32>
    %c0_10 = arith.constant 0 : index
    %c0_11 = arith.constant 0 : index
    %9 = vector.load %arg1[%c0_10, %c0_11] : memref<16x128xf32, #tpu.memory_space<vmem>>, vector<16x128xf32>
    %cst_12 = arith.constant dense<0.000000e+00> : vector<128xf32>
    %10 = vector.multi_reduction <add>, %9, %cst_12 [0] : vector<16x128xf32> to vector<128xf32>
    %11 = vector.shape_cast %10 : vector<128xf32> to vector<1x128xf32>
    %cst_13 = arith.constant 1.600000e+01 : f32
    %12 = vector.broadcast %cst_13 : f32 to vector<1x128xf32>
    %13 = arith.divf %11, %12 : vector<1x128xf32>
    %c0_14 = arith.constant 0 : index
    %c0_15 = arith.constant 0 : index
    %14 = vector.load %arg2[%c0_14, %c0_15] : memref<16x128xf32, #tpu.memory_space<vmem>>, vector<16x128xf32>
    %cst_16 = arith.constant dense<0.000000e+00> : vector<128xf32>
    %15 = vector.multi_reduction <add>, %14, %cst_16 [0] : vector<16x128xf32> to vector<128xf32>
    %16 = vector.shape_cast %15 : vector<128xf32> to vector<1x128xf32>
    %cst_17 = arith.constant 1.600000e+01 : f32
    %17 = vector.broadcast %cst_17 : f32 to vector<1x128xf32>
    %18 = arith.divf %16, %17 : vector<1x128xf32>
    %c0_18 = arith.constant 0 : index
    %c0_19 = arith.constant 0 : index
    %19 = vector.load %arg7[%c0_18, %c0_19] : memref<128x128xf32, #tpu.memory_space<vmem>>, vector<128x128xf32>
    %cst_20 = arith.constant dense<0.000000e+00> : vector<1x128xf32>
    %20 = tpu.matmul %13, %19, %cst_20 {dimension_numbers = #tpu.dot_dimension_numbers<[1], [0], [0], [1], [0, 0, 1, 1], [], []>} : vector<1x128xf32>, vector<128x128xf32>, vector<1x128xf32> -> vector<1x128xf32>
    %c0_21 = arith.constant 0 : index
    %c0_22 = arith.constant 0 : index
    %21 = vector.load %arg8[%c0_21, %c0_22] : memref<128x128xf32, #tpu.memory_space<vmem>>, vector<128x128xf32>
    %cst_23 = arith.constant dense<0.000000e+00> : vector<1x128xf32>
    %22 = tpu.matmul %18, %21, %cst_23 {dimension_numbers = #tpu.dot_dimension_numbers<[1], [0], [0], [1], [0, 0, 1, 1], [], []>} : vector<1x128xf32>, vector<128x128xf32>, vector<1x128xf32> -> vector<1x128xf32>
    %23 = arith.addf %20, %22 : vector<1x128xf32>
    %c0_24 = arith.constant 0 : index
    %c0_25 = arith.constant 0 : index
    %24 = vector.load %arg9[%c0_24, %c0_25] : memref<1x128xf32, #tpu.memory_space<vmem>>, vector<1x128xf32>
    %25 = arith.addf %23, %24 : vector<1x128xf32>
    %26 = arith.addf %25, %8 : vector<1x128xf32>
    %27 = math.tanh %26 : vector<1x128xf32>
    %c0_26 = arith.constant 0 : index
    %c0_27 = arith.constant 0 : index
    %28 = vector.load %arg10[%c0_26, %c0_27] : memref<128x128xf32, #tpu.memory_space<vmem>>, vector<128x128xf32>
    %cst_28 = arith.constant dense<0.000000e+00> : vector<1x128xf32>
    %29 = tpu.matmul %27, %28, %cst_28 {dimension_numbers = #tpu.dot_dimension_numbers<[1], [0], [0], [1], [0, 0, 1, 1], [], []>} : vector<1x128xf32>, vector<128x128xf32>, vector<1x128xf32> -> vector<1x128xf32>
    %c0_29 = arith.constant 0 : index
    %c0_30 = arith.constant 0 : index
    %30 = vector.load %arg11[%c0_29, %c0_30] : memref<1x128xf32, #tpu.memory_space<vmem>>, vector<1x128xf32>
    %31 = arith.addf %29, %30 : vector<1x128xf32>
    %c0_31 = arith.constant 0 : index
    %c0_32 = arith.constant 0 : index
    %32 = vector.load %arg12[%c0_31, %c0_32] : memref<1x128xf32, #tpu.memory_space<vmem>>, vector<1x128xf32>
    tpu.vector_store %arg12[%c0_31, %c0_32], %31 {strides = array<i32>} : memref<1x128xf32, #tpu.memory_space<vmem>>, vector<1x128xf32>,
    return
  }
}

</mosaic_0001>

<bundles_post_ra>
// kernel: dtis_forward.12
= control target key start
LH: loop header
LB: loop body
LE: loop exit
PB: predicated region body
PF: predicated region fallthrough
CT: control target
= control target key end

     0   :  { %8 = vsyncpa [#allocation3], 0  ;;  %s294_s0 = inlined_call_operand.vmem [shape: f32[16,128], index: 0, kind: input, shape index: {}]   ;;  %s295_s1 = inlined_call_operand.hbm [shape: f32[128,128], index: 1, kind: input, shape index: {}]   ;;  %s296_s2 = inlined_call_operand.hbm [shape: f32[1,128], index: 2, kind: input, shape index: {}]   ;;  %s297_s3 = inlined_call_operand.vmem [shape: f32[16,128], index: 3, kind: output, shape index: {}]  }
   0x1   :  { %9 = vsyncpa [#allocation5], 0  ;;  %s252_s12 = smov [#allocation2]  }
   0x2   :  { %s17_s13 = sshll.u32 %s252_s12, 4  ;;  %s18_s13 = int_to_ptr.vmem [resolvable:$true] %s17_s13 }
   0x3   :  { %s216_s14 = scalar_lea.vmem %s18_s13, 2048  ;;  %p221_p1 = scmp.lt.s32.totalorder %s18_s13, %s18_s13 }
   0x4   :  { %p217_p0 = scmp.ne.s32.totalorder %s18_s13, %s216_s14  ;;  %p222_p2 = scmp.lt.s32.totalorder %s216_s14, %s216_s14 }
   0x6   :  { %p223_p3 = por %p222_p2, %p221_p1 }
   0x8   :  { %p224_p4 = pnand %p223_p3, %p217_p0 }
   0xa   :  { %227 = shalt.err (!%p224_p4)
}
   0xb   :  { %s253_s15 = smov 128   ;;  %s254_s16 = smov 8  }
   0xc   :  { %23 = dma.hbm_to_vmem [thread:$0]  %s295_s1, 2048, %s18_s13, [#allocation3], %s253_s15, %s253_s15, %s254_s16  }
   0xd   :  { %s255_s19 = smov [#allocation4]  }
   0xe   :  { %s30_s20 = sshll.u32 %s255_s19, 4  ;;  %s31_s20 = int_to_ptr.vmem [resolvable:$true] %s30_s20 }
   0xf   :  { %s236_s21 = scalar_lea.vmem %s31_s20, 16  ;;  %s240_s22 = scalar_lea.vmem %s31_s20, 32 }
  0x10   :  { %p237_p5 = scmp.ne.s32.totalorder %s31_s20, %s236_s21  ;;  %p241_p6 = scmp.lt.s32.totalorder %s31_s20, %s31_s20 }
  0x11   :  { %p242_p7 = scmp.lt.s32.totalorder %s240_s22, %s236_s21 }
  0x13   :  { %p243_p8 = por %p242_p7, %p241_p6 }
  0x15   :  { %p244_p9 = pnand %p243_p8, %p237_p5 }
  0x17   :  { %247 = shalt.err (!%p244_p9)
}
  0x18   :  { %33 = dma.hbm_to_vmem [thread:$0]  %s296_s2, 16, %s31_s20, [#allocation5]  }
  0x19   :  { %248 = dma.done.wait [#allocation3], 2048  }
  0x1a   :  { %249 = vsyncadd [#allocation3], 4294965248 }
  0x1b   :  { %250 = dma.done.wait [#allocation5], 16  }
  0x1c   :  { %251 = vsyncadd [#allocation5], 4294967280  ;;  %v57_v0 = vld [vmem:[#allocation2 + $0x78] sm:$0xff]  ;;  %v56_v1 = vld [vmem:[#allocation2 + $0x70] sm:$0xff] }
  0x1d   :  { %169 = vmatprep.subr.mxu0 %v57_v0  ;;  %v55_v2 = vld [vmem:[#allocation2 + $0x68] sm:$0xff]  ;;  %v54_v3 = vld [vmem:[#allocation2 + $0x60] sm:$0xff]  ;;  %v53_v5 = vld [vmem:[#allocation2 + $0x58] sm:$0xff] }
  0x1e   :  { %170 = vmatpush3.msra.mxu0 %v57_v0  ;;  %v40_v4 = vld [vmem:[%s294_s0] sm:$0xff]  ;;  %v52_v6 = vld [vmem:[#allocation2 + $0x50] sm:$0xff]  ;;  %v51_v7 = vld [vmem:[#allocation2 + $0x48] sm:$0xff] }
  0x1f   :  { %171 = vmatprep.subr.mxu0 %v56_v1  ;;  %201 = vmatprep.mubr.f32.mxu0 %v40_v4  ;;  %v50_v8 = vld [vmem:[#allocation2 + $0x40] sm:$0xff]  ;;  %v49_v9 = vld [vmem:[#allocation2 + $0x38] sm:$0xff]  ;;  %v48_v10 = vld [vmem:[#allocation2 + $0x30] sm:$0xff] }
  0x20   :  { %172 = vmatpush3.msra.mxu0 %v56_v1  ;;  %v47_v11 = vld [vmem:[#allocation2 + $0x28] sm:$0xff]  ;;  %v46_v12 = vld [vmem:[#allocation2 + $0x20] sm:$0xff]  ;;  %v45_v13 = vld [vmem:[#allocation2 + $0x18] sm:$0xff] }
  0x21   :  { %173 = vmatprep.subr.mxu0 %v55_v2  ;;  %v44_v14 = vld [vmem:[#allocation2 + $0x10] sm:$0xff]  ;;  %v43_v15 = vld [vmem:[#allocation2 + $0x8] sm:$0xff]  ;;  %v42_v16 = vld [vmem:[#allocation2] sm:$0xff] }
  0x22   :  { %174 = vmatpush3.msra.mxu0 %v55_v2  ;;  %v41_v17 = vld [vmem:[%s294_s0 + $0x8] sm:$0xff]  ;;  %v150_v18 = vld [vmem:[#allocation4] ss:$0 sm:$0xff] }
  0x23   :  { %175 = vmatprep.subr.mxu0 %v54_v3 }
  0x24   :  { %176 = vmatpush3.msra.mxu0 %v54_v3 }
  0x25   :  { %177 = vmatprep.subr.mxu0 %v53_v5 }
  0x26   :  { %178 = vmatpush3.msra.mxu0 %v53_v5 }
  0x27   :  { %179 = vmatprep.subr.mxu0 %v52_v6 }
  0x28   :  { %180 = vmatpush3.msra.mxu0 %v52_v6 }
  0x29   :  { %181 = vmatprep.subr.mxu0 %v51_v7 }
  0x2a   :  { %182 = vmatpush3.msra.mxu0 %v51_v7 }
  0x2b   :  { %183 = vmatprep.subr.mxu0 %v50_v8 }
  0x2c   :  { %184 = vmatpush3.msra.mxu0 %v50_v8 }
  0x2d   :  { %185 = vmatprep.subr.mxu0 %v49_v9 }
  0x2e   :  { %186 = vmatpush3.msra.mxu0 %v49_v9 }
  0x2f   :  { %187 = vmatprep.subr.mxu0 %v48_v10 }
  0x30   :  { %188 = vmatpush3.msra.mxu0 %v48_v10 }
  0x31   :  { %189 = vmatprep.subr.mxu0 %v47_v11 }
  0x32   :  { %190 = vmatpush3.msra.mxu0 %v47_v11 }
  0x33   :  { %191 = vmatprep.subr.mxu0 %v46_v12 }
  0x34   :  { %192 = vmatpush3.msra.mxu0 %v46_v12 }
  0x35   :  { %193 = vmatprep.subr.mxu0 %v45_v13 }
  0x36   :  { %194 = vmatpush3.msra.mxu0 %v45_v13 }
  0x37   :  { %195 = vmatprep.subr.mxu0 %v44_v14 }
  0x38   :  { %196 = vmatpush3.msra.mxu0 %v44_v14 }
  0x39   :  { %197 = vmatprep.subr.mxu0 %v43_v15 }
  0x3a   :  { %198 = vmatpush3.msra.mxu0 %v43_v15 }
  0x3b   :  { %199 = vmatprep.subr.mxu0 %v42_v16 }
  0x3c   :  { %200 = vmatpush3.msra.mxu0 %v42_v16 }
  0x3d   :  { %202 = vmatmul.mubr.f32.vlgmr.msra.gmra.mxu0 %v41_v17 }
  0xfd   :  { %v203_v19 = vpop.f32.mrf.mxu0 }
  0xfe   :  { %v137_v20 = vadd.f32 %v203_v19, %v150_v18 }
  0xff   :  { %v131_v21 = vpop.f32.mrf.mxu0 }
 0x100   :  { %v141_v22 = vmax.f32 %v137_v20, 0.0  ;;  %v132_v23 = vadd.f32 %v150_v18, %v131_v21 }
 0x102   :  { %143 = vst [vmem:[%s297_s3 + $0x8] sm:$0xff] %v141_v22  ;;  %v140_v24 = vmax.f32 %v132_v23, 0.0 }
 0x104   :  { %142 = vst [vmem:[%s297_s3] sm:$0xff] %v140_v24 }
 0x105   :  { %148 = vsyncpa [#allocation3], 1 }
 0x106   :  { %149 = vsyncpa [#allocation5], 1 }

// kernel: dtis_forward.13
= control target key start
LH: loop header
LB: loop body
LE: loop exit
PB: predicated region body
PF: predicated region fallthrough
CT: control target
= control target key end

     0   :  { %9 = vsyncpa [#allocation3], 0  ;;  %s448_s0 = inlined_call_operand.vmem [shape: f32[16,128], index: 0, kind: input, shape index: {}]   ;;  %s449_s1 = inlined_call_operand.vmem [shape: f32[16,128], index: 1, kind: input, shape index: {}]   ;;  %s450_s2 = inlined_call_operand.hbm [shape: f32[128,128], index: 2, kind: input, shape index: {}]   ;;  %s451_s3 = inlined_call_operand.hbm [shape: f32[128,128], index: 3, kind: input, shape index: {}]   ;;  %s452_s4 = inlined_call_operand.vmem [shape: f32[16,128], index: 4, kind: output, shape index: {}]  }
   0x1   :  { %10 = vsyncpa [#allocation5], 0  ;;  %s395_s15 = smov [#allocation2]  }
   0x2   :  { %s20_s16 = sshll.u32 %s395_s15, 4  ;;  %s21_s16 = int_to_ptr.vmem [resolvable:$true] %s20_s16 }
   0x3   :  { %s359_s17 = scalar_lea.vmem %s21_s16, 2048  ;;  %p364_p1 = scmp.lt.s32.totalorder %s21_s16, %s21_s16 }
   0x4   :  { %p360_p0 = scmp.ne.s32.totalorder %s21_s16, %s359_s17  ;;  %p365_p2 = scmp.lt.s32.totalorder %s359_s17, %s359_s17 }
   0x6   :  { %p366_p3 = por %p365_p2, %p364_p1 }
   0x8   :  { %p367_p4 = pnand %p366_p3, %p360_p0 }
   0xa   :  { %370 = shalt.err (!%p367_p4)
}
   0xb   :  { %s396_s18 = smov 128   ;;  %s397_s19 = smov 8  }
   0xc   :  { %26 = dma.hbm_to_vmem [thread:$0]  %s450_s2, 2048, %s21_s16, [#allocation3], %s396_s18, %s396_s18, %s397_s19  }
   0xd   :  { %s398_s22 = smov [#allocation4]  }
   0xe   :  { %s32_s23 = sshll.u32 %s398_s22, 4  ;;  %s33_s23 = int_to_ptr.vmem [resolvable:$true] %s32_s23 }
   0xf   :  { %s379_s24 = scalar_lea.vmem %s33_s23, 2048  ;;  %p384_p6 = scmp.lt.s32.totalorder %s33_s23, %s33_s23 }
  0x10   :  { %p380_p5 = scmp.ne.s32.totalorder %s33_s23, %s379_s24  ;;  %p385_p7 = scmp.lt.s32.totalorder %s379_s24, %s379_s24 }
  0x12   :  { %p386_p8 = por %p385_p7, %p384_p6 }
  0x14   :  { %p387_p9 = pnand %p386_p8, %p380_p5 }
  0x16   :  { %390 = shalt.err (!%p387_p9)
}
  0x17   :  { %38 = dma.hbm_to_vmem [thread:$0]  %s451_s3, 2048, %s33_s23, [#allocation5], %s396_s18, %s396_s18, %s397_s19  }
  0x18   :  { %391 = dma.done.wait [#allocation3], 2048  }
  0x19   :  { %392 = vsyncadd [#allocation3], 4294965248 }
  0x1a   :  { %393 = dma.done.wait [#allocation5], 2048  }
  0x1b   :  { %394 = vsyncadd [#allocation5], 4294965248  ;;  %v80_v0 = vld [vmem:[#allocation4 + $0x78] sm:$0xff]  ;;  %v79_v2 = vld [vmem:[#allocation4 + $0x70] sm:$0xff] }
  0x1c   :  { %v62_v1 = vld [vmem:[#allocation2 + $0x78] sm:$0xff]  ;;  %277 = vmatprep.subr.mxu0 %v80_v0  ;;  %v61_v3 = vld [vmem:[#allocation2 + $0x70] sm:$0xff]  ;;  %v78_v4 = vld [vmem:[#allocation4 + $0x68] sm:$0xff] }
  0x1d   :  { %312 = vmatprep.subr.mxu1 %v62_v1  ;;  %278 = vmatpush3.msra.mxu0 %v80_v0  ;;  %v60_v5 = vld [vmem:[#allocation2 + $0x68] sm:$0xff]  ;;  %v77_v6 = vld [vmem:[#allocation4 + $0x60] sm:$0xff]  ;;  %v76_v8 = vld [vmem:[#allocation4 + $0x58] sm:$0xff] }
  0x1e   :  { %313 = vmatpush3.msra.mxu1 %v62_v1  ;;  %279 = vmatprep.subr.mxu0 %v79_v2  ;;  %v59_v7 = vld [vmem:[#allocation2 + $0x60] sm:$0xff]  ;;  %v58_v9 = vld [vmem:[#allocation2 + $0x58] sm:$0xff]  ;;  %v75_v10 = vld [vmem:[#allocation4 + $0x50] sm:$0xff] }
  0x1f   :  { %314 = vmatprep.subr.mxu1 %v61_v3  ;;  %280 = vmatpush3.msra.mxu0 %v79_v2  ;;  %v57_v11 = vld [vmem:[#allocation2 + $0x50] sm:$0xff]  ;;  %v74_v12 = vld [vmem:[#allocation4 + $0x48] sm:$0xff]  ;;  %v73_v14 = vld [vmem:[#allocation4 + $0x40] sm:$0xff] }
  0x20   :  { %315 = vmatpush3.msra.mxu1 %v61_v3  ;;  %281 = vmatprep.subr.mxu0 %v78_v4  ;;  %v56_v13 = vld [vmem:[#allocation2 + $0x48] sm:$0xff]  ;;  %v55_v15 = vld [vmem:[#allocation2 + $0x40] sm:$0xff]  ;;  %v72_v16 = vld [vmem:[#allocation4 + $0x38] sm:$0xff] }
  0x21   :  { %316 = vmatprep.subr.mxu1 %v60_v5  ;;  %282 = vmatpush3.msra.mxu0 %v78_v4  ;;  %v54_v17 = vld [vmem:[#allocation2 + $0x38] sm:$0xff]  ;;  %v71_v18 = vld [vmem:[#allocation4 + $0x30] sm:$0xff]  ;;  %v70_v20 = vld [vmem:[#allocation4 + $0x28] sm:$0xff] }
  0x22   :  { %317 = vmatpush3.msra.mxu1 %v60_v5  ;;  %283 = vmatprep.subr.mxu0 %v77_v6  ;;  %v53_v19 = vld [vmem:[#allocation2 + $0x30] sm:$0xff]  ;;  %v52_v21 = vld [vmem:[#allocation2 + $0x28] sm:$0xff]  ;;  %v69_v22 = vld [vmem:[#allocation4 + $0x20] sm:$0xff] }
  0x23   :  { %318 = vmatprep.subr.mxu1 %v59_v7  ;;  %284 = vmatpush3.msra.mxu0 %v77_v6  ;;  %v51_v23 = vld [vmem:[#allocation2 + $0x20] sm:$0xff]  ;;  %v68_v24 = vld [vmem:[#allocation4 + $0x18] sm:$0xff]  ;;  %v67_v26 = vld [vmem:[#allocation4 + $0x10] sm:$0xff] }
  0x24   :  { %319 = vmatpush3.msra.mxu1 %v59_v7  ;;  %285 = vmatprep.subr.mxu0 %v76_v8  ;;  %v50_v25 = vld [vmem:[#allocation2 + $0x18] sm:$0xff]  ;;  %v49_v27 = vld [vmem:[#allocation2 + $0x10] sm:$0xff]  ;;  %v66_v28 = vld [vmem:[#allocation4 + $0x8] sm:$0xff] }
  0x25   :  { %320 = vmatprep.subr.mxu1 %v58_v9  ;;  %286 = vmatpush3.msra.mxu0 %v76_v8  ;;  %v48_v29 = vld [vmem:[#allocation2 + $0x8] sm:$0xff]  ;;  %v65_v30 = vld [vmem:[#allocation4] sm:$0xff] }
  0x26   :  { %321 = vmatpush3.msra.mxu1 %v58_v9  ;;  %287 = vmatprep.subr.mxu0 %v75_v10  ;;  %v47_v31 = vld [vmem:[#allocation2] sm:$0xff]  ;;  %v64_v34 = vld [vmem:[%s449_s1 + $0x8] sm:$0xff] }
  0x27   :  { %322 = vmatprep.subr.mxu1 %v57_v11  ;;  %288 = vmatpush3.msra.mxu0 %v75_v10  ;;  %v63_v32 = vld [vmem:[%s449_s1] sm:$0xff]  ;;  %v46_v35 = vld [vmem:[%s448_s0 + $0x8] sm:$0xff] }
  0x28   :  { %323 = vmatpush3.msra.mxu1 %v57_v11  ;;  %289 = vmatprep.subr.mxu0 %v74_v12  ;;  %v45_v33 = vld [vmem:[%s448_s0] sm:$0xff] }
  0x29   :  { %324 = vmatprep.subr.mxu1 %v56_v13  ;;  %290 = vmatpush3.msra.mxu0 %v74_v12 }
  0x2a   :  { %325 = vmatpush3.msra.mxu1 %v56_v13  ;;  %291 = vmatprep.subr.mxu0 %v73_v14 }
  0x2b   :  { %326 = vmatprep.subr.mxu1 %v55_v15  ;;  %292 = vmatpush3.msra.mxu0 %v73_v14 }
  0x2c   :  { %327 = vmatpush3.msra.mxu1 %v55_v15  ;;  %293 = vmatprep.subr.mxu0 %v72_v16 }
  0x2d   :  { %328 = vmatprep.subr.mxu1 %v54_v17  ;;  %294 = vmatpush3.msra.mxu0 %v72_v16 }
  0x2e   :  { %329 = vmatpush3.msra.mxu1 %v54_v17  ;;  %295 = vmatprep.subr.mxu0 %v71_v18 }
  0x2f   :  { %330 = vmatprep.subr.mxu1 %v53_v19  ;;  %296 = vmatpush3.msra.mxu0 %v71_v18 }
  0x30   :  { %331 = vmatpush3.msra.mxu1 %v53_v19  ;;  %297 = vmatprep.subr.mxu0 %v70_v20 }
  0x31   :  { %332 = vmatprep.subr.mxu1 %v52_v21  ;;  %298 = vmatpush3.msra.mxu0 %v70_v20 }
  0x32   :  { %333 = vmatpush3.msra.mxu1 %v52_v21  ;;  %299 = vmatprep.subr.mxu0 %v69_v22 }
  0x33   :  { %334 = vmatprep.subr.mxu1 %v51_v23  ;;  %300 = vmatpush3.msra.mxu0 %v69_v22 }
  0x34   :  { %335 = vmatpush3.msra.mxu1 %v51_v23  ;;  %301 = vmatprep.subr.mxu0 %v68_v24 }
  0x35   :  { %336 = vmatprep.subr.mxu1 %v50_v25  ;;  %302 = vmatpush3.msra.mxu0 %v68_v24 }
  0x36   :  { %337 = vmatpush3.msra.mxu1 %v50_v25  ;;  %303 = vmatprep.subr.mxu0 %v67_v26 }
  0x37   :  { %338 = vmatprep.subr.mxu1 %v49_v27  ;;  %304 = vmatpush3.msra.mxu0 %v67_v26 }
  0x38   :  { %339 = vmatpush3.msra.mxu1 %v49_v27  ;;  %305 = vmatprep.subr.mxu0 %v66_v28 }
  0x39   :  { %340 = vmatprep.subr.mxu1 %v48_v29  ;;  %306 = vmatpush3.msra.mxu0 %v66_v28 }
  0x3a   :  { %341 = vmatpush3.msra.mxu1 %v48_v29  ;;  %307 = vmatprep.subr.mxu0 %v65_v30 }
  0x3b   :  { %342 = vmatprep.subr.mxu1 %v47_v31  ;;  %308 = vmatpush3.msra.mxu0 %v65_v30 }
  0x3c   :  { %309 = vmatprep.mubr.f32.mxu0 %v63_v32  ;;  %343 = vmatpush3.msra.mxu1 %v47_v31 }
  0x3d   :  { %344 = vmatprep.mubr.f32.mxu1 %v45_v33  ;;  %310 = vmatmul.mubr.f32.vlgmr.msra.gmra.mxu0 %v64_v34 }
  0x3e   :  { %345 = vmatmul.mubr.f32.vlgmr.msra.gmra.mxu1 %v46_v35 }
  0xfd   :  { %v311_v36 = vpop.f32.mrf.mxu0 }
  0xfe   :  { %v346_v37 = vpop.f32.mrf.mxu1 }
  0xff   :  { %v228_v38 = vadd.f32 %v346_v37, %v311_v36  ;;  %v147_v39 = vpop.f32.mrf.mxu0 }
 0x100   :  { %v222_v40 = vpop.f32.mrf.mxu1 }
 0x101   :  { %v232_v41 = vmax.f32 %v228_v38, 0.0  ;;  %v223_v42 = vadd.f32 %v222_v40, %v147_v39 }
 0x103   :  { %234 = vst [vmem:[%s452_s4 + $0x8] sm:$0xff] %v232_v41  ;;  %v231_v43 = vmax.f32 %v223_v42, 0.0 }
 0x105   :  { %233 = vst [vmem:[%s452_s4] sm:$0xff] %v231_v43 }
 0x106   :  { %239 = vsyncpa [#allocation3], 1 }
 0x107   :  { %240 = vsyncpa [#allocation5], 1 }

// kernel: dtis_forward.16
= control target key start
LH: loop header
LB: loop body
LE: loop exit
PB: predicated region body
PF: predicated region fallthrough
CT: control target
= control target key end

     0   :  { %8 = vsyncpa [#allocation3], 0  ;;  %s410_s0 = inlined_call_operand.vmem [shape: f32[16,128], index: 0, kind: input, shape index: {}]   ;;  %s411_s1 = inlined_call_operand.hbm [shape: f32[128,512], index: 1, kind: input, shape index: {}]   ;;  %s412_s2 = inlined_call_operand.hbm [shape: f32[1,512], index: 2, kind: input, shape index: {}]   ;;  %s413_s3 = inlined_call_operand.vmem [shape: f32[16,512], index: 3, kind: output, shape index: {}]  }
   0x1   :  { %9 = vsyncpa [#allocation5], 0  ;;  %s345_s12 = smov [#allocation2]  }
   0x2   :  { %s17_s13 = sshll.u32 %s345_s12, 4  ;;  %s18_s13 = int_to_ptr.vmem [resolvable:$true] %s17_s13 }
   0x3   :  { %s309_s14 = scalar_lea.vmem %s18_s13, 8192  ;;  %p314_p1 = scmp.lt.s32.totalorder %s18_s13, %s18_s13 }
   0x4   :  { %p310_p0 = scmp.ne.s32.totalorder %s18_s13, %s309_s14  ;;  %p315_p2 = scmp.lt.s32.totalorder %s309_s14, %s309_s14 }
   0x6   :  { %p316_p3 = por %p315_p2, %p314_p1 }
   0x8   :  { %p317_p4 = pnand %p316_p3, %p310_p0 }
   0xa   :  { %320 = shalt.err (!%p317_p4)
}
   0xb   :  { %s346_s15 = smov 512   ;;  %s347_s16 = smov 32  }
   0xc   :  { %23 = dma.hbm_to_vmem [thread:$0]  %s411_s1, 8192, %s18_s13, [#allocation3], %s346_s15, %s346_s15, %s347_s16  }
   0xd   :  { %s348_s19 = smov [#allocation4]  }
   0xe   :  { %s30_s20 = sshll.u32 %s348_s19, 4  ;;  %s31_s20 = int_to_ptr.vmem [resolvable:$true] %s30_s20 }
   0xf   :  { %s329_s21 = scalar_lea.vmem %s31_s20, 64  ;;  %p334_p6 = scmp.lt.s32.totalorder %s31_s20, %s31_s20 }
  0x10   :  { %p330_p5 = scmp.ne.s32.totalorder %s31_s20, %s329_s21  ;;  %p335_p7 = scmp.lt.s32.totalorder %s329_s21, %s329_s21 }
  0x12   :  { %p336_p8 = por %p335_p7, %p334_p6 }
  0x14   :  { %p337_p9 = pnand %p336_p8, %p330_p5 }
  0x16   :  { %340 = shalt.err (!%p337_p9)
}
  0x17   :  { %33 = dma.hbm_to_vmem [thread:$0]  %s412_s2, 64, %s31_s20, [#allocation5]  }
  0x18   :  { %341 = dma.done.wait [#allocation3], 8192  }
  0x19   :  { %342 = vsyncadd [#allocation3], 4294959104 }
  0x1a   :  { %343 = dma.done.wait [#allocation5], 64  }
  0x1b   :  { %344 = vsyncadd [#allocation5], 4294967232  ;;  %v349_v0 = vmov 0.0   ;;  %v103_v1 = vld [vmem:[#allocation2 + $0x1e8] sm:$0xff]  ;;  %v105_v2 = vld [vmem:[#allocation2 + $0x1f8] sm:$0xff] }
  0x1c   :  { %192 = vmatprep.mubr.f32.mxu0 %v349_v0  ;;  %269 = vmatprep.mubr.f32.mxu1 %v349_v0  ;;  %v102_v3 = vld [vmem:[#allocation2 + $0x1e0] sm:$0xff]  ;;  %v104_v4 = vld [vmem:[#allocation2 + $0x1f0] sm:$0xff]  ;;  %v99_v5 = vld [vmem:[#allocation2 + $0x1c8] sm:$0xff] }
  0x1d   :  { %128 = vmatprep.subr.mxu0 %v103_v1  ;;  %205 = vmatprep.subr.mxu1 %v105_v2  ;;  %v101_v6 = vld [vmem:[#allocation2 + $0x1d8] sm:$0xff]  ;;  %v98_v7 = vld [vmem:[#allocation2 + $0x1c0] sm:$0xff]  ;;  %v100_v8 = vld [vmem:[#allocation2 + $0x1d0] sm:$0xff] }
  0x1e   :  { %129 = vmatpush1.msra.mxu0 %v102_v3  ;;  %206 = vmatpush1.msra.mxu1 %v104_v4  ;;  %v95_v9 = vld [vmem:[#allocation2 + $0x1a8] sm:$0xff]  ;;  %v97_v10 = vld [vmem:[#allocation2 + $0x1b8] sm:$0xff]  ;;  %v94_v11 = vld [vmem:[#allocation2 + $0x1a0] sm:$0xff]  ;;  %v108_v4 = vlaneseq }
  0x1f   :  { %130 = vmatprep.subr.mxu0 %v99_v5  ;;  %207 = vmatprep.subr.mxu1 %v101_v6  ;;  %v96_v12 = vld [vmem:[#allocation2 + $0x1b0] sm:$0xff]  ;;  %v91_v13 = vld [vmem:[#allocation2 + $0x188] sm:$0xff]  ;;  %v93_v14 = vld [vmem:[#allocation2 + $0x198] sm:$0xff] }
  0x20   :  { %131 = vmatpush1.msra.mxu0 %v98_v7  ;;  %208 = vmatpush1.msra.mxu1 %v100_v8  ;;  %v90_v15 = vld [vmem:[#allocation2 + $0x180] sm:$0xff]  ;;  %v92_v16 = vld [vmem:[#allocation2 + $0x190] sm:$0xff]  ;;  %v87_v17 = vld [vmem:[#allocation2 + $0x168] sm:$0xff]  ;;  %v109_v5 = vshrl.u32 %v108_v4, 7 }
  0x21   :  { %132 = vmatprep.subr.mxu0 %v95_v9  ;;  %209 = vmatprep.subr.mxu1 %v97_v10  ;;  %v89_v18 = vld [vmem:[#allocation2 + $0x178] sm:$0xff]  ;;  %v86_v19 = vld [vmem:[#allocation2 + $0x160] sm:$0xff]  ;;  %v88_v20 = vld [vmem:[#allocation2 + $0x170] sm:$0xff] }
  0x22   :  { %133 = vmatpush1.msra.mxu0 %v94_v11  ;;  %210 = vmatpush1.msra.mxu1 %v96_v12  ;;  %v83_v21 = vld [vmem:[#allocation2 + $0x148] sm:$0xff]  ;;  %v85_v22 = vld [vmem:[#allocation2 + $0x158] sm:$0xff]  ;;  %v82_v23 = vld [vmem:[#allocation2 + $0x140] sm:$0xff]  ;;  %v110_v6 = vsub.s32 0, %v109_v5  ;;  %v118_v7 = vsub.s32 2, %v109_v5  ;;  %v114_v9 = vsub.s32 1, %v109_v5 }
  0x23   :  { %134 = vmatprep.subr.mxu0 %v91_v13  ;;  %211 = vmatprep.subr.mxu1 %v93_v14  ;;  %v84_v24 = vld [vmem:[#allocation2 + $0x150] sm:$0xff]  ;;  %v79_v25 = vld [vmem:[#allocation2 + $0x128] sm:$0xff]  ;;  %v81_v26 = vld [vmem:[#allocation2 + $0x138] sm:$0xff]  ;;  %v122_v10 = vsub.s32 3, %v109_v5 }
  0x24   :  { %135 = vmatpush1.msra.mxu0 %v90_v15  ;;  %212 = vmatpush1.msra.mxu1 %v92_v16  ;;  %v78_v27 = vld [vmem:[#allocation2 + $0x120] sm:$0xff]  ;;  %v80_v28 = vld [vmem:[#allocation2 + $0x130] sm:$0xff]  ;;  %v75_v29 = vld [vmem:[#allocation2 + $0x108] sm:$0xff] }
  0x25   :  { %136 = vmatprep.subr.mxu0 %v87_v17  ;;  %213 = vmatprep.subr.mxu1 %v89_v18  ;;  %v77_v30 = vld [vmem:[#allocation2 + $0x118] sm:$0xff]  ;;  %v74_v31 = vld [vmem:[#allocation2 + $0x100] sm:$0xff]  ;;  %v76_v32 = vld [vmem:[#allocation2 + $0x110] sm:$0xff] }
  0x26   :  { %137 = vmatpush1.msra.mxu0 %v86_v19  ;;  %214 = vmatpush1.msra.mxu1 %v88_v20  ;;  %v71_v33 = vld [vmem:[#allocation2 + $0xe8] sm:$0xff]  ;;  %v73_v34 = vld [vmem:[#allocation2 + $0xf8] sm:$0xff]  ;;  %v70_v35 = vld [vmem:[#allocation2 + $0xe0] sm:$0xff] }
  0x27   :  { %138 = vmatprep.subr.mxu0 %v83_v21  ;;  %215 = vmatprep.subr.mxu1 %v85_v22  ;;  %v72_v36 = vld [vmem:[#allocation2 + $0xf0] sm:$0xff]  ;;  %v67_v37 = vld [vmem:[#allocation2 + $0xc8] sm:$0xff]  ;;  %v69_v38 = vld [vmem:[#allocation2 + $0xd8] sm:$0xff] }
  0x28   :  { %139 = vmatpush1.msra.mxu0 %v82_v23  ;;  %216 = vmatpush1.msra.mxu1 %v84_v24  ;;  %v66_v39 = vld [vmem:[#allocation2 + $0xc0] sm:$0xff]  ;;  %v68_v40 = vld [vmem:[#allocation2 + $0xd0] sm:$0xff]  ;;  %v63_v41 = vld [vmem:[#allocation2 + $0xa8] sm:$0xff] }
  0x29   :  { %140 = vmatprep.subr.mxu0 %v79_v25  ;;  %217 = vmatprep.subr.mxu1 %v81_v26  ;;  %v65_v42 = vld [vmem:[#allocation2 + $0xb8] sm:$0xff]  ;;  %v62_v43 = vld [vmem:[#allocation2 + $0xa0] sm:$0xff]  ;;  %v64_v44 = vld [vmem:[#allocation2 + $0xb0] sm:$0xff] }
  0x2a   :  { %141 = vmatpush1.msra.mxu0 %v78_v27  ;;  %218 = vmatpush1.msra.mxu1 %v80_v28  ;;  %v59_v45 = vld [vmem:[#allocation2 + $0x88] sm:$0xff]  ;;  %v61_v46 = vld [vmem:[#allocation2 + $0x98] sm:$0xff]  ;;  %v58_v47 = vld [vmem:[#allocation2 + $0x80] sm:$0xff] }
  0x2b   :  { %142 = vmatprep.subr.mxu0 %v75_v29  ;;  %219 = vmatprep.subr.mxu1 %v77_v30  ;;  %v60_v48 = vld [vmem:[#allocation2 + $0x90] sm:$0xff]  ;;  %v55_v49 = vld [vmem:[#allocation2 + $0x68] sm:$0xff]  ;;  %v57_v50 = vld [vmem:[#allocation2 + $0x78] sm:$0xff] }
  0x2c   :  { %143 = vmatpush1.msra.mxu0 %v74_v31  ;;  %220 = vmatpush1.msra.mxu1 %v76_v32  ;;  %v54_v51 = vld [vmem:[#allocation2 + $0x60] sm:$0xff]  ;;  %v56_v52 = vld [vmem:[#allocation2 + $0x70] sm:$0xff]  ;;  %v51_v53 = vld [vmem:[#allocation2 + $0x48] sm:$0xff] }
  0x2d   :  { %144 = vmatprep.subr.mxu0 %v71_v33  ;;  %221 = vmatprep.subr.mxu1 %v73_v34  ;;  %v53_v54 = vld [vmem:[#allocation2 + $0x58] sm:$0xff]  ;;  %v50_v55 = vld [vmem:[#allocation2 + $0x40] sm:$0xff]  ;;  %v52_v56 = vld [vmem:[#allocation2 + $0x50] sm:$0xff] }
  0x2e   :  { %145 = vmatpush1.msra.mxu0 %v70_v35  ;;  %222 = vmatpush1.msra.mxu1 %v72_v36  ;;  %v47_v57 = vld [vmem:[#allocation2 + $0x28] sm:$0xff]  ;;  %v49_v58 = vld [vmem:[#allocation2 + $0x38] sm:$0xff]  ;;  %v46_v59 = vld [vmem:[#allocation2 + $0x20] sm:$0xff] }
  0x2f   :  { %146 = vmatprep.subr.mxu0 %v67_v37  ;;  %223 = vmatprep.subr.mxu1 %v69_v38  ;;  %v48_v60 = vld [vmem:[#allocation2 + $0x30] sm:$0xff]  ;;  %v43_v61 = vld [vmem:[#allocation2 + $0x8] sm:$0xff]  ;;  %v45_v62 = vld [vmem:[#allocation2 + $0x18] sm:$0xff] }
  0x30   :  { %147 = vmatpush1.msra.mxu0 %v66_v39  ;;  %224 = vmatpush1.msra.mxu1 %v68_v40  ;;  %v42_v63 = vld [vmem:[#allocation2] sm:$0xff]  ;;  %v44_v1 = vld [vmem:[#allocation2 + $0x10] sm:$0xff]  ;;  %v41_v3 = vld [vmem:[%s410_s0 + $0x8] sm:$0xff] }
  0x31   :  { %148 = vmatprep.subr.mxu0 %v63_v41  ;;  %225 = vmatprep.subr.mxu1 %v65_v42  ;;  %v40_v2 = vld [vmem:[%s410_s0] sm:$0xff] }
  0x32   :  { %149 = vmatpush1.msra.mxu0 %v62_v43  ;;  %226 = vmatpush1.msra.mxu1 %v64_v44  ;;  %v106_v8 = vld [vmem:[#allocation4] sm:$0xf] }
  0x33   :  { %150 = vmatprep.subr.mxu0 %v59_v45  ;;  %227 = vmatprep.subr.mxu1 %v61_v46  ;;  %v111_v11 = vrot.slane %v106_v8, %v110_v6  ;;  %v119_v12 = vrot.slane %v106_v8, %v118_v7  ;;  %v115_v13 = vrot.slane %v106_v8, %v114_v9 }
  0x34   :  { %151 = vmatpush1.msra.mxu0 %v58_v47  ;;  %228 = vmatpush1.msra.mxu1 %v60_v48  ;;  %v123_v14 = vrot.slane %v106_v8, %v122_v10 }
  0x35   :  { %152 = vmatprep.subr.mxu0 %v55_v49  ;;  %229 = vmatprep.subr.mxu1 %v57_v50 }
  0x36   :  { %153 = vmatpush1.msra.mxu0 %v54_v51  ;;  %230 = vmatpush1.msra.mxu1 %v56_v52 }
  0x37   :  { %154 = vmatprep.subr.mxu0 %v51_v53  ;;  %231 = vmatprep.subr.mxu1 %v53_v54 }
  0x38   :  { %155 = vmatpush1.msra.mxu0 %v50_v55  ;;  %232 = vmatpush1.msra.mxu1 %v52_v56 }
  0x39   :  { %156 = vmatprep.subr.mxu0 %v47_v57  ;;  %233 = vmatprep.subr.mxu1 %v49_v58 }
  0x3a   :  { %157 = vmatpush1.msra.mxu0 %v46_v59  ;;  %234 = vmatpush1.msra.mxu1 %v48_v60 }
  0x3b   :  { %158 = vmatprep.subr.mxu0 %v43_v61  ;;  %235 = vmatprep.subr.mxu1 %v45_v62 }
  0x3c   :  { %159 = vmatpush1.msra.mxu0 %v42_v63  ;;  %236 = vmatpush1.msra.mxu1 %v44_v1 }
  0x3d   :  { %193 = vmatmul.mubr.f32.vlgmr.msra.gmra.mxu0 %v40_v2  ;;  %270 = vmatmul.mubr.f32.vlgmr.msra.gmra.mxu1 %v40_v2 }
  0x3e   :  { %198 = vmatprep.mubr.f32.mxu0 %v349_v0  ;;  %275 = vmatprep.mubr.f32.mxu1 %v349_v0 }
  0x41   :  { %199 = vmatmul.mubr.f32.gmra.mxu0 %v41_v3  ;;  %276 = vmatmul.mubr.f32.gmra.mxu1 %v41_v3 }
  0xfd   :  { %v194_v15 = vpop.f32.mrf.mxu0  ;;  %v271_v16 = vpop.f32.mrf.mxu1 }
  0xfe   :  { %v195_v0 = vadd.f32 %v194_v15, %v111_v11  ;;  %v272_v17 = vadd.f32 %v271_v16, %v119_v12 }
  0xff   :  { %v196_v18 = vpop.f32.mrf.mxu0  ;;  %v273_v19 = vpop.f32.mrf.mxu1 }
 0x100   :  { %282 = vst [vmem:[%s413_s3] sm:$0xff] %v195_v0  ;;  %284 = vst [vmem:[%s413_s3 + $0x10] sm:$0xff] %v272_v17  ;;  %v197_v20 = vadd.f32 %v196_v18, %v115_v13  ;;  %v274_v21 = vadd.f32 %v273_v19, %v123_v14 }
 0x101   :  { %v200_v22 = vpop.f32.mrf.mxu0  ;;  %v277_v23 = vpop.f32.mrf.mxu1 }
 0x102   :  { %283 = vst [vmem:[%s413_s3 + $0x8] sm:$0xff] %v197_v20  ;;  %285 = vst [vmem:[%s413_s3 + $0x18] sm:$0xff] %v274_v21  ;;  %v201_v24 = vadd.f32 %v200_v22, %v111_v11  ;;  %v278_v25 = vadd.f32 %v277_v23, %v119_v12 }
 0x103   :  { %v202_v26 = vpop.f32.mrf.mxu0  ;;  %v279_v27 = vpop.f32.mrf.mxu1 }
 0x104   :  { %286 = vst [vmem:[%s413_s3 + $0x20] sm:$0xff] %v201_v24  ;;  %288 = vst [vmem:[%s413_s3 + $0x30] sm:$0xff] %v278_v25  ;;  %v203_v28 = vadd.f32 %v202_v26, %v115_v13  ;;  %v280_v29 = vadd.f32 %v279_v27, %v123_v14 }
 0x106   :  { %287 = vst [vmem:[%s413_s3 + $0x28] sm:$0xff] %v203_v28  ;;  %289 = vst [vmem:[%s413_s3 + $0x38] sm:$0xff] %v280_v29 }
 0x107   :  { %294 = vsyncpa [#allocation3], 1 }
 0x108   :  { %295 = vsyncpa [#allocation5], 1 }

// kernel: dtis_forward.18
= control target key start
LH: loop header
LB: loop body
LE: loop exit
PB: predicated region body
PF: predicated region fallthrough
CT: control target
= control target key end

     0   :  { %s571_s1 = inlined_call_operand.vmem [shape: f32[512,128], index: 1, kind: input, shape index: {}]   ;;  %s572_s0 = inlined_call_operand.vmem [shape: f32[16,512], index: 0, kind: input, shape index: {}]   ;;  %s573_s2 = inlined_call_operand.vmem [shape: f32[1,128], index: 2, kind: input, shape index: {}]   ;;  %s574_s3 = inlined_call_operand.vmem [shape: f32[16,128], index: 3, kind: output, shape index: {}]  }
   0x1   :  { %v53_v0 = vld [vmem:[%s571_s1 + $0xf8] sm:$0xff]  ;;  %v52_v4 = vld [vmem:[%s571_s1 + $0xf0] sm:$0xff]  ;;  %v51_v8 = vld [vmem:[%s571_s1 + $0xe8] sm:$0xff] }
   0x2   :  { %v85_v1 = vld [vmem:[%s571_s1 + $0x1f8] sm:$0xff]  ;;  %250 = vmatprep.subr.mxu0 %v53_v0  ;;  %v84_v5 = vld [vmem:[%s571_s1 + $0x1f0] sm:$0xff]  ;;  %v83_v9 = vld [vmem:[%s571_s1 + $0x1e8] sm:$0xff] }
   0x3   :  { %v37_v2 = vld [vmem:[%s571_s1 + $0x78] sm:$0xff]  ;;  %288 = vmatprep.subr.mxu1 %v85_v1  ;;  %v36_v6 = vld [vmem:[%s571_s1 + $0x70] sm:$0xff]  ;;  %v35_v10 = vld [vmem:[%s571_s1 + $0x68] sm:$0xff] }
   0x4   :  { %v69_v3 = vld [vmem:[%s571_s1 + $0x178] sm:$0xff]  ;;  %251 = vmatpush3.msra.mxu0 %v37_v2  ;;  %v68_v7 = vld [vmem:[%s571_s1 + $0x170] sm:$0xff]  ;;  %v67_v11 = vld [vmem:[%s571_s1 + $0x168] sm:$0xff] }
   0x5   :  { %289 = vmatpush3.msra.mxu1 %v69_v3  ;;  %252 = vmatprep.subr.mxu0 %v52_v4  ;;  %v50_v12 = vld [vmem:[%s571_s1 + $0xe0] sm:$0xff]  ;;  %v49_v16 = vld [vmem:[%s571_s1 + $0xd8] sm:$0xff]  ;;  %v48_v20 = vld [vmem:[%s571_s1 + $0xd0] sm:$0xff] }
   0x6   :  { %290 = vmatprep.subr.mxu1 %v84_v5  ;;  %253 = vmatpush3.msra.mxu0 %v36_v6  ;;  %v82_v13 = vld [vmem:[%s571_s1 + $0x1e0] sm:$0xff]  ;;  %v81_v17 = vld [vmem:[%s571_s1 + $0x1d8] sm:$0xff]  ;;  %v80_v21 = vld [vmem:[%s571_s1 + $0x1d0] sm:$0xff] }
   0x7   :  { %291 = vmatpush3.msra.mxu1 %v68_v7  ;;  %254 = vmatprep.subr.mxu0 %v51_v8  ;;  %v34_v14 = vld [vmem:[%s571_s1 + $0x60] sm:$0xff]  ;;  %v33_v18 = vld [vmem:[%s571_s1 + $0x58] sm:$0xff]  ;;  %v32_v22 = vld [vmem:[%s571_s1 + $0x50] sm:$0xff] }
   0x8   :  { %292 = vmatprep.subr.mxu1 %v83_v9  ;;  %v66_v15 = vld [vmem:[%s571_s1 + $0x160] sm:$0xff]  ;;  %255 = vmatpush3.msra.mxu0 %v35_v10  ;;  %v65_v19 = vld [vmem:[%s571_s1 + $0x158] sm:$0xff]  ;;  %v64_v23 = vld [vmem:[%s571_s1 + $0x150] sm:$0xff] }
   0x9   :  { %293 = vmatpush3.msra.mxu1 %v67_v11  ;;  %256 = vmatprep.subr.mxu0 %v50_v12  ;;  %v47_v24 = vld [vmem:[%s571_s1 + $0xc8] sm:$0xff]  ;;  %v46_v28 = vld [vmem:[%s571_s1 + $0xc0] sm:$0xff]  ;;  %v45_v32 = vld [vmem:[%s571_s1 + $0xb8] sm:$0xff] }
   0xa   :  { %294 = vmatprep.subr.mxu1 %v82_v13  ;;  %257 = vmatpush3.msra.mxu0 %v34_v14  ;;  %v79_v25 = vld [vmem:[%s571_s1 + $0x1c8] sm:$0xff]  ;;  %v78_v29 = vld [vmem:[%s571_s1 + $0x1c0] sm:$0xff]  ;;  %v77_v33 = vld [vmem:[%s571_s1 + $0x1b8] sm:$0xff] }
   0xb   :  { %295 = vmatpush3.msra.mxu1 %v66_v15  ;;  %258 = vmatprep.subr.mxu0 %v49_v16  ;;  %v31_v26 = vld [vmem:[%s571_s1 + $0x48] sm:$0xff]  ;;  %v30_v30 = vld [vmem:[%s571_s1 + $0x40] sm:$0xff]  ;;  %v29_v34 = vld [vmem:[%s571_s1 + $0x38] sm:$0xff] }
   0xc   :  { %296 = vmatprep.subr.mxu1 %v81_v17  ;;  %259 = vmatpush3.msra.mxu0 %v33_v18  ;;  %v63_v27 = vld [vmem:[%s571_s1 + $0x148] sm:$0xff]  ;;  %v62_v31 = vld [vmem:[%s571_s1 + $0x140] sm:$0xff]  ;;  %v61_v35 = vld [vmem:[%s571_s1 + $0x138] sm:$0xff] }
   0xd   :  { %297 = vmatpush3.msra.mxu1 %v65_v19  ;;  %260 = vmatprep.subr.mxu0 %v48_v20  ;;  %v44_v36 = vld [vmem:[%s571_s1 + $0xb0] sm:$0xff]  ;;  %v43_v40 = vld [vmem:[%s571_s1 + $0xa8] sm:$0xff]  ;;  %v42_v44 = vld [vmem:[%s571_s1 + $0xa0] sm:$0xff] }
   0xe   :  { %298 = vmatprep.subr.mxu1 %v80_v21  ;;  %261 = vmatpush3.msra.mxu0 %v32_v22  ;;  %v76_v37 = vld [vmem:[%s571_s1 + $0x1b0] sm:$0xff]  ;;  %v75_v41 = vld [vmem:[%s571_s1 + $0x1a8] sm:$0xff]  ;;  %v74_v45 = vld [vmem:[%s571_s1 + $0x1a0] sm:$0xff] }
   0xf   :  { %299 = vmatpush3.msra.mxu1 %v64_v23  ;;  %262 = vmatprep.subr.mxu0 %v47_v24  ;;  %v28_v38 = vld [vmem:[%s571_s1 + $0x30] sm:$0xff]  ;;  %v27_v42 = vld [vmem:[%s571_s1 + $0x28] sm:$0xff]  ;;  %v26_v46 = vld [vmem:[%s571_s1 + $0x20] sm:$0xff] }
  0x10   :  { %300 = vmatprep.subr.mxu1 %v79_v25  ;;  %263 = vmatpush3.msra.mxu0 %v31_v26  ;;  %v60_v39 = vld [vmem:[%s571_s1 + $0x130] sm:$0xff]  ;;  %v59_v43 = vld [vmem:[%s571_s1 + $0x128] sm:$0xff]  ;;  %v58_v47 = vld [vmem:[%s571_s1 + $0x120] sm:$0xff] }
  0x11   :  { %301 = vmatpush3.msra.mxu1 %v63_v27  ;;  %264 = vmatprep.subr.mxu0 %v46_v28  ;;  %v41_v48 = vld [vmem:[%s571_s1 + $0x98] sm:$0xff]  ;;  %v40_v52 = vld [vmem:[%s571_s1 + $0x90] sm:$0xff]  ;;  %v39_v56 = vld [vmem:[%s571_s1 + $0x88] sm:$0xff] }
  0x12   :  { %302 = vmatprep.subr.mxu1 %v78_v29  ;;  %265 = vmatpush3.msra.mxu0 %v30_v30  ;;  %v73_v49 = vld [vmem:[%s571_s1 + $0x198] sm:$0xff]  ;;  %v72_v53 = vld [vmem:[%s571_s1 + $0x190] sm:$0xff]  ;;  %v71_v57 = vld [vmem:[%s571_s1 + $0x188] sm:$0xff] }
  0x13   :  { %303 = vmatpush3.msra.mxu1 %v62_v31  ;;  %266 = vmatprep.subr.mxu0 %v45_v32  ;;  %v25_v50 = vld [vmem:[%s571_s1 + $0x18] sm:$0xff]  ;;  %v24_v54 = vld [vmem:[%s571_s1 + $0x10] sm:$0xff]  ;;  %v23_v58 = vld [vmem:[%s571_s1 + $0x8] sm:$0xff] }
  0x14   :  { %304 = vmatprep.subr.mxu1 %v77_v33  ;;  %267 = vmatpush3.msra.mxu0 %v29_v34  ;;  %v57_v51 = vld [vmem:[%s571_s1 + $0x118] sm:$0xff]  ;;  %v56_v55 = vld [vmem:[%s571_s1 + $0x110] sm:$0xff]  ;;  %v55_v59 = vld [vmem:[%s571_s1 + $0x108] sm:$0xff] }
  0x15   :  { %305 = vmatpush3.msra.mxu1 %v61_v35  ;;  %268 = vmatprep.subr.mxu0 %v44_v36  ;;  %v38_v60 = vld [vmem:[%s571_s1 + $0x80] sm:$0xff]  ;;  %v15_v63 = vld [vmem:[%s572_s0 + $0x8] sm:$0xff]  ;;  %v17_v1 = vld [vmem:[%s572_s0 + $0x18] sm:$0xff] }
  0x16   :  { %306 = vmatprep.subr.mxu1 %v76_v37  ;;  %269 = vmatpush3.msra.mxu0 %v28_v38  ;;  %v70_v61 = vld [vmem:[%s571_s1 + $0x180] sm:$0xff]  ;;  %v16_v3 = vld [vmem:[%s572_s0 + $0x10] sm:$0xff]  ;;  %v19_v4 = vld [vmem:[%s572_s0 + $0x28] sm:$0xff] }
  0x17   :  { %307 = vmatpush3.msra.mxu1 %v60_v39  ;;  %270 = vmatprep.subr.mxu0 %v43_v40  ;;  %v22_v62 = vld [vmem:[%s571_s1] sm:$0xff]  ;;  %v21_v5 = vld [vmem:[%s572_s0 + $0x38] sm:$0xff]  ;;  %v20_v7 = vld [vmem:[%s572_s0 + $0x30] sm:$0xff] }
  0x18   :  { %308 = vmatprep.subr.mxu1 %v75_v41  ;;  %271 = vmatpush3.msra.mxu0 %v27_v42  ;;  %v54_v0 = vld [vmem:[%s571_s1 + $0x100] sm:$0xff] }
  0x19   :  { %309 = vmatpush3.msra.mxu1 %v59_v43  ;;  %272 = vmatprep.subr.mxu0 %v42_v44  ;;  %v14_v2 = vld [vmem:[%s572_s0] sm:$0xff] }
  0x1a   :  { %310 = vmatprep.subr.mxu1 %v74_v45  ;;  %273 = vmatpush3.msra.mxu0 %v26_v46  ;;  %v18_v6 = vld [vmem:[%s572_s0 + $0x20] sm:$0xff] }
  0x1b   :  { %311 = vmatpush3.msra.mxu1 %v58_v47  ;;  %274 = vmatprep.subr.mxu0 %v41_v48  ;;  %v249_v10 = vld [vmem:[%s573_s2] ss:$0 sm:$0xff] }
  0x1c   :  { %312 = vmatprep.subr.mxu1 %v73_v49  ;;  %275 = vmatpush3.msra.mxu0 %v25_v50 }
  0x1d   :  { %313 = vmatpush3.msra.mxu1 %v57_v51  ;;  %276 = vmatprep.subr.mxu0 %v40_v52 }
  0x1e   :  { %314 = vmatprep.subr.mxu1 %v72_v53  ;;  %277 = vmatpush3.msra.mxu0 %v24_v54 }
  0x1f   :  { %315 = vmatpush3.msra.mxu1 %v56_v55  ;;  %278 = vmatprep.subr.mxu0 %v39_v56 }
  0x20   :  { %316 = vmatprep.subr.mxu1 %v71_v57  ;;  %279 = vmatpush3.msra.mxu0 %v23_v58 }
  0x21   :  { %317 = vmatpush3.msra.mxu1 %v55_v59  ;;  %280 = vmatprep.subr.mxu0 %v38_v60 }
  0x22   :  { %318 = vmatprep.subr.mxu1 %v70_v61  ;;  %281 = vmatpush3.msra.mxu0 %v22_v62 }
  0x23   :  { %157 = vmatprep.mubr.f32.mxu0 %v15_v63  ;;  %319 = vmatpush3.msra.mxu1 %v54_v0 }
  0x24   :  { %232 = vmatprep.mubr.f32.mxu1 %v17_v1  ;;  %158 = vmatmul.mubr.f32.vlgmr.msra.gmra.mxu0 %v14_v2 }
  0x25   :  { %233 = vmatmul.mubr.f32.vlgmr.msra.gmra.mxu1 %v16_v3  ;;  %162 = vmatprep.mubr.f32.mxu0 %v19_v4 }
  0x26   :  { %237 = vmatprep.mubr.f32.mxu1 %v21_v5 }
  0x28   :  { %163 = vmatmul.mubr.f32.gmra.mxu0 %v18_v6 }
  0x29   :  { %238 = vmatmul.mubr.f32.gmra.mxu1 %v20_v7 }
  0xe4   :  { %v282_v8 = vpop.f32.mrf.mxu0 }
  0xe5   :  { %v320_v9 = vpop.f32.mrf.mxu1 }
  0xe6   :  { %v283_v11 = vpop.f32.mrf.mxu0 }
  0xe7   :  { %v321_v12 = vpop.f32.mrf.mxu1  ;;  %v284_v13 = vadd.f32 %v283_v11, %v282_v8 }
  0xe8   :  { %v285_v14 = vpop.f32.mrf.mxu0  ;;  %v322_v17 = vadd.f32 %v321_v12, %v320_v9 }
  0xe9   :  { %v323_v15 = vpop.f32.mrf.mxu1  ;;  %v160_v16 = vadd.f32 %v284_v13, %v249_v10 }
  0xea   :  { %v286_v18 = vpop.f32.mrf.mxu0 }
  0xeb   :  { %v324_v19 = vpop.f32.mrf.mxu1  ;;  %v235_v20 = vadd.f32 %v322_v17, %v160_v16  ;;  %v287_v21 = vadd.f32 %v286_v18, %v285_v14 }
  0xec   :  { %v325_v23 = vadd.f32 %v324_v19, %v323_v15 }
  0xed   :  { %243 = vst [vmem:[%s574_s3] sm:$0xff] %v235_v20  ;;  %v165_v22 = vadd.f32 %v287_v21, %v249_v10 }
  0xef   :  { %v240_v24 = vadd.f32 %v325_v23, %v165_v22 }
  0xf1   :  { %244 = vst [vmem:[%s574_s3 + $0x8] sm:$0xff] %v240_v24 }

// kernel: dtis_forward.17
= control target key start
LH: loop header
LB: loop body
LE: loop exit
PB: predicated region body
PF: predicated region fallthrough
CT: control target
= control target key end

     0   :  { %8 = vsyncpa [#allocation3], 0  ;;  %s1134_s0 = inlined_call_operand.vmem [shape: f32[16,512], index: 0, kind: input, shape index: {}]   ;;  %s1135_s1 = inlined_call_operand.hbm [shape: f32[512,768], index: 1, kind: input, shape index: {}]   ;;  %s1136_s2 = inlined_call_operand.hbm [shape: f32[1,768], index: 2, kind: input, shape index: {}]   ;;  %s1137_s3 = inlined_call_operand.vmem [shape: f32[16,768], index: 3, kind: output, shape index: {}]  }
   0x1   :  { %9 = vsyncpa [#allocation5], 0  ;;  %s996_s12 = smov [#allocation2]  }
   0x2   :  { %s17_s13 = sshll.u32 %s996_s12, 4  ;;  %s18_s13 = int_to_ptr.vmem [resolvable:$true] %s17_s13 }
   0x3   :  { %s960_s14 = scalar_lea.vmem %s18_s13, 49152  ;;  %p965_p1 = scmp.lt.s32.totalorder %s18_s13, %s18_s13 }
   0x4   :  { %p961_p0 = scmp.ne.s32.totalorder %s18_s13, %s960_s14  ;;  %p966_p2 = scmp.lt.s32.totalorder %s960_s14, %s960_s14 }
   0x6   :  { %p967_p3 = por %p966_p2, %p965_p1 }
   0x8   :  { %p968_p4 = pnand %p967_p3, %p961_p0 }
   0xa   :  { %971 = shalt.err (!%p968_p4)
}
   0xb   :  { %s997_s15 = smov 768   ;;  %s998_s16 = smov 48  }
   0xc   :  { %23 = dma.hbm_to_vmem [thread:$0]  %s1135_s1, 49152, %s18_s13, [#allocation3], %s997_s15, %s997_s15, %s998_s16  }
   0xd   :  { %s999_s19 = smov [#allocation4]  }
   0xe   :  { %s30_s20 = sshll.u32 %s999_s19, 4  ;;  %s31_s20 = int_to_ptr.vmem [resolvable:$true] %s30_s20 }
   0xf   :  { %s980_s21 = scalar_lea.vmem %s31_s20, 96  ;;  %p985_p6 = scmp.lt.s32.totalorder %s31_s20, %s31_s20 }
  0x10   :  { %p981_p5 = scmp.ne.s32.totalorder %s31_s20, %s980_s21  ;;  %p986_p7 = scmp.lt.s32.totalorder %s980_s21, %s980_s21 }
  0x12   :  { %p987_p8 = por %p986_p7, %p985_p6 }
  0x14   :  { %p988_p9 = pnand %p987_p8, %p981_p5 }
  0x16   :  { %991 = shalt.err (!%p988_p9)
}
  0x17   :  { %33 = dma.hbm_to_vmem [thread:$0]  %s1136_s2, 96, %s31_s20, [#allocation5]  }
  0x18   :  { %992 = dma.done.wait [#allocation3], 49152  }
  0x19   :  { %993 = vsyncadd [#allocation3], 4294918144 }
  0x1a   :  { %994 = dma.done.wait [#allocation5], 96  }
  0x1b   :  { %995 = vsyncadd [#allocation5], 4294967200  ;;  %v139_v0 = vld [vmem:[#allocation2 + $0x2d8] sm:$0xff]  ;;  %v138_v2 = vld [vmem:[#allocation2 + $0x2d0] sm:$0xff] }
  0x1c   :  { %v331_v1 = vld [vmem:[#allocation2 + $0x8d8] sm:$0xff]  ;;  %464 = vmatprep.subr.mxu0 %v139_v0  ;;  %v330_v3 = vld [vmem:[#allocation2 + $0x8d0] sm:$0xff]  ;;  %v133_v4 = vld [vmem:[#allocation2 + $0x2a8] sm:$0xff] }
  0x1d   :  { %541 = vmatprep.subr.mxu1 %v331_v1  ;;  %v325_v5 = vld [vmem:[#allocation2 + $0x8a8] sm:$0xff]  ;;  %465 = vmatpush1.msra.mxu0 %v138_v2  ;;  %v132_v6 = vld [vmem:[#allocation2 + $0x2a0] sm:$0xff]  ;;  %v127_v8 = vld [vmem:[#allocation2 + $0x278] sm:$0xff] }
  0x1e   :  { %542 = vmatpush1.msra.mxu1 %v330_v3  ;;  %v324_v7 = vld [vmem:[#allocation2 + $0x8a0] sm:$0xff]  ;;  %466 = vmatprep.subr.mxu0 %v133_v4  ;;  %v319_v9 = vld [vmem:[#allocation2 + $0x878] sm:$0xff]  ;;  %v126_v10 = vld [vmem:[#allocation2 + $0x270] sm:$0xff] }
  0x1f   :  { %543 = vmatprep.subr.mxu1 %v325_v5  ;;  %v318_v11 = vld [vmem:[#allocation2 + $0x870] sm:$0xff]  ;;  %467 = vmatpush1.msra.mxu0 %v132_v6  ;;  %v121_v12 = vld [vmem:[#allocation2 + $0x248] sm:$0xff]  ;;  %v120_v14 = vld [vmem:[#allocation2 + $0x240] sm:$0xff] }
  0x20   :  { %544 = vmatpush1.msra.mxu1 %v324_v7  ;;  %v313_v13 = vld [vmem:[#allocation2 + $0x848] sm:$0xff]  ;;  %468 = vmatprep.subr.mxu0 %v127_v8  ;;  %v312_v15 = vld [vmem:[#allocation2 + $0x840] sm:$0xff]  ;;  %v115_v16 = vld [vmem:[#allocation2 + $0x218] sm:$0xff] }
  0x21   :  { %545 = vmatprep.subr.mxu1 %v319_v9  ;;  %469 = vmatpush1.msra.mxu0 %v126_v10  ;;  %v307_v17 = vld [vmem:[#allocation2 + $0x818] sm:$0xff]  ;;  %v114_v18 = vld [vmem:[#allocation2 + $0x210] sm:$0xff]  ;;  %v109_v20 = vld [vmem:[#allocation2 + $0x1e8] sm:$0xff] }
  0x22   :  { %546 = vmatpush1.msra.mxu1 %v318_v11  ;;  %470 = vmatprep.subr.mxu0 %v121_v12  ;;  %v306_v19 = vld [vmem:[#allocation2 + $0x810] sm:$0xff]  ;;  %v301_v21 = vld [vmem:[#allocation2 + $0x7e8] sm:$0xff]  ;;  %v108_v22 = vld [vmem:[#allocation2 + $0x1e0] sm:$0xff] }
  0x23   :  { %547 = vmatprep.subr.mxu1 %v313_v13  ;;  %471 = vmatpush1.msra.mxu0 %v120_v14  ;;  %v300_v23 = vld [vmem:[#allocation2 + $0x7e0] sm:$0xff]  ;;  %v103_v24 = vld [vmem:[#allocation2 + $0x1b8] sm:$0xff]  ;;  %v102_v26 = vld [vmem:[#allocation2 + $0x1b0] sm:$0xff] }
  0x24   :  { %548 = vmatpush1.msra.mxu1 %v312_v15  ;;  %472 = vmatprep.subr.mxu0 %v115_v16  ;;  %v295_v25 = vld [vmem:[#allocation2 + $0x7b8] sm:$0xff]  ;;  %v294_v27 = vld [vmem:[#allocation2 + $0x7b0] sm:$0xff]  ;;  %v97_v28 = vld [vmem:[#allocation2 + $0x188] sm:$0xff] }
  0x25   :  { %549 = vmatprep.subr.mxu1 %v307_v17  ;;  %473 = vmatpush1.msra.mxu0 %v114_v18  ;;  %v289_v29 = vld [vmem:[#allocation2 + $0x788] sm:$0xff]  ;;  %v96_v30 = vld [vmem:[#allocation2 + $0x180] sm:$0xff]  ;;  %v91_v32 = vld [vmem:[#allocation2 + $0x158] sm:$0xff] }
  0x26   :  { %550 = vmatpush1.msra.mxu1 %v306_v19  ;;  %474 = vmatprep.subr.mxu0 %v109_v20  ;;  %v288_v31 = vld [vmem:[#allocation2 + $0x780] sm:$0xff]  ;;  %v283_v33 = vld [vmem:[#allocation2 + $0x758] sm:$0xff]  ;;  %v90_v34 = vld [vmem:[#allocation2 + $0x150] sm:$0xff] }
  0x27   :  { %551 = vmatprep.subr.mxu1 %v301_v21  ;;  %475 = vmatpush1.msra.mxu0 %v108_v22  ;;  %v282_v35 = vld [vmem:[#allocation2 + $0x750] sm:$0xff]  ;;  %v85_v36 = vld [vmem:[#allocation2 + $0x128] sm:$0xff]  ;;  %v84_v38 = vld [vmem:[#allocation2 + $0x120] sm:$0xff] }
  0x28   :  { %552 = vmatpush1.msra.mxu1 %v300_v23  ;;  %476 = vmatprep.subr.mxu0 %v103_v24  ;;  %v277_v37 = vld [vmem:[#allocation2 + $0x728] sm:$0xff]  ;;  %v276_v39 = vld [vmem:[#allocation2 + $0x720] sm:$0xff]  ;;  %v79_v40 = vld [vmem:[#allocation2 + $0xf8] sm:$0xff] }
  0x29   :  { %553 = vmatprep.subr.mxu1 %v295_v25  ;;  %477 = vmatpush1.msra.mxu0 %v102_v26  ;;  %v271_v41 = vld [vmem:[#allocation2 + $0x6f8] sm:$0xff]  ;;  %v78_v42 = vld [vmem:[#allocation2 + $0xf0] sm:$0xff]  ;;  %v73_v44 = vld [vmem:[#allocation2 + $0xc8] sm:$0xff] }
  0x2a   :  { %554 = vmatpush1.msra.mxu1 %v294_v27  ;;  %478 = vmatprep.subr.mxu0 %v97_v28  ;;  %v270_v43 = vld [vmem:[#allocation2 + $0x6f0] sm:$0xff]  ;;  %v265_v45 = vld [vmem:[#allocation2 + $0x6c8] sm:$0xff]  ;;  %v72_v46 = vld [vmem:[#allocation2 + $0xc0] sm:$0xff] }
  0x2b   :  { %555 = vmatprep.subr.mxu1 %v289_v29  ;;  %479 = vmatpush1.msra.mxu0 %v96_v30  ;;  %v264_v47 = vld [vmem:[#allocation2 + $0x6c0] sm:$0xff]  ;;  %v67_v48 = vld [vmem:[#allocation2 + $0x98] sm:$0xff]  ;;  %v66_v50 = vld [vmem:[#allocation2 + $0x90] sm:$0xff] }
  0x2c   :  { %556 = vmatpush1.msra.mxu1 %v288_v31  ;;  %480 = vmatprep.subr.mxu0 %v91_v32  ;;  %v259_v49 = vld [vmem:[#allocation2 + $0x698] sm:$0xff]  ;;  %v258_v51 = vld [vmem:[#allocation2 + $0x690] sm:$0xff]  ;;  %v61_v52 = vld [vmem:[#allocation2 + $0x68] sm:$0xff] }
  0x2d   :  { %557 = vmatprep.subr.mxu1 %v283_v33  ;;  %481 = vmatpush1.msra.mxu0 %v90_v34  ;;  %v253_v53 = vld [vmem:[#allocation2 + $0x668] sm:$0xff]  ;;  %v60_v54 = vld [vmem:[#allocation2 + $0x60] sm:$0xff]  ;;  %v55_v56 = vld [vmem:[#allocation2 + $0x38] sm:$0xff] }
  0x2e   :  { %558 = vmatpush1.msra.mxu1 %v282_v35  ;;  %482 = vmatprep.subr.mxu0 %v85_v36  ;;  %v252_v55 = vld [vmem:[#allocation2 + $0x660] sm:$0xff]  ;;  %v247_v57 = vld [vmem:[#allocation2 + $0x638] sm:$0xff]  ;;  %v54_v58 = vld [vmem:[#allocation2 + $0x30] sm:$0xff] }
  0x2f   :  { %559 = vmatprep.subr.mxu1 %v277_v37  ;;  %483 = vmatpush1.msra.mxu0 %v84_v38  ;;  %v246_v59 = vld [vmem:[#allocation2 + $0x630] sm:$0xff]  ;;  %v49_v60 = vld [vmem:[#allocation2 + $0x8] sm:$0xff]  ;;  %v48_v62 = vld [vmem:[#allocation2] sm:$0xff] }
  0x30   :  { %560 = vmatpush1.msra.mxu1 %v276_v39  ;;  %484 = vmatprep.subr.mxu0 %v79_v40  ;;  %v241_v61 = vld [vmem:[#allocation2 + $0x608] sm:$0xff]  ;;  %v240_v63 = vld [vmem:[#allocation2 + $0x600] sm:$0xff]  ;;  %v235_v0 = vld [vmem:[#allocation2 + $0x5d8] sm:$0xff] }
  0x31   :  { %561 = vmatprep.subr.mxu1 %v271_v41  ;;  %485 = vmatpush1.msra.mxu0 %v78_v42  ;;  %v427_v1 = vld [vmem:[#allocation2 + $0xbd8] sm:$0xff]  ;;  %v234_v2 = vld [vmem:[#allocation2 + $0x5d0] sm:$0xff]  ;;  %v229_v4 = vld [vmem:[#allocation2 + $0x5a8] sm:$0xff] }
  0x32   :  { %562 = vmatpush1.msra.mxu1 %v270_v43  ;;  %486 = vmatprep.subr.mxu0 %v73_v44  ;;  %v426_v3 = vld [vmem:[#allocation2 + $0xbd0] sm:$0xff]  ;;  %v421_v5 = vld [vmem:[#allocation2 + $0xba8] sm:$0xff]  ;;  %v228_v6 = vld [vmem:[#allocation2 + $0x5a0] sm:$0xff] }
  0x33   :  { %563 = vmatprep.subr.mxu1 %v265_v45  ;;  %487 = vmatpush1.msra.mxu0 %v72_v46  ;;  %v420_v7 = vld [vmem:[#allocation2 + $0xba0] sm:$0xff]  ;;  %v223_v8 = vld [vmem:[#allocation2 + $0x578] sm:$0xff]  ;;  %v222_v10 = vld [vmem:[#allocation2 + $0x570] sm:$0xff] }
  0x34   :  { %564 = vmatpush1.msra.mxu1 %v264_v47  ;;  %488 = vmatprep.subr.mxu0 %v67_v48  ;;  %v415_v9 = vld [vmem:[#allocation2 + $0xb78] sm:$0xff]  ;;  %v414_v11 = vld [vmem:[#allocation2 + $0xb70] sm:$0xff]  ;;  %v217_v12 = vld [vmem:[#allocation2 + $0x548] sm:$0xff] }
  0x35   :  { %565 = vmatprep.subr.mxu1 %v259_v49  ;;  %489 = vmatpush1.msra.mxu0 %v66_v50  ;;  %v409_v13 = vld [vmem:[#allocation2 + $0xb48] sm:$0xff]  ;;  %v216_v14 = vld [vmem:[#allocation2 + $0x540] sm:$0xff]  ;;  %v211_v16 = vld [vmem:[#allocation2 + $0x518] sm:$0xff] }
  0x36   :  { %566 = vmatpush1.msra.mxu1 %v258_v51  ;;  %490 = vmatprep.subr.mxu0 %v61_v52  ;;  %v408_v15 = vld [vmem:[#allocation2 + $0xb40] sm:$0xff]  ;;  %v403_v17 = vld [vmem:[#allocation2 + $0xb18] sm:$0xff]  ;;  %v210_v18 = vld [vmem:[#allocation2 + $0x510] sm:$0xff] }
  0x37   :  { %567 = vmatprep.subr.mxu1 %v253_v53  ;;  %491 = vmatpush1.msra.mxu0 %v60_v54  ;;  %v402_v19 = vld [vmem:[#allocation2 + $0xb10] sm:$0xff]  ;;  %v205_v20 = vld [vmem:[#allocation2 + $0x4e8] sm:$0xff]  ;;  %v204_v22 = vld [vmem:[#allocation2 + $0x4e0] sm:$0xff] }
  0x38   :  { %568 = vmatpush1.msra.mxu1 %v252_v55  ;;  %492 = vmatprep.subr.mxu0 %v55_v56  ;;  %v397_v21 = vld [vmem:[#allocation2 + $0xae8] sm:$0xff]  ;;  %v396_v23 = vld [vmem:[#allocation2 + $0xae0] sm:$0xff]  ;;  %v199_v24 = vld [vmem:[#allocation2 + $0x4b8] sm:$0xff] }
  0x39   :  { %569 = vmatprep.subr.mxu1 %v247_v57  ;;  %493 = vmatpush1.msra.mxu0 %v54_v58  ;;  %v391_v25 = vld [vmem:[#allocation2 + $0xab8] sm:$0xff]  ;;  %v198_v26 = vld [vmem:[#allocation2 + $0x4b0] sm:$0xff]  ;;  %v193_v28 = vld [vmem:[#allocation2 + $0x488] sm:$0xff] }
  0x3a   :  { %570 = vmatpush1.msra.mxu1 %v246_v59  ;;  %494 = vmatprep.subr.mxu0 %v49_v60  ;;  %v390_v27 = vld [vmem:[#allocation2 + $0xab0] sm:$0xff]  ;;  %v385_v29 = vld [vmem:[#allocation2 + $0xa88] sm:$0xff]  ;;  %v192_v30 = vld [vmem:[#allocation2 + $0x480] sm:$0xff] }
  0x3b   :  { %571 = vmatprep.subr.mxu1 %v241_v61  ;;  %495 = vmatpush1.msra.mxu0 %v48_v62  ;;  %v384_v31 = vld [vmem:[#allocation2 + $0xa80] sm:$0xff]  ;;  %v187_v32 = vld [vmem:[#allocation2 + $0x458] sm:$0xff]  ;;  %v186_v34 = vld [vmem:[#allocation2 + $0x450] sm:$0xff] }
  0x3c   :  { %572 = vmatpush1.msra.mxu1 %v240_v63  ;;  %496 = vmatprep.subr.mxu0 %v235_v0  ;;  %v379_v33 = vld [vmem:[#allocation2 + $0xa58] sm:$0xff]  ;;  %v378_v35 = vld [vmem:[#allocation2 + $0xa50] sm:$0xff]  ;;  %v181_v36 = vld [vmem:[#allocation2 + $0x428] sm:$0xff] }
  0x3d   :  { %573 = vmatprep.subr.mxu1 %v427_v1  ;;  %497 = vmatpush2.msra.mxu0 %v234_v2  ;;  %v373_v37 = vld [vmem:[#allocation2 + $0xa28] sm:$0xff]  ;;  %v180_v38 = vld [vmem:[#allocation2 + $0x420] sm:$0xff]  ;;  %v175_v40 = vld [vmem:[#allocation2 + $0x3f8] sm:$0xff] }
  0x3e   :  { %574 = vmatpush2.msra.mxu1 %v426_v3  ;;  %498 = vmatprep.subr.mxu0 %v229_v4  ;;  %v372_v39 = vld [vmem:[#allocation2 + $0xa20] sm:$0xff]  ;;  %v367_v41 = vld [vmem:[#allocation2 + $0x9f8] sm:$0xff]  ;;  %v174_v42 = vld [vmem:[#allocation2 + $0x3f0] sm:$0xff] }
  0x3f   :  { %575 = vmatprep.subr.mxu1 %v421_v5  ;;  %499 = vmatpush2.msra.mxu0 %v228_v6  ;;  %v366_v43 = vld [vmem:[#allocation2 + $0x9f0] sm:$0xff]  ;;  %v169_v44 = vld [vmem:[#allocation2 + $0x3c8] sm:$0xff]  ;;  %v168_v46 = vld [vmem:[#allocation2 + $0x3c0] sm:$0xff] }
  0x40   :  { %576 = vmatpush2.msra.mxu1 %v420_v7  ;;  %500 = vmatprep.subr.mxu0 %v223_v8  ;;  %v361_v45 = vld [vmem:[#allocation2 + $0x9c8] sm:$0xff]  ;;  %v360_v47 = vld [vmem:[#allocation2 + $0x9c0] sm:$0xff]  ;;  %v163_v48 = vld [vmem:[#allocation2 + $0x398] sm:$0xff] }
  0x41   :  { %577 = vmatprep.subr.mxu1 %v415_v9  ;;  %501 = vmatpush2.msra.mxu0 %v222_v10  ;;  %v355_v49 = vld [vmem:[#allocation2 + $0x998] sm:$0xff]  ;;  %v162_v50 = vld [vmem:[#allocation2 + $0x390] sm:$0xff]  ;;  %v157_v52 = vld [vmem:[#allocation2 + $0x368] sm:$0xff] }
  0x42   :  { %578 = vmatpush2.msra.mxu1 %v414_v11  ;;  %502 = vmatprep.subr.mxu0 %v217_v12  ;;  %v354_v51 = vld [vmem:[#allocation2 + $0x990] sm:$0xff]  ;;  %v349_v53 = vld [vmem:[#allocation2 + $0x968] sm:$0xff]  ;;  %v156_v54 = vld [vmem:[#allocation2 + $0x360] sm:$0xff] }
  0x43   :  { %579 = vmatprep.subr.mxu1 %v409_v13  ;;  %503 = vmatpush2.msra.mxu0 %v216_v14  ;;  %v348_v55 = vld [vmem:[#allocation2 + $0x960] sm:$0xff]  ;;  %v151_v56 = vld [vmem:[#allocation2 + $0x338] sm:$0xff]  ;;  %v150_v58 = vld [vmem:[#allocation2 + $0x330] sm:$0xff] }
  0x44   :  { %580 = vmatpush2.msra.mxu1 %v408_v15  ;;  %504 = vmatprep.subr.mxu0 %v211_v16  ;;  %v343_v57 = vld [vmem:[#allocation2 + $0x938] sm:$0xff]  ;;  %v342_v59 = vld [vmem:[#allocation2 + $0x930] sm:$0xff]  ;;  %v145_v60 = vld [vmem:[#allocation2 + $0x308] sm:$0xff] }
  0x45   :  { %581 = vmatprep.subr.mxu1 %v403_v17  ;;  %505 = vmatpush2.msra.mxu0 %v210_v18  ;;  %v337_v61 = vld [vmem:[#allocation2 + $0x908] sm:$0xff]  ;;  %v144_v62 = vld [vmem:[#allocation2 + $0x300] sm:$0xff]  ;;  %v1039_v2 = vld [vmem:[%s1134_s0 + $0x18] sm:$0xff] }
  0x46   :  { %582 = vmatpush2.msra.mxu1 %v402_v19  ;;  %506 = vmatprep.subr.mxu0 %v205_v20  ;;  %v1029_v63 = vld [vmem:[%s1134_s0 + $0x8] sm:$0xff]  ;;  %v336_v0 = vld [vmem:[#allocation2 + $0x900] sm:$0xff]  ;;  %v1045_v5 = vld [vmem:[%s1134_s0 + $0x10] sm:$0xff] }
  0x47   :  { %583 = vmatprep.subr.mxu1 %v397_v21  ;;  %507 = vmatpush2.msra.mxu0 %v204_v22  ;;  %v1034_v1 = vld [vmem:[%s1134_s0] sm:$0xff]  ;;  %v141_v3 = vld [vmem:[#allocation2 + $0x2e8] sm:$0xff]  ;;  %v135_v8 = vld [vmem:[#allocation2 + $0x2b8] sm:$0xff] }
  0x48   :  { %584 = vmatpush2.msra.mxu1 %v396_v23  ;;  %508 = vmatprep.subr.mxu0 %v199_v24  ;;  %v333_v4 = vld [vmem:[#allocation2 + $0x8e8] sm:$0xff]  ;;  %v140_v6 = vld [vmem:[#allocation2 + $0x2e0] sm:$0xff]  ;;  %v327_v9 = vld [vmem:[#allocation2 + $0x8b8] sm:$0xff] }
  0x49   :  { %585 = vmatprep.subr.mxu1 %v391_v25  ;;  %509 = vmatpush2.msra.mxu0 %v198_v26  ;;  %v332_v7 = vld [vmem:[#allocation2 + $0x8e0] sm:$0xff]  ;;  %v134_v10 = vld [vmem:[#allocation2 + $0x2b0] sm:$0xff]  ;;  %v129_v12 = vld [vmem:[#allocation2 + $0x288] sm:$0xff] }
  0x4a   :  { %586 = vmatpush2.msra.mxu1 %v390_v27  ;;  %510 = vmatprep.subr.mxu0 %v193_v28  ;;  %v326_v11 = vld [vmem:[#allocation2 + $0x8b0] sm:$0xff]  ;;  %v321_v13 = vld [vmem:[#allocation2 + $0x888] sm:$0xff]  ;;  %v128_v14 = vld [vmem:[#allocation2 + $0x280] sm:$0xff] }
  0x4b   :  { %587 = vmatprep.subr.mxu1 %v385_v29  ;;  %511 = vmatpush2.msra.mxu0 %v192_v30  ;;  %v320_v15 = vld [vmem:[#allocation2 + $0x880] sm:$0xff]  ;;  %v123_v16 = vld [vmem:[#allocation2 + $0x258] sm:$0xff]  ;;  %v122_v18 = vld [vmem:[#allocation2 + $0x250] sm:$0xff] }
  0x4c   :  { %588 = vmatpush2.msra.mxu1 %v384_v31  ;;  %512 = vmatprep.subr.mxu0 %v187_v32  ;;  %v315_v17 = vld [vmem:[#allocation2 + $0x858] sm:$0xff]  ;;  %v314_v19 = vld [vmem:[#allocation2 + $0x850] sm:$0xff]  ;;  %v117_v20 = vld [vmem:[#allocation2 + $0x228] sm:$0xff] }
  0x4d   :  { %589 = vmatprep.subr.mxu1 %v379_v33  ;;  %513 = vmatpush2.msra.mxu0 %v186_v34  ;;  %v309_v21 = vld [vmem:[#allocation2 + $0x828] sm:$0xff]  ;;  %v116_v22 = vld [vmem:[#allocation2 + $0x220] sm:$0xff]  ;;  %v111_v24 = vld [vmem:[#allocation2 + $0x1f8] sm:$0xff] }
  0x4e   :  { %590 = vmatpush2.msra.mxu1 %v378_v35  ;;  %514 = vmatprep.subr.mxu0 %v181_v36  ;;  %v308_v23 = vld [vmem:[#allocation2 + $0x820] sm:$0xff]  ;;  %v303_v25 = vld [vmem:[#allocation2 + $0x7f8] sm:$0xff]  ;;  %v110_v26 = vld [vmem:[#allocation2 + $0x1f0] sm:$0xff] }
  0x4f   :  { %591 = vmatprep.subr.mxu1 %v373_v37  ;;  %515 = vmatpush2.msra.mxu0 %v180_v38  ;;  %v302_v27 = vld [vmem:[#allocation2 + $0x7f0] sm:$0xff]  ;;  %v105_v28 = vld [vmem:[#allocation2 + $0x1c8] sm:$0xff]  ;;  %v104_v30 = vld [vmem:[#allocation2 + $0x1c0] sm:$0xff] }
  0x50   :  { %592 = vmatpush2.msra.mxu1 %v372_v39  ;;  %516 = vmatprep.subr.mxu0 %v175_v40  ;;  %v297_v29 = vld [vmem:[#allocation2 + $0x7c8] sm:$0xff]  ;;  %v296_v31 = vld [vmem:[#allocation2 + $0x7c0] sm:$0xff]  ;;  %v99_v32 = vld [vmem:[#allocation2 + $0x198] sm:$0xff] }
  0x51   :  { %593 = vmatprep.subr.mxu1 %v367_v41  ;;  %517 = vmatpush2.msra.mxu0 %v174_v42  ;;  %v291_v33 = vld [vmem:[#allocation2 + $0x798] sm:$0xff]  ;;  %v98_v34 = vld [vmem:[#allocation2 + $0x190] sm:$0xff]  ;;  %v93_v36 = vld [vmem:[#allocation2 + $0x168] sm:$0xff] }
  0x52   :  { %594 = vmatpush2.msra.mxu1 %v366_v43  ;;  %518 = vmatprep.subr.mxu0 %v169_v44  ;;  %v290_v35 = vld [vmem:[#allocation2 + $0x790] sm:$0xff]  ;;  %v285_v37 = vld [vmem:[#allocation2 + $0x768] sm:$0xff]  ;;  %v92_v38 = vld [vmem:[#allocation2 + $0x160] sm:$0xff] }
  0x53   :  { %595 = vmatprep.subr.mxu1 %v361_v45  ;;  %519 = vmatpush2.msra.mxu0 %v168_v46  ;;  %v284_v39 = vld [vmem:[#allocation2 + $0x760] sm:$0xff]  ;;  %v87_v40 = vld [vmem:[#allocation2 + $0x138] sm:$0xff]  ;;  %v86_v42 = vld [vmem:[#allocation2 + $0x130] sm:$0xff] }
  0x54   :  { %596 = vmatpush2.msra.mxu1 %v360_v47  ;;  %520 = vmatprep.subr.mxu0 %v163_v48  ;;  %v279_v41 = vld [vmem:[#allocation2 + $0x738] sm:$0xff]  ;;  %v278_v43 = vld [vmem:[#allocation2 + $0x730] sm:$0xff]  ;;  %v81_v44 = vld [vmem:[#allocation2 + $0x108] sm:$0xff] }
  0x55   :  { %597 = vmatprep.subr.mxu1 %v355_v49  ;;  %521 = vmatpush2.msra.mxu0 %v162_v50  ;;  %v273_v45 = vld [vmem:[#allocation2 + $0x708] sm:$0xff]  ;;  %v80_v46 = vld [vmem:[#allocation2 + $0x100] sm:$0xff]  ;;  %v75_v48 = vld [vmem:[#allocation2 + $0xd8] sm:$0xff] }
  0x56   :  { %598 = vmatpush2.msra.mxu1 %v354_v51  ;;  %522 = vmatprep.subr.mxu0 %v157_v52  ;;  %v272_v47 = vld [vmem:[#allocation2 + $0x700] sm:$0xff]  ;;  %v267_v49 = vld [vmem:[#allocation2 + $0x6d8] sm:$0xff]  ;;  %v74_v50 = vld [vmem:[#allocation2 + $0xd0] sm:$0xff] }
  0x57   :  { %599 = vmatprep.subr.mxu1 %v349_v53  ;;  %523 = vmatpush2.msra.mxu0 %v156_v54  ;;  %v266_v51 = vld [vmem:[#allocation2 + $0x6d0] sm:$0xff]  ;;  %v69_v52 = vld [vmem:[#allocation2 + $0xa8] sm:$0xff]  ;;  %v68_v54 = vld [vmem:[#allocation2 + $0xa0] sm:$0xff] }
  0x58   :  { %600 = vmatpush2.msra.mxu1 %v348_v55  ;;  %524 = vmatprep.subr.mxu0 %v151_v56  ;;  %v261_v53 = vld [vmem:[#allocation2 + $0x6a8] sm:$0xff]  ;;  %v260_v55 = vld [vmem:[#allocation2 + $0x6a0] sm:$0xff]  ;;  %v63_v56 = vld [vmem:[#allocation2 + $0x78] sm:$0xff] }
  0x59   :  { %601 = vmatprep.subr.mxu1 %v343_v57  ;;  %525 = vmatpush2.msra.mxu0 %v150_v58  ;;  %v255_v57 = vld [vmem:[#allocation2 + $0x678] sm:$0xff]  ;;  %v62_v58 = vld [vmem:[#allocation2 + $0x70] sm:$0xff] }
  0x5a   :  { %602 = vmatpush2.msra.mxu1 %v342_v59  ;;  %526 = vmatprep.subr.mxu0 %v145_v60  ;;  %v254_v59 = vld [vmem:[#allocation2 + $0x670] sm:$0xff]  ;;  %v57_v60 = vld [vmem:[#allocation2 + $0x48] sm:$0xff] }
  0x5b   :  { %603 = vmatprep.subr.mxu1 %v337_v61  ;;  %527 = vmatpush2.msra.mxu0 %v144_v62  ;;  %v249_v61 = vld [vmem:[#allocation2 + $0x648] sm:$0xff]  ;;  %v56_v62 = vld [vmem:[#allocation2 + $0x40] sm:$0xff] }
  0x5c   :  { %528 = vmatprep.mubr.f32.mxu0 %v1029_v63  ;;  %604 = vmatpush2.msra.mxu1 %v336_v0  ;;  %v248_v0 = vld [vmem:[#allocation2 + $0x640] sm:$0xff] }
  0x5d   :  { %529 = vmatmul.mubr.f32.vlgmr.msra.gmra.mxu0 %v1034_v1  ;;  %605 = vmatprep.mubr.f32.mxu1 %v1039_v2 }
  0x5e   :  { %618 = vmatprep.subr.mxu0 %v141_v3  ;;  %695 = vmatprep.subr.mxu1 %v333_v4  ;;  %v51_v3 = vld [vmem:[#allocation2 + $0x18] sm:$0xff] }
  0x5f   :  { %606 = vmatmul.mubr.f32.vlgmr.msra.gmra.mxu1 %v1045_v5  ;;  %619 = vmatpush1.msra.mxu0 %v140_v6  ;;  %v243_v4 = vld [vmem:[#allocation2 + $0x618] sm:$0xff]  ;;  %v50_v6 = vld [vmem:[#allocation2 + $0x10] sm:$0xff] }
  0x60   :  { %696 = vmatpush1.msra.mxu1 %v332_v7  ;;  %620 = vmatprep.subr.mxu0 %v135_v8  ;;  %v242_v7 = vld [vmem:[#allocation2 + $0x610] sm:$0xff]  ;;  %v237_v8 = vld [vmem:[#allocation2 + $0x5e8] sm:$0xff] }
  0x61   :  { %697 = vmatprep.subr.mxu1 %v327_v9  ;;  %621 = vmatpush1.msra.mxu0 %v134_v10  ;;  %v429_v9 = vld [vmem:[#allocation2 + $0xbe8] sm:$0xff]  ;;  %v236_v10 = vld [vmem:[#allocation2 + $0x5e0] sm:$0xff] }
  0x62   :  { %698 = vmatpush1.msra.mxu1 %v326_v11  ;;  %622 = vmatprep.subr.mxu0 %v129_v12  ;;  %v428_v11 = vld [vmem:[#allocation2 + $0xbe0] sm:$0xff]  ;;  %v231_v12 = vld [vmem:[#allocation2 + $0x5b8] sm:$0xff] }
  0x63   :  { %699 = vmatprep.subr.mxu1 %v321_v13  ;;  %623 = vmatpush1.msra.mxu0 %v128_v14  ;;  %v423_v13 = vld [vmem:[#allocation2 + $0xbb8] sm:$0xff]  ;;  %v230_v14 = vld [vmem:[#allocation2 + $0x5b0] sm:$0xff] }
  0x64   :  { %700 = vmatpush1.msra.mxu1 %v320_v15  ;;  %624 = vmatprep.subr.mxu0 %v123_v16  ;;  %v422_v15 = vld [vmem:[#allocation2 + $0xbb0] sm:$0xff]  ;;  %v225_v16 = vld [vmem:[#allocation2 + $0x588] sm:$0xff] }
  0x65   :  { %701 = vmatprep.subr.mxu1 %v315_v17  ;;  %625 = vmatpush1.msra.mxu0 %v122_v18  ;;  %v417_v17 = vld [vmem:[#allocation2 + $0xb88] sm:$0xff]  ;;  %v224_v18 = vld [vmem:[#allocation2 + $0x580] sm:$0xff] }
  0x66   :  { %702 = vmatpush1.msra.mxu1 %v314_v19  ;;  %626 = vmatprep.subr.mxu0 %v117_v20  ;;  %v416_v19 = vld [vmem:[#allocation2 + $0xb80] sm:$0xff]  ;;  %v219_v20 = vld [vmem:[#allocation2 + $0x558] sm:$0xff] }
  0x67   :  { %703 = vmatprep.subr.mxu1 %v309_v21  ;;  %627 = vmatpush1.msra.mxu0 %v116_v22  ;;  %v411_v21 = vld [vmem:[#allocation2 + $0xb58] sm:$0xff]  ;;  %v218_v22 = vld [vmem:[#allocation2 + $0x550] sm:$0xff] }
  0x68   :  { %704 = vmatpush1.msra.mxu1 %v308_v23  ;;  %628 = vmatprep.subr.mxu0 %v111_v24  ;;  %v410_v23 = vld [vmem:[#allocation2 + $0xb50] sm:$0xff]  ;;  %v213_v24 = vld [vmem:[#allocation2 + $0x528] sm:$0xff] }
  0x69   :  { %705 = vmatprep.subr.mxu1 %v303_v25  ;;  %629 = vmatpush1.msra.mxu0 %v110_v26  ;;  %v405_v25 = vld [vmem:[#allocation2 + $0xb28] sm:$0xff]  ;;  %v212_v26 = vld [vmem:[#allocation2 + $0x520] sm:$0xff] }
  0x6a   :  { %706 = vmatpush1.msra.mxu1 %v302_v27  ;;  %630 = vmatprep.subr.mxu0 %v105_v28  ;;  %v404_v27 = vld [vmem:[#allocation2 + $0xb20] sm:$0xff]  ;;  %v207_v28 = vld [vmem:[#allocation2 + $0x4f8] sm:$0xff] }
  0x6b   :  { %707 = vmatprep.subr.mxu1 %v297_v29  ;;  %631 = vmatpush1.msra.mxu0 %v104_v30  ;;  %v399_v29 = vld [vmem:[#allocation2 + $0xaf8] sm:$0xff]  ;;  %v206_v30 = vld [vmem:[#allocation2 + $0x4f0] sm:$0xff] }
  0x6c   :  { %708 = vmatpush1.msra.mxu1 %v296_v31  ;;  %632 = vmatprep.subr.mxu0 %v99_v32  ;;  %v398_v31 = vld [vmem:[#allocation2 + $0xaf0] sm:$0xff]  ;;  %v201_v32 = vld [vmem:[#allocation2 + $0x4c8] sm:$0xff] }
  0x6d   :  { %709 = vmatprep.subr.mxu1 %v291_v33  ;;  %633 = vmatpush1.msra.mxu0 %v98_v34  ;;  %v393_v33 = vld [vmem:[#allocation2 + $0xac8] sm:$0xff]  ;;  %v200_v34 = vld [vmem:[#allocation2 + $0x4c0] sm:$0xff] }
  0x6e   :  { %710 = vmatpush1.msra.mxu1 %v290_v35  ;;  %634 = vmatprep.subr.mxu0 %v93_v36  ;;  %v392_v35 = vld [vmem:[#allocation2 + $0xac0] sm:$0xff]  ;;  %v195_v36 = vld [vmem:[#allocation2 + $0x498] sm:$0xff] }
  0x6f   :  { %711 = vmatprep.subr.mxu1 %v285_v37  ;;  %635 = vmatpush1.msra.mxu0 %v92_v38  ;;  %v387_v37 = vld [vmem:[#allocation2 + $0xa98] sm:$0xff]  ;;  %v194_v38 = vld [vmem:[#allocation2 + $0x490] sm:$0xff] }
  0x70   :  { %712 = vmatpush1.msra.mxu1 %v284_v39  ;;  %636 = vmatprep.subr.mxu0 %v87_v40  ;;  %v386_v39 = vld [vmem:[#allocation2 + $0xa90] sm:$0xff]  ;;  %v189_v40 = vld [vmem:[#allocation2 + $0x468] sm:$0xff] }
  0x71   :  { %713 = vmatprep.subr.mxu1 %v279_v41  ;;  %637 = vmatpush1.msra.mxu0 %v86_v42  ;;  %v381_v41 = vld [vmem:[#allocation2 + $0xa68] sm:$0xff]  ;;  %v188_v42 = vld [vmem:[#allocation2 + $0x460] sm:$0xff] }
  0x72   :  { %714 = vmatpush1.msra.mxu1 %v278_v43  ;;  %638 = vmatprep.subr.mxu0 %v81_v44  ;;  %v380_v43 = vld [vmem:[#allocation2 + $0xa60] sm:$0xff]  ;;  %v183_v44 = vld [vmem:[#allocation2 + $0x438] sm:$0xff] }
  0x73   :  { %715 = vmatprep.subr.mxu1 %v273_v45  ;;  %639 = vmatpush1.msra.mxu0 %v80_v46  ;;  %v375_v45 = vld [vmem:[#allocation2 + $0xa38] sm:$0xff]  ;;  %v182_v46 = vld [vmem:[#allocation2 + $0x430] sm:$0xff] }
  0x74   :  { %716 = vmatpush1.msra.mxu1 %v272_v47  ;;  %640 = vmatprep.subr.mxu0 %v75_v48  ;;  %v374_v47 = vld [vmem:[#allocation2 + $0xa30] sm:$0xff]  ;;  %v177_v48 = vld [vmem:[#allocation2 + $0x408] sm:$0xff] }
  0x75   :  { %717 = vmatprep.subr.mxu1 %v267_v49  ;;  %641 = vmatpush1.msra.mxu0 %v74_v50  ;;  %v369_v49 = vld [vmem:[#allocation2 + $0xa08] sm:$0xff]  ;;  %v176_v50 = vld [vmem:[#allocation2 + $0x400] sm:$0xff] }
  0x76   :  { %718 = vmatpush1.msra.mxu1 %v266_v51  ;;  %642 = vmatprep.subr.mxu0 %v69_v52  ;;  %v368_v51 = vld [vmem:[#allocation2 + $0xa00] sm:$0xff]  ;;  %v171_v52 = vld [vmem:[#allocation2 + $0x3d8] sm:$0xff] }
  0x77   :  { %719 = vmatprep.subr.mxu1 %v261_v53  ;;  %643 = vmatpush1.msra.mxu0 %v68_v54  ;;  %v363_v53 = vld [vmem:[#allocation2 + $0x9d8] sm:$0xff]  ;;  %v170_v54 = vld [vmem:[#allocation2 + $0x3d0] sm:$0xff] }
  0x78   :  { %720 = vmatpush1.msra.mxu1 %v260_v55  ;;  %644 = vmatprep.subr.mxu0 %v63_v56  ;;  %v362_v55 = vld [vmem:[#allocation2 + $0x9d0] sm:$0xff]  ;;  %v165_v56 = vld [vmem:[#allocation2 + $0x3a8] sm:$0xff] }
  0x79   :  { %721 = vmatprep.subr.mxu1 %v255_v57  ;;  %645 = vmatpush1.msra.mxu0 %v62_v58  ;;  %v357_v57 = vld [vmem:[#allocation2 + $0x9a8] sm:$0xff]  ;;  %v164_v58 = vld [vmem:[#allocation2 + $0x3a0] sm:$0xff] }
  0x7a   :  { %722 = vmatpush1.msra.mxu1 %v254_v59  ;;  %646 = vmatprep.subr.mxu0 %v57_v60  ;;  %v356_v59 = vld [vmem:[#allocation2 + $0x9a0] sm:$0xff]  ;;  %v1053_v60 = vld [vmem:[%s1134_s0 + $0x28] sm:$0xff] }
  0x7b   :  { %723 = vmatprep.subr.mxu1 %v249_v61  ;;  %647 = vmatpush1.msra.mxu0 %v56_v62  ;;  %v159_v61 = vld [vmem:[#allocation2 + $0x378] sm:$0xff] }
  0x7c   :  { %724 = vmatpush1.msra.mxu1 %v248_v0  ;;  %648 = vmatprep.subr.mxu0 %v51_v3  ;;  %v351_v62 = vld [vmem:[#allocation2 + $0x978] sm:$0xff]  ;;  %v1058_v0 = vld [vmem:[%s1134_s0 + $0x20] sm:$0xff]  ;;  %v158_v3 = vld [vmem:[#allocation2 + $0x370] sm:$0xff] }
  0x7d   :  { %725 = vmatprep.subr.mxu1 %v243_v4  ;;  %649 = vmatpush1.msra.mxu0 %v50_v6  ;;  %v350_v4 = vld [vmem:[#allocation2 + $0x970] sm:$0xff]  ;;  %v1064_v6 = vld [vmem:[%s1134_s0 + $0x38] sm:$0xff] }
  0x7e   :  { %726 = vmatpush1.msra.mxu1 %v242_v7  ;;  %650 = vmatprep.subr.mxu0 %v237_v8  ;;  %v153_v7 = vld [vmem:[#allocation2 + $0x348] sm:$0xff] }
  0x7f   :  { %727 = vmatprep.subr.mxu1 %v429_v9  ;;  %651 = vmatpush2.msra.mxu0 %v236_v10  ;;  %v345_v8 = vld [vmem:[#allocation2 + $0x948] sm:$0xff]  ;;  %v1070_v9 = vld [vmem:[%s1134_s0 + $0x30] sm:$0xff]  ;;  %v152_v10 = vld [vmem:[#allocation2 + $0x340] sm:$0xff] }
  0x80   :  { %728 = vmatpush2.msra.mxu1 %v428_v11  ;;  %652 = vmatprep.subr.mxu0 %v231_v12  ;;  %v344_v11 = vld [vmem:[#allocation2 + $0x940] sm:$0xff]  ;;  %v147_v12 = vld [vmem:[#allocation2 + $0x318] sm:$0xff] }
  0x81   :  { %729 = vmatprep.subr.mxu1 %v423_v13  ;;  %653 = vmatpush2.msra.mxu0 %v230_v14  ;;  %v339_v13 = vld [vmem:[#allocation2 + $0x918] sm:$0xff]  ;;  %v146_v14 = vld [vmem:[#allocation2 + $0x310] sm:$0xff] }
  0x82   :  { %730 = vmatpush2.msra.mxu1 %v422_v15  ;;  %654 = vmatprep.subr.mxu0 %v225_v16  ;;  %v338_v15 = vld [vmem:[#allocation2 + $0x910] sm:$0xff]  ;;  %v143_v16 = vld [vmem:[#allocation2 + $0x2f8] sm:$0xff] }
  0x83   :  { %731 = vmatprep.subr.mxu1 %v417_v17  ;;  %655 = vmatpush2.msra.mxu0 %v224_v18  ;;  %v335_v17 = vld [vmem:[#allocation2 + $0x8f8] sm:$0xff]  ;;  %v142_v18 = vld [vmem:[#allocation2 + $0x2f0] sm:$0xff] }
  0x84   :  { %732 = vmatpush2.msra.mxu1 %v416_v19  ;;  %656 = vmatprep.subr.mxu0 %v219_v20  ;;  %v334_v19 = vld [vmem:[#allocation2 + $0x8f0] sm:$0xff]  ;;  %v137_v20 = vld [vmem:[#allocation2 + $0x2c8] sm:$0xff] }
  0x85   :  { %733 = vmatprep.subr.mxu1 %v411_v21  ;;  %657 = vmatpush2.msra.mxu0 %v218_v22  ;;  %v329_v21 = vld [vmem:[#allocation2 + $0x8c8] sm:$0xff]  ;;  %v136_v22 = vld [vmem:[#allocation2 + $0x2c0] sm:$0xff] }
  0x86   :  { %734 = vmatpush2.msra.mxu1 %v410_v23  ;;  %658 = vmatprep.subr.mxu0 %v213_v24  ;;  %v328_v23 = vld [vmem:[#allocation2 + $0x8c0] sm:$0xff]  ;;  %v131_v24 = vld [vmem:[#allocation2 + $0x298] sm:$0xff] }
  0x87   :  { %735 = vmatprep.subr.mxu1 %v405_v25  ;;  %659 = vmatpush2.msra.mxu0 %v212_v26  ;;  %v130_v25 = vld [vmem:[#allocation2 + $0x290] sm:$0xff]  ;;  %v125_v26 = vld [vmem:[#allocation2 + $0x268] sm:$0xff] }
  0x88   :  { %736 = vmatpush2.msra.mxu1 %v404_v27  ;;  %660 = vmatprep.subr.mxu0 %v207_v28  ;;  %v124_v27 = vld [vmem:[#allocation2 + $0x260] sm:$0xff] }
  0x89   :  { %737 = vmatprep.subr.mxu1 %v399_v29  ;;  %661 = vmatpush2.msra.mxu0 %v206_v30  ;;  %v316_v28 = vld [vmem:[#allocation2 + $0x860] sm:$0xff]  ;;  %v311_v29 = vld [vmem:[#allocation2 + $0x838] sm:$0xff]  ;;  %v118_v30 = vld [vmem:[#allocation2 + $0x230] sm:$0xff] }
  0x8a   :  { %738 = vmatpush2.msra.mxu1 %v398_v31  ;;  %662 = vmatprep.subr.mxu0 %v201_v32  ;;  %v310_v31 = vld [vmem:[#allocation2 + $0x830] sm:$0xff]  ;;  %v113_v32 = vld [vmem:[#allocation2 + $0x208] sm:$0xff] }
  0x8b   :  { %739 = vmatprep.subr.mxu1 %v393_v33  ;;  %663 = vmatpush2.msra.mxu0 %v200_v34  ;;  %v305_v33 = vld [vmem:[#allocation2 + $0x808] sm:$0xff]  ;;  %v112_v34 = vld [vmem:[#allocation2 + $0x200] sm:$0xff] }
  0x8c   :  { %740 = vmatpush2.msra.mxu1 %v392_v35  ;;  %664 = vmatprep.subr.mxu0 %v195_v36  ;;  %v304_v35 = vld [vmem:[#allocation2 + $0x800] sm:$0xff]  ;;  %v107_v36 = vld [vmem:[#allocation2 + $0x1d8] sm:$0xff] }
  0x8d   :  { %741 = vmatprep.subr.mxu1 %v387_v37  ;;  %665 = vmatpush2.msra.mxu0 %v194_v38  ;;  %v299_v37 = vld [vmem:[#allocation2 + $0x7d8] sm:$0xff]  ;;  %v106_v38 = vld [vmem:[#allocation2 + $0x1d0] sm:$0xff] }
  0x8e   :  { %742 = vmatpush2.msra.mxu1 %v386_v39  ;;  %666 = vmatprep.subr.mxu0 %v189_v40  ;;  %v298_v39 = vld [vmem:[#allocation2 + $0x7d0] sm:$0xff]  ;;  %v101_v40 = vld [vmem:[#allocation2 + $0x1a8] sm:$0xff] }
  0x8f   :  { %743 = vmatprep.subr.mxu1 %v381_v41  ;;  %667 = vmatpush2.msra.mxu0 %v188_v42  ;;  %v293_v41 = vld [vmem:[#allocation2 + $0x7a8] sm:$0xff]  ;;  %v100_v42 = vld [vmem:[#allocation2 + $0x1a0] sm:$0xff] }
  0x90   :  { %744 = vmatpush2.msra.mxu1 %v380_v43  ;;  %668 = vmatprep.subr.mxu0 %v183_v44  ;;  %v292_v43 = vld [vmem:[#allocation2 + $0x7a0] sm:$0xff]  ;;  %v95_v44 = vld [vmem:[#allocation2 + $0x178] sm:$0xff] }
  0x91   :  { %745 = vmatprep.subr.mxu1 %v375_v45  ;;  %669 = vmatpush2.msra.mxu0 %v182_v46  ;;  %v287_v45 = vld [vmem:[#allocation2 + $0x778] sm:$0xff]  ;;  %v94_v46 = vld [vmem:[#allocation2 + $0x170] sm:$0xff] }
  0x92   :  { %746 = vmatpush2.msra.mxu1 %v374_v47  ;;  %670 = vmatprep.subr.mxu0 %v177_v48  ;;  %v286_v47 = vld [vmem:[#allocation2 + $0x770] sm:$0xff]  ;;  %v89_v48 = vld [vmem:[#allocation2 + $0x148] sm:$0xff] }
  0x93   :  { %747 = vmatprep.subr.mxu1 %v369_v49  ;;  %671 = vmatpush2.msra.mxu0 %v176_v50  ;;  %v281_v49 = vld [vmem:[#allocation2 + $0x748] sm:$0xff]  ;;  %v88_v50 = vld [vmem:[#allocation2 + $0x140] sm:$0xff] }
  0x94   :  { %748 = vmatpush2.msra.mxu1 %v368_v51  ;;  %672 = vmatprep.subr.mxu0 %v171_v52  ;;  %v280_v51 = vld [vmem:[#allocation2 + $0x740] sm:$0xff]  ;;  %v83_v52 = vld [vmem:[#allocation2 + $0x118] sm:$0xff] }
  0x95   :  { %749 = vmatprep.subr.mxu1 %v363_v53  ;;  %673 = vmatpush2.msra.mxu0 %v170_v54  ;;  %v275_v53 = vld [vmem:[#allocation2 + $0x718] sm:$0xff]  ;;  %v82_v54 = vld [vmem:[#allocation2 + $0x110] sm:$0xff] }
  0x96   :  { %750 = vmatpush2.msra.mxu1 %v362_v55  ;;  %674 = vmatprep.subr.mxu0 %v165_v56  ;;  %v274_v55 = vld [vmem:[#allocation2 + $0x710] sm:$0xff]  ;;  %v77_v56 = vld [vmem:[#allocation2 + $0xe8] sm:$0xff] }
  0x97   :  { %751 = vmatprep.subr.mxu1 %v357_v57  ;;  %675 = vmatpush2.msra.mxu0 %v164_v58  ;;  %v269_v57 = vld [vmem:[#allocation2 + $0x6e8] sm:$0xff]  ;;  %v76_v58 = vld [vmem:[#allocation2 + $0xe0] sm:$0xff] }
  0x98   :  { %752 = vmatpush2.msra.mxu1 %v356_v59  ;;  %534 = vmatprep.mubr.f32.mxu0 %v1053_v60  ;;  %v268_v59 = vld [vmem:[#allocation2 + $0x6e0] sm:$0xff] }
  0x99   :  { %676 = vmatprep.subr.mxu0 %v159_v61  ;;  %753 = vmatprep.subr.mxu1 %v351_v62  ;;  %v71_v61 = vld [vmem:[#allocation2 + $0xb8] sm:$0xff] }
  0x9a   :  { %535 = vmatmul.mubr.f32.gmra.mxu0 %v1058_v0  ;;  %754 = vmatpush2.msra.mxu1 %v350_v4  ;;  %v263_v62 = vld [vmem:[#allocation2 + $0x6b8] sm:$0xff]  ;;  %v262_v4 = vld [vmem:[#allocation2 + $0x6b0] sm:$0xff] }
  0x9b   :  { %677 = vmatpush2.msra.mxu0 %v158_v3  ;;  %611 = vmatprep.mubr.f32.mxu1 %v1064_v6  ;;  %v70_v3 = vld [vmem:[#allocation2 + $0xb0] sm:$0xff] }
  0x9c   :  { %678 = vmatprep.subr.mxu0 %v153_v7  ;;  %755 = vmatprep.subr.mxu1 %v345_v8  ;;  %v65_v7 = vld [vmem:[#allocation2 + $0x88] sm:$0xff] }
  0x9d   :  { %612 = vmatmul.mubr.f32.gmra.mxu1 %v1070_v9  ;;  %679 = vmatpush2.msra.mxu0 %v152_v10  ;;  %v257_v8 = vld [vmem:[#allocation2 + $0x688] sm:$0xff]  ;;  %v64_v10 = vld [vmem:[#allocation2 + $0x80] sm:$0xff] }
  0x9e   :  { %756 = vmatpush2.msra.mxu1 %v344_v11  ;;  %680 = vmatprep.subr.mxu0 %v147_v12  ;;  %v256_v11 = vld [vmem:[#allocation2 + $0x680] sm:$0xff]  ;;  %v59_v12 = vld [vmem:[#allocation2 + $0x58] sm:$0xff] }
  0x9f   :  { %757 = vmatprep.subr.mxu1 %v339_v13  ;;  %681 = vmatpush2.msra.mxu0 %v146_v14  ;;  %v251_v13 = vld [vmem:[#allocation2 + $0x658] sm:$0xff]  ;;  %v58_v14 = vld [vmem:[#allocation2 + $0x50] sm:$0xff] }
  0xa0   :  { %682 = vmatprep.mubr.f32.mxu0 %v1029_v63  ;;  %758 = vmatpush2.msra.mxu1 %v338_v15  ;;  %v323_v63 = vld [vmem:[#allocation2 + $0x898] sm:$0xff]  ;;  %v250_v15 = vld [vmem:[#allocation2 + $0x650] sm:$0xff] }
  0xa1   :  { %683 = vmatmul.mubr.f32.vlgmr.msra.gmra.mxu0 %v1034_v1  ;;  %759 = vmatprep.mubr.f32.mxu1 %v1039_v2  ;;  %v322_v1 = vld [vmem:[#allocation2 + $0x890] sm:$0xff]  ;;  %v317_v2 = vld [vmem:[#allocation2 + $0x868] sm:$0xff] }
  0xa2   :  { %772 = vmatprep.subr.mxu0 %v143_v16  ;;  %849 = vmatprep.subr.mxu1 %v335_v17  ;;  %v53_v16 = vld [vmem:[#allocation2 + $0x28] sm:$0xff] }
  0xa3   :  { %760 = vmatmul.mubr.f32.vlgmr.msra.gmra.mxu1 %v1045_v5  ;;  %773 = vmatpush1.msra.mxu0 %v142_v18  ;;  %v119_v5 = vld [vmem:[#allocation2 + $0x238] sm:$0xff]  ;;  %v245_v17 = vld [vmem:[#allocation2 + $0x628] sm:$0xff]  ;;  %v52_v18 = vld [vmem:[#allocation2 + $0x20] sm:$0xff] }
  0xa4   :  { %850 = vmatpush1.msra.mxu1 %v334_v19  ;;  %774 = vmatprep.subr.mxu0 %v137_v20  ;;  %v244_v19 = vld [vmem:[#allocation2 + $0x620] sm:$0xff]  ;;  %v239_v20 = vld [vmem:[#allocation2 + $0x5f8] sm:$0xff] }
  0xa5   :  { %851 = vmatprep.subr.mxu1 %v329_v21  ;;  %775 = vmatpush1.msra.mxu0 %v136_v22  ;;  %v431_v21 = vld [vmem:[#allocation2 + $0xbf8] sm:$0xff]  ;;  %v238_v22 = vld [vmem:[#allocation2 + $0x5f0] sm:$0xff] }
  0xa6   :  { %852 = vmatpush1.msra.mxu1 %v328_v23  ;;  %776 = vmatprep.subr.mxu0 %v131_v24  ;;  %v430_v23 = vld [vmem:[#allocation2 + $0xbf0] sm:$0xff]  ;;  %v233_v24 = vld [vmem:[#allocation2 + $0x5c8] sm:$0xff] }
  0xa7   :  { %853 = vmatprep.subr.mxu1 %v323_v63  ;;  %777 = vmatpush1.msra.mxu0 %v130_v25  ;;  %v425_v63 = vld [vmem:[#allocation2 + $0xbc8] sm:$0xff]  ;;  %v232_v25 = vld [vmem:[#allocation2 + $0x5c0] sm:$0xff] }
  0xa8   :  { %854 = vmatpush1.msra.mxu1 %v322_v1  ;;  %778 = vmatprep.subr.mxu0 %v125_v26  ;;  %v424_v1 = vld [vmem:[#allocation2 + $0xbc0] sm:$0xff]  ;;  %v227_v26 = vld [vmem:[#allocation2 + $0x598] sm:$0xff] }
  0xa9   :  { %855 = vmatprep.subr.mxu1 %v317_v2  ;;  %779 = vmatpush1.msra.mxu0 %v124_v27  ;;  %v419_v2 = vld [vmem:[#allocation2 + $0xb98] sm:$0xff]  ;;  %v226_v27 = vld [vmem:[#allocation2 + $0x590] sm:$0xff] }
  0xaa   :  { %856 = vmatpush1.msra.mxu1 %v316_v28  ;;  %780 = vmatprep.subr.mxu0 %v119_v5  ;;  %v418_v28 = vld [vmem:[#allocation2 + $0xb90] sm:$0xff]  ;;  %v221_v5 = vld [vmem:[#allocation2 + $0x568] sm:$0xff] }
  0xab   :  { %857 = vmatprep.subr.mxu1 %v311_v29  ;;  %781 = vmatpush1.msra.mxu0 %v118_v30  ;;  %v413_v29 = vld [vmem:[#allocation2 + $0xb68] sm:$0xff]  ;;  %v220_v30 = vld [vmem:[#allocation2 + $0x560] sm:$0xff] }
  0xac   :  { %858 = vmatpush1.msra.mxu1 %v310_v31  ;;  %782 = vmatprep.subr.mxu0 %v113_v32  ;;  %v412_v31 = vld [vmem:[#allocation2 + $0xb60] sm:$0xff]  ;;  %v215_v32 = vld [vmem:[#allocation2 + $0x538] sm:$0xff] }
  0xad   :  { %859 = vmatprep.subr.mxu1 %v305_v33  ;;  %783 = vmatpush1.msra.mxu0 %v112_v34  ;;  %v407_v33 = vld [vmem:[#allocation2 + $0xb38] sm:$0xff]  ;;  %v214_v34 = vld [vmem:[#allocation2 + $0x530] sm:$0xff] }
  0xae   :  { %860 = vmatpush1.msra.mxu1 %v304_v35  ;;  %784 = vmatprep.subr.mxu0 %v107_v36  ;;  %v406_v35 = vld [vmem:[#allocation2 + $0xb30] sm:$0xff]  ;;  %v209_v36 = vld [vmem:[#allocation2 + $0x508] sm:$0xff] }
  0xaf   :  { %861 = vmatprep.subr.mxu1 %v299_v37  ;;  %785 = vmatpush1.msra.mxu0 %v106_v38  ;;  %v401_v37 = vld [vmem:[#allocation2 + $0xb08] sm:$0xff]  ;;  %v208_v38 = vld [vmem:[#allocation2 + $0x500] sm:$0xff] }
  0xb0   :  { %862 = vmatpush1.msra.mxu1 %v298_v39  ;;  %786 = vmatprep.subr.mxu0 %v101_v40  ;;  %v400_v39 = vld [vmem:[#allocation2 + $0xb00] sm:$0xff]  ;;  %v203_v40 = vld [vmem:[#allocation2 + $0x4d8] sm:$0xff] }
  0xb1   :  { %863 = vmatprep.subr.mxu1 %v293_v41  ;;  %787 = vmatpush1.msra.mxu0 %v100_v42  ;;  %v395_v41 = vld [vmem:[#allocation2 + $0xad8] sm:$0xff]  ;;  %v202_v42 = vld [vmem:[#allocation2 + $0x4d0] sm:$0xff] }
  0xb2   :  { %864 = vmatpush1.msra.mxu1 %v292_v43  ;;  %788 = vmatprep.subr.mxu0 %v95_v44  ;;  %v394_v43 = vld [vmem:[#allocation2 + $0xad0] sm:$0xff]  ;;  %v197_v44 = vld [vmem:[#allocation2 + $0x4a8] sm:$0xff] }
  0xb3   :  { %865 = vmatprep.subr.mxu1 %v287_v45  ;;  %789 = vmatpush1.msra.mxu0 %v94_v46  ;;  %v389_v45 = vld [vmem:[#allocation2 + $0xaa8] sm:$0xff]  ;;  %v196_v46 = vld [vmem:[#allocation2 + $0x4a0] sm:$0xff] }
  0xb4   :  { %866 = vmatpush1.msra.mxu1 %v286_v47  ;;  %790 = vmatprep.subr.mxu0 %v89_v48  ;;  %v388_v47 = vld [vmem:[#allocation2 + $0xaa0] sm:$0xff]  ;;  %v191_v48 = vld [vmem:[#allocation2 + $0x478] sm:$0xff] }
  0xb5   :  { %867 = vmatprep.subr.mxu1 %v281_v49  ;;  %791 = vmatpush1.msra.mxu0 %v88_v50  ;;  %v383_v49 = vld [vmem:[#allocation2 + $0xa78] sm:$0xff]  ;;  %v190_v50 = vld [vmem:[#allocation2 + $0x470] sm:$0xff] }
  0xb6   :  { %868 = vmatpush1.msra.mxu1 %v280_v51  ;;  %792 = vmatprep.subr.mxu0 %v83_v52  ;;  %v382_v51 = vld [vmem:[#allocation2 + $0xa70] sm:$0xff]  ;;  %v185_v52 = vld [vmem:[#allocation2 + $0x448] sm:$0xff] }
  0xb7   :  { %869 = vmatprep.subr.mxu1 %v275_v53  ;;  %793 = vmatpush1.msra.mxu0 %v82_v54  ;;  %v377_v53 = vld [vmem:[#allocation2 + $0xa48] sm:$0xff]  ;;  %v184_v54 = vld [vmem:[#allocation2 + $0x440] sm:$0xff] }
  0xb8   :  { %870 = vmatpush1.msra.mxu1 %v274_v55  ;;  %794 = vmatprep.subr.mxu0 %v77_v56  ;;  %v376_v55 = vld [vmem:[#allocation2 + $0xa40] sm:$0xff]  ;;  %v179_v56 = vld [vmem:[#allocation2 + $0x418] sm:$0xff] }
  0xb9   :  { %871 = vmatprep.subr.mxu1 %v269_v57  ;;  %795 = vmatpush1.msra.mxu0 %v76_v58  ;;  %v371_v57 = vld [vmem:[#allocation2 + $0xa18] sm:$0xff]  ;;  %v178_v58 = vld [vmem:[#allocation2 + $0x410] sm:$0xff] }
  0xba   :  { %872 = vmatpush1.msra.mxu1 %v268_v59  ;;  %796 = vmatprep.subr.mxu0 %v71_v61  ;;  %v370_v59 = vld [vmem:[#allocation2 + $0xa10] sm:$0xff]  ;;  %v173_v61 = vld [vmem:[#allocation2 + $0x3e8] sm:$0xff] }
  0xbb   :  { %873 = vmatprep.subr.mxu1 %v263_v62  ;;  %797 = vmatpush1.msra.mxu0 %v70_v3  ;;  %v365_v62 = vld [vmem:[#allocation2 + $0x9e8] sm:$0xff]  ;;  %v172_v3 = vld [vmem:[#allocation2 + $0x3e0] sm:$0xff] }
  0xbc   :  { %874 = vmatpush1.msra.mxu1 %v262_v4  ;;  %798 = vmatprep.subr.mxu0 %v65_v7  ;;  %v364_v4 = vld [vmem:[#allocation2 + $0x9e0] sm:$0xff]  ;;  %v167_v7 = vld [vmem:[#allocation2 + $0x3b8] sm:$0xff] }
  0xbd   :  { %875 = vmatprep.subr.mxu1 %v257_v8  ;;  %799 = vmatpush1.msra.mxu0 %v64_v10  ;;  %v359_v8 = vld [vmem:[#allocation2 + $0x9b8] sm:$0xff]  ;;  %v166_v10 = vld [vmem:[#allocation2 + $0x3b0] sm:$0xff] }
  0xbe   :  { %876 = vmatpush1.msra.mxu1 %v256_v11  ;;  %800 = vmatprep.subr.mxu0 %v59_v12  ;;  %v358_v11 = vld [vmem:[#allocation2 + $0x9b0] sm:$0xff]  ;;  %v161_v12 = vld [vmem:[#allocation2 + $0x388] sm:$0xff] }
  0xbf   :  { %877 = vmatprep.subr.mxu1 %v251_v13  ;;  %801 = vmatpush1.msra.mxu0 %v58_v14  ;;  %v353_v13 = vld [vmem:[#allocation2 + $0x988] sm:$0xff]  ;;  %v160_v14 = vld [vmem:[#allocation2 + $0x380] sm:$0xff] }
  0xc0   :  { %878 = vmatpush1.msra.mxu1 %v250_v15  ;;  %802 = vmatprep.subr.mxu0 %v53_v16  ;;  %v352_v15 = vld [vmem:[#allocation2 + $0x980] sm:$0xff]  ;;  %v155_v16 = vld [vmem:[#allocation2 + $0x358] sm:$0xff] }
  0xc1   :  { %879 = vmatprep.subr.mxu1 %v245_v17  ;;  %803 = vmatpush1.msra.mxu0 %v52_v18  ;;  %v347_v17 = vld [vmem:[#allocation2 + $0x958] sm:$0xff]  ;;  %v154_v18 = vld [vmem:[#allocation2 + $0x350] sm:$0xff] }
  0xc2   :  { %880 = vmatpush1.msra.mxu1 %v244_v19  ;;  %804 = vmatprep.subr.mxu0 %v239_v20  ;;  %v346_v19 = vld [vmem:[#allocation2 + $0x950] sm:$0xff]  ;;  %v149_v20 = vld [vmem:[#allocation2 + $0x328] sm:$0xff] }
  0xc3   :  { %881 = vmatprep.subr.mxu1 %v431_v21  ;;  %805 = vmatpush2.msra.mxu0 %v238_v22  ;;  %v341_v21 = vld [vmem:[#allocation2 + $0x928] sm:$0xff]  ;;  %v148_v22 = vld [vmem:[#allocation2 + $0x320] sm:$0xff] }
  0xc4   :  { %882 = vmatpush2.msra.mxu1 %v430_v23  ;;  %806 = vmatprep.subr.mxu0 %v233_v24  ;;  %v340_v23 = vld [vmem:[#allocation2 + $0x920] sm:$0xff]  ;;  %v948_v24 = vld [vmem:[%s1134_s0 + $0x8] sm:$0xff] }
  0xc5   :  { %883 = vmatprep.subr.mxu1 %v425_v63  ;;  %807 = vmatpush2.msra.mxu0 %v232_v25  ;;  %v949_v63 = vld [vmem:[%s1134_s0 + $0x18] sm:$0xff]  ;;  %v950_v25 = vld [vmem:[%s1134_s0] sm:$0xff] }
  0xc6   :  { %884 = vmatpush2.msra.mxu1 %v424_v1  ;;  %808 = vmatprep.subr.mxu0 %v227_v26  ;;  %v951_v1 = vld [vmem:[%s1134_s0 + $0x10] sm:$0xff]  ;;  %v434_v26 = vlaneseq }
  0xc7   :  { %885 = vmatprep.subr.mxu1 %v419_v2  ;;  %809 = vmatpush2.msra.mxu0 %v226_v27 }
  0xc8   :  { %886 = vmatpush2.msra.mxu1 %v418_v28  ;;  %810 = vmatprep.subr.mxu0 %v221_v5  ;;  %v435_v2 = vshrl.u32 %v434_v26, 7  ;;  %v432_v28 = vld [vmem:[#allocation4] sm:$0x3f] }
  0xc9   :  { %887 = vmatprep.subr.mxu1 %v413_v29  ;;  %811 = vmatpush2.msra.mxu0 %v220_v30 }
  0xca   :  { %888 = vmatpush2.msra.mxu1 %v412_v31  ;;  %812 = vmatprep.subr.mxu0 %v215_v32  ;;  %v436_v27 = vsub.s32 0, %v435_v2  ;;  %v440_v5 = vsub.s32 1, %v435_v2 }
  0xcb   :  { %889 = vmatprep.subr.mxu1 %v407_v33  ;;  %813 = vmatpush2.msra.mxu0 %v214_v34 }
  0xcc   :  { %890 = vmatpush2.msra.mxu1 %v406_v35  ;;  %814 = vmatprep.subr.mxu0 %v209_v36  ;;  %v437_v29 = vrot.slane %v432_v28, %v436_v27  ;;  %v441_v30 = vrot.slane %v432_v28, %v440_v5 }
  0xcd   :  { %891 = vmatprep.subr.mxu1 %v401_v37  ;;  %815 = vmatpush2.msra.mxu0 %v208_v38 }
  0xce   :  { %892 = vmatpush2.msra.mxu1 %v400_v39  ;;  %816 = vmatprep.subr.mxu0 %v203_v40  ;;  %v448_v39 = vsub.s32 3, %v435_v2 }
  0xcf   :  { %893 = vmatprep.subr.mxu1 %v395_v41  ;;  %817 = vmatpush2.msra.mxu0 %v202_v42 }
  0xd0   :  { %894 = vmatpush2.msra.mxu1 %v394_v43  ;;  %818 = vmatprep.subr.mxu0 %v197_v44 }
  0xd1   :  { %895 = vmatprep.subr.mxu1 %v389_v45  ;;  %819 = vmatpush2.msra.mxu0 %v196_v46  ;;  %v449_v46 = vrot.slane %v432_v28, %v448_v39 }
  0xd2   :  { %896 = vmatpush2.msra.mxu1 %v388_v47  ;;  %820 = vmatprep.subr.mxu0 %v191_v48 }
  0xd3   :  { %897 = vmatprep.subr.mxu1 %v383_v49  ;;  %821 = vmatpush2.msra.mxu0 %v190_v50 }
  0xd4   :  { %898 = vmatpush2.msra.mxu1 %v382_v51  ;;  %822 = vmatprep.subr.mxu0 %v185_v52 }
  0xd5   :  { %899 = vmatprep.subr.mxu1 %v377_v53  ;;  %823 = vmatpush2.msra.mxu0 %v184_v54 }
  0xd6   :  { %900 = vmatpush2.msra.mxu1 %v376_v55  ;;  %824 = vmatprep.subr.mxu0 %v179_v56 }
  0xd7   :  { %901 = vmatprep.subr.mxu1 %v371_v57  ;;  %825 = vmatpush2.msra.mxu0 %v178_v58  ;;  %v452_v58 = vsub.s32 4, %v435_v2 }
  0xd8   :  { %902 = vmatpush2.msra.mxu1 %v370_v59  ;;  %826 = vmatprep.subr.mxu0 %v173_v61 }
  0xd9   :  { %903 = vmatprep.subr.mxu1 %v365_v62  ;;  %827 = vmatpush2.msra.mxu0 %v172_v3  ;;  %v456_v62 = vsub.s32 5, %v435_v2 }
  0xda   :  { %904 = vmatpush2.msra.mxu1 %v364_v4  ;;  %828 = vmatprep.subr.mxu0 %v167_v7  ;;  %v453_v7 = vrot.slane %v432_v28, %v452_v58 }
  0xdb   :  { %905 = vmatprep.subr.mxu1 %v359_v8  ;;  %688 = vmatprep.mubr.f32.mxu0 %v1053_v60 }
  0xdc   :  { %829 = vmatpush2.msra.mxu0 %v166_v10  ;;  %906 = vmatpush2.msra.mxu1 %v358_v11  ;;  %v457_v10 = vrot.slane %v432_v28, %v456_v62 }
  0xdd   :  { %689 = vmatmul.mubr.f32.gmra.mxu0 %v1058_v0  ;;  %830 = vmatprep.subr.mxu0 %v161_v12 }
  0xde   :  { %907 = vmatprep.subr.mxu1 %v353_v13  ;;  %765 = vmatprep.mubr.f32.mxu1 %v1064_v6 }
  0xdf   :  { %831 = vmatpush2.msra.mxu0 %v160_v14  ;;  %908 = vmatpush2.msra.mxu1 %v352_v15 }
  0xe0   :  { %832 = vmatprep.subr.mxu0 %v155_v16  ;;  %766 = vmatmul.mubr.f32.gmra.mxu1 %v1070_v9 }
  0xe1   :  { %909 = vmatprep.subr.mxu1 %v347_v17  ;;  %833 = vmatpush2.msra.mxu0 %v154_v18 }
  0xe2   :  { %910 = vmatpush2.msra.mxu1 %v346_v19  ;;  %834 = vmatprep.subr.mxu0 %v149_v20 }
  0xe3   :  { %911 = vmatprep.subr.mxu1 %v341_v21  ;;  %835 = vmatpush2.msra.mxu0 %v148_v22 }
  0xe4   :  { %836 = vmatprep.mubr.f32.mxu0 %v948_v24  ;;  %912 = vmatpush2.msra.mxu1 %v340_v23 }
  0xe5   :  { %913 = vmatprep.mubr.f32.mxu1 %v949_v63  ;;  %837 = vmatmul.mubr.f32.vlgmr.msra.gmra.mxu0 %v950_v25 }
  0xe6   :  { %914 = vmatmul.mubr.f32.vlgmr.msra.gmra.mxu1 %v951_v1  ;;  %842 = vmatprep.mubr.f32.mxu0 %v1053_v60 }
  0xe7   :  { %919 = vmatprep.mubr.f32.mxu1 %v1064_v6 }
  0xe9   :  { %843 = vmatmul.mubr.f32.gmra.mxu0 %v1058_v0 }
  0xea   :  { %920 = vmatmul.mubr.f32.gmra.mxu1 %v1070_v9  ;;  %v444_v9 = vsub.s32 2, %v435_v2 }
  0xec   :  { %v445_v43 = vrot.slane %v432_v28, %v444_v9 }
 0x11d   :  { %v530_v31 = vpop.f32.mrf.mxu0 }
 0x11e   :  { %v531_v32 = vadd.f32 %v530_v31, %v437_v29 }
 0x11f   :  { %v607_v33 = vpop.f32.mrf.mxu1  ;;  %v532_v34 = vpop.f32.mrf.mxu0 }
 0x120   :  { %v608_v35 = vadd.f32 %v607_v33, %v531_v32  ;;  %v533_v36 = vadd.f32 %v532_v34, %v441_v30 }
 0x121   :  { %v609_v60 = vpop.f32.mrf.mxu1 }
 0x122   :  { %926 = vst [vmem:[%s1137_s3] sm:$0xff] %v608_v35  ;;  %v610_v0 = vadd.f32 %v609_v60, %v533_v36 }
 0x124   :  { %927 = vst [vmem:[%s1137_s3 + $0x8] sm:$0xff] %v610_v0 }
 0x15a   :  { %v536_v6 = vpop.f32.mrf.mxu0 }
 0x15b   :  { %v537_v37 = vadd.f32 %v536_v6, %v437_v29 }
 0x15c   :  { %v538_v38 = vpop.f32.mrf.mxu0 }
 0x15d   :  { %v539_v40 = vadd.f32 %v538_v38, %v441_v30  ;;  %v613_v41 = vpop.f32.mrf.mxu1 }
 0x15e   :  { %v614_v42 = vadd.f32 %v613_v41, %v537_v37 }
 0x15f   :  { %v615_v44 = vpop.f32.mrf.mxu1 }
 0x160   :  { %932 = vst [vmem:[%s1137_s3 + $0x30] sm:$0xff] %v614_v42  ;;  %v616_v45 = vadd.f32 %v615_v44, %v539_v40 }
 0x161   :  { %v684_v47 = vpop.f32.mrf.mxu0 }
 0x162   :  { %933 = vst [vmem:[%s1137_s3 + $0x38] sm:$0xff] %v616_v45  ;;  %v685_v48 = vadd.f32 %v684_v47, %v445_v43 }
 0x163   :  { %v761_v49 = vpop.f32.mrf.mxu1  ;;  %v686_v50 = vpop.f32.mrf.mxu0 }
 0x164   :  { %v762_v51 = vadd.f32 %v761_v49, %v685_v48  ;;  %v687_v52 = vadd.f32 %v686_v50, %v449_v46 }
 0x165   :  { %v763_v53 = vpop.f32.mrf.mxu1 }
 0x166   :  { %928 = vst [vmem:[%s1137_s3 + $0x10] sm:$0xff] %v762_v51  ;;  %v764_v54 = vadd.f32 %v763_v53, %v687_v52 }
 0x168   :  { %929 = vst [vmem:[%s1137_s3 + $0x18] sm:$0xff] %v764_v54 }
 0x19d   :  { %v690_v55 = vpop.f32.mrf.mxu0 }
 0x19e   :  { %v691_v56 = vadd.f32 %v690_v55, %v445_v43 }
 0x19f   :  { %v692_v57 = vpop.f32.mrf.mxu0 }
 0x1a0   :  { %v693_v59 = vadd.f32 %v692_v57, %v449_v46  ;;  %v767_v61 = vpop.f32.mrf.mxu1 }
 0x1a1   :  { %v768_v3 = vadd.f32 %v767_v61, %v691_v56 }
 0x1a2   :  { %v769_v4 = vpop.f32.mrf.mxu1 }
 0x1a3   :  { %934 = vst [vmem:[%s1137_s3 + $0x40] sm:$0xff] %v768_v3  ;;  %v770_v8 = vadd.f32 %v769_v4, %v693_v59 }
 0x1a5   :  { %935 = vst [vmem:[%s1137_s3 + $0x48] sm:$0xff] %v770_v8  ;;  %v838_v11 = vpop.f32.mrf.mxu0 }
 0x1a6   :  { %v915_v12 = vpop.f32.mrf.mxu1  ;;  %v839_v13 = vadd.f32 %v838_v11, %v453_v7 }
 0x1a7   :  { %v840_v14 = vpop.f32.mrf.mxu0 }
 0x1a8   :  { %v917_v15 = vpop.f32.mrf.mxu1  ;;  %v916_v16 = vadd.f32 %v915_v12, %v839_v13  ;;  %v841_v17 = vadd.f32 %v840_v14, %v457_v10 }
 0x1a9   :  { %v844_v18 = vpop.f32.mrf.mxu0 }
 0x1aa   :  { %v921_v19 = vpop.f32.mrf.mxu1  ;;  %930 = vst [vmem:[%s1137_s3 + $0x20] sm:$0xff] %v916_v16  ;;  %v918_v20 = vadd.f32 %v917_v15, %v841_v17  ;;  %v845_v21 = vadd.f32 %v844_v18, %v453_v7 }
 0x1ab   :  { %v846_v22 = vpop.f32.mrf.mxu0 }
 0x1ac   :  { %931 = vst [vmem:[%s1137_s3 + $0x28] sm:$0xff] %v918_v20  ;;  %v922_v23 = vadd.f32 %v921_v19, %v845_v21  ;;  %v847_v24 = vadd.f32 %v846_v22, %v457_v10  ;;  %v923_v63 = vpop.f32.mrf.mxu1 }
 0x1ae   :  { %936 = vst [vmem:[%s1137_s3 + $0x50] sm:$0xff] %v922_v23  ;;  %v924_v25 = vadd.f32 %v923_v63, %v847_v24 }
 0x1b0   :  { %937 = vst [vmem:[%s1137_s3 + $0x58] sm:$0xff] %v924_v25 }
 0x1b1   :  { %942 = vsyncpa [#allocation3], 1 }
 0x1b2   :  { %943 = vsyncpa [#allocation5], 1 }

// kernel: dtis_forward.20
= control target key start
LH: loop header
LB: loop body
LE: loop exit
PB: predicated region body
PF: predicated region fallthrough
CT: control target
= control target key end

     0   :  { %v2297_v3 = vmov 0.0   ;;  %v173_v53 = vlaneseq  ;;  %s2816_s4 = inlined_call_operand.vmem [shape: f32[128,256], index: 4, kind: input, shape index: {}]   ;;  %s2817_s2 = inlined_call_operand.vmem [shape: f32[128,128], index: 2, kind: input, shape index: {}]   ;;  %s2818_s1 = inlined_call_operand.vmem [shape: f32[16,128], index: 1, kind: input, shape index: {}, may-alias: {0,1}]   ;;  %s2819_s0 = inlined_call_operand.vmem [shape: f32[16,128], index: 0, kind: input, shape index: {}, may-alias: {0,1}]   ;;  %s2820_s5 = inlined_call_operand.vmem [shape: f32[1,256], index: 5, kind: input, shape index: {}]   ;;  %s2821_s3 = inlined_call_operand.vmem [shape: f32[1,128], index: 3, kind: input, shape index: {}]   ;;  %s2822_s6 = inlined_call_operand.vmem [shape: f32[128,128], index: 6, kind: input, shape index: {}]   ;;  %s2823_s7 = inlined_call_operand.vmem [shape: f32[1,128], index: 7, kind: input, shape index: {}]   ;;  %s2824_s8 = inlined_call_operand.vmem [shape: f32[1,128], index: 8, kind: input, shape index: {}]   ;;  %s2825_s9 = inlined_call_operand.vmem [shape: f32[1,128], index: 9, kind: input, shape index: {}]   ;;  %s2826_s10 = inlined_call_operand.vmem [shape: f32[16,128], index: 10, kind: output, shape index: {}]  }
   0x1   :  { %v170_v0 = vld [vmem:[%s2816_s4 + $0xf8] sm:$0xff]  ;;  %v169_v1 = vld [vmem:[%s2816_s4 + $0xf0] sm:$0xff]  ;;  %v168_v2 = vld [vmem:[%s2816_s4 + $0xe8] sm:$0xff]  ;;  %247 = vmatprep.mubr.f32.mxu1 %v2297_v3 }
   0x2   :  { %183 = vmatprep.subr.mxu1 %v170_v0  ;;  %v167_v4 = vld [vmem:[%s2816_s4 + $0xe0] sm:$0xff]  ;;  %v54_v5 = vld [vmem:[%s2817_s2 + $0x78] sm:$0xff]  ;;  %v53_v7 = vld [vmem:[%s2817_s2 + $0x70] sm:$0xff]  ;;  %v2517_v54 = vand.u32 127, %v173_v53  ;;  %v174_v55 = vshrl.u32 %v173_v53, 7 }
   0x3   :  { %184 = vmatpush1.msra.mxu1 %v169_v1  ;;  %2046 = vmatprep.subr.mxu0 %v54_v5  ;;  %v166_v6 = vld [vmem:[%s2816_s4 + $0xd8] sm:$0xff]  ;;  %v165_v8 = vld [vmem:[%s2816_s4 + $0xd0] sm:$0xff]  ;;  %v52_v9 = vld [vmem:[%s2817_s2 + $0x68] sm:$0xff] }
   0x4   :  { %185 = vmatprep.subr.mxu1 %v168_v2  ;;  %2047 = vmatpush3.msra.mxu0 %v54_v5  ;;  %v164_v10 = vld [vmem:[%s2816_s4 + $0xc8] sm:$0xff]  ;;  %v163_v11 = vld [vmem:[%s2816_s4 + $0xc0] sm:$0xff]  ;;  %v162_v13 = vld [vmem:[%s2816_s4 + $0xb8] sm:$0xff]  ;;  %vm369_vm0 = vcmp.ge.s32.totalorder %v2517_v54, 16  ;;  %vm370_vm1 = vcmp.lt.s32.totalorder %v2517_v54, 32  ;;  %v179_v56 = vsub.s32 1, %v174_v55 }
   0x5   :  { %186 = vmatpush1.msra.mxu1 %v167_v4  ;;  %2048 = vmatprep.subr.mxu0 %v53_v7  ;;  %v51_v12 = vld [vmem:[%s2817_s2 + $0x60] sm:$0xff]  ;;  %v161_v14 = vld [vmem:[%s2816_s4 + $0xb0] sm:$0xff]  ;;  %v50_v15 = vld [vmem:[%s2817_s2 + $0x58] sm:$0xff]  ;;  %vm826_vm2 = vcmp.ge.s32.totalorder %v2517_v54, 48  ;;  %vm827_vm3 = vcmp.lt.s32.totalorder %v2517_v54, 64  ;;  %vm637_vm4 = vcmp.ge.s32.totalorder %v2517_v54, 32 }
   0x6   :  { %187 = vmatprep.subr.mxu1 %v166_v6  ;;  %2049 = vmatpush3.msra.mxu0 %v53_v7  ;;  %v160_v16 = vld [vmem:[%s2816_s4 + $0xa8] sm:$0xff]  ;;  %v159_v17 = vld [vmem:[%s2816_s4 + $0xa0] sm:$0xff]  ;;  %v49_v18 = vld [vmem:[%s2817_s2 + $0x50] sm:$0xff]  ;;  %vm638_vm5 = vcmp.lt.s32.totalorder %v2517_v54, 48  ;;  %vm1015_vm7 = vcmp.ge.s32.totalorder %v2517_v54, 64  ;;  %vm1016_vm8 = vcmp.lt.s32.totalorder %v2517_v54, 80 }
   0x7   :  { %188 = vmatpush1.msra.mxu1 %v165_v8  ;;  %2050 = vmatprep.subr.mxu0 %v52_v9  ;;  %v158_v19 = vld [vmem:[%s2816_s4 + $0x98] sm:$0xff]  ;;  %v157_v20 = vld [vmem:[%s2816_s4 + $0x90] sm:$0xff]  ;;  %v48_v21 = vld [vmem:[%s2817_s2 + $0x48] sm:$0xff]  ;;  %v175_v59 = vsub.s32 0, %v174_v55  ;;  %vm1204_vm10 = vcmp.ge.s32.totalorder %v2517_v54, 80  ;;  %vm1205_vm11 = vcmp.lt.s32.totalorder %v2517_v54, 96 }
   0x8   :  { %189 = vmatprep.subr.mxu1 %v164_v10  ;;  %2051 = vmatpush3.msra.mxu0 %v52_v9  ;;  %v156_v22 = vld [vmem:[%s2816_s4 + $0x88] sm:$0xff]  ;;  %v155_v23 = vld [vmem:[%s2816_s4 + $0x80] sm:$0xff]  ;;  %v154_v25 = vld [vmem:[%s2816_s4 + $0x78] sm:$0xff]  ;;  %vm1393_vm13 = vcmp.ge.s32.totalorder %v2517_v54, 96  ;;  %vm1394_vm14 = vcmp.lt.s32.totalorder %v2517_v54, 112 }
   0x9   :  { %190 = vmatpush1.msra.mxu1 %v163_v11  ;;  %2052 = vmatprep.subr.mxu0 %v51_v12  ;;  %v47_v24 = vld [vmem:[%s2817_s2 + $0x40] sm:$0xff]  ;;  %v153_v26 = vld [vmem:[%s2816_s4 + $0x70] sm:$0xff]  ;;  %v46_v27 = vld [vmem:[%s2817_s2 + $0x38] sm:$0xff] }
   0xa   :  { %191 = vmatprep.subr.mxu1 %v162_v13  ;;  %2053 = vmatpush3.msra.mxu0 %v51_v12  ;;  %v152_v28 = vld [vmem:[%s2816_s4 + $0x68] sm:$0xff]  ;;  %v151_v29 = vld [vmem:[%s2816_s4 + $0x60] sm:$0xff]  ;;  %v45_v30 = vld [vmem:[%s2817_s2 + $0x30] sm:$0xff] }
   0xb   :  { %192 = vmatpush1.msra.mxu1 %v161_v14  ;;  %2054 = vmatprep.subr.mxu0 %v50_v15  ;;  %v150_v31 = vld [vmem:[%s2816_s4 + $0x58] sm:$0xff]  ;;  %v149_v32 = vld [vmem:[%s2816_s4 + $0x50] sm:$0xff]  ;;  %v44_v33 = vld [vmem:[%s2817_s2 + $0x28] sm:$0xff] }
   0xc   :  { %193 = vmatprep.subr.mxu1 %v160_v16  ;;  %2055 = vmatpush3.msra.mxu0 %v50_v15  ;;  %v148_v34 = vld [vmem:[%s2816_s4 + $0x48] sm:$0xff]  ;;  %v147_v35 = vld [vmem:[%s2816_s4 + $0x40] sm:$0xff]  ;;  %v146_v37 = vld [vmem:[%s2816_s4 + $0x38] sm:$0xff] }
   0xd   :  { %194 = vmatpush1.msra.mxu1 %v159_v17  ;;  %2056 = vmatprep.subr.mxu0 %v49_v18  ;;  %v43_v36 = vld [vmem:[%s2817_s2 + $0x20] sm:$0xff]  ;;  %v145_v38 = vld [vmem:[%s2816_s4 + $0x30] sm:$0xff]  ;;  %v42_v39 = vld [vmem:[%s2817_s2 + $0x18] sm:$0xff] }
   0xe   :  { %195 = vmatprep.subr.mxu1 %v158_v19  ;;  %2057 = vmatpush3.msra.mxu0 %v49_v18  ;;  %v144_v40 = vld [vmem:[%s2816_s4 + $0x28] sm:$0xff]  ;;  %v143_v41 = vld [vmem:[%s2816_s4 + $0x20] sm:$0xff]  ;;  %v41_v42 = vld [vmem:[%s2817_s2 + $0x10] sm:$0xff] }
   0xf   :  { %196 = vmatpush1.msra.mxu1 %v157_v20  ;;  %2058 = vmatprep.subr.mxu0 %v48_v21  ;;  %v142_v43 = vld [vmem:[%s2816_s4 + $0x18] sm:$0xff]  ;;  %v141_v44 = vld [vmem:[%s2816_s4 + $0x10] sm:$0xff]  ;;  %v40_v45 = vld [vmem:[%s2817_s2 + $0x8] sm:$0xff] }
  0x10   :  { %197 = vmatprep.subr.mxu1 %v156_v22  ;;  %2059 = vmatpush3.msra.mxu0 %v48_v21  ;;  %v140_v46 = vld [vmem:[%s2816_s4 + $0x8] sm:$0xff]  ;;  %v139_v47 = vld [vmem:[%s2816_s4] sm:$0xff]  ;;  %vm2525_vm6 = vmand %vm369_vm0, %vm370_vm1  ;;  %vm263_vm0 = vcmp.lt.s32.totalorder %v2517_v54, 16 }
  0x11   :  { %198 = vmatpush1.msra.mxu1 %v155_v23  ;;  %2060 = vmatprep.subr.mxu0 %v47_v24  ;;  %v39_v48 = vld [vmem:[%s2817_s2] sm:$0xff]  ;;  %v2509_v51 = vld [vmem:[%s2819_s0 + $0x8] sm:$0xff]  ;;  %vm828_vm9 = vmand %vm826_vm2, %vm827_vm3  ;;  %v1920_v10 = vsel %vm2525_vm6, 1.0, %v2297_v3  ;;  %v1919_v11 = vsel %vm263_vm0, 1.0, %v2297_v3  ;;  %vm1582_vm3 = vcmp.ge.s32.totalorder %v2517_v54, 112 }
  0x12   :  { %199 = vmatprep.subr.mxu1 %v154_v25  ;;  %2061 = vmatpush3.msra.mxu0 %v47_v24  ;;  %v37_v49 = vld [vmem:[%s2818_s1] sm:$0xff]  ;;  %v38_v52 = vld [vmem:[%s2818_s1 + $0x8] sm:$0xff]  ;;  %vm639_vm12 = vmand %vm637_vm4, %vm638_vm5  ;;  %v1928_v2 = vsel %vm828_vm9, 1.0, %v2297_v3  ;;  %vm344_vm4 = vcmask 130048  }
  0x13   :  { %200 = vmatpush1.msra.mxu1 %v153_v26  ;;  %2062 = vmatprep.subr.mxu0 %v46_v27  ;;  %v2504_v50 = vld [vmem:[%s2819_s0] sm:$0xff]  ;;  %vm1017_vm15 = vmand %vm1015_vm7, %vm1016_vm8  ;;  %v1925_v6 = vsel %vm639_vm12, 1.0, %v2297_v3 }
  0x14   :  { %201 = vmatprep.subr.mxu1 %v152_v28  ;;  %2063 = vmatpush3.msra.mxu0 %v46_v27  ;;  %v171_v58 = vld [vmem:[%s2820_s5] sm:$0x3]  ;;  %vm1206_vm1 = vmand %vm1204_vm10, %vm1205_vm11  ;;  %v1931_v7 = vsel %vm1017_vm15, 1.0, %v2297_v3 }
  0x15   :  { %202 = vmatpush1.msra.mxu1 %v151_v29  ;;  %2064 = vmatprep.subr.mxu0 %v45_v30  ;;  %v180_v60 = vrot.slane %v171_v58, %v179_v56  ;;  %v1918_v62 = vld [vmem:[%s2821_s3] ss:$0 sm:$0xff]  ;;  %v176_v63 = vrot.slane %v171_v58, %v175_v59  ;;  %vm1395_vm2 = vmand %vm1393_vm13, %vm1394_vm14  ;;  %v1934_v12 = vsel %vm1206_vm1, 1.0, %v2297_v3 }
  0x16   :  { %203 = vmatprep.subr.mxu1 %v150_v31  ;;  %2065 = vmatpush3.msra.mxu0 %v45_v30  ;;  %v1937_v16 = vsel %vm1395_vm2, 1.0, %v2297_v3 }
  0x17   :  { %204 = vmatpush1.msra.mxu1 %v149_v32  ;;  %2066 = vmatprep.subr.mxu0 %v44_v33 }
  0x18   :  { %205 = vmatprep.subr.mxu1 %v148_v34  ;;  %2067 = vmatpush3.msra.mxu0 %v44_v33 }
  0x19   :  { %206 = vmatpush1.msra.mxu1 %v147_v35  ;;  %2068 = vmatprep.subr.mxu0 %v43_v36 }
  0x1a   :  { %207 = vmatprep.subr.mxu1 %v146_v37  ;;  %2069 = vmatpush3.msra.mxu0 %v43_v36 }
  0x1b   :  { %208 = vmatpush1.msra.mxu1 %v145_v38  ;;  %2070 = vmatprep.subr.mxu0 %v42_v39 }
  0x1c   :  { %209 = vmatprep.subr.mxu1 %v144_v40  ;;  %2071 = vmatpush3.msra.mxu0 %v42_v39  ;;  %v1940_v40 = vsel %vm1582_vm3, 1.0, %v2297_v3 }
  0x1d   :  { %210 = vmatpush1.msra.mxu1 %v143_v41  ;;  %2072 = vmatprep.subr.mxu0 %v41_v42 }
  0x1e   :  { %211 = vmatprep.subr.mxu1 %v142_v43  ;;  %2073 = vmatpush3.msra.mxu0 %v41_v42 }
  0x1f   :  { %212 = vmatpush1.msra.mxu1 %v141_v44  ;;  %2074 = vmatprep.subr.mxu0 %v40_v45 }
  0x20   :  { %213 = vmatprep.subr.mxu1 %v140_v46  ;;  %2075 = vmatpush3.msra.mxu0 %v40_v45 }
  0x21   :  { %214 = vmatpush1.msra.mxu1 %v139_v47  ;;  %2076 = vmatprep.subr.mxu0 %v39_v48 }
  0x22   :  { %248 = vmatmul.mubr.f32.vlgmr.msra.gmra.mxu1 %v37_v49  ;;  %2077 = vmatpush3.msra.mxu0 %v39_v48 }
  0x23   :  { %2078 = vmatprep.mubr.f32.mxu0 %v2504_v50  ;;  %253 = vmatprep.mubr.f32.mxu1 %v2297_v3 }
  0x24   :  { %2079 = vmatmul.mubr.f32.vlgmr.msra.gmra.mxu0 %v2509_v51 }
  0x26   :  { %254 = vmatmul.mubr.f32.gmra.mxu1 %v38_v52 }
  0xe2   :  { %v249_v61 = vpop.f32.mrf.mxu1 }
  0xe3   :  { %v2565_v21 = vadd.f32 %v249_v61, %v176_v63 }
  0xe4   :  { %v251_v0 = vpop.f32.mrf.mxu1  ;;  %v2080_v1 = vpop.f32.mrf.mxu0 }
  0xe5   :  { %v2543_v4 = vadd.f32 %v251_v0, %v180_v60  ;;  %v134_v5 = vadd.f32 %v2080_v1, %v1918_v62 }
  0xe6   :  { %v255_v8 = vpop.f32.mrf.mxu1  ;;  %v128_v9 = vpop.f32.mrf.mxu0 }
  0xe7   :  { %v138_v13 = vmul.f32 0.25, %v134_v5  ;;  %v2552_v14 = vadd.f32 %v255_v8, %v176_v63  ;;  %v129_v15 = vadd.f32 %v1918_v62, %v128_v9  ;;  %v2556_v18 = vmul.f32 %v1925_v6, %v2543_v4 }
  0xe8   :  { %v257_v17 = vpop.f32.mrf.mxu1  ;;  %v2559_v19 = vmul.f32 %v1931_v7, %v2543_v4  ;;  %v2562_v20 = vmul.f32 %v1928_v2, %v2543_v4  ;;  %v473_v24 = vmul.f32 %v1920_v10, %v2543_v4  ;;  %v2577_v28 = vmul.f32 %v1934_v12, %v2543_v4 }
  0xe9   :  { %v137_v22 = vmul.f32 0.25, %v129_v15  ;;  %v258_v23 = vadd.f32 %v257_v17, %v180_v60  ;;  %2081 = vmatprep.subr.mxu1 %v2552_v14  ;;  %v2570_v25 = vmul.f32 %v1925_v6, %v138_v13  ;;  %v2572_v26 = vmul.f32 %v1928_v2, %v138_v13 }
  0xea   :  { %2082 = vmatpush3.xpose.msra.mxu1 %v2552_v14  ;;  %v2574_v27 = vmul.f32 %v1931_v7, %v138_v13  ;;  %v268_v31 = vmul.f32 %v1919_v11, %v138_v13  ;;  %v2602_v43 = vmul.f32 %v1934_v12, %v138_v13  ;;  %v2606_v44 = vmul.f32 %v1937_v16, %v2543_v4 }
  0xeb   :  { %2083 = vmatprep.subr.mxu1 %v2565_v21  ;;  %v474_v29 = vmul.f32 %v1920_v10, %v258_v23  ;;  %v267_v30 = vmul.f32 %v1919_v11, %v137_v22  ;;  %v2580_v32 = vmul.f32 %v1928_v2, %v258_v23  ;;  %v374_v33 = vmul.f32 %v1920_v10, %v137_v22 }
  0xec   :  { %v2582_v34 = vmul.f32 %v1925_v6, %v137_v22  ;;  %v2584_v35 = vmul.f32 %v1925_v6, %v258_v23  ;;  %v2586_v36 = vmul.f32 %v1928_v2, %v137_v22  ;;  %v2588_v37 = vmul.f32 %v1931_v7, %v258_v23 }
  0xed   :  { %2095 = vmatprep.subr.mxu0 %v474_v29  ;;  %2085 = vmatprep.mubr.f32.mxu1 %v267_v30  ;;  %v2590_v38 = vmul.f32 %v1931_v7, %v137_v22  ;;  %v2592_v39 = vmul.f32 %v1934_v12, %v258_v23  ;;  %v2598_v41 = vmul.f32 %v1934_v12, %v137_v22 }
  0xee   :  { %2084 = vmatpush3.xpose.msra.mxu1 %v2565_v21  ;;  %2096 = vmatpush3.msra.mxu0 %v474_v29  ;;  %v2600_v42 = vmul.f32 %v1937_v16, %v258_v23  ;;  %v2608_v45 = vmul.f32 %v1937_v16, %v137_v22  ;;  %v2610_v46 = vmul.f32 %v1940_v40, %v258_v23 }
  0xef   :  { %2088 = vmatprep.subr.mxu1 %v2552_v14  ;;  %2097 = vmatprep.subr.mxu0 %v473_v24  ;;  %v2612_v3 = vmul.f32 %v1937_v16, %v138_v13  ;;  %v2615_v47 = vmul.f32 %v1940_v40, %v2543_v4  ;;  %v2617_v48 = vmul.f32 %v1940_v40, %v137_v22 }
  0xf0   :  { %2098 = vmatpush3.msra.mxu0 %v473_v24  ;;  %v2619_v49 = vmul.f32 %v1940_v40, %v138_v13  ;;  %v368_v52 = vmul.f32 %v1919_v11, %v258_v23  ;;  %v375_v53 = vmul.f32 %v1920_v10, %v138_v13  ;;  %v367_v54 = vmul.f32 %v1919_v11, %v2543_v4 }
  0xf1   :  { %2086 = vmatmul.mubr.f32.vlgmr.msra.gmra.mxu1 %v268_v31  ;;  %2130 = vmatprep.subr.mxu0 %v2580_v32 }
  0xf2   :  { %2089 = vmatpush3.xpose.msra.mxu1 %v2552_v14  ;;  %2092 = vmatprep.mubr.f32.mxu1 %v374_v33 }
  0xf3   :  { %2090 = vmatprep.subr.mxu1 %v2565_v21 }
  0xf6   :  { %2091 = vmatpush3.xpose.msra.mxu1 %v2565_v21 }
  0xf7   :  { %2102 = vmatprep.subr.mxu1 %v368_v52 }
  0xf9   :  { %2093 = vmatmul.mubr.f32.vlgmr.msra.gmra.mxu1 %v375_v53 }
  0xfa   :  { %2103 = vmatpush3.msra.mxu1 %v368_v52 }
  0xfb   :  { %2104 = vmatprep.subr.mxu1 %v367_v54 }
  0xfc   :  { %2105 = vmatpush3.msra.mxu1 %v367_v54 }
  0xfd   :  { %2109 = vmatprep.subr.mxu1 %v2552_v14 }
 0x1b1   :  { %v2087_v55 = vpop.f32.mrf.mxu1 }
 0x1b2   :  { %v348_v58 = vsel %vm344_vm4, %v2087_v55, -inf }
 0x1b3   :  { %v335_v56 = vpop.f32.mrf.mxu1 }
 0x1b4   :  { %v345_v57 = vsel %vm344_vm4, %v335_v56, -inf }
 0x1b5   :  { %346 = vmax.xlane.f32.xlu0 %v345_v57 }
 0x1b9   :  { %349 = vmax.xlane.f32.xlu0 %v348_v58  ;;  %v2094_v12 = vpop.f32.mrf.mxu1 }
 0x1ba   :  { %v454_v53 = vsel %vm344_vm4, %v2094_v12, -inf }
 0x1bb   :  { %v442_v13 = vpop.f32.mrf.mxu1 }
 0x1bc   :  { %v451_v54 = vsel %vm344_vm4, %v442_v13, -inf }
 0x23e   :  { %v347_v59 = vpop.xlane.xlu0 %346 }
 0x23f   :  { %v351_v60 = vsub.f32 %v335_v56, %v347_v59 }
 0x241   :  { %v353_v61 = vmul.f32 1.442695, %v351_v60 }
 0x242   :  { %v350_v62 = vpop.xlane.xlu0 %349 }
 0x243   :  { %2229 = vpow2.f32 %v353_v61  ;;  %v352_v63 = vsub.f32 %v2087_v55, %v350_v62 }
 0x245   :  { %v355_v0 = vmul.f32 1.442695, %v352_v63 }
 0x247   :  { %2231 = vpow2.f32 %v355_v0 }
 0x250   :  { %v2230_v1 = vpop.eup %2229 }
 0x251   :  { %v357_v2 = vsel %vm344_vm4, %v2230_v1, 0.0 }
 0x252   :  { %358 = vadd.xlane.f32.xlu1 %v357_v2 }
 0x254   :  { %v2232_v4 = vpop.eup %2231 }
 0x255   :  { %v360_v5 = vsel %vm344_vm4, %v2232_v4, 0.0 }
 0x256   :  { %361 = vadd.xlane.f32.xlu1 %v360_v5 }
 0x2db   :  { %v359_v6 = vpop.xlane.xlu1 %358 }
 0x2dc   :  { %2233 = vrcp.f32 %v359_v6 }
 0x2df   :  { %v362_v7 = vpop.xlane.xlu1 %361 }
 0x2e0   :  { %2235 = vrcp.f32 %v362_v7 }
 0x2e9   :  { %v2234_v8 = vpop.eup %2233 }
 0x2ea   :  { %v365_v9 = vmul.f32 %v2234_v8, %v2230_v1 }
 0x2ec   :  { %2106 = vmatprep.mubr.msk.f32.mxu1 %vm344_vm4, %v365_v9 }
 0x2ed   :  { %v2236_v10 = vpop.eup %2235 }
 0x2ee   :  { %v366_v11 = vmul.f32 %v2236_v10, %v2232_v4 }
 0x2f0   :  { %2107 = vmatmul.mubr.msk.f32.vlgmr.msra.gmra.mxu1 %vm344_vm4, %v366_v11 }
 0x2f1   :  { %2110 = vmatpush3.xpose.msra.mxu1 %v2552_v14  ;;  %2113 = vmatprep.mubr.f32.mxu1 %v2582_v34 }
 0x2f2   :  { %2111 = vmatprep.subr.mxu1 %v2565_v21 }
 0x2f5   :  { %2112 = vmatpush3.xpose.msra.mxu1 %v2565_v21 }
 0x2f6   :  { %2116 = vmatprep.subr.mxu1 %v2584_v35 }
 0x2f8   :  { %2114 = vmatmul.mubr.f32.vlgmr.msra.gmra.mxu1 %v2570_v25 }
 0x2f9   :  { %2117 = vmatpush3.msra.mxu1 %v2584_v35 }
 0x2fa   :  { %2118 = vmatprep.subr.mxu1 %v2556_v18 }
 0x2fb   :  { %2119 = vmatpush3.msra.mxu1 %v2556_v18 }
 0x2fc   :  { %2123 = vmatprep.subr.mxu1 %v2552_v14 }
 0x3b0   :  { %v2643_v15 = vpop.f32.mrf.mxu1 }
 0x3b2   :  { %v2645_v16 = vpop.f32.mrf.mxu1 }
 0x3b8   :  { %v2115_v17 = vpop.f32.mrf.mxu1 }
 0x3b9   :  { %v722_v22 = vsel %vm344_vm4, %v2115_v17, -inf }
 0x3ba   :  { %723 = vmax.xlane.f32.xlu1 %v722_v22  ;;  %v710_v23 = vpop.f32.mrf.mxu1 }
 0x3bb   :  { %v719_v24 = vsel %vm344_vm4, %v710_v23, -inf }
 0x3bc   :  { %720 = vmax.xlane.f32.xlu0 %v719_v24 }
 0x443   :  { %v724_v25 = vpop.xlane.xlu1 %723 }
 0x444   :  { %v726_v29 = vsub.f32 %v2115_v17, %v724_v25 }
 0x445   :  { %v721_v30 = vpop.xlane.xlu0 %720 }
 0x446   :  { %v729_v18 = vmul.f32 1.442695, %v726_v29  ;;  %v725_v31 = vsub.f32 %v710_v23, %v721_v30 }
 0x448   :  { %2237 = vpow2.f32 %v729_v18  ;;  %v727_v33 = vmul.f32 1.442695, %v725_v31 }
 0x44a   :  { %2239 = vpow2.f32 %v727_v33 }
 0x455   :  { %v2238_v34 = vpop.eup %2237 }
 0x456   :  { %v734_v35 = vsel %vm344_vm4, %v2238_v34, 0.0 }
 0x457   :  { %v2240_v40 = vpop.eup %2239  ;;  %735 = vadd.xlane.f32.xlu1 %v734_v35 }
 0x458   :  { %v731_v52 = vsel %vm344_vm4, %v2240_v40, 0.0 }
 0x459   :  { %732 = vadd.xlane.f32.xlu0 %v731_v52 }
 0x45b   :  { %455 = vmax.xlane.f32.xlu1 %v454_v53 }
 0x45d   :  { %452 = vmax.xlane.f32.xlu0 %v451_v54 }
 0x4e0   :  { %v736_v55 = vpop.xlane.xlu1 %735 }
 0x4e1   :  { %2241 = vrcp.f32 %v736_v55 }
 0x4e2   :  { %v733_v56 = vpop.xlane.xlu0 %732 }
 0x4e3   :  { %2243 = vrcp.f32 %v733_v56 }
 0x4e4   :  { %v456_v61 = vpop.xlane.xlu1 %455 }
 0x4e5   :  { %v458_v63 = vsub.f32 %v2094_v12, %v456_v61 }
 0x4e6   :  { %v453_v62 = vpop.xlane.xlu0 %452 }
 0x4e7   :  { %v461_v0 = vmul.f32 1.442695, %v458_v63 }
 0x4e9   :  { %2245 = vpow2.f32 %v461_v0 }
 0x4ee   :  { %v2242_v57 = vpop.eup %2241 }
 0x4ef   :  { %v740_v60 = vmul.f32 %v2242_v57, %v2238_v34 }
 0x4f0   :  { %v2244_v58 = vpop.eup %2243 }
 0x4f1   :  { %v739_v59 = vmul.f32 %v2244_v58, %v2240_v40 }
 0x4f3   :  { %2120 = vmatprep.mubr.msk.f32.mxu1 %vm344_vm4, %v739_v59 }
 0x4f4   :  { %2121 = vmatmul.mubr.msk.f32.vlgmr.msra.gmra.mxu1 %vm344_vm4, %v740_v60 }
 0x4f5   :  { %2124 = vmatpush3.xpose.msra.mxu1 %v2552_v14  ;;  %2127 = vmatprep.mubr.f32.mxu1 %v2586_v36  ;;  %v457_v36 = vsub.f32 %v442_v13, %v453_v62 }
 0x4f6   :  { %2125 = vmatprep.subr.mxu1 %v2565_v21  ;;  %v2246_v5 = vpop.eup %2245 }
 0x4f7   :  { %v459_v1 = vmul.f32 1.442695, %v457_v36  ;;  %v466_v8 = vsel %vm344_vm4, %v2246_v5, 0.0 }
 0x4f9   :  { %2126 = vmatpush3.xpose.msra.mxu1 %v2565_v21  ;;  %2247 = vpow2.f32 %v459_v1 }
 0x4fa   :  { %2144 = vmatprep.subr.mxu1 %v2588_v37 }
 0x4fc   :  { %2128 = vmatmul.mubr.f32.vlgmr.msra.gmra.mxu1 %v2572_v26 }
 0x4fd   :  { %2145 = vmatpush3.msra.mxu1 %v2588_v37 }
 0x4fe   :  { %2146 = vmatprep.subr.mxu1 %v2559_v19 }
 0x4ff   :  { %2147 = vmatpush3.msra.mxu1 %v2559_v19 }
 0x500   :  { %2151 = vmatprep.subr.mxu1 %v2552_v14 }
 0x506   :  { %v2248_v7 = vpop.eup %2247 }
 0x507   :  { %v463_v9 = vsel %vm344_vm4, %v2248_v7, 0.0 }
 0x5b4   :  { %v2665_v2 = vpop.f32.mrf.mxu1 }
 0x5b6   :  { %v2667_v4 = vpop.f32.mrf.mxu1 }
 0x5bc   :  { %v2129_v26 = vpop.f32.mrf.mxu1 }
 0x5bd   :  { %v911_v37 = vsel %vm344_vm4, %v2129_v26, -inf }
 0x5be   :  { %912 = vmax.xlane.f32.xlu1 %v911_v37  ;;  %v899_v19 = vpop.f32.mrf.mxu1 }
 0x5bf   :  { %v908_v6 = vsel %vm344_vm4, %v899_v19, -inf }
 0x5c0   :  { %909 = vmax.xlane.f32.xlu0 %v908_v6 }
 0x5c2   :  { %467 = vadd.xlane.f32.xlu1 %v466_v8 }
 0x5c4   :  { %464 = vadd.xlane.f32.xlu0 %v463_v9 }
 0x647   :  { %v913_v10 = vpop.xlane.xlu1 %912 }
 0x648   :  { %v915_v11 = vsub.f32 %v2129_v26, %v913_v10 }
 0x649   :  { %v910_v12 = vpop.xlane.xlu0 %909 }
 0x64a   :  { %v918_v13 = vmul.f32 1.442695, %v915_v11  ;;  %v914_v17 = vsub.f32 %v899_v19, %v910_v12 }
 0x64b   :  { %v468_v22 = vpop.xlane.xlu1 %467 }
 0x64c   :  { %2249 = vpow2.f32 %v918_v13  ;;  %v916_v23 = vmul.f32 1.442695, %v914_v17 }
 0x64d   :  { %2251 = vrcp.f32 %v468_v22  ;;  %v465_v24 = vpop.xlane.xlu0 %464 }
 0x64e   :  { %2253 = vpow2.f32 %v916_v23 }
 0x64f   :  { %2255 = vrcp.f32 %v465_v24 }
 0x659   :  { %v2250_v25 = vpop.eup %2249 }
 0x65a   :  { %v2252_v29 = vpop.eup %2251  ;;  %v923_v30 = vsel %vm344_vm4, %v2250_v25, 0.0 }
 0x65b   :  { %v2254_v18 = vpop.eup %2253  ;;  %924 = vadd.xlane.f32.xlu1 %v923_v30  ;;  %v472_v35 = vmul.f32 %v2252_v29, %v2246_v5 }
 0x65c   :  { %v2256_v31 = vpop.eup %2255  ;;  %v920_v33 = vsel %vm344_vm4, %v2254_v18, 0.0 }
 0x65d   :  { %921 = vadd.xlane.f32.xlu0 %v920_v33  ;;  %v471_v34 = vmul.f32 %v2256_v31, %v2248_v7 }
 0x65f   :  { %2099 = vmatprep.mubr.msk.f32.mxu0 %vm344_vm4, %v471_v34 }
 0x660   :  { %2100 = vmatmul.mubr.msk.f32.vlgmr.msra.gmra.mxu0 %vm344_vm4, %v472_v35 }
 0x661   :  { %2131 = vmatpush3.msra.mxu0 %v2580_v32 }
 0x662   :  { %2132 = vmatprep.subr.mxu0 %v2562_v20 }
 0x663   :  { %2133 = vmatpush3.msra.mxu0 %v2562_v20 }
 0x664   :  { %2137 = vmatprep.subr.mxu0 %v2552_v14 }
 0x6e4   :  { %v925_v40 = vpop.xlane.xlu1 %924 }
 0x6e5   :  { %2257 = vrcp.f32 %v925_v40 }
 0x6e6   :  { %v922_v52 = vpop.xlane.xlu0 %921 }
 0x6e7   :  { %2259 = vrcp.f32 %v922_v52 }
 0x6f2   :  { %v2258_v53 = vpop.eup %2257 }
 0x6f3   :  { %v929_v56 = vmul.f32 %v2258_v53, %v2250_v25 }
 0x6f4   :  { %v2260_v54 = vpop.eup %2259 }
 0x6f5   :  { %v928_v55 = vmul.f32 %v2260_v54, %v2254_v18 }
 0x6f7   :  { %2134 = vmatprep.mubr.msk.f32.mxu0 %vm344_vm4, %v928_v55 }
 0x6f8   :  { %2135 = vmatmul.mubr.msk.f32.vlgmr.msra.gmra.mxu0 %vm344_vm4, %v929_v56 }
 0x6f9   :  { %2138 = vmatpush3.xpose.msra.mxu0 %v2552_v14  ;;  %2141 = vmatprep.mubr.f32.mxu0 %v2590_v38 }
 0x6fa   :  { %2139 = vmatprep.subr.mxu0 %v2565_v21 }
 0x6fd   :  { %2140 = vmatpush3.xpose.msra.mxu0 %v2565_v21 }
 0x6fe   :  { %2158 = vmatprep.subr.mxu0 %v2592_v39 }
 0x700   :  { %2142 = vmatmul.mubr.f32.vlgmr.msra.gmra.mxu0 %v2574_v27 }
 0x701   :  { %2159 = vmatpush3.msra.mxu0 %v2592_v39 }
 0x702   :  { %2160 = vmatprep.subr.mxu0 %v2577_v28 }
 0x703   :  { %2161 = vmatpush3.msra.mxu0 %v2577_v28 }
 0x704   :  { %2165 = vmatprep.subr.mxu0 %v2552_v14 }
 0x720   :  { %v2101_v20 = vpop.f32.mrf.mxu0 }
 0x721   :  { %v634_v32 = vadd.f32 %v2643_v15, %v2101_v20 }
 0x722   :  { %v547_v38 = vpop.f32.mrf.mxu0 }
 0x723   :  { %v825_v57 = vadd.f32 %v2665_v2, %v634_v32  ;;  %v629_v11 = vadd.f32 %v2645_v16, %v547_v38 }
 0x7b8   :  { %v2136_v58 = vpop.f32.mrf.mxu0 }
 0x7b9   :  { %v1014_v59 = vadd.f32 %v2136_v58, %v825_v57 }
 0x7ba   :  { %v1004_v60 = vpop.f32.mrf.mxu0 }
 0x7c0   :  { %v2143_v61 = vpop.f32.mrf.mxu0 }
 0x7c1   :  { %v1100_v27 = vsel %vm344_vm4, %v2143_v61, -inf }
 0x7c2   :  { %1101 = vmax.xlane.f32.xlu1 %v1100_v27  ;;  %v1088_v39 = vpop.f32.mrf.mxu0 }
 0x7c3   :  { %v1097_v62 = vsel %vm344_vm4, %v1088_v39, -inf }
 0x7c4   :  { %1098 = vmax.xlane.f32.xlu0 %v1097_v62 }
 0x84b   :  { %v1102_v28 = vpop.xlane.xlu1 %1101 }
 0x84c   :  { %v1104_v63 = vsub.f32 %v2143_v61, %v1102_v28 }
 0x84d   :  { %v1099_v36 = vpop.xlane.xlu0 %1098 }
 0x84e   :  { %v1107_v0 = vmul.f32 1.442695, %v1104_v63  ;;  %v1103_v1 = vsub.f32 %v1088_v39, %v1099_v36 }
 0x850   :  { %2261 = vpow2.f32 %v1107_v0  ;;  %v1105_v15 = vmul.f32 1.442695, %v1103_v1 }
 0x852   :  { %2263 = vpow2.f32 %v1105_v15 }
 0x85d   :  { %v2262_v2 = vpop.eup %2261 }
 0x85e   :  { %v1112_v26 = vsel %vm344_vm4, %v2262_v2, 0.0 }
 0x85f   :  { %v2264_v37 = vpop.eup %2263  ;;  %1113 = vadd.xlane.f32.xlu1 %v1112_v26 }
 0x860   :  { %v1109_v5 = vsel %vm344_vm4, %v2264_v37, 0.0 }
 0x861   :  { %1110 = vadd.xlane.f32.xlu0 %v1109_v5 }
 0x8e8   :  { %v1114_v19 = vpop.xlane.xlu1 %1113 }
 0x8e9   :  { %2265 = vrcp.f32 %v1114_v19 }
 0x8ea   :  { %v1111_v6 = vpop.xlane.xlu0 %1110 }
 0x8eb   :  { %2267 = vrcp.f32 %v1111_v6 }
 0x8f6   :  { %v2266_v7 = vpop.eup %2265 }
 0x8f7   :  { %v1118_v10 = vmul.f32 %v2266_v7, %v2262_v2 }
 0x8f8   :  { %v2268_v8 = vpop.eup %2267 }
 0x8f9   :  { %v1117_v9 = vmul.f32 %v2268_v8, %v2264_v37 }
 0x8fb   :  { %2148 = vmatprep.mubr.msk.f32.mxu1 %vm344_vm4, %v1117_v9 }
 0x8fc   :  { %2149 = vmatmul.mubr.msk.f32.vlgmr.msra.gmra.mxu1 %vm344_vm4, %v1118_v10 }
 0x8fd   :  { %2152 = vmatpush3.xpose.msra.mxu1 %v2552_v14  ;;  %2155 = vmatprep.mubr.f32.mxu1 %v2598_v41  ;;  %v824_v41 = vadd.f32 %v2667_v4, %v629_v11 }
 0x8fe   :  { %2153 = vmatprep.subr.mxu1 %v2565_v21 }
 0x8ff   :  { %v1013_v13 = vadd.f32 %v1004_v60, %v824_v41 }
 0x901   :  { %2154 = vmatpush3.xpose.msra.mxu1 %v2565_v21 }
 0x902   :  { %2172 = vmatprep.subr.mxu1 %v2600_v42 }
 0x904   :  { %2156 = vmatmul.mubr.f32.vlgmr.msra.gmra.mxu1 %v2602_v43 }
 0x905   :  { %2173 = vmatpush3.msra.mxu1 %v2600_v42 }
 0x906   :  { %2174 = vmatprep.subr.mxu1 %v2606_v44 }
 0x907   :  { %2175 = vmatpush3.msra.mxu1 %v2606_v44 }
 0x908   :  { %2179 = vmatprep.subr.mxu1 %v2552_v14 }
 0x9bc   :  { %v2150_v12 = vpop.f32.mrf.mxu1 }
 0x9bd   :  { %v1203_v17 = vadd.f32 %v2150_v12, %v1014_v59 }
 0x9be   :  { %v1193_v22 = vpop.f32.mrf.mxu1 }
 0x9bf   :  { %v1202_v23 = vadd.f32 %v1193_v22, %v1013_v13 }
 0x9c4   :  { %v2157_v24 = vpop.f32.mrf.mxu1 }
 0x9c5   :  { %v1289_v43 = vsel %vm344_vm4, %v2157_v24, -inf }
 0x9c6   :  { %1290 = vmax.xlane.f32.xlu1 %v1289_v43  ;;  %v1277_v42 = vpop.f32.mrf.mxu1 }
 0x9c7   :  { %v1286_v25 = vsel %vm344_vm4, %v1277_v42, -inf }
 0x9c8   :  { %1287 = vmax.xlane.f32.xlu0 %v1286_v25 }
 0xa4f   :  { %v1291_v44 = vpop.xlane.xlu1 %1290 }
 0xa50   :  { %v1293_v29 = vsub.f32 %v2157_v24, %v1291_v44  ;;  %v1786_v24 = vld [vmem:[%s2822_s6 + $0x78] sm:$0xff] }
 0xa51   :  { %v1288_v30 = vpop.xlane.xlu0 %1287 }
 0xa52   :  { %v1296_v18 = vmul.f32 1.442695, %v1293_v29  ;;  %v1292_v16 = vsub.f32 %v1277_v42, %v1288_v30 }
 0xa54   :  { %2269 = vpow2.f32 %v1296_v18  ;;  %v1294_v4 = vmul.f32 1.442695, %v1292_v16  ;;  %v1785_v18 = vld [vmem:[%s2822_s6 + $0x70] sm:$0xff]  ;;  %v1784_v16 = vld [vmem:[%s2822_s6 + $0x68] sm:$0xff] }
 0xa56   :  { %2271 = vpow2.f32 %v1294_v4  ;;  %v1783_v4 = vld [vmem:[%s2822_s6 + $0x60] sm:$0xff] }
 0xa61   :  { %v2270_v31 = vpop.eup %2269 }
 0xa62   :  { %v1301_v33 = vsel %vm344_vm4, %v2270_v31, 0.0 }
 0xa63   :  { %v2272_v34 = vpop.eup %2271  ;;  %1302 = vadd.xlane.f32.xlu1 %v1301_v33  ;;  %v1781_v33 = vld [vmem:[%s2822_s6 + $0x50] sm:$0xff] }
 0xa64   :  { %v1298_v35 = vsel %vm344_vm4, %v2272_v34, 0.0 }
 0xa65   :  { %1299 = vadd.xlane.f32.xlu0 %v1298_v35  ;;  %v1779_v35 = vld [vmem:[%s2822_s6 + $0x40] sm:$0xff] }
 0xaec   :  { %v1303_v40 = vpop.xlane.xlu1 %1302 }
 0xaed   :  { %2273 = vrcp.f32 %v1303_v40  ;;  %v1778_v40 = vld [vmem:[%s2822_s6 + $0x38] sm:$0xff] }
 0xaee   :  { %v1300_v52 = vpop.xlane.xlu0 %1299 }
 0xaef   :  { %2275 = vrcp.f32 %v1300_v52  ;;  %v1777_v52 = vld [vmem:[%s2822_s6 + $0x30] sm:$0xff] }
 0xafa   :  { %v2274_v53 = vpop.eup %2273 }
 0xafb   :  { %v1307_v56 = vmul.f32 %v2274_v53, %v2270_v31  ;;  %v1782_v31 = vld [vmem:[%s2822_s6 + $0x58] sm:$0xff]  ;;  %v1776_v53 = vld [vmem:[%s2822_s6 + $0x28] sm:$0xff] }
 0xafc   :  { %v2276_v54 = vpop.eup %2275 }
 0xafd   :  { %v1306_v55 = vmul.f32 %v2276_v54, %v2272_v34  ;;  %v1780_v34 = vld [vmem:[%s2822_s6 + $0x48] sm:$0xff]  ;;  %v1775_v54 = vld [vmem:[%s2822_s6 + $0x20] sm:$0xff] }
 0xaff   :  { %2162 = vmatprep.mubr.msk.f32.mxu0 %vm344_vm4, %v1306_v55  ;;  %v1774_v55 = vld [vmem:[%s2822_s6 + $0x18] sm:$0xff] }
 0xb00   :  { %2163 = vmatmul.mubr.msk.f32.vlgmr.msra.gmra.mxu0 %vm344_vm4, %v1307_v56  ;;  %v1773_v56 = vld [vmem:[%s2822_s6 + $0x10] sm:$0xff] }
 0xb01   :  { %2166 = vmatpush3.xpose.msra.mxu0 %v2552_v14  ;;  %2169 = vmatprep.mubr.f32.mxu0 %v2608_v45 }
 0xb02   :  { %2167 = vmatprep.subr.mxu0 %v2565_v21 }
 0xb05   :  { %2168 = vmatpush3.xpose.msra.mxu0 %v2565_v21 }
 0xb06   :  { %2186 = vmatprep.subr.mxu0 %v2610_v46 }
 0xb08   :  { %2170 = vmatmul.mubr.f32.vlgmr.msra.gmra.mxu0 %v2612_v3 }
 0xb09   :  { %2187 = vmatpush3.msra.mxu0 %v2610_v46 }
 0xb0a   :  { %2188 = vmatprep.subr.mxu0 %v2615_v47 }
 0xb0b   :  { %2189 = vmatpush3.msra.mxu0 %v2615_v47 }
 0xb0c   :  { %2193 = vmatprep.subr.mxu0 %v1786_v24 }
 0xbc0   :  { %v2164_v20 = vpop.f32.mrf.mxu0 }
 0xbc1   :  { %v1392_v32 = vadd.f32 %v2164_v20, %v1203_v17  ;;  %v1772_v20 = vld [vmem:[%s2822_s6 + $0x8] sm:$0xff] }
 0xbc2   :  { %v1382_v38 = vpop.f32.mrf.mxu0 }
 0xbc3   :  { %v1391_v57 = vadd.f32 %v1382_v38, %v1202_v23 }
 0xbc8   :  { %v2171_v58 = vpop.f32.mrf.mxu0 }
 0xbc9   :  { %v1478_v45 = vsel %vm344_vm4, %v2171_v58, -inf }
 0xbca   :  { %1479 = vmax.xlane.f32.xlu1 %v1478_v45  ;;  %v1466_v59 = vpop.f32.mrf.mxu0 }
 0xbcb   :  { %v1475_v60 = vsel %vm344_vm4, %v1466_v59, -inf }
 0xbcc   :  { %1476 = vmax.xlane.f32.xlu0 %v1475_v60 }
 0xc53   :  { %v1480_v61 = vpop.xlane.xlu1 %1479 }
 0xc54   :  { %v1482_v3 = vsub.f32 %v2171_v58, %v1480_v61 }
 0xc55   :  { %v1477_v27 = vpop.xlane.xlu0 %1476 }
 0xc56   :  { %v1485_v46 = vmul.f32 1.442695, %v1482_v3  ;;  %v1481_v39 = vsub.f32 %v1466_v59, %v1477_v27  ;;  %v1943_v59 = vld [vmem:[%s2823_s7] ss:$0 sm:$0xff] }
 0xc58   :  { %2277 = vpow2.f32 %v1485_v46  ;;  %v1483_v62 = vmul.f32 1.442695, %v1481_v39 }
 0xc5a   :  { %2279 = vpow2.f32 %v1483_v62 }
 0xc65   :  { %v2278_v47 = vpop.eup %2277 }
 0xc66   :  { %v1490_v28 = vsel %vm344_vm4, %v2278_v47, 0.0 }
 0xc67   :  { %v2280_v63 = vpop.eup %2279  ;;  %1491 = vadd.xlane.f32.xlu1 %v1490_v28 }
 0xc68   :  { %v1487_v36 = vsel %vm344_vm4, %v2280_v63, 0.0 }
 0xc69   :  { %1488 = vadd.xlane.f32.xlu0 %v1487_v36 }
 0xcf0   :  { %v1492_v0 = vpop.xlane.xlu1 %1491 }
 0xcf1   :  { %2281 = vrcp.f32 %v1492_v0 }
 0xcf2   :  { %v1489_v1 = vpop.xlane.xlu0 %1488 }
 0xcf3   :  { %2283 = vrcp.f32 %v1489_v1 }
 0xcfe   :  { %v2282_v15 = vpop.eup %2281 }
 0xcff   :  { %v1496_v37 = vmul.f32 %v2282_v15, %v2278_v47 }
 0xd00   :  { %v2284_v2 = vpop.eup %2283 }
 0xd01   :  { %v1495_v26 = vmul.f32 %v2284_v2, %v2280_v63 }
 0xd03   :  { %2176 = vmatprep.mubr.msk.f32.mxu1 %vm344_vm4, %v1495_v26 }
 0xd04   :  { %2177 = vmatmul.mubr.msk.f32.vlgmr.msra.gmra.mxu1 %vm344_vm4, %v1496_v37 }
 0xd05   :  { %2180 = vmatpush3.xpose.msra.mxu1 %v2552_v14  ;;  %2183 = vmatprep.mubr.f32.mxu1 %v2617_v48 }
 0xd06   :  { %2181 = vmatprep.subr.mxu1 %v2565_v21 }
 0xd09   :  { %2182 = vmatpush3.xpose.msra.mxu1 %v2565_v21 }
 0xd0c   :  { %2184 = vmatmul.mubr.f32.vlgmr.msra.gmra.mxu1 %v2619_v49 }
 0xdc4   :  { %v2178_v5 = vpop.f32.mrf.mxu1 }
 0xdc5   :  { %v2739_v19 = vadd.f32 %v2178_v5, %v1392_v32  ;;  %v1771_v32 = vld [vmem:[%s2822_s6] sm:$0xff] }
 0xdc6   :  { %v1571_v6 = vpop.f32.mrf.mxu1 }
 0xdc7   :  { %v2741_v7 = vadd.f32 %v1571_v6, %v1391_v57  ;;  %v1944_v6 = vld [vmem:[%s2824_s8] ss:$0 sm:$0xff] }
 0xdcc   :  { %v2185_v8 = vpop.f32.mrf.mxu1 }
 0xdcd   :  { %v1667_v9 = vsel %vm344_vm4, %v2185_v8, -inf }
 0xdce   :  { %1668 = vmax.xlane.f32.xlu1 %v1667_v9  ;;  %v1655_v10 = vpop.f32.mrf.mxu1  ;;  %v1945_v9 = vld [vmem:[%s2825_s9] ss:$0 sm:$0xff] }
 0xdcf   :  { %v1664_v14 = vsel %vm344_vm4, %v1655_v10, -inf }
 0xdd0   :  { %1665 = vmax.xlane.f32.xlu0 %v1664_v14 }
 0xe57   :  { %v1669_v48 = vpop.xlane.xlu1 %1668 }
 0xe58   :  { %v1671_v11 = vsub.f32 %v2185_v8, %v1669_v48 }
 0xe59   :  { %v1666_v41 = vpop.xlane.xlu0 %1665 }
 0xe5a   :  { %v1674_v21 = vmul.f32 1.442695, %v1671_v11  ;;  %v1670_v12 = vsub.f32 %v1655_v10, %v1666_v41 }
 0xe5c   :  { %2285 = vpow2.f32 %v1674_v21  ;;  %v1672_v49 = vmul.f32 1.442695, %v1670_v12 }
 0xe5e   :  { %2287 = vpow2.f32 %v1672_v49 }
 0xe69   :  { %v2286_v13 = vpop.eup %2285 }
 0xe6a   :  { %v1679_v17 = vsel %vm344_vm4, %v2286_v13, 0.0 }
 0xe6b   :  { %v2288_v22 = vpop.eup %2287  ;;  %1680 = vadd.xlane.f32.xlu1 %v1679_v17 }
 0xe6c   :  { %v1676_v23 = vsel %vm344_vm4, %v2288_v22, 0.0 }
 0xe6d   :  { %1677 = vadd.xlane.f32.xlu0 %v1676_v23 }
 0xef4   :  { %v1681_v43 = vpop.xlane.xlu1 %1680 }
 0xef5   :  { %2289 = vrcp.f32 %v1681_v43 }
 0xef6   :  { %v1678_v42 = vpop.xlane.xlu0 %1677 }
 0xef7   :  { %2291 = vrcp.f32 %v1678_v42 }
 0xf02   :  { %v2290_v25 = vpop.eup %2289 }
 0xf03   :  { %v1685_v30 = vmul.f32 %v2290_v25, %v2286_v13 }
 0xf04   :  { %v2292_v44 = vpop.eup %2291 }
 0xf05   :  { %v1684_v29 = vmul.f32 %v2292_v44, %v2288_v22 }
 0xf07   :  { %2190 = vmatprep.mubr.msk.f32.mxu0 %vm344_vm4, %v1684_v29 }
 0xf08   :  { %2191 = vmatmul.mubr.msk.f32.vlgmr.msra.gmra.mxu0 %vm344_vm4, %v1685_v30 }
 0xf09   :  { %2194 = vmatpush3.msra.mxu0 %v1786_v24 }
 0xf0a   :  { %2195 = vmatprep.subr.mxu0 %v1785_v18 }
 0xf0b   :  { %2196 = vmatpush3.msra.mxu0 %v1785_v18 }
 0xf0c   :  { %2197 = vmatprep.subr.mxu0 %v1784_v16 }
 0xf0d   :  { %2198 = vmatpush3.msra.mxu0 %v1784_v16 }
 0xf0e   :  { %2199 = vmatprep.subr.mxu0 %v1783_v4 }
 0xf0f   :  { %2200 = vmatpush3.msra.mxu0 %v1783_v4 }
 0xf10   :  { %2201 = vmatprep.subr.mxu0 %v1782_v31 }
 0xf11   :  { %2202 = vmatpush3.msra.mxu0 %v1782_v31 }
 0xf12   :  { %2203 = vmatprep.subr.mxu0 %v1781_v33 }
 0xf13   :  { %2204 = vmatpush3.msra.mxu0 %v1781_v33 }
 0xf14   :  { %2205 = vmatprep.subr.mxu0 %v1780_v34 }
 0xf15   :  { %2206 = vmatpush3.msra.mxu0 %v1780_v34 }
 0xf16   :  { %2207 = vmatprep.subr.mxu0 %v1779_v35 }
 0xf17   :  { %2208 = vmatpush3.msra.mxu0 %v1779_v35 }
 0xf18   :  { %2209 = vmatprep.subr.mxu0 %v1778_v40 }
 0xf19   :  { %2210 = vmatpush3.msra.mxu0 %v1778_v40 }
 0xf1a   :  { %2211 = vmatprep.subr.mxu0 %v1777_v52 }
 0xf1b   :  { %2212 = vmatpush3.msra.mxu0 %v1777_v52 }
 0xf1c   :  { %2213 = vmatprep.subr.mxu0 %v1776_v53 }
 0xf1d   :  { %2214 = vmatpush3.msra.mxu0 %v1776_v53 }
 0xf1e   :  { %2215 = vmatprep.subr.mxu0 %v1775_v54 }
 0xf1f   :  { %2216 = vmatpush3.msra.mxu0 %v1775_v54 }
 0xf20   :  { %2217 = vmatprep.subr.mxu0 %v1774_v55 }
 0xf21   :  { %2218 = vmatpush3.msra.mxu0 %v1774_v55 }
 0xf22   :  { %2219 = vmatprep.subr.mxu0 %v1773_v56 }
 0xf23   :  { %2220 = vmatpush3.msra.mxu0 %v1773_v56 }
 0xf24   :  { %2221 = vmatprep.subr.mxu0 %v1772_v20 }
 0xf25   :  { %2222 = vmatpush3.msra.mxu0 %v1772_v20 }
 0xf26   :  { %2223 = vmatprep.subr.mxu0 %v1771_v32 }
 0xf27   :  { %2224 = vmatpush3.msra.mxu0 %v1771_v32 }
 0xfc8   :  { %v2192_v38 = vpop.f32.mrf.mxu0 }
 0xfc9   :  { %v1770_v45 = vadd.f32 %v2192_v38, %v2739_v19 }
 0xfca   :  { %v1760_v57 = vpop.f32.mrf.mxu0 }
 0xfcb   :  { %v1769_v58 = vadd.f32 %v1760_v57, %v2741_v7 }
 0xfcd   :  { %2225 = vmatprep.mubr.f32.mxu0 %v1769_v58 }
 0xfce   :  { %2226 = vmatmul.mubr.f32.vlgmr.msra.gmra.mxu0 %v1770_v45 }
0x108e   :  { %v2227_v60 = vpop.f32.mrf.mxu0 }
0x108f   :  { %v1866_v61 = vadd.f32 %v2227_v60, %v1943_v59 }
0x1090   :  { %v1860_v3 = vpop.f32.mrf.mxu0 }
0x1091   :  { %v1861_v27 = vadd.f32 %v1943_v59, %v1860_v3  ;;  %v1870_v46 = vadd.f32 %v1866_v61, %v2509_v51 }
0x1093   :  { %1873 = vadd.xlane.f32.xlu1 %v1870_v46  ;;  %v1869_v39 = vadd.f32 %v1861_v27, %v2504_v50 }
0x1095   :  { %1871 = vadd.xlane.f32.xlu0 %v1869_v39 }
0x111c   :  { %v1874_v62 = vpop.xlane.xlu1 %1873 }
0x111d   :  { %v1877_v47 = vmul.f32 0.0078125, %v1874_v62 }
0x111e   :  { %v1872_v28 = vpop.xlane.xlu0 %1871 }
0x111f   :  { %v1879_v63 = vsub.f32 %v1870_v46, %v1877_v47  ;;  %v1876_v36 = vmul.f32 0.0078125, %v1872_v28 }
0x1121   :  { %v1878_v0 = vsub.f32 %v1869_v39, %v1876_v36  ;;  %v1881_v1 = vmul.f32 %v1879_v63, %v1879_v63 }
0x1123   :  { %1884 = vadd.xlane.f32.xlu1 %v1881_v1  ;;  %v1880_v15 = vmul.f32 %v1878_v0, %v1878_v0 }
0x1125   :  { %1882 = vadd.xlane.f32.xlu0 %v1880_v15 }
0x11ac   :  { %v1885_v2 = vpop.xlane.xlu1 %1884 }
0x11ad   :  { %v1887_v26 = vmul.f32 0.0078125, %v1885_v2 }
0x11ae   :  { %v1883_v37 = vpop.xlane.xlu0 %1882 }
0x11af   :  { %v1889_v5 = vadd.f32 1e-05, %v1887_v26  ;;  %v1886_v19 = vmul.f32 0.0078125, %v1883_v37 }
0x11b1   :  { %2293 = vrsqrt.f32 %v1889_v5  ;;  %v1888_v51 = vadd.f32 1e-05, %v1886_v19 }
0x11b3   :  { %2295 = vrsqrt.f32 %v1888_v51 }
0x11be   :  { %v2294_v50 = vpop.eup %2293 }
0x11bf   :  { %v1893_v7 = vmul.f32 %v2294_v50, %v1879_v63 }
0x11c0   :  { %v2296_v8 = vpop.eup %2295 }
0x11c1   :  { %v1902_v10 = vmul.f32 %v1944_v6, %v1893_v7  ;;  %v1892_v14 = vmul.f32 %v2296_v8, %v1878_v0 }
0x11c3   :  { %v1911_v48 = vadd.f32 %v1945_v9, %v1902_v10  ;;  %v1901_v11 = vmul.f32 %v1944_v6, %v1892_v14 }
0x11c5   :  { %1913 = vst [vmem:[%s2826_s10 + $0x8] sm:$0xff] %v1911_v48  ;;  %v1910_v41 = vadd.f32 %v1945_v9, %v1901_v11 }
0x11c7   :  { %1912 = vst [vmem:[%s2826_s10] sm:$0xff] %v1910_v41 }

// kernel: dtis_forward.23
= control target key start
LH: loop header
LB: loop body
LE: loop exit
PB: predicated region body
PF: predicated region fallthrough
CT: control target
= control target key end

     0   :  { %s3365_s0 = inlined_call_operand.vmem [shape: f32[1,768], index: 0, kind: input, shape index: {}]   ;;  %s3366_s1 = inlined_call_operand.vmem [shape: f32[16,128], index: 1, kind: input, shape index: {}]   ;;  %s3367_s2 = inlined_call_operand.vmem [shape: f32[16,128], index: 2, kind: input, shape index: {}]   ;;  %s3368_s3 = inlined_call_operand.vmem [shape: f32[768,512], index: 3, kind: input, shape index: {}]   ;;  %s3369_s4 = inlined_call_operand.vmem [shape: f32[1,512], index: 4, kind: input, shape index: {}]   ;;  %s3370_s5 = inlined_call_operand.vmem [shape: f32[512,128], index: 5, kind: input, shape index: {}]   ;;  %s3371_s6 = inlined_call_operand.vmem [shape: f32[1,128], index: 6, kind: input, shape index: {}]   ;;  %s3372_s7 = inlined_call_operand.vmem [shape: f32[128,128], index: 7, kind: input, shape index: {}]   ;;  %s3373_s8 = inlined_call_operand.vmem [shape: f32[128,128], index: 8, kind: input, shape index: {}]   ;;  %s3374_s9 = inlined_call_operand.vmem [shape: f32[1,128], index: 9, kind: input, shape index: {}]   ;;  %s3375_s10 = inlined_call_operand.vmem [shape: f32[128,128], index: 10, kind: input, shape index: {}]   ;;  %s3376_s11 = inlined_call_operand.vmem [shape: f32[1,128], index: 11, kind: input, shape index: {}]   ;;  %s3377_s12 = inlined_call_operand.hbm [shape: f32[1,128], index: 12, kind: output, shape index: {}]  }
   0x1   :  { %v104_v0 = vld [vmem:[%s3368_s3 + $0x1e8] sm:$0xff]  ;;  %v103_v2 = vld [vmem:[%s3368_s3 + $0x1e0] sm:$0xff] }
   0x2   :  { %v232_v1 = vld [vmem:[%s3368_s3 + $0x5e8] sm:$0xff]  ;;  %480 = vmatprep.subr.mxu0 %v104_v0  ;;  %v231_v3 = vld [vmem:[%s3368_s3 + $0x5e0] sm:$0xff] }
   0x3   :  { %551 = vmatprep.subr.mxu1 %v232_v1  ;;  %v100_v4 = vld [vmem:[%s3368_s3 + $0x1c8] sm:$0xff]  ;;  %481 = vmatpush1.msra.mxu0 %v103_v2  ;;  %v99_v6 = vld [vmem:[%s3368_s3 + $0x1c0] sm:$0xff] }
   0x4   :  { %v228_v5 = vld [vmem:[%s3368_s3 + $0x5c8] sm:$0xff]  ;;  %552 = vmatpush1.msra.mxu1 %v231_v3  ;;  %v227_v7 = vld [vmem:[%s3368_s3 + $0x5c0] sm:$0xff]  ;;  %482 = vmatprep.subr.mxu0 %v100_v4 }
   0x5   :  { %v96_v8 = vld [vmem:[%s3368_s3 + $0x1a8] sm:$0xff]  ;;  %553 = vmatprep.subr.mxu1 %v228_v5  ;;  %v95_v10 = vld [vmem:[%s3368_s3 + $0x1a0] sm:$0xff]  ;;  %483 = vmatpush1.msra.mxu0 %v99_v6 }
   0x6   :  { %v224_v9 = vld [vmem:[%s3368_s3 + $0x5a8] sm:$0xff]  ;;  %v223_v11 = vld [vmem:[%s3368_s3 + $0x5a0] sm:$0xff]  ;;  %554 = vmatpush1.msra.mxu1 %v227_v7  ;;  %484 = vmatprep.subr.mxu0 %v96_v8 }
   0x7   :  { %v92_v12 = vld [vmem:[%s3368_s3 + $0x188] sm:$0xff]  ;;  %555 = vmatprep.subr.mxu1 %v224_v9  ;;  %v91_v14 = vld [vmem:[%s3368_s3 + $0x180] sm:$0xff]  ;;  %485 = vmatpush1.msra.mxu0 %v95_v10  ;;  %v429_v10 = vlaneseq }
   0x8   :  { %v220_v13 = vld [vmem:[%s3368_s3 + $0x588] sm:$0xff]  ;;  %v219_v15 = vld [vmem:[%s3368_s3 + $0x580] sm:$0xff]  ;;  %556 = vmatpush1.msra.mxu1 %v223_v11  ;;  %486 = vmatprep.subr.mxu0 %v92_v12 }
   0x9   :  { %v88_v16 = vld [vmem:[%s3368_s3 + $0x168] sm:$0xff]  ;;  %557 = vmatprep.subr.mxu1 %v220_v13  ;;  %v87_v18 = vld [vmem:[%s3368_s3 + $0x160] sm:$0xff]  ;;  %487 = vmatpush1.msra.mxu0 %v91_v14 }
   0xa   :  { %v216_v17 = vld [vmem:[%s3368_s3 + $0x568] sm:$0xff]  ;;  %v215_v19 = vld [vmem:[%s3368_s3 + $0x560] sm:$0xff]  ;;  %558 = vmatpush1.msra.mxu1 %v219_v15  ;;  %488 = vmatprep.subr.mxu0 %v88_v16 }
   0xb   :  { %v84_v20 = vld [vmem:[%s3368_s3 + $0x148] sm:$0xff]  ;;  %559 = vmatprep.subr.mxu1 %v216_v17  ;;  %v83_v22 = vld [vmem:[%s3368_s3 + $0x140] sm:$0xff]  ;;  %489 = vmatpush1.msra.mxu0 %v87_v18 }
   0xc   :  { %v212_v21 = vld [vmem:[%s3368_s3 + $0x548] sm:$0xff]  ;;  %v211_v23 = vld [vmem:[%s3368_s3 + $0x540] sm:$0xff]  ;;  %560 = vmatpush1.msra.mxu1 %v215_v19  ;;  %490 = vmatprep.subr.mxu0 %v84_v20  ;;  %v1977_v19 = vshrl.u32 %v429_v10, 7 }
   0xd   :  { %v80_v24 = vld [vmem:[%s3368_s3 + $0x128] sm:$0xff]  ;;  %561 = vmatprep.subr.mxu1 %v212_v21  ;;  %v79_v26 = vld [vmem:[%s3368_s3 + $0x120] sm:$0xff]  ;;  %491 = vmatpush1.msra.mxu0 %v83_v22 }
   0xe   :  { %v208_v25 = vld [vmem:[%s3368_s3 + $0x528] sm:$0xff]  ;;  %v207_v27 = vld [vmem:[%s3368_s3 + $0x520] sm:$0xff]  ;;  %562 = vmatpush1.msra.mxu1 %v211_v23  ;;  %492 = vmatprep.subr.mxu0 %v80_v24  ;;  %v451_v24 = vsub.s32 5, %v1977_v19 }
   0xf   :  { %v76_v28 = vld [vmem:[%s3368_s3 + $0x108] sm:$0xff]  ;;  %563 = vmatprep.subr.mxu1 %v208_v25  ;;  %v75_v30 = vld [vmem:[%s3368_s3 + $0x100] sm:$0xff]  ;;  %493 = vmatpush1.msra.mxu0 %v79_v26  ;;  %v447_v25 = vsub.s32 4, %v1977_v19 }
  0x10   :  { %v204_v29 = vld [vmem:[%s3368_s3 + $0x508] sm:$0xff]  ;;  %v203_v31 = vld [vmem:[%s3368_s3 + $0x500] sm:$0xff]  ;;  %564 = vmatpush1.msra.mxu1 %v207_v27  ;;  %494 = vmatprep.subr.mxu0 %v76_v28 }
  0x11   :  { %v72_v32 = vld [vmem:[%s3368_s3 + $0xe8] sm:$0xff]  ;;  %565 = vmatprep.subr.mxu1 %v204_v29  ;;  %v71_v34 = vld [vmem:[%s3368_s3 + $0xe0] sm:$0xff]  ;;  %495 = vmatpush1.msra.mxu0 %v75_v30 }
  0x12   :  { %v200_v33 = vld [vmem:[%s3368_s3 + $0x4e8] sm:$0xff]  ;;  %v199_v35 = vld [vmem:[%s3368_s3 + $0x4e0] sm:$0xff]  ;;  %566 = vmatpush1.msra.mxu1 %v203_v31  ;;  %496 = vmatprep.subr.mxu0 %v72_v32 }
  0x13   :  { %v68_v36 = vld [vmem:[%s3368_s3 + $0xc8] sm:$0xff]  ;;  %567 = vmatprep.subr.mxu1 %v200_v33  ;;  %v67_v38 = vld [vmem:[%s3368_s3 + $0xc0] sm:$0xff]  ;;  %497 = vmatpush1.msra.mxu0 %v71_v34 }
  0x14   :  { %v196_v37 = vld [vmem:[%s3368_s3 + $0x4c8] sm:$0xff]  ;;  %v195_v39 = vld [vmem:[%s3368_s3 + $0x4c0] sm:$0xff]  ;;  %568 = vmatpush1.msra.mxu1 %v199_v35  ;;  %498 = vmatprep.subr.mxu0 %v68_v36 }
  0x15   :  { %v64_v40 = vld [vmem:[%s3368_s3 + $0xa8] sm:$0xff]  ;;  %569 = vmatprep.subr.mxu1 %v196_v37  ;;  %v63_v42 = vld [vmem:[%s3368_s3 + $0xa0] sm:$0xff]  ;;  %499 = vmatpush1.msra.mxu0 %v67_v38 }
  0x16   :  { %v192_v41 = vld [vmem:[%s3368_s3 + $0x4a8] sm:$0xff]  ;;  %v191_v43 = vld [vmem:[%s3368_s3 + $0x4a0] sm:$0xff]  ;;  %570 = vmatpush1.msra.mxu1 %v195_v39  ;;  %500 = vmatprep.subr.mxu0 %v64_v40 }
  0x17   :  { %v60_v44 = vld [vmem:[%s3368_s3 + $0x88] sm:$0xff]  ;;  %571 = vmatprep.subr.mxu1 %v192_v41  ;;  %v59_v46 = vld [vmem:[%s3368_s3 + $0x80] sm:$0xff]  ;;  %501 = vmatpush1.msra.mxu0 %v63_v42 }
  0x18   :  { %v188_v45 = vld [vmem:[%s3368_s3 + $0x488] sm:$0xff]  ;;  %v187_v47 = vld [vmem:[%s3368_s3 + $0x480] sm:$0xff]  ;;  %572 = vmatpush1.msra.mxu1 %v191_v43  ;;  %502 = vmatprep.subr.mxu0 %v60_v44 }
  0x19   :  { %v56_v48 = vld [vmem:[%s3368_s3 + $0x68] sm:$0xff]  ;;  %573 = vmatprep.subr.mxu1 %v188_v45  ;;  %v55_v50 = vld [vmem:[%s3368_s3 + $0x60] sm:$0xff]  ;;  %503 = vmatpush1.msra.mxu0 %v59_v46 }
  0x1a   :  { %v184_v49 = vld [vmem:[%s3368_s3 + $0x468] sm:$0xff]  ;;  %v183_v51 = vld [vmem:[%s3368_s3 + $0x460] sm:$0xff]  ;;  %574 = vmatpush1.msra.mxu1 %v187_v47  ;;  %504 = vmatprep.subr.mxu0 %v56_v48 }
  0x1b   :  { %v52_v52 = vld [vmem:[%s3368_s3 + $0x48] sm:$0xff]  ;;  %575 = vmatprep.subr.mxu1 %v184_v49  ;;  %v51_v54 = vld [vmem:[%s3368_s3 + $0x40] sm:$0xff]  ;;  %505 = vmatpush1.msra.mxu0 %v55_v50 }
  0x1c   :  { %v180_v53 = vld [vmem:[%s3368_s3 + $0x448] sm:$0xff]  ;;  %v179_v55 = vld [vmem:[%s3368_s3 + $0x440] sm:$0xff]  ;;  %576 = vmatpush1.msra.mxu1 %v183_v51  ;;  %506 = vmatprep.subr.mxu0 %v52_v52 }
  0x1d   :  { %v48_v56 = vld [vmem:[%s3368_s3 + $0x28] sm:$0xff]  ;;  %577 = vmatprep.subr.mxu1 %v180_v53  ;;  %v47_v58 = vld [vmem:[%s3368_s3 + $0x20] sm:$0xff]  ;;  %507 = vmatpush1.msra.mxu0 %v51_v54 }
  0x1e   :  { %v176_v57 = vld [vmem:[%s3368_s3 + $0x428] sm:$0xff]  ;;  %v175_v59 = vld [vmem:[%s3368_s3 + $0x420] sm:$0xff]  ;;  %578 = vmatpush1.msra.mxu1 %v179_v55  ;;  %508 = vmatprep.subr.mxu0 %v48_v56 }
  0x1f   :  { %v44_v60 = vld [vmem:[%s3368_s3 + $0x8] sm:$0xff]  ;;  %579 = vmatprep.subr.mxu1 %v176_v57  ;;  %v43_v62 = vld [vmem:[%s3368_s3] sm:$0xff]  ;;  %509 = vmatpush1.msra.mxu0 %v47_v58 }
  0x20   :  { %v172_v61 = vld [vmem:[%s3368_s3 + $0x408] sm:$0xff]  ;;  %v171_v63 = vld [vmem:[%s3368_s3 + $0x400] sm:$0xff]  ;;  %580 = vmatpush1.msra.mxu1 %v175_v59  ;;  %510 = vmatprep.subr.mxu0 %v44_v60 }
  0x21   :  { %v168_v0 = vld [vmem:[%s3368_s3 + $0x3e8] sm:$0xff]  ;;  %581 = vmatprep.subr.mxu1 %v172_v61  ;;  %v167_v2 = vld [vmem:[%s3368_s3 + $0x3e0] sm:$0xff]  ;;  %511 = vmatpush1.msra.mxu0 %v43_v62  ;;  %v435_v61 = vsub.s32 1, %v1977_v19 }
  0x22   :  { %v296_v1 = vld [vmem:[%s3368_s3 + $0x7e8] sm:$0xff]  ;;  %v295_v3 = vld [vmem:[%s3368_s3 + $0x7e0] sm:$0xff]  ;;  %582 = vmatpush1.msra.mxu1 %v171_v63  ;;  %512 = vmatprep.subr.mxu0 %v168_v0  ;;  %v431_v0 = vsub.s32 0, %v1977_v19 }
  0x23   :  { %v164_v4 = vld [vmem:[%s3368_s3 + $0x3c8] sm:$0xff]  ;;  %583 = vmatprep.subr.mxu1 %v296_v1  ;;  %v163_v6 = vld [vmem:[%s3368_s3 + $0x3c0] sm:$0xff]  ;;  %513 = vmatpush2.msra.mxu0 %v167_v2 }
  0x24   :  { %v292_v5 = vld [vmem:[%s3368_s3 + $0x7c8] sm:$0xff]  ;;  %v291_v7 = vld [vmem:[%s3368_s3 + $0x7c0] sm:$0xff]  ;;  %584 = vmatpush2.msra.mxu1 %v295_v3  ;;  %514 = vmatprep.subr.mxu0 %v164_v4  ;;  %v443_v3 = vsub.s32 3, %v1977_v19 }
  0x25   :  { %v160_v8 = vld [vmem:[%s3368_s3 + $0x3a8] sm:$0xff]  ;;  %585 = vmatprep.subr.mxu1 %v292_v5  ;;  %v159_v11 = vld [vmem:[%s3368_s3 + $0x3a0] sm:$0xff]  ;;  %515 = vmatpush2.msra.mxu0 %v163_v6  ;;  %v439_v6 = vsub.s32 2, %v1977_v19 }
  0x26   :  { %v288_v9 = vld [vmem:[%s3368_s3 + $0x7a8] sm:$0xff]  ;;  %v287_v12 = vld [vmem:[%s3368_s3 + $0x7a0] sm:$0xff]  ;;  %586 = vmatpush2.msra.mxu1 %v291_v7  ;;  %516 = vmatprep.subr.mxu0 %v160_v8 }
  0x27   :  { %v156_v13 = vld [vmem:[%s3368_s3 + $0x388] sm:$0xff]  ;;  %587 = vmatprep.subr.mxu1 %v288_v9  ;;  %v155_v15 = vld [vmem:[%s3368_s3 + $0x380] sm:$0xff]  ;;  %517 = vmatpush2.msra.mxu0 %v159_v11 }
  0x28   :  { %v284_v14 = vld [vmem:[%s3368_s3 + $0x788] sm:$0xff]  ;;  %v283_v16 = vld [vmem:[%s3368_s3 + $0x780] sm:$0xff]  ;;  %588 = vmatpush2.msra.mxu1 %v287_v12  ;;  %518 = vmatprep.subr.mxu0 %v156_v13 }
  0x29   :  { %v152_v17 = vld [vmem:[%s3368_s3 + $0x368] sm:$0xff]  ;;  %589 = vmatprep.subr.mxu1 %v284_v14  ;;  %v151_v20 = vld [vmem:[%s3368_s3 + $0x360] sm:$0xff]  ;;  %519 = vmatpush2.msra.mxu0 %v155_v15 }
  0x2a   :  { %v280_v18 = vld [vmem:[%s3368_s3 + $0x768] sm:$0xff]  ;;  %v279_v21 = vld [vmem:[%s3368_s3 + $0x760] sm:$0xff]  ;;  %590 = vmatpush2.msra.mxu1 %v283_v16  ;;  %520 = vmatprep.subr.mxu0 %v152_v17  ;;  %v106_v16 = vld [vmem:[%s3368_s3 + $0x1f8] sm:$0xff] }
  0x2b   :  { %v148_v22 = vld [vmem:[%s3368_s3 + $0x348] sm:$0xff]  ;;  %591 = vmatprep.subr.mxu1 %v280_v18  ;;  %v147_v26 = vld [vmem:[%s3368_s3 + $0x340] sm:$0xff]  ;;  %521 = vmatpush2.msra.mxu0 %v151_v20  ;;  %v105_v18 = vld [vmem:[%s3368_s3 + $0x1f0] sm:$0xff] }
  0x2c   :  { %v276_v23 = vld [vmem:[%s3368_s3 + $0x748] sm:$0xff]  ;;  %v275_v27 = vld [vmem:[%s3368_s3 + $0x740] sm:$0xff]  ;;  %592 = vmatpush2.msra.mxu1 %v279_v21  ;;  %522 = vmatprep.subr.mxu0 %v148_v22  ;;  %v102_v21 = vld [vmem:[%s3368_s3 + $0x1d8] sm:$0xff] }
  0x2d   :  { %v144_v28 = vld [vmem:[%s3368_s3 + $0x328] sm:$0xff]  ;;  %593 = vmatprep.subr.mxu1 %v276_v23  ;;  %v143_v30 = vld [vmem:[%s3368_s3 + $0x320] sm:$0xff]  ;;  %523 = vmatpush2.msra.mxu0 %v147_v26  ;;  %v101_v23 = vld [vmem:[%s3368_s3 + $0x1d0] sm:$0xff] }
  0x2e   :  { %v272_v29 = vld [vmem:[%s3368_s3 + $0x728] sm:$0xff]  ;;  %v271_v31 = vld [vmem:[%s3368_s3 + $0x720] sm:$0xff]  ;;  %594 = vmatpush2.msra.mxu1 %v275_v27  ;;  %524 = vmatprep.subr.mxu0 %v144_v28  ;;  %v97_v27 = vld [vmem:[%s3368_s3 + $0x1b0] sm:$0xff] }
  0x2f   :  { %v2014_v32 = vld [vmem:[%s3365_s0] sm:$0x3f]  ;;  %v140_v33 = vld [vmem:[%s3368_s3 + $0x308] sm:$0xff]  ;;  %595 = vmatprep.subr.mxu1 %v272_v29  ;;  %525 = vmatpush2.msra.mxu0 %v143_v30  ;;  %v94_v29 = vld [vmem:[%s3368_s3 + $0x198] sm:$0xff] }
  0x30   :  { %v268_v34 = vld [vmem:[%s3368_s3 + $0x708] sm:$0xff]  ;;  %v2023_v35 = vrot.slane %v2014_v32, %v451_v24  ;;  %v2026_v36 = vrot.slane %v2014_v32, %v447_v25  ;;  %v139_v37 = vld [vmem:[%s3368_s3 + $0x300] sm:$0xff]  ;;  %596 = vmatpush2.msra.mxu1 %v271_v31  ;;  %526 = vmatprep.subr.mxu0 %v140_v33  ;;  %v2131_v9 = vrot.slane %v2014_v32, %v435_v61  ;;  %v98_v25 = vld [vmem:[%s3368_s3 + $0x1b8] sm:$0xff] }
  0x31   :  { %v267_v38 = vld [vmem:[%s3368_s3 + $0x700] sm:$0xff]  ;;  %v136_v39 = vld [vmem:[%s3368_s3 + $0x2e8] sm:$0xff]  ;;  %597 = vmatprep.subr.mxu1 %v268_v34  ;;  %527 = vmatpush2.msra.mxu0 %v139_v37  ;;  %v2139_v11 = vrot.slane %v2014_v32, %v431_v0  ;;  %v2147_v13 = vrot.slane %v2014_v32, %v443_v3  ;;  %v2155_v15 = vrot.slane %v2014_v32, %v439_v6  ;;  %v93_v31 = vld [vmem:[%s3368_s3 + $0x190] sm:$0xff] }
  0x32   :  { %v264_v40 = vld [vmem:[%s3368_s3 + $0x6e8] sm:$0xff]  ;;  %v135_v41 = vld [vmem:[%s3368_s3 + $0x2e0] sm:$0xff]  ;;  %598 = vmatpush2.msra.mxu1 %v267_v38  ;;  %528 = vmatprep.subr.mxu0 %v136_v39  ;;  %v90_v33 = vld [vmem:[%s3368_s3 + $0x178] sm:$0xff] }
  0x33   :  { %v263_v42 = vld [vmem:[%s3368_s3 + $0x6e0] sm:$0xff]  ;;  %v132_v43 = vld [vmem:[%s3368_s3 + $0x2c8] sm:$0xff]  ;;  %599 = vmatprep.subr.mxu1 %v264_v40  ;;  %529 = vmatpush2.msra.mxu0 %v135_v41  ;;  %v89_v37 = vld [vmem:[%s3368_s3 + $0x170] sm:$0xff] }
  0x34   :  { %v260_v44 = vld [vmem:[%s3368_s3 + $0x6c8] sm:$0xff]  ;;  %v131_v45 = vld [vmem:[%s3368_s3 + $0x2c0] sm:$0xff]  ;;  %600 = vmatpush2.msra.mxu1 %v263_v42  ;;  %530 = vmatprep.subr.mxu0 %v132_v43  ;;  %v86_v39 = vld [vmem:[%s3368_s3 + $0x158] sm:$0xff] }
  0x35   :  { %v259_v46 = vld [vmem:[%s3368_s3 + $0x6c0] sm:$0xff]  ;;  %v128_v47 = vld [vmem:[%s3368_s3 + $0x2a8] sm:$0xff]  ;;  %601 = vmatprep.subr.mxu1 %v260_v44  ;;  %531 = vmatpush2.msra.mxu0 %v131_v45  ;;  %v85_v41 = vld [vmem:[%s3368_s3 + $0x150] sm:$0xff] }
  0x36   :  { %v256_v48 = vld [vmem:[%s3368_s3 + $0x6a8] sm:$0xff]  ;;  %v127_v49 = vld [vmem:[%s3368_s3 + $0x2a0] sm:$0xff]  ;;  %602 = vmatpush2.msra.mxu1 %v259_v46  ;;  %532 = vmatprep.subr.mxu0 %v128_v47  ;;  %v82_v43 = vld [vmem:[%s3368_s3 + $0x138] sm:$0xff] }
  0x37   :  { %v255_v50 = vld [vmem:[%s3368_s3 + $0x6a0] sm:$0xff]  ;;  %v124_v51 = vld [vmem:[%s3368_s3 + $0x288] sm:$0xff]  ;;  %603 = vmatprep.subr.mxu1 %v256_v48  ;;  %533 = vmatpush2.msra.mxu0 %v127_v49  ;;  %v81_v45 = vld [vmem:[%s3368_s3 + $0x130] sm:$0xff] }
  0x38   :  { %v252_v52 = vld [vmem:[%s3368_s3 + $0x688] sm:$0xff]  ;;  %v123_v53 = vld [vmem:[%s3368_s3 + $0x280] sm:$0xff]  ;;  %604 = vmatpush2.msra.mxu1 %v255_v50  ;;  %534 = vmatprep.subr.mxu0 %v124_v51  ;;  %v78_v47 = vld [vmem:[%s3368_s3 + $0x118] sm:$0xff] }
  0x39   :  { %v251_v54 = vld [vmem:[%s3368_s3 + $0x680] sm:$0xff]  ;;  %v120_v55 = vld [vmem:[%s3368_s3 + $0x268] sm:$0xff]  ;;  %605 = vmatprep.subr.mxu1 %v252_v52  ;;  %535 = vmatpush2.msra.mxu0 %v123_v53  ;;  %v77_v49 = vld [vmem:[%s3368_s3 + $0x110] sm:$0xff] }
  0x3a   :  { %v248_v56 = vld [vmem:[%s3368_s3 + $0x668] sm:$0xff]  ;;  %v119_v57 = vld [vmem:[%s3368_s3 + $0x260] sm:$0xff]  ;;  %606 = vmatpush2.msra.mxu1 %v251_v54  ;;  %536 = vmatprep.subr.mxu0 %v120_v55  ;;  %v74_v51 = vld [vmem:[%s3368_s3 + $0xf8] sm:$0xff] }
  0x3b   :  { %v247_v58 = vld [vmem:[%s3368_s3 + $0x660] sm:$0xff]  ;;  %v116_v59 = vld [vmem:[%s3368_s3 + $0x248] sm:$0xff]  ;;  %607 = vmatprep.subr.mxu1 %v248_v56  ;;  %537 = vmatpush2.msra.mxu0 %v119_v57  ;;  %v73_v53 = vld [vmem:[%s3368_s3 + $0xf0] sm:$0xff] }
  0x3c   :  { %v244_v60 = vld [vmem:[%s3368_s3 + $0x648] sm:$0xff]  ;;  %v115_v62 = vld [vmem:[%s3368_s3 + $0x240] sm:$0xff]  ;;  %608 = vmatpush2.msra.mxu1 %v247_v58  ;;  %538 = vmatprep.subr.mxu0 %v116_v59  ;;  %v70_v55 = vld [vmem:[%s3368_s3 + $0xd8] sm:$0xff] }
  0x3d   :  { %v243_v63 = vld [vmem:[%s3368_s3 + $0x640] sm:$0xff]  ;;  %v112_v1 = vld [vmem:[%s3368_s3 + $0x228] sm:$0xff]  ;;  %609 = vmatprep.subr.mxu1 %v244_v60  ;;  %539 = vmatpush2.msra.mxu0 %v115_v62  ;;  %v69_v57 = vld [vmem:[%s3368_s3 + $0xd0] sm:$0xff] }
  0x3e   :  { %v240_v2 = vld [vmem:[%s3368_s3 + $0x628] sm:$0xff]  ;;  %v111_v4 = vld [vmem:[%s3368_s3 + $0x220] sm:$0xff]  ;;  %610 = vmatpush2.msra.mxu1 %v243_v63  ;;  %540 = vmatprep.subr.mxu0 %v112_v1  ;;  %v66_v59 = vld [vmem:[%s3368_s3 + $0xb8] sm:$0xff] }
  0x3f   :  { %v239_v5 = vld [vmem:[%s3368_s3 + $0x620] sm:$0xff]  ;;  %v108_v7 = vld [vmem:[%s3368_s3 + $0x208] sm:$0xff]  ;;  %611 = vmatprep.subr.mxu1 %v240_v2  ;;  %541 = vmatpush2.msra.mxu0 %v111_v4  ;;  %v65_v62 = vld [vmem:[%s3368_s3 + $0xb0] sm:$0xff] }
  0x40   :  { %v236_v8 = vld [vmem:[%s3368_s3 + $0x608] sm:$0xff]  ;;  %v107_v10 = vld [vmem:[%s3368_s3 + $0x200] sm:$0xff]  ;;  %612 = vmatpush2.msra.mxu1 %v239_v5  ;;  %542 = vmatprep.subr.mxu0 %v108_v7  ;;  %v62_v1 = vld [vmem:[%s3368_s3 + $0x98] sm:$0xff] }
  0x41   :  { %v235_v12 = vld [vmem:[%s3368_s3 + $0x600] sm:$0xff]  ;;  %613 = vmatprep.subr.mxu1 %v236_v8  ;;  %v360_v14 = vld [vmem:[%s3368_s3 + $0x9e8] sm:$0xff]  ;;  %543 = vmatpush2.msra.mxu0 %v107_v10  ;;  %v61_v4 = vld [vmem:[%s3368_s3 + $0x90] sm:$0xff] }
  0x42   :  { %544 = vmatprep.mubr.f32.mxu0 %v2131_v9  ;;  %614 = vmatpush2.msra.mxu1 %v235_v12  ;;  %v359_v17 = vld [vmem:[%s3368_s3 + $0x9e0] sm:$0xff]  ;;  %v356_v20 = vld [vmem:[%s3368_s3 + $0x9c8] sm:$0xff]  ;;  %v58_v7 = vld [vmem:[%s3368_s3 + $0x78] sm:$0xff] }
  0x43   :  { %545 = vmatmul.mubr.f32.vlgmr.msra.gmra.mxu0 %v2139_v11  ;;  %615 = vmatprep.mubr.f32.mxu1 %v2147_v13  ;;  %v355_v22 = vld [vmem:[%s3368_s3 + $0x9c0] sm:$0xff]  ;;  %v352_v24 = vld [vmem:[%s3368_s3 + $0x9a8] sm:$0xff]  ;;  %v57_v10 = vld [vmem:[%s3368_s3 + $0x70] sm:$0xff] }
  0x44   :  { %622 = vmatprep.subr.mxu0 %v360_v14  ;;  %693 = vmatprep.subr.mxu1 %v106_v16  ;;  %v351_v26 = vld [vmem:[%s3368_s3 + $0x9a0] sm:$0xff]  ;;  %v348_v28 = vld [vmem:[%s3368_s3 + $0x988] sm:$0xff]  ;;  %v54_v14 = vld [vmem:[%s3368_s3 + $0x58] sm:$0xff] }
  0x45   :  { %616 = vmatmul.mubr.f32.vlgmr.msra.gmra.mxu1 %v2155_v15  ;;  %623 = vmatpush1.msra.mxu0 %v359_v17  ;;  %v347_v30 = vld [vmem:[%s3368_s3 + $0x980] sm:$0xff]  ;;  %v344_v32 = vld [vmem:[%s3368_s3 + $0x968] sm:$0xff]  ;;  %v53_v17 = vld [vmem:[%s3368_s3 + $0x50] sm:$0xff] }
  0x46   :  { %694 = vmatpush1.msra.mxu1 %v105_v18  ;;  %624 = vmatprep.subr.mxu0 %v356_v20  ;;  %v343_v34 = vld [vmem:[%s3368_s3 + $0x960] sm:$0xff]  ;;  %v340_v38 = vld [vmem:[%s3368_s3 + $0x948] sm:$0xff]  ;;  %v50_v20 = vld [vmem:[%s3368_s3 + $0x38] sm:$0xff] }
  0x47   :  { %695 = vmatprep.subr.mxu1 %v102_v21  ;;  %625 = vmatpush1.msra.mxu0 %v355_v22  ;;  %v339_v40 = vld [vmem:[%s3368_s3 + $0x940] sm:$0xff]  ;;  %v336_v42 = vld [vmem:[%s3368_s3 + $0x928] sm:$0xff]  ;;  %v49_v22 = vld [vmem:[%s3368_s3 + $0x30] sm:$0xff] }
  0x48   :  { %696 = vmatpush1.msra.mxu1 %v101_v23  ;;  %626 = vmatprep.subr.mxu0 %v352_v24  ;;  %v335_v44 = vld [vmem:[%s3368_s3 + $0x920] sm:$0xff]  ;;  %v332_v46 = vld [vmem:[%s3368_s3 + $0x908] sm:$0xff]  ;;  %v46_v24 = vld [vmem:[%s3368_s3 + $0x18] sm:$0xff] }
  0x49   :  { %697 = vmatprep.subr.mxu1 %v98_v25  ;;  %627 = vmatpush1.msra.mxu0 %v351_v26  ;;  %v331_v48 = vld [vmem:[%s3368_s3 + $0x900] sm:$0xff]  ;;  %v328_v50 = vld [vmem:[%s3368_s3 + $0x8e8] sm:$0xff]  ;;  %v45_v26 = vld [vmem:[%s3368_s3 + $0x10] sm:$0xff] }
  0x4a   :  { %698 = vmatpush1.msra.mxu1 %v97_v27  ;;  %628 = vmatprep.subr.mxu0 %v348_v28  ;;  %v327_v52 = vld [vmem:[%s3368_s3 + $0x8e0] sm:$0xff]  ;;  %v324_v54 = vld [vmem:[%s3368_s3 + $0x8c8] sm:$0xff]  ;;  %v170_v28 = vld [vmem:[%s3368_s3 + $0x3f8] sm:$0xff] }
  0x4b   :  { %699 = vmatprep.subr.mxu1 %v94_v29  ;;  %629 = vmatpush1.msra.mxu0 %v347_v30  ;;  %v323_v56 = vld [vmem:[%s3368_s3 + $0x8c0] sm:$0xff]  ;;  %v320_v58 = vld [vmem:[%s3368_s3 + $0x8a8] sm:$0xff]  ;;  %v169_v30 = vld [vmem:[%s3368_s3 + $0x3f0] sm:$0xff] }
  0x4c   :  { %700 = vmatpush1.msra.mxu1 %v93_v31  ;;  %630 = vmatprep.subr.mxu0 %v344_v32  ;;  %v319_v60 = vld [vmem:[%s3368_s3 + $0x8a0] sm:$0xff]  ;;  %v316_v63 = vld [vmem:[%s3368_s3 + $0x888] sm:$0xff]  ;;  %v166_v32 = vld [vmem:[%s3368_s3 + $0x3d8] sm:$0xff] }
  0x4d   :  { %701 = vmatprep.subr.mxu1 %v90_v33  ;;  %631 = vmatpush1.msra.mxu0 %v343_v34  ;;  %v315_v2 = vld [vmem:[%s3368_s3 + $0x880] sm:$0xff]  ;;  %v312_v5 = vld [vmem:[%s3368_s3 + $0x868] sm:$0xff]  ;;  %v165_v34 = vld [vmem:[%s3368_s3 + $0x3d0] sm:$0xff] }
  0x4e   :  { %702 = vmatpush1.msra.mxu1 %v89_v37  ;;  %632 = vmatprep.subr.mxu0 %v340_v38  ;;  %v311_v8 = vld [vmem:[%s3368_s3 + $0x860] sm:$0xff]  ;;  %v308_v12 = vld [vmem:[%s3368_s3 + $0x848] sm:$0xff]  ;;  %v162_v38 = vld [vmem:[%s3368_s3 + $0x3b8] sm:$0xff] }
  0x4f   :  { %703 = vmatprep.subr.mxu1 %v86_v39  ;;  %633 = vmatpush1.msra.mxu0 %v339_v40  ;;  %v307_v16 = vld [vmem:[%s3368_s3 + $0x840] sm:$0xff]  ;;  %v304_v18 = vld [vmem:[%s3368_s3 + $0x828] sm:$0xff]  ;;  %v161_v40 = vld [vmem:[%s3368_s3 + $0x3b0] sm:$0xff] }
  0x50   :  { %704 = vmatpush1.msra.mxu1 %v85_v41  ;;  %634 = vmatprep.subr.mxu0 %v336_v42  ;;  %v303_v21 = vld [vmem:[%s3368_s3 + $0x820] sm:$0xff]  ;;  %v300_v23 = vld [vmem:[%s3368_s3 + $0x808] sm:$0xff]  ;;  %v158_v42 = vld [vmem:[%s3368_s3 + $0x398] sm:$0xff] }
  0x51   :  { %705 = vmatprep.subr.mxu1 %v82_v43  ;;  %635 = vmatpush1.msra.mxu0 %v335_v44  ;;  %v299_v25 = vld [vmem:[%s3368_s3 + $0x800] sm:$0xff]  ;;  %v424_v27 = vld [vmem:[%s3368_s3 + $0xbe8] sm:$0xff]  ;;  %v157_v44 = vld [vmem:[%s3368_s3 + $0x390] sm:$0xff] }
  0x52   :  { %706 = vmatpush1.msra.mxu1 %v81_v45  ;;  %636 = vmatprep.subr.mxu0 %v332_v46  ;;  %v423_v29 = vld [vmem:[%s3368_s3 + $0xbe0] sm:$0xff]  ;;  %v420_v31 = vld [vmem:[%s3368_s3 + $0xbc8] sm:$0xff]  ;;  %v154_v46 = vld [vmem:[%s3368_s3 + $0x378] sm:$0xff] }
  0x53   :  { %707 = vmatprep.subr.mxu1 %v78_v47  ;;  %637 = vmatpush1.msra.mxu0 %v331_v48  ;;  %v419_v33 = vld [vmem:[%s3368_s3 + $0xbc0] sm:$0xff]  ;;  %v416_v37 = vld [vmem:[%s3368_s3 + $0xba8] sm:$0xff]  ;;  %v153_v48 = vld [vmem:[%s3368_s3 + $0x370] sm:$0xff] }
  0x54   :  { %708 = vmatpush1.msra.mxu1 %v77_v49  ;;  %638 = vmatprep.subr.mxu0 %v328_v50  ;;  %v415_v39 = vld [vmem:[%s3368_s3 + $0xba0] sm:$0xff]  ;;  %v412_v41 = vld [vmem:[%s3368_s3 + $0xb88] sm:$0xff]  ;;  %v150_v50 = vld [vmem:[%s3368_s3 + $0x358] sm:$0xff] }
  0x55   :  { %709 = vmatprep.subr.mxu1 %v74_v51  ;;  %639 = vmatpush1.msra.mxu0 %v327_v52  ;;  %v411_v43 = vld [vmem:[%s3368_s3 + $0xb80] sm:$0xff]  ;;  %v408_v45 = vld [vmem:[%s3368_s3 + $0xb68] sm:$0xff]  ;;  %v149_v52 = vld [vmem:[%s3368_s3 + $0x350] sm:$0xff] }
  0x56   :  { %710 = vmatpush1.msra.mxu1 %v73_v53  ;;  %640 = vmatprep.subr.mxu0 %v324_v54  ;;  %v407_v47 = vld [vmem:[%s3368_s3 + $0xb60] sm:$0xff]  ;;  %v404_v49 = vld [vmem:[%s3368_s3 + $0xb48] sm:$0xff]  ;;  %v146_v54 = vld [vmem:[%s3368_s3 + $0x338] sm:$0xff] }
  0x57   :  { %711 = vmatprep.subr.mxu1 %v70_v55  ;;  %641 = vmatpush1.msra.mxu0 %v323_v56  ;;  %v403_v51 = vld [vmem:[%s3368_s3 + $0xb40] sm:$0xff]  ;;  %v400_v53 = vld [vmem:[%s3368_s3 + $0xb28] sm:$0xff]  ;;  %v145_v56 = vld [vmem:[%s3368_s3 + $0x330] sm:$0xff] }
  0x58   :  { %712 = vmatpush1.msra.mxu1 %v69_v57  ;;  %642 = vmatprep.subr.mxu0 %v320_v58  ;;  %v399_v55 = vld [vmem:[%s3368_s3 + $0xb20] sm:$0xff]  ;;  %v396_v57 = vld [vmem:[%s3368_s3 + $0xb08] sm:$0xff]  ;;  %v142_v58 = vld [vmem:[%s3368_s3 + $0x318] sm:$0xff] }
  0x59   :  { %713 = vmatprep.subr.mxu1 %v66_v59  ;;  %643 = vmatpush1.msra.mxu0 %v319_v60  ;;  %v395_v59 = vld [vmem:[%s3368_s3 + $0xb00] sm:$0xff]  ;;  %v141_v60 = vld [vmem:[%s3368_s3 + $0x310] sm:$0xff] }
  0x5a   :  { %714 = vmatpush1.msra.mxu1 %v65_v62  ;;  %644 = vmatprep.subr.mxu0 %v316_v63  ;;  %v392_v62 = vld [vmem:[%s3368_s3 + $0xae8] sm:$0xff]  ;;  %v138_v63 = vld [vmem:[%s3368_s3 + $0x2f8] sm:$0xff] }
  0x5b   :  { %715 = vmatprep.subr.mxu1 %v62_v1  ;;  %645 = vmatpush1.msra.mxu0 %v315_v2  ;;  %v391_v1 = vld [vmem:[%s3368_s3 + $0xae0] sm:$0xff]  ;;  %v137_v2 = vld [vmem:[%s3368_s3 + $0x2f0] sm:$0xff] }
  0x5c   :  { %716 = vmatpush1.msra.mxu1 %v61_v4  ;;  %646 = vmatprep.subr.mxu0 %v312_v5  ;;  %v388_v4 = vld [vmem:[%s3368_s3 + $0xac8] sm:$0xff]  ;;  %v134_v5 = vld [vmem:[%s3368_s3 + $0x2d8] sm:$0xff] }
  0x5d   :  { %717 = vmatprep.subr.mxu1 %v58_v7  ;;  %647 = vmatpush1.msra.mxu0 %v311_v8  ;;  %v387_v7 = vld [vmem:[%s3368_s3 + $0xac0] sm:$0xff]  ;;  %v133_v8 = vld [vmem:[%s3368_s3 + $0x2d0] sm:$0xff] }
  0x5e   :  { %718 = vmatpush1.msra.mxu1 %v57_v10  ;;  %648 = vmatprep.subr.mxu0 %v308_v12  ;;  %v384_v10 = vld [vmem:[%s3368_s3 + $0xaa8] sm:$0xff]  ;;  %v130_v12 = vld [vmem:[%s3368_s3 + $0x2b8] sm:$0xff] }
  0x5f   :  { %719 = vmatprep.subr.mxu1 %v54_v14  ;;  %649 = vmatpush1.msra.mxu0 %v307_v16  ;;  %v383_v14 = vld [vmem:[%s3368_s3 + $0xaa0] sm:$0xff]  ;;  %v129_v16 = vld [vmem:[%s3368_s3 + $0x2b0] sm:$0xff] }
  0x60   :  { %720 = vmatpush1.msra.mxu1 %v53_v17  ;;  %650 = vmatprep.subr.mxu0 %v304_v18  ;;  %v380_v17 = vld [vmem:[%s3368_s3 + $0xa88] sm:$0xff]  ;;  %v126_v18 = vld [vmem:[%s3368_s3 + $0x298] sm:$0xff] }
  0x61   :  { %721 = vmatprep.subr.mxu1 %v50_v20  ;;  %651 = vmatpush1.msra.mxu0 %v303_v21  ;;  %v379_v20 = vld [vmem:[%s3368_s3 + $0xa80] sm:$0xff]  ;;  %v125_v21 = vld [vmem:[%s3368_s3 + $0x290] sm:$0xff] }
  0x62   :  { %722 = vmatpush1.msra.mxu1 %v49_v22  ;;  %652 = vmatprep.subr.mxu0 %v300_v23  ;;  %v376_v22 = vld [vmem:[%s3368_s3 + $0xa68] sm:$0xff]  ;;  %v122_v23 = vld [vmem:[%s3368_s3 + $0x278] sm:$0xff] }
  0x63   :  { %723 = vmatprep.subr.mxu1 %v46_v24  ;;  %653 = vmatpush1.msra.mxu0 %v299_v25  ;;  %v375_v24 = vld [vmem:[%s3368_s3 + $0xa60] sm:$0xff]  ;;  %v121_v25 = vld [vmem:[%s3368_s3 + $0x270] sm:$0xff] }
  0x64   :  { %724 = vmatpush1.msra.mxu1 %v45_v26  ;;  %654 = vmatprep.subr.mxu0 %v424_v27  ;;  %v372_v26 = vld [vmem:[%s3368_s3 + $0xa48] sm:$0xff]  ;;  %v118_v27 = vld [vmem:[%s3368_s3 + $0x258] sm:$0xff] }
  0x65   :  { %725 = vmatprep.subr.mxu1 %v170_v28  ;;  %655 = vmatpush2.msra.mxu0 %v423_v29  ;;  %v371_v28 = vld [vmem:[%s3368_s3 + $0xa40] sm:$0xff]  ;;  %v117_v29 = vld [vmem:[%s3368_s3 + $0x250] sm:$0xff] }
  0x66   :  { %726 = vmatpush2.msra.mxu1 %v169_v30  ;;  %656 = vmatprep.subr.mxu0 %v420_v31  ;;  %v368_v30 = vld [vmem:[%s3368_s3 + $0xa28] sm:$0xff]  ;;  %v114_v31 = vld [vmem:[%s3368_s3 + $0x238] sm:$0xff] }
  0x67   :  { %727 = vmatprep.subr.mxu1 %v166_v32  ;;  %657 = vmatpush2.msra.mxu0 %v419_v33  ;;  %v367_v32 = vld [vmem:[%s3368_s3 + $0xa20] sm:$0xff]  ;;  %v113_v33 = vld [vmem:[%s3368_s3 + $0x230] sm:$0xff] }
  0x68   :  { %728 = vmatpush2.msra.mxu1 %v165_v34  ;;  %658 = vmatprep.subr.mxu0 %v416_v37  ;;  %v364_v34 = vld [vmem:[%s3368_s3 + $0xa08] sm:$0xff]  ;;  %v110_v37 = vld [vmem:[%s3368_s3 + $0x218] sm:$0xff] }
  0x69   :  { %729 = vmatprep.subr.mxu1 %v162_v38  ;;  %659 = vmatpush2.msra.mxu0 %v415_v39  ;;  %v363_v38 = vld [vmem:[%s3368_s3 + $0xa00] sm:$0xff]  ;;  %v109_v39 = vld [vmem:[%s3368_s3 + $0x210] sm:$0xff] }
  0x6a   :  { %730 = vmatpush2.msra.mxu1 %v161_v40  ;;  %660 = vmatprep.subr.mxu0 %v412_v41 }
  0x6b   :  { %731 = vmatprep.subr.mxu1 %v158_v42  ;;  %661 = vmatpush2.msra.mxu0 %v411_v43 }
  0x6c   :  { %732 = vmatpush2.msra.mxu1 %v157_v44  ;;  %662 = vmatprep.subr.mxu0 %v408_v45 }
  0x6d   :  { %733 = vmatprep.subr.mxu1 %v154_v46  ;;  %663 = vmatpush2.msra.mxu0 %v407_v47 }
  0x6e   :  { %734 = vmatpush2.msra.mxu1 %v153_v48  ;;  %664 = vmatprep.subr.mxu0 %v404_v49 }
  0x6f   :  { %735 = vmatprep.subr.mxu1 %v150_v50  ;;  %665 = vmatpush2.msra.mxu0 %v403_v51 }
  0x70   :  { %736 = vmatpush2.msra.mxu1 %v149_v52  ;;  %666 = vmatprep.subr.mxu0 %v400_v53 }
  0x71   :  { %737 = vmatprep.subr.mxu1 %v146_v54  ;;  %667 = vmatpush2.msra.mxu0 %v399_v55 }
  0x72   :  { %738 = vmatpush2.msra.mxu1 %v145_v56  ;;  %668 = vmatprep.subr.mxu0 %v396_v57 }
  0x73   :  { %739 = vmatprep.subr.mxu1 %v142_v58  ;;  %669 = vmatpush2.msra.mxu0 %v395_v59 }
  0x74   :  { %740 = vmatpush2.msra.mxu1 %v141_v60  ;;  %670 = vmatprep.subr.mxu0 %v392_v62 }
  0x75   :  { %741 = vmatprep.subr.mxu1 %v138_v63  ;;  %671 = vmatpush2.msra.mxu0 %v391_v1 }
  0x76   :  { %742 = vmatpush2.msra.mxu1 %v137_v2  ;;  %672 = vmatprep.subr.mxu0 %v388_v4 }
  0x77   :  { %743 = vmatprep.subr.mxu1 %v134_v5  ;;  %673 = vmatpush2.msra.mxu0 %v387_v7 }
  0x78   :  { %744 = vmatpush2.msra.mxu1 %v133_v8  ;;  %674 = vmatprep.subr.mxu0 %v384_v10 }
  0x79   :  { %745 = vmatprep.subr.mxu1 %v130_v12  ;;  %675 = vmatpush2.msra.mxu0 %v383_v14 }
  0x7a   :  { %746 = vmatpush2.msra.mxu1 %v129_v16  ;;  %676 = vmatprep.subr.mxu0 %v380_v17 }
  0x7b   :  { %747 = vmatprep.subr.mxu1 %v126_v18  ;;  %677 = vmatpush2.msra.mxu0 %v379_v20 }
  0x7c   :  { %748 = vmatpush2.msra.mxu1 %v125_v21  ;;  %678 = vmatprep.subr.mxu0 %v376_v22 }
  0x7d   :  { %749 = vmatprep.subr.mxu1 %v122_v23  ;;  %679 = vmatpush2.msra.mxu0 %v375_v24 }
  0x7e   :  { %750 = vmatpush2.msra.mxu1 %v121_v25  ;;  %680 = vmatprep.subr.mxu0 %v372_v26 }
  0x7f   :  { %751 = vmatprep.subr.mxu1 %v118_v27  ;;  %681 = vmatpush2.msra.mxu0 %v371_v28 }
  0x80   :  { %752 = vmatpush2.msra.mxu1 %v117_v29  ;;  %682 = vmatprep.subr.mxu0 %v368_v30 }
  0x81   :  { %753 = vmatprep.subr.mxu1 %v114_v31  ;;  %683 = vmatpush2.msra.mxu0 %v367_v32 }
  0x82   :  { %754 = vmatpush2.msra.mxu1 %v113_v33 }
  0x83   :  { %17 = vsyncpa [#allocation3], 0  ;;  %684 = vmatprep.subr.mxu0 %v364_v34  ;;  %755 = vmatprep.subr.mxu1 %v110_v37  ;;  %v234_v40 = vld [vmem:[%s3368_s3 + $0x5f8] sm:$0xff]  ;;  %v233_v42 = vld [vmem:[%s3368_s3 + $0x5f0] sm:$0xff]  ;;  %vm1664_vm0 = vmmov 0  }
  0x84   :  { %685 = vmatpush2.msra.mxu0 %v363_v38  ;;  %686 = vmatprep.mubr.f32.mxu0 %v2023_v35  ;;  %v362_v41 = vld [vmem:[%s3368_s3 + $0x9f8] sm:$0xff]  ;;  %v361_v43 = vld [vmem:[%s3368_s3 + $0x9f0] sm:$0xff]  ;;  %v1112_v19 = vld [vmem:[%s3366_s1 + $0x8] sm:$0xff] }
  0x85   :  { %756 = vmatpush2.msra.mxu1 %v109_v39  ;;  %687 = vmatmul.mubr.f32.vlgmr.msra.gmra.mxu0 %v2026_v36  ;;  %v230_v44 = vld [vmem:[%s3368_s3 + $0x5d8] sm:$0xff]  ;;  %v229_v46 = vld [vmem:[%s3368_s3 + $0x5d0] sm:$0xff] }
  0x86   :  { %757 = vmatprep.mubr.f32.mxu1 %v2131_v9  ;;  %764 = vmatprep.subr.mxu0 %v234_v40  ;;  %v358_v45 = vld [vmem:[%s3368_s3 + $0x9d8] sm:$0xff]  ;;  %v357_v9 = vld [vmem:[%s3368_s3 + $0x9d0] sm:$0xff] }
  0x87   :  { %835 = vmatprep.subr.mxu1 %v362_v41  ;;  %758 = vmatmul.mubr.f32.vlgmr.msra.gmra.mxu1 %v2139_v11  ;;  %v226_v47 = vld [vmem:[%s3368_s3 + $0x5b8] sm:$0xff]  ;;  %v225_v11 = vld [vmem:[%s3368_s3 + $0x5b0] sm:$0xff] }
  0x88   :  { %765 = vmatpush1.msra.mxu0 %v233_v42  ;;  %836 = vmatpush1.msra.mxu1 %v361_v43  ;;  %v354_v48 = vld [vmem:[%s3368_s3 + $0x9b8] sm:$0xff]  ;;  %v353_v49 = vld [vmem:[%s3368_s3 + $0x9b0] sm:$0xff] }
  0x89   :  { %766 = vmatprep.subr.mxu0 %v230_v44  ;;  %837 = vmatprep.subr.mxu1 %v358_v45  ;;  %v222_v50 = vld [vmem:[%s3368_s3 + $0x598] sm:$0xff]  ;;  %v221_v52 = vld [vmem:[%s3368_s3 + $0x590] sm:$0xff] }
  0x8a   :  { %767 = vmatpush1.msra.mxu0 %v229_v46  ;;  %838 = vmatpush1.msra.mxu1 %v357_v9  ;;  %v350_v51 = vld [vmem:[%s3368_s3 + $0x998] sm:$0xff]  ;;  %v349_v53 = vld [vmem:[%s3368_s3 + $0x990] sm:$0xff] }
  0x8b   :  { %768 = vmatprep.subr.mxu0 %v226_v47  ;;  %839 = vmatprep.subr.mxu1 %v354_v48  ;;  %v218_v54 = vld [vmem:[%s3368_s3 + $0x578] sm:$0xff]  ;;  %v217_v56 = vld [vmem:[%s3368_s3 + $0x570] sm:$0xff] }
  0x8c   :  { %769 = vmatpush1.msra.mxu0 %v225_v11  ;;  %840 = vmatpush1.msra.mxu1 %v353_v49  ;;  %v346_v55 = vld [vmem:[%s3368_s3 + $0x978] sm:$0xff]  ;;  %v345_v57 = vld [vmem:[%s3368_s3 + $0x970] sm:$0xff] }
  0x8d   :  { %770 = vmatprep.subr.mxu0 %v222_v50  ;;  %841 = vmatprep.subr.mxu1 %v350_v51  ;;  %v214_v58 = vld [vmem:[%s3368_s3 + $0x558] sm:$0xff]  ;;  %v213_v60 = vld [vmem:[%s3368_s3 + $0x550] sm:$0xff] }
  0x8e   :  { %771 = vmatpush1.msra.mxu0 %v221_v52  ;;  %842 = vmatpush1.msra.mxu1 %v349_v53  ;;  %v342_v59 = vld [vmem:[%s3368_s3 + $0x958] sm:$0xff]  ;;  %v341_v62 = vld [vmem:[%s3368_s3 + $0x950] sm:$0xff] }
  0x8f   :  { %772 = vmatprep.subr.mxu0 %v218_v54  ;;  %843 = vmatprep.subr.mxu1 %v346_v55  ;;  %v210_v63 = vld [vmem:[%s3368_s3 + $0x538] sm:$0xff]  ;;  %v209_v2 = vld [vmem:[%s3368_s3 + $0x530] sm:$0xff] }
  0x90   :  { %773 = vmatpush1.msra.mxu0 %v217_v56  ;;  %844 = vmatpush1.msra.mxu1 %v345_v57  ;;  %v338_v1 = vld [vmem:[%s3368_s3 + $0x938] sm:$0xff]  ;;  %v337_v4 = vld [vmem:[%s3368_s3 + $0x930] sm:$0xff] }
  0x91   :  { %774 = vmatprep.subr.mxu0 %v214_v58  ;;  %845 = vmatprep.subr.mxu1 %v342_v59  ;;  %v206_v5 = vld [vmem:[%s3368_s3 + $0x518] sm:$0xff]  ;;  %v205_v8 = vld [vmem:[%s3368_s3 + $0x510] sm:$0xff] }
  0x92   :  { %775 = vmatpush1.msra.mxu0 %v213_v60  ;;  %846 = vmatpush1.msra.mxu1 %v341_v62  ;;  %v334_v7 = vld [vmem:[%s3368_s3 + $0x918] sm:$0xff]  ;;  %v333_v10 = vld [vmem:[%s3368_s3 + $0x910] sm:$0xff] }
  0x93   :  { %776 = vmatprep.subr.mxu0 %v210_v63  ;;  %847 = vmatprep.subr.mxu1 %v338_v1  ;;  %v202_v12 = vld [vmem:[%s3368_s3 + $0x4f8] sm:$0xff]  ;;  %v201_v16 = vld [vmem:[%s3368_s3 + $0x4f0] sm:$0xff] }
  0x94   :  { %777 = vmatpush1.msra.mxu0 %v209_v2  ;;  %848 = vmatpush1.msra.mxu1 %v337_v4  ;;  %v330_v14 = vld [vmem:[%s3368_s3 + $0x8f8] sm:$0xff]  ;;  %v329_v17 = vld [vmem:[%s3368_s3 + $0x8f0] sm:$0xff] }
  0x95   :  { %778 = vmatprep.subr.mxu0 %v206_v5  ;;  %849 = vmatprep.subr.mxu1 %v334_v7  ;;  %v198_v18 = vld [vmem:[%s3368_s3 + $0x4d8] sm:$0xff]  ;;  %v197_v21 = vld [vmem:[%s3368_s3 + $0x4d0] sm:$0xff] }
  0x96   :  { %779 = vmatpush1.msra.mxu0 %v205_v8  ;;  %850 = vmatpush1.msra.mxu1 %v333_v10  ;;  %v326_v20 = vld [vmem:[%s3368_s3 + $0x8d8] sm:$0xff]  ;;  %v325_v22 = vld [vmem:[%s3368_s3 + $0x8d0] sm:$0xff] }
  0x97   :  { %780 = vmatprep.subr.mxu0 %v202_v12  ;;  %851 = vmatprep.subr.mxu1 %v330_v14  ;;  %v194_v23 = vld [vmem:[%s3368_s3 + $0x4b8] sm:$0xff]  ;;  %v193_v25 = vld [vmem:[%s3368_s3 + $0x4b0] sm:$0xff] }
  0x98   :  { %781 = vmatpush1.msra.mxu0 %v201_v16  ;;  %852 = vmatpush1.msra.mxu1 %v329_v17  ;;  %v322_v24 = vld [vmem:[%s3368_s3 + $0x8b8] sm:$0xff]  ;;  %v321_v26 = vld [vmem:[%s3368_s3 + $0x8b0] sm:$0xff] }
  0x99   :  { %782 = vmatprep.subr.mxu0 %v198_v18  ;;  %853 = vmatprep.subr.mxu1 %v326_v20  ;;  %v190_v27 = vld [vmem:[%s3368_s3 + $0x498] sm:$0xff]  ;;  %v189_v29 = vld [vmem:[%s3368_s3 + $0x490] sm:$0xff] }
  0x9a   :  { %783 = vmatpush1.msra.mxu0 %v197_v21  ;;  %854 = vmatpush1.msra.mxu1 %v325_v22  ;;  %v318_v28 = vld [vmem:[%s3368_s3 + $0x898] sm:$0xff]  ;;  %v317_v30 = vld [vmem:[%s3368_s3 + $0x890] sm:$0xff] }
  0x9b   :  { %784 = vmatprep.subr.mxu0 %v194_v23  ;;  %855 = vmatprep.subr.mxu1 %v322_v24  ;;  %v186_v31 = vld [vmem:[%s3368_s3 + $0x478] sm:$0xff]  ;;  %v185_v33 = vld [vmem:[%s3368_s3 + $0x470] sm:$0xff] }
  0x9c   :  { %785 = vmatpush1.msra.mxu0 %v193_v25  ;;  %856 = vmatpush1.msra.mxu1 %v321_v26  ;;  %v314_v32 = vld [vmem:[%s3368_s3 + $0x878] sm:$0xff]  ;;  %v313_v34 = vld [vmem:[%s3368_s3 + $0x870] sm:$0xff] }
  0x9d   :  { %786 = vmatprep.subr.mxu0 %v190_v27  ;;  %857 = vmatprep.subr.mxu1 %v318_v28  ;;  %v182_v37 = vld [vmem:[%s3368_s3 + $0x458] sm:$0xff]  ;;  %v181_v39 = vld [vmem:[%s3368_s3 + $0x450] sm:$0xff] }
  0x9e   :  { %787 = vmatpush1.msra.mxu0 %v189_v29  ;;  %858 = vmatpush1.msra.mxu1 %v317_v30  ;;  %v310_v38 = vld [vmem:[%s3368_s3 + $0x858] sm:$0xff]  ;;  %v309_v40 = vld [vmem:[%s3368_s3 + $0x850] sm:$0xff] }
  0x9f   :  { %788 = vmatprep.subr.mxu0 %v186_v31  ;;  %859 = vmatprep.subr.mxu1 %v314_v32  ;;  %v178_v41 = vld [vmem:[%s3368_s3 + $0x438] sm:$0xff]  ;;  %v177_v43 = vld [vmem:[%s3368_s3 + $0x430] sm:$0xff] }
  0xa0   :  { %789 = vmatpush1.msra.mxu0 %v185_v33  ;;  %860 = vmatpush1.msra.mxu1 %v313_v34  ;;  %v306_v42 = vld [vmem:[%s3368_s3 + $0x838] sm:$0xff]  ;;  %v305_v44 = vld [vmem:[%s3368_s3 + $0x830] sm:$0xff] }
  0xa1   :  { %790 = vmatprep.subr.mxu0 %v182_v37  ;;  %861 = vmatprep.subr.mxu1 %v310_v38  ;;  %v174_v45 = vld [vmem:[%s3368_s3 + $0x418] sm:$0xff]  ;;  %v173_v9 = vld [vmem:[%s3368_s3 + $0x410] sm:$0xff] }
  0xa2   :  { %791 = vmatpush1.msra.mxu0 %v181_v39  ;;  %862 = vmatpush1.msra.mxu1 %v309_v40  ;;  %v302_v46 = vld [vmem:[%s3368_s3 + $0x818] sm:$0xff]  ;;  %v301_v47 = vld [vmem:[%s3368_s3 + $0x810] sm:$0xff] }
  0xa3   :  { %792 = vmatprep.subr.mxu0 %v178_v41  ;;  %863 = vmatprep.subr.mxu1 %v306_v42  ;;  %v298_v48 = vld [vmem:[%s3368_s3 + $0x7f8] sm:$0xff]  ;;  %v297_v49 = vld [vmem:[%s3368_s3 + $0x7f0] sm:$0xff] }
  0xa4   :  { %793 = vmatpush1.msra.mxu0 %v177_v43  ;;  %864 = vmatpush1.msra.mxu1 %v305_v44  ;;  %v426_v11 = vld [vmem:[%s3368_s3 + $0xbf8] sm:$0xff]  ;;  %v425_v50 = vld [vmem:[%s3368_s3 + $0xbf0] sm:$0xff] }
  0xa5   :  { %794 = vmatprep.subr.mxu0 %v174_v45  ;;  %865 = vmatprep.subr.mxu1 %v302_v46  ;;  %v294_v51 = vld [vmem:[%s3368_s3 + $0x7d8] sm:$0xff]  ;;  %v293_v53 = vld [vmem:[%s3368_s3 + $0x7d0] sm:$0xff] }
  0xa6   :  { %795 = vmatpush1.msra.mxu0 %v173_v9  ;;  %866 = vmatpush1.msra.mxu1 %v301_v47  ;;  %v422_v52 = vld [vmem:[%s3368_s3 + $0xbd8] sm:$0xff]  ;;  %v421_v54 = vld [vmem:[%s3368_s3 + $0xbd0] sm:$0xff] }
  0xa7   :  { %796 = vmatprep.subr.mxu0 %v298_v48  ;;  %867 = vmatprep.subr.mxu1 %v426_v11  ;;  %v290_v55 = vld [vmem:[%s3368_s3 + $0x7b8] sm:$0xff]  ;;  %v289_v57 = vld [vmem:[%s3368_s3 + $0x7b0] sm:$0xff] }
  0xa8   :  { %797 = vmatpush2.msra.mxu0 %v297_v49  ;;  %868 = vmatpush2.msra.mxu1 %v425_v50  ;;  %v418_v56 = vld [vmem:[%s3368_s3 + $0xbb8] sm:$0xff]  ;;  %v417_v58 = vld [vmem:[%s3368_s3 + $0xbb0] sm:$0xff] }
  0xa9   :  { %798 = vmatprep.subr.mxu0 %v294_v51  ;;  %869 = vmatprep.subr.mxu1 %v422_v52  ;;  %v286_v59 = vld [vmem:[%s3368_s3 + $0x798] sm:$0xff]  ;;  %v285_v62 = vld [vmem:[%s3368_s3 + $0x790] sm:$0xff] }
  0xaa   :  { %799 = vmatpush2.msra.mxu0 %v293_v53  ;;  %870 = vmatpush2.msra.mxu1 %v421_v54  ;;  %v414_v60 = vld [vmem:[%s3368_s3 + $0xb98] sm:$0xff]  ;;  %v413_v63 = vld [vmem:[%s3368_s3 + $0xb90] sm:$0xff] }
  0xab   :  { %800 = vmatprep.subr.mxu0 %v290_v55  ;;  %871 = vmatprep.subr.mxu1 %v418_v56  ;;  %v282_v1 = vld [vmem:[%s3368_s3 + $0x778] sm:$0xff]  ;;  %v281_v4 = vld [vmem:[%s3368_s3 + $0x770] sm:$0xff] }
  0xac   :  { %801 = vmatpush2.msra.mxu0 %v289_v57  ;;  %872 = vmatpush2.msra.mxu1 %v417_v58  ;;  %v410_v2 = vld [vmem:[%s3368_s3 + $0xb78] sm:$0xff]  ;;  %v409_v5 = vld [vmem:[%s3368_s3 + $0xb70] sm:$0xff] }
  0xad   :  { %802 = vmatprep.subr.mxu0 %v286_v59  ;;  %873 = vmatprep.subr.mxu1 %v414_v60  ;;  %v278_v7 = vld [vmem:[%s3368_s3 + $0x758] sm:$0xff]  ;;  %v277_v10 = vld [vmem:[%s3368_s3 + $0x750] sm:$0xff] }
  0xae   :  { %803 = vmatpush2.msra.mxu0 %v285_v62  ;;  %874 = vmatpush2.msra.mxu1 %v413_v63  ;;  %v406_v8 = vld [vmem:[%s3368_s3 + $0xb58] sm:$0xff]  ;;  %v405_v12 = vld [vmem:[%s3368_s3 + $0xb50] sm:$0xff]  ;;  %v934_v62 = vld [vmem:[%s3370_s5 + $0xe0] sm:$0xff] }
  0xaf   :  { %804 = vmatprep.subr.mxu0 %v282_v1  ;;  %875 = vmatprep.subr.mxu1 %v410_v2  ;;  %v274_v14 = vld [vmem:[%s3368_s3 + $0x738] sm:$0xff]  ;;  %v273_v17 = vld [vmem:[%s3368_s3 + $0x730] sm:$0xff]  ;;  %v918_v1 = vld [vmem:[%s3370_s5 + $0x60] sm:$0xff] }
  0xb0   :  { %805 = vmatpush2.msra.mxu0 %v281_v4  ;;  %876 = vmatpush2.msra.mxu1 %v409_v5  ;;  %v402_v16 = vld [vmem:[%s3368_s3 + $0xb38] sm:$0xff]  ;;  %v401_v18 = vld [vmem:[%s3368_s3 + $0xb30] sm:$0xff]  ;;  %v967_v2 = vld [vmem:[%s3370_s5 + $0x1e8] sm:$0xff] }
  0xb1   :  { %806 = vmatprep.subr.mxu0 %v278_v7  ;;  %877 = vmatprep.subr.mxu1 %v406_v8  ;;  %v270_v20 = vld [vmem:[%s3368_s3 + $0x718] sm:$0xff]  ;;  %v269_v22 = vld [vmem:[%s3368_s3 + $0x710] sm:$0xff]  ;;  %v951_v5 = vld [vmem:[%s3370_s5 + $0x168] sm:$0xff] }
  0xb2   :  { %807 = vmatpush2.msra.mxu0 %v277_v10  ;;  %878 = vmatpush2.msra.mxu1 %v405_v12  ;;  %v398_v21 = vld [vmem:[%s3368_s3 + $0xb18] sm:$0xff]  ;;  %v397_v23 = vld [vmem:[%s3368_s3 + $0xb10] sm:$0xff]  ;;  %v966_v8 = vld [vmem:[%s3370_s5 + $0x1e0] sm:$0xff] }
  0xb3   :  { %808 = vmatprep.subr.mxu0 %v274_v14  ;;  %879 = vmatprep.subr.mxu1 %v402_v16  ;;  %v266_v24 = vld [vmem:[%s3368_s3 + $0x6f8] sm:$0xff]  ;;  %v265_v26 = vld [vmem:[%s3368_s3 + $0x6f0] sm:$0xff]  ;;  %v950_v12 = vld [vmem:[%s3370_s5 + $0x160] sm:$0xff] }
  0xb4   :  { %809 = vmatpush2.msra.mxu0 %v273_v17  ;;  %880 = vmatpush2.msra.mxu1 %v401_v18  ;;  %v394_v25 = vld [vmem:[%s3368_s3 + $0xaf8] sm:$0xff]  ;;  %v393_v27 = vld [vmem:[%s3368_s3 + $0xaf0] sm:$0xff]  ;;  %v931_v17 = vld [vmem:[%s3370_s5 + $0xc8] sm:$0xff] }
  0xb5   :  { %810 = vmatprep.subr.mxu0 %v270_v20  ;;  %881 = vmatprep.subr.mxu1 %v398_v21  ;;  %v262_v28 = vld [vmem:[%s3368_s3 + $0x6d8] sm:$0xff]  ;;  %v261_v30 = vld [vmem:[%s3368_s3 + $0x6d0] sm:$0xff]  ;;  %v915_v20 = vld [vmem:[%s3370_s5 + $0x48] sm:$0xff] }
  0xb6   :  { %811 = vmatpush2.msra.mxu0 %v269_v22  ;;  %882 = vmatpush2.msra.mxu1 %v397_v23  ;;  %v390_v29 = vld [vmem:[%s3368_s3 + $0xad8] sm:$0xff]  ;;  %v389_v31 = vld [vmem:[%s3368_s3 + $0xad0] sm:$0xff]  ;;  %v930_v22 = vld [vmem:[%s3370_s5 + $0xc0] sm:$0xff] }
  0xb7   :  { %812 = vmatprep.subr.mxu0 %v266_v24  ;;  %883 = vmatprep.subr.mxu1 %v394_v25  ;;  %v258_v32 = vld [vmem:[%s3368_s3 + $0x6b8] sm:$0xff]  ;;  %v257_v34 = vld [vmem:[%s3368_s3 + $0x6b0] sm:$0xff]  ;;  %v914_v24 = vld [vmem:[%s3370_s5 + $0x40] sm:$0xff] }
  0xb8   :  { %813 = vmatpush2.msra.mxu0 %v265_v26  ;;  %884 = vmatpush2.msra.mxu1 %v393_v27  ;;  %v386_v33 = vld [vmem:[%s3368_s3 + $0xab8] sm:$0xff]  ;;  %v385_v37 = vld [vmem:[%s3368_s3 + $0xab0] sm:$0xff]  ;;  %v963_v25 = vld [vmem:[%s3370_s5 + $0x1c8] sm:$0xff] }
  0xb9   :  { %814 = vmatprep.subr.mxu0 %v262_v28  ;;  %885 = vmatprep.subr.mxu1 %v390_v29  ;;  %v254_v38 = vld [vmem:[%s3368_s3 + $0x698] sm:$0xff]  ;;  %v253_v40 = vld [vmem:[%s3368_s3 + $0x690] sm:$0xff]  ;;  %v947_v27 = vld [vmem:[%s3370_s5 + $0x148] sm:$0xff] }
  0xba   :  { %815 = vmatpush2.msra.mxu0 %v261_v30  ;;  %886 = vmatpush2.msra.mxu1 %v389_v31  ;;  %v382_v39 = vld [vmem:[%s3368_s3 + $0xa98] sm:$0xff]  ;;  %v381_v41 = vld [vmem:[%s3368_s3 + $0xa90] sm:$0xff]  ;;  %v962_v29 = vld [vmem:[%s3370_s5 + $0x1c0] sm:$0xff] }
  0xbb   :  { %816 = vmatprep.subr.mxu0 %v258_v32  ;;  %887 = vmatprep.subr.mxu1 %v386_v33  ;;  %v250_v42 = vld [vmem:[%s3368_s3 + $0x678] sm:$0xff]  ;;  %v249_v44 = vld [vmem:[%s3368_s3 + $0x670] sm:$0xff]  ;;  %v946_v31 = vld [vmem:[%s3370_s5 + $0x140] sm:$0xff] }
  0xbc   :  { %817 = vmatpush2.msra.mxu0 %v257_v34  ;;  %888 = vmatpush2.msra.mxu1 %v385_v37  ;;  %v378_v43 = vld [vmem:[%s3368_s3 + $0xa78] sm:$0xff]  ;;  %v377_v45 = vld [vmem:[%s3368_s3 + $0xa70] sm:$0xff]  ;;  %v927_v34 = vld [vmem:[%s3370_s5 + $0xa8] sm:$0xff] }
  0xbd   :  { %818 = vmatprep.subr.mxu0 %v254_v38  ;;  %889 = vmatprep.subr.mxu1 %v382_v39  ;;  %v246_v46 = vld [vmem:[%s3368_s3 + $0x658] sm:$0xff]  ;;  %v245_v47 = vld [vmem:[%s3368_s3 + $0x650] sm:$0xff]  ;;  %v911_v38 = vld [vmem:[%s3370_s5 + $0x28] sm:$0xff] }
  0xbe   :  { %819 = vmatpush2.msra.mxu0 %v253_v40  ;;  %890 = vmatpush2.msra.mxu1 %v381_v41  ;;  %v374_v9 = vld [vmem:[%s3368_s3 + $0xa58] sm:$0xff]  ;;  %v373_v48 = vld [vmem:[%s3368_s3 + $0xa50] sm:$0xff]  ;;  %v926_v40 = vld [vmem:[%s3370_s5 + $0xa0] sm:$0xff] }
  0xbf   :  { %820 = vmatprep.subr.mxu0 %v250_v42  ;;  %891 = vmatprep.subr.mxu1 %v378_v43  ;;  %v242_v11 = vld [vmem:[%s3368_s3 + $0x638] sm:$0xff]  ;;  %v241_v50 = vld [vmem:[%s3368_s3 + $0x630] sm:$0xff]  ;;  %v910_v42 = vld [vmem:[%s3370_s5 + $0x20] sm:$0xff] }
  0xc0   :  { %821 = vmatpush2.msra.mxu0 %v249_v44  ;;  %892 = vmatpush2.msra.mxu1 %v377_v45  ;;  %v370_v49 = vld [vmem:[%s3368_s3 + $0xa38] sm:$0xff]  ;;  %v369_v51 = vld [vmem:[%s3368_s3 + $0xa30] sm:$0xff]  ;;  %v959_v43 = vld [vmem:[%s3370_s5 + $0x1a8] sm:$0xff] }
  0xc1   :  { %822 = vmatprep.subr.mxu0 %v246_v46  ;;  %893 = vmatprep.subr.mxu1 %v374_v9  ;;  %v238_v52 = vld [vmem:[%s3368_s3 + $0x618] sm:$0xff]  ;;  %v237_v54 = vld [vmem:[%s3368_s3 + $0x610] sm:$0xff]  ;;  %v943_v45 = vld [vmem:[%s3370_s5 + $0x128] sm:$0xff] }
  0xc2   :  { %823 = vmatpush2.msra.mxu0 %v245_v47  ;;  %894 = vmatpush2.msra.mxu1 %v373_v48  ;;  %v366_v53 = vld [vmem:[%s3368_s3 + $0xa18] sm:$0xff]  ;;  %v365_v55 = vld [vmem:[%s3368_s3 + $0xa10] sm:$0xff]  ;;  %v958_v9 = vld [vmem:[%s3370_s5 + $0x1a0] sm:$0xff] }
  0xc3   :  { %824 = vmatprep.subr.mxu0 %v242_v11  ;;  %895 = vmatprep.subr.mxu1 %v370_v49  ;;  %v937_v56 = vld [vmem:[%s3370_s5 + $0xf8] sm:$0xff]  ;;  %v936_v58 = vld [vmem:[%s3370_s5 + $0xf0] sm:$0xff]  ;;  %v942_v48 = vld [vmem:[%s3370_s5 + $0x120] sm:$0xff] }
  0xc4   :  { %825 = vmatpush2.msra.mxu0 %v241_v50  ;;  %896 = vmatpush2.msra.mxu1 %v369_v51  ;;  %v921_v57 = vld [vmem:[%s3370_s5 + $0x78] sm:$0xff]  ;;  %v968_v60 = vld [vmem:[%s3370_s5 + $0x1f0] sm:$0xff]  ;;  %v923_v50 = vld [vmem:[%s3370_s5 + $0x88] sm:$0xff] }
  0xc5   :  { %826 = vmatprep.subr.mxu0 %v238_v52  ;;  %897 = vmatprep.subr.mxu1 %v366_v53  ;;  %v953_v59 = vld [vmem:[%s3370_s5 + $0x178] sm:$0xff]  ;;  %v952_v63 = vld [vmem:[%s3370_s5 + $0x170] sm:$0xff]  ;;  %v907_v51 = vld [vmem:[%s3370_s5 + $0x8] sm:$0xff] }
  0xc6   :  { %827 = vmatpush2.msra.mxu0 %v237_v54  ;;  %828 = vmatprep.mubr.f32.mxu0 %v2147_v13  ;;  %v920_v13 = vld [vmem:[%s3370_s5 + $0x70] sm:$0xff]  ;;  %v933_v4 = vld [vmem:[%s3370_s5 + $0xd8] sm:$0xff]  ;;  %v922_v52 = vld [vmem:[%s3370_s5 + $0x80] sm:$0xff] }
  0xc7   :  { %898 = vmatpush2.msra.mxu1 %v365_v55  ;;  %899 = vmatprep.mubr.f32.mxu1 %v2023_v35  ;;  %v935_v35 = vld [vmem:[%s3370_s5 + $0xe8] sm:$0xff]  ;;  %v917_v7 = vld [vmem:[%s3370_s5 + $0x58] sm:$0xff]  ;;  %v932_v10 = vld [vmem:[%s3370_s5 + $0xd0] sm:$0xff] }
  0xc8   :  { %829 = vmatmul.mubr.f32.vlgmr.msra.gmra.mxu0 %v2155_v15  ;;  %900 = vmatmul.mubr.f32.vlgmr.msra.gmra.mxu1 %v2026_v36  ;;  %v919_v15 = vld [vmem:[%s3370_s5 + $0x68] sm:$0xff]  ;;  %v969_v36 = vld [vmem:[%s3370_s5 + $0x1f8] sm:$0xff]  ;;  %v916_v14 = vld [vmem:[%s3370_s5 + $0x50] sm:$0xff] }
  0xc9   :  { %1410 = vmatprep.subr.mxu0 %v937_v56  ;;  %1445 = vmatprep.subr.mxu1 %v969_v36  ;;  %v965_v16 = vld [vmem:[%s3370_s5 + $0x1d8] sm:$0xff]  ;;  %v964_v21 = vld [vmem:[%s3370_s5 + $0x1d0] sm:$0xff]  ;;  %v906_v53 = vld [vmem:[%s3370_s5] sm:$0xff] }
  0xca   :  { %1411 = vmatpush3.msra.mxu0 %v921_v57  ;;  %1446 = vmatpush3.msra.mxu1 %v953_v59  ;;  %v949_v18 = vld [vmem:[%s3370_s5 + $0x158] sm:$0xff]  ;;  %v948_v23 = vld [vmem:[%s3370_s5 + $0x150] sm:$0xff]  ;;  %v955_v57 = vld [vmem:[%s3370_s5 + $0x188] sm:$0xff] }
  0xcb   :  { %1412 = vmatprep.subr.mxu0 %v936_v58  ;;  %1447 = vmatprep.subr.mxu1 %v968_v60  ;;  %v929_v26 = vld [vmem:[%s3370_s5 + $0xb8] sm:$0xff]  ;;  %v928_v30 = vld [vmem:[%s3370_s5 + $0xb0] sm:$0xff]  ;;  %v939_v58 = vld [vmem:[%s3370_s5 + $0x108] sm:$0xff] }
  0xcc   :  { %1413 = vmatpush3.msra.mxu0 %v920_v13  ;;  %1448 = vmatpush3.msra.mxu1 %v952_v63  ;;  %v913_v28 = vld [vmem:[%s3370_s5 + $0x38] sm:$0xff]  ;;  %v912_v32 = vld [vmem:[%s3370_s5 + $0x30] sm:$0xff]  ;;  %v954_v13 = vld [vmem:[%s3370_s5 + $0x180] sm:$0xff] }
  0xcd   :  { %1414 = vmatprep.subr.mxu0 %v935_v35  ;;  %1449 = vmatprep.subr.mxu1 %v967_v2  ;;  %v961_v33 = vld [vmem:[%s3370_s5 + $0x1b8] sm:$0xff]  ;;  %v960_v39 = vld [vmem:[%s3370_s5 + $0x1b0] sm:$0xff]  ;;  %v1663_v35 = vmov 0.0   ;;  %v3131_v36 = vld [vmem:[%s3369_s4] sm:$0xf] }
  0xce   :  { %1415 = vmatpush3.msra.mxu0 %v919_v15  ;;  %1450 = vmatpush3.msra.mxu1 %v951_v5  ;;  %v945_v37 = vld [vmem:[%s3370_s5 + $0x138] sm:$0xff]  ;;  %v944_v41 = vld [vmem:[%s3370_s5 + $0x130] sm:$0xff]  ;;  %v938_v15 = vld [vmem:[%s3370_s5 + $0x100] sm:$0xff]  ;;  %v467_v60 = vrot.slane %v3131_v36, %v435_v61 }
  0xcf   :  { %1416 = vmatprep.subr.mxu0 %v934_v62  ;;  %1451 = vmatprep.subr.mxu1 %v966_v8  ;;  %v925_v44 = vld [vmem:[%s3370_s5 + $0x98] sm:$0xff]  ;;  %v924_v47 = vld [vmem:[%s3370_s5 + $0x90] sm:$0xff]  ;;  %v463_v62 = vrot.slane %v3131_v36, %v431_v0  ;;  %v1123_v61 = vld [vmem:[%s3367_s2 + $0x8] sm:$0xff] }
  0xd0   :  { %1417 = vmatpush3.msra.mxu0 %v918_v1  ;;  %1452 = vmatpush3.msra.mxu1 %v950_v12  ;;  %v909_v46 = vld [vmem:[%s3370_s5 + $0x18] sm:$0xff]  ;;  %v908_v11 = vld [vmem:[%s3370_s5 + $0x10] sm:$0xff] }
  0xd1   :  { %1418 = vmatprep.subr.mxu0 %v933_v4  ;;  %1453 = vmatprep.subr.mxu1 %v965_v16  ;;  %v957_v49 = vld [vmem:[%s3370_s5 + $0x198] sm:$0xff]  ;;  %v956_v55 = vld [vmem:[%s3370_s5 + $0x190] sm:$0xff]  ;;  %v1122_v16 = vld [vmem:[%s3367_s2] sm:$0xff] }
  0xd2   :  { %1419 = vmatpush3.msra.mxu0 %v917_v7  ;;  %1454 = vmatpush3.msra.mxu1 %v949_v18  ;;  %v941_v54 = vld [vmem:[%s3370_s5 + $0x118] sm:$0xff]  ;;  %v940_v56 = vld [vmem:[%s3370_s5 + $0x110] sm:$0xff] }
  0xd3   :  { %1420 = vmatprep.subr.mxu0 %v932_v10  ;;  %1455 = vmatprep.subr.mxu1 %v964_v21  ;;  %v1163_v0 = vld [vmem:[%s3373_s8 + $0x78] sm:$0xff]  ;;  %v1162_v18 = vld [vmem:[%s3373_s8 + $0x70] sm:$0xff]  ;;  %v1161_v21 = vld [vmem:[%s3373_s8 + $0x68] sm:$0xff] }
  0xd4   :  { %1421 = vmatpush3.msra.mxu0 %v916_v14  ;;  %1456 = vmatpush3.msra.mxu1 %v948_v23 }
  0xd5   :  { %1422 = vmatprep.subr.mxu0 %v931_v17  ;;  %1457 = vmatprep.subr.mxu1 %v963_v25  ;;  %v1158_v25 = vld [vmem:[%s3373_s8 + $0x50] sm:$0xff] }
  0xd6   :  { %1423 = vmatpush3.msra.mxu0 %v915_v20  ;;  %1458 = vmatpush3.msra.mxu1 %v947_v27  ;;  %v1124_v20 = vadd.f32 %v1123_v61, %v1122_v16  ;;  %v1157_v27 = vld [vmem:[%s3373_s8 + $0x48] sm:$0xff] }
  0xd7   :  { %1424 = vmatprep.subr.mxu0 %v930_v22  ;;  %1459 = vmatprep.subr.mxu1 %v962_v29  ;;  %v1160_v22 = vld [vmem:[%s3373_s8 + $0x60] sm:$0xff]  ;;  %v1133_v61 = vld [vmem:[%s3372_s7 + $0x8] sm:$0xff] }
  0xd8   :  { %1425 = vmatpush3.msra.mxu0 %v914_v24  ;;  %1460 = vmatpush3.msra.mxu1 %v946_v31  ;;  %v1125_v23 = vrot.slane %v1124_v20, 4  ;;  %v1159_v24 = vld [vmem:[%s3373_s8 + $0x58] sm:$0xff]  ;;  %v1154_v31 = vld [vmem:[%s3373_s8 + $0x30] sm:$0xff] }
  0xd9   :  { %1426 = vmatprep.subr.mxu0 %v929_v26  ;;  %1461 = vmatprep.subr.mxu1 %v961_v33  ;;  %v1153_v33 = vld [vmem:[%s3373_s8 + $0x28] sm:$0xff] }
  0xda   :  { %1427 = vmatpush3.msra.mxu0 %v913_v28  ;;  %1462 = vmatpush3.msra.mxu1 %v945_v37  ;;  %v1126_v26 = vadd.f32 %v1125_v23, %v1124_v20  ;;  %v1156_v28 = vld [vmem:[%s3373_s8 + $0x40] sm:$0xff]  ;;  %v1322_v20 = vld [vmem:[%s3375_s10 + $0x70] sm:$0xff]  ;;  %v1319_v23 = vld [vmem:[%s3375_s10 + $0x58] sm:$0xff] }
  0xdb   :  { %1428 = vmatprep.subr.mxu0 %v928_v30  ;;  %1463 = vmatprep.subr.mxu1 %v960_v39  ;;  %v1155_v30 = vld [vmem:[%s3373_s8 + $0x38] sm:$0xff]  ;;  %v1150_v39 = vld [vmem:[%s3373_s8 + $0x10] sm:$0xff] }
  0xdc   :  { %1429 = vmatpush3.msra.mxu0 %v912_v32  ;;  %1464 = vmatpush3.msra.mxu1 %v944_v41  ;;  %v1127_v29 = vrot.slane %v1126_v26, 2  ;;  %v1149_v41 = vld [vmem:[%s3373_s8 + $0x8] sm:$0xff] }
  0xdd   :  { %1430 = vmatprep.subr.mxu0 %v927_v34  ;;  %1465 = vmatprep.subr.mxu1 %v959_v43  ;;  %v1152_v34 = vld [vmem:[%s3373_s8 + $0x20] sm:$0xff] }
  0xde   :  { %1431 = vmatpush3.msra.mxu0 %v911_v38  ;;  %1466 = vmatpush3.msra.mxu1 %v943_v45  ;;  %v1128_v32 = vadd.f32 %v1127_v29, %v1126_v26  ;;  %v1151_v38 = vld [vmem:[%s3373_s8 + $0x18] sm:$0xff]  ;;  %v471_v45 = vrot.slane %v3131_v36, %v439_v6  ;;  %v1316_v26 = vld [vmem:[%s3375_s10 + $0x40] sm:$0xff]  ;;  %v1313_v29 = vld [vmem:[%s3375_s10 + $0x28] sm:$0xff] }
  0xdf   :  { %1432 = vmatprep.subr.mxu0 %v926_v40  ;;  %1467 = vmatprep.subr.mxu1 %v958_v9 }
  0xe0   :  { %1433 = vmatpush3.msra.mxu0 %v910_v42  ;;  %1468 = vmatpush3.msra.mxu1 %v942_v48  ;;  %v1129_v37 = vrot.slane %v1128_v32, 1  ;;  %v1148_v42 = vld [vmem:[%s3373_s8] sm:$0xff] }
  0xe1   :  { %1434 = vmatprep.subr.mxu0 %v925_v44  ;;  %1469 = vmatprep.subr.mxu1 %v957_v49 }
  0xe2   :  { %1435 = vmatpush3.msra.mxu0 %v909_v46  ;;  %1470 = vmatpush3.msra.mxu1 %v941_v54  ;;  %v1130_v40 = vadd.f32 %v1129_v37, %v1128_v32  ;;  %v475_v46 = vrot.slane %v3131_v36, %v443_v3  ;;  %v1147_v3 = vld [vmem:[%s3372_s7 + $0x78] sm:$0xff]  ;;  %v1310_v32 = vld [vmem:[%s3375_s10 + $0x10] sm:$0xff] }
  0xe3   :  { %1436 = vmatprep.subr.mxu0 %v924_v47  ;;  %1471 = vmatprep.subr.mxu1 %v956_v55  ;;  %v1111_v55 = vld [vmem:[%s3366_s1] sm:$0xff]  ;;  %v1143_v36 = vld [vmem:[%s3372_s7 + $0x58] sm:$0xff] }
  0xe4   :  { %1437 = vmatpush3.msra.mxu0 %v908_v11  ;;  %1472 = vmatpush3.msra.mxu1 %v940_v56  ;;  %v1131_v43 = vmul.f32 0.0625, %v1130_v40  ;;  %v1146_v56 = vld [vmem:[%s3372_s7 + $0x70] sm:$0xff] }
  0xe5   :  { %1438 = vmatprep.subr.mxu0 %v923_v50  ;;  %1473 = vmatprep.subr.mxu1 %v955_v57  ;;  %v1113_v57 = vadd.f32 %v1112_v19, %v1111_v55 }
  0xe6   :  { %1439 = vmatpush3.msra.mxu0 %v907_v51  ;;  %1474 = vmatpush3.msra.mxu1 %v939_v58  ;;  %v1145_v58 = vld [vmem:[%s3372_s7 + $0x68] sm:$0xff] }
  0xe7   :  { %1440 = vmatprep.subr.mxu0 %v922_v52  ;;  %1475 = vmatprep.subr.mxu1 %v954_v13  ;;  %v1144_v13 = vld [vmem:[%s3372_s7 + $0x60] sm:$0xff] }
  0xe8   :  { %1441 = vmatpush3.msra.mxu0 %v906_v53  ;;  %1476 = vmatpush3.msra.mxu1 %v938_v15  ;;  %v1114_v15 = vrot.slane %v1113_v57, 4 }
  0xe9   :  { %1531 = vmatprep.subr.mxu0 %v1663_v35  ;;  %1566 = vmatprep.subr.mxu1 %v1663_v35 }
 0x103   :  { %v546_v59 = vpop.f32.mrf.mxu0 }
 0x104   :  { %v547_v4 = vadd.f32 %v546_v59, %v463_v62  ;;  %v1142_v59 = vld [vmem:[%s3372_s7 + $0x50] sm:$0xff]  ;;  %v1141_v62 = vld [vmem:[%s3372_s7 + $0x48] sm:$0xff] }
 0x105   :  { %v617_v63 = vpop.f32.mrf.mxu1  ;;  %v548_v1 = vpop.f32.mrf.mxu0 }
 0x106   :  { %v549_v2 = vadd.f32 %v548_v1, %v467_v60  ;;  %v618_v10 = vadd.f32 %v617_v63, %v547_v4  ;;  %v1115_v60 = vadd.f32 %v1114_v15, %v1113_v57  ;;  %v1140_v63 = vld [vmem:[%s3372_s7 + $0x40] sm:$0xff]  ;;  %v1138_v4 = vld [vmem:[%s3372_s7 + $0x30] sm:$0xff] }
 0x107   :  { %v619_v5 = vpop.f32.mrf.mxu1 }
 0x108   :  { %v620_v8 = vadd.f32 %v619_v5, %v549_v2  ;;  %v1116_v1 = vrot.slane %v1115_v60, 2  ;;  %v1139_v2 = vld [vmem:[%s3372_s7 + $0x38] sm:$0xff] }
 0x10a   :  { %v1117_v5 = vadd.f32 %v1116_v1, %v1115_v60 }
 0x145   :  { %v688_v7 = vpop.f32.mrf.mxu0 }
 0x146   :  { %v689_v17 = vadd.f32 %v688_v7, %v618_v10  ;;  %v1137_v7 = vld [vmem:[%s3372_s7 + $0x28] sm:$0xff]  ;;  %v1118_v10 = vrot.slane %v1117_v5, 1 }
 0x147   :  { %v690_v12 = vpop.f32.mrf.mxu0  ;;  %v759_v44 = vpop.f32.mrf.mxu1 }
 0x148   :  { %v691_v14 = vadd.f32 %v690_v12, %v620_v8  ;;  %v760_v47 = vadd.f32 %v759_v44, %v471_v45  ;;  %v1136_v8 = vld [vmem:[%s3372_s7 + $0x20] sm:$0xff]  ;;  %v1135_v12 = vld [vmem:[%s3372_s7 + $0x18] sm:$0xff]  ;;  %v1119_v16 = vadd.f32 %v1118_v10, %v1117_v5 }
 0x149   :  { %v761_v9 = vpop.f32.mrf.mxu1  ;;  %v970_v44 = vld [vmem:[%s3371_s6] sm:$0x1]  ;;  %s1665_s6 = smov [#allocation2]  }
 0x14a   :  { %1035 = vmatprep.mubr.f32.mxu0 %v691_v14  ;;  %v762_v49 = vadd.f32 %v761_v9, %v475_v46  ;;  %v1134_v14 = vld [vmem:[%s3372_s7 + $0x10] sm:$0xff]  ;;  %v1304_v9 = vld [vmem:[%s3374_s9] sm:$0x1]  ;;  %s1402_s18 = sshll.u32 %s1665_s6, 4  ;;  %s1403_s18 = int_to_ptr.vmem [resolvable:$true] %s1402_s18 }
 0x14b   :  { %1036 = vmatmul.mubr.f32.vlgmr.msra.gmra.mxu0 %v689_v17  ;;  %v1132_v17 = vld [vmem:[%s3372_s7] sm:$0xff]  ;;  %s1641_s9 = scalar_lea.vmem %s1403_s18, 16  ;;  %s1645_s19 = scalar_lea.vmem %s1403_s18, 32 }
 0x14c   :  { %1532 = vmatpush3.msra.mxu0 %v1163_v0  ;;  %1563 = vmatprep.mubr.msk.f32.mxu0 %vm1664_vm0, %v1663_v35  ;;  %v1121_v0 = vmul.f32 0.0625, %v1119_v16  ;;  %p1642_p0 = scmp.ne.s32.totalorder %s1403_s18, %s1641_s9  ;;  %p1646_p1 = scmp.lt.s32.totalorder %s1403_s18, %s1403_s18 }
 0x14d   :  { %1533 = vmatprep.subr.mxu0 %v1663_v35  ;;  %p1647_p2 = scmp.lt.s32.totalorder %s1645_s19, %s1641_s9 }
 0x14e   :  { %1534 = vmatpush3.msra.mxu0 %v1162_v18  ;;  %v1323_v18 = vld [vmem:[%s3375_s10 + $0x78] sm:$0xff] }
 0x14f   :  { %1535 = vmatprep.subr.mxu0 %v1663_v35  ;;  %p1648_p3 = por %p1647_p2, %p1646_p1 }
 0x150   :  { %1536 = vmatpush3.msra.mxu0 %v1161_v21  ;;  %v1321_v21 = vld [vmem:[%s3375_s10 + $0x68] sm:$0xff] }
 0x151   :  { %1537 = vmatprep.subr.mxu0 %v1663_v35  ;;  %p1649_p4 = pnand %p1648_p3, %p1642_p0 }
 0x152   :  { %1538 = vmatpush3.msra.mxu0 %v1160_v22  ;;  %v1320_v22 = vld [vmem:[%s3375_s10 + $0x60] sm:$0xff] }
 0x153   :  { %1539 = vmatprep.subr.mxu0 %v1663_v35 }
 0x154   :  { %1540 = vmatpush3.msra.mxu0 %v1159_v24  ;;  %v1318_v24 = vld [vmem:[%s3375_s10 + $0x50] sm:$0xff] }
 0x155   :  { %1541 = vmatprep.subr.mxu0 %v1663_v35 }
 0x156   :  { %1542 = vmatpush3.msra.mxu0 %v1158_v25  ;;  %v1317_v25 = vld [vmem:[%s3375_s10 + $0x48] sm:$0xff] }
 0x157   :  { %1543 = vmatprep.subr.mxu0 %v1663_v35 }
 0x158   :  { %1544 = vmatpush3.msra.mxu0 %v1157_v27  ;;  %v1315_v27 = vld [vmem:[%s3375_s10 + $0x38] sm:$0xff] }
 0x159   :  { %1545 = vmatprep.subr.mxu0 %v1663_v35 }
 0x15a   :  { %1546 = vmatpush3.msra.mxu0 %v1156_v28  ;;  %v1314_v28 = vld [vmem:[%s3375_s10 + $0x30] sm:$0xff] }
 0x15b   :  { %1547 = vmatprep.subr.mxu0 %v1663_v35 }
 0x15c   :  { %1548 = vmatpush3.msra.mxu0 %v1155_v30  ;;  %v1312_v30 = vld [vmem:[%s3375_s10 + $0x20] sm:$0xff] }
 0x15d   :  { %1549 = vmatprep.subr.mxu0 %v1663_v35 }
 0x15e   :  { %1550 = vmatpush3.msra.mxu0 %v1154_v31  ;;  %v1311_v31 = vld [vmem:[%s3375_s10 + $0x18] sm:$0xff] }
 0x15f   :  { %1551 = vmatprep.subr.mxu0 %v1663_v35 }
 0x160   :  { %1552 = vmatpush3.msra.mxu0 %v1153_v33  ;;  %v1309_v33 = vld [vmem:[%s3375_s10 + $0x8] sm:$0xff] }
 0x161   :  { %1553 = vmatprep.subr.mxu0 %v1663_v35 }
 0x162   :  { %1554 = vmatpush3.msra.mxu0 %v1152_v34  ;;  %v1308_v34 = vld [vmem:[%s3375_s10] sm:$0xff] }
 0x163   :  { %1555 = vmatprep.subr.mxu0 %v1663_v35 }
 0x164   :  { %1556 = vmatpush3.msra.mxu0 %v1151_v38 }
 0x165   :  { %1557 = vmatprep.subr.mxu0 %v1663_v35 }
 0x166   :  { %1558 = vmatpush3.msra.mxu0 %v1150_v39 }
 0x167   :  { %1559 = vmatprep.subr.mxu0 %v1663_v35 }
 0x168   :  { %1560 = vmatpush3.msra.mxu0 %v1149_v41 }
 0x169   :  { %1561 = vmatprep.subr.mxu0 %v1663_v35 }
 0x16a   :  { %1562 = vmatpush3.msra.mxu0 %v1148_v42 }
 0x16b   :  { %1564 = vmatmul.mubr.f32.vlgmr.msra.gmra.mxu0 %v1131_v43  ;;  %1601 = vmatprep.subr.mxu0 %v1663_v35 }
 0x16c   :  { %1633 = vmatprep.mubr.msk.f32.mxu0 %vm1664_vm0, %v1663_v35  ;;  %1602 = vmatpush3.msra.mxu0 %v1323_v18 }
 0x16d   :  { %1603 = vmatprep.subr.mxu0 %v1663_v35 }
 0x16e   :  { %1604 = vmatpush3.msra.mxu0 %v1322_v20 }
 0x16f   :  { %1605 = vmatprep.subr.mxu0 %v1663_v35 }
 0x170   :  { %1606 = vmatpush3.msra.mxu0 %v1321_v21 }
 0x171   :  { %1607 = vmatprep.subr.mxu0 %v1663_v35 }
 0x172   :  { %1608 = vmatpush3.msra.mxu0 %v1320_v22 }
 0x173   :  { %1609 = vmatprep.subr.mxu0 %v1663_v35 }
 0x174   :  { %1610 = vmatpush3.msra.mxu0 %v1319_v23 }
 0x175   :  { %1611 = vmatprep.subr.mxu0 %v1663_v35 }
 0x176   :  { %1612 = vmatpush3.msra.mxu0 %v1318_v24 }
 0x177   :  { %1613 = vmatprep.subr.mxu0 %v1663_v35 }
 0x178   :  { %1614 = vmatpush3.msra.mxu0 %v1317_v25 }
 0x179   :  { %1615 = vmatprep.subr.mxu0 %v1663_v35 }
 0x17a   :  { %1616 = vmatpush3.msra.mxu0 %v1316_v26 }
 0x17b   :  { %1617 = vmatprep.subr.mxu0 %v1663_v35 }
 0x17c   :  { %1618 = vmatpush3.msra.mxu0 %v1315_v27 }
 0x17d   :  { %1619 = vmatprep.subr.mxu0 %v1663_v35 }
 0x17e   :  { %1620 = vmatpush3.msra.mxu0 %v1314_v28 }
 0x17f   :  { %1621 = vmatprep.subr.mxu0 %v1663_v35 }
 0x180   :  { %1622 = vmatpush3.msra.mxu0 %v1313_v29 }
 0x181   :  { %1623 = vmatprep.subr.mxu0 %v1663_v35 }
 0x182   :  { %1624 = vmatpush3.msra.mxu0 %v1312_v30 }
 0x183   :  { %1625 = vmatprep.subr.mxu0 %v1663_v35 }
 0x184   :  { %1626 = vmatpush3.msra.mxu0 %v1311_v31 }
 0x185   :  { %1627 = vmatprep.subr.mxu0 %v1663_v35 }
 0x186   :  { %1628 = vmatpush3.msra.mxu0 %v1310_v32 }
 0x187   :  { %1629 = vmatprep.subr.mxu0 %v1663_v35 }
 0x188   :  { %v830_v48 = vpop.f32.mrf.mxu0  ;;  %v901_v11 = vpop.f32.mrf.mxu1  ;;  %1630 = vmatpush3.msra.mxu0 %v1309_v33 }
 0x189   :  { %v831_v50 = vadd.f32 %v830_v48, %v760_v47  ;;  %1631 = vmatprep.subr.mxu0 %v1663_v35 }
 0x18a   :  { %v832_v51 = vpop.f32.mrf.mxu0  ;;  %v903_v53 = vpop.f32.mrf.mxu1  ;;  %1632 = vmatpush3.msra.mxu0 %v1308_v34 }
 0x18b   :  { %v833_v52 = vadd.f32 %v832_v51, %v762_v49  ;;  %v902_v6 = vadd.f32 %v901_v11, %v831_v50 }
 0x18d   :  { %v904_v54 = vadd.f32 %v903_v53, %v833_v52  ;;  %v1324_v52 = vld [vmem:[%s3376_s11] sm:$0x1] }
 0x18f   :  { %1105 = vmatprep.mubr.f32.mxu1 %v904_v54 }
 0x190   :  { %1106 = vmatmul.mubr.f32.vlgmr.msra.gmra.mxu1 %v902_v6 }
 0x191   :  { %1567 = vmatpush3.msra.mxu1 %v1147_v3  ;;  %1598 = vmatprep.mubr.msk.f32.mxu1 %vm1664_vm0, %v1663_v35 }
 0x192   :  { %1568 = vmatprep.subr.mxu1 %v1663_v35 }
 0x193   :  { %1569 = vmatpush3.msra.mxu1 %v1146_v56 }
 0x194   :  { %1570 = vmatprep.subr.mxu1 %v1663_v35 }
 0x195   :  { %1571 = vmatpush3.msra.mxu1 %v1145_v58 }
 0x196   :  { %1572 = vmatprep.subr.mxu1 %v1663_v35 }
 0x197   :  { %1573 = vmatpush3.msra.mxu1 %v1144_v13 }
 0x198   :  { %1574 = vmatprep.subr.mxu1 %v1663_v35 }
 0x199   :  { %1575 = vmatpush3.msra.mxu1 %v1143_v36 }
 0x19a   :  { %1576 = vmatprep.subr.mxu1 %v1663_v35 }
 0x19b   :  { %1577 = vmatpush3.msra.mxu1 %v1142_v59 }
 0x19c   :  { %1578 = vmatprep.subr.mxu1 %v1663_v35 }
 0x19d   :  { %1579 = vmatpush3.msra.mxu1 %v1141_v62 }
 0x19e   :  { %1580 = vmatprep.subr.mxu1 %v1663_v35 }
 0x19f   :  { %1581 = vmatpush3.msra.mxu1 %v1140_v63 }
 0x1a0   :  { %1582 = vmatprep.subr.mxu1 %v1663_v35 }
 0x1a1   :  { %1583 = vmatpush3.msra.mxu1 %v1139_v2 }
 0x1a2   :  { %1584 = vmatprep.subr.mxu1 %v1663_v35 }
 0x1a3   :  { %1585 = vmatpush3.msra.mxu1 %v1138_v4 }
 0x1a4   :  { %1586 = vmatprep.subr.mxu1 %v1663_v35 }
 0x1a5   :  { %1587 = vmatpush3.msra.mxu1 %v1137_v7 }
 0x1a6   :  { %1588 = vmatprep.subr.mxu1 %v1663_v35 }
 0x1a7   :  { %1589 = vmatpush3.msra.mxu1 %v1136_v8 }
 0x1a8   :  { %1590 = vmatprep.subr.mxu1 %v1663_v35 }
 0x1a9   :  { %1591 = vmatpush3.msra.mxu1 %v1135_v12 }
 0x1aa   :  { %1592 = vmatprep.subr.mxu1 %v1663_v35 }
 0x1ab   :  { %1593 = vmatpush3.msra.mxu1 %v1134_v14 }
 0x1ac   :  { %1594 = vmatprep.subr.mxu1 %v1663_v35 }
 0x1ad   :  { %1595 = vmatpush3.msra.mxu1 %v1133_v61 }
 0x1ae   :  { %1596 = vmatprep.subr.mxu1 %v1663_v35 }
 0x1af   :  { %1597 = vmatpush3.msra.mxu1 %v1132_v17 }
 0x1b0   :  { %1599 = vmatmul.mubr.f32.vlgmr.msra.gmra.mxu1 %v1121_v0 }
 0x20b   :  { %v1442_v37 = vpop.f32.mrf.mxu0 }
 0x20d   :  { %v1443_v38 = vpop.f32.mrf.mxu0 }
 0x20e   :  { %v1444_v39 = vadd.f32 %v1443_v38, %v1442_v37 }
 0x210   :  { %v1038_v47 = vadd.f32 %v1444_v39, %v970_v44 }
 0x22b   :  { %v1230_v40 = vpop.f32.mrf.mxu0 }
 0x22d   :  { %v1565_v41 = vpop.f32.mrf.mxu0 }
 0x250   :  { %v1477_v42 = vpop.f32.mrf.mxu1 }
 0x252   :  { %v1478_v43 = vpop.f32.mrf.mxu1 }
 0x253   :  { %v1479_v45 = vadd.f32 %v1478_v43, %v1477_v42 }
 0x255   :  { %v1108_v11 = vadd.f32 %v1479_v45, %v1038_v47 }
 0x270   :  { %v1300_v46 = vpop.f32.mrf.mxu1 }
 0x271   :  { %v1301_v35 = vadd.f32 %v1300_v46, %v1230_v40 }
 0x272   :  { %v1600_v48 = vpop.f32.mrf.mxu1 }
 0x273   :  { %v1305_v49 = vadd.f32 %v1304_v9, %v1301_v35 }
 0x275   :  { %v1306_v50 = vadd.f32 %v1305_v49, %v1108_v11 }
 0x277   :  { %1639 = vtanh.f32 %v1306_v50 }
 0x284   :  { %v1640_v51 = vpop.eup %1639 }
 0x285   :  { %1634 = vmatmul.mubr.f32.vlgmr.msra.gmra.mxu0 %v1640_v51 }
 0x345   :  { %v1391_v53 = vpop.f32.mrf.mxu0 }
 0x346   :  { %v1392_v54 = vadd.f32 %v1391_v53, %v1324_v52 }
 0x347   :  { %v1635_v55 = vpop.f32.mrf.mxu0 }
 0x348   :  { %1395 = vst [vmem:[#allocation2] sm:$0x1] %v1392_v54 }
 0x349   :  { %1652 = shalt.err (!%p1649_p4)
}
 0x34a   :  { %1405 = dma.vmem_to_hbm [thread:$0]  %s1403_s18, 16, %s3377_s12, [#allocation3]  }
 0x34b   :  { %1661 = dma.done.wait [#allocation3], 16  }
 0x34c   :  { %1662 = vsyncadd [#allocation3], 4294967280 }
 0x34d   :  { %1409 = vsyncpa [#allocation3], 1 }

// kernel: dtis_forward.19
= control target key start
LH: loop header
LB: loop body
LE: loop exit
PB: predicated region body
PF: predicated region fallthrough
CT: control target
= control target key end

     0   :  { %vm204_vm0 = vcmask 1046528   ;;  %vm670_vm1 = vcmask 1045504   ;;  %vm3908_vm2 = vmmov 0   ;;  %s5661_s1 = inlined_call_operand.vmem [shape: f32[3,512,128], index: 1, kind: input, shape index: {}]   ;;  %s5662_s0 = inlined_call_operand.vmem [shape: f32[31,512], index: 0, kind: input, shape index: {}]   ;;  %s5663_s4 = inlined_call_operand.vmem [shape: f32[6,128,128], index: 4, kind: input, shape index: {}]   ;;  %s5664_s2 = inlined_call_operand.vmem [shape: f32[1,128], index: 2, kind: input, shape index: {}]   ;;  %s5665_s3 = inlined_call_operand.vmem [shape: f32[2,128], index: 3, kind: input, shape index: {}]   ;;  %s5666_s7 = inlined_call_operand.vmem [shape: f32[9,128,128], index: 7, kind: input, shape index: {}]   ;;  %s5667_s5 = inlined_call_operand.vmem [shape: f32[1,128], index: 5, kind: input, shape index: {}]   ;;  %s5668_s6 = inlined_call_operand.vmem [shape: f32[2,128], index: 6, kind: input, shape index: {}]   ;;  %s5669_s8 = inlined_call_operand.vmem [shape: f32[1,128], index: 8, kind: input, shape index: {}]   ;;  %s5670_s9 = inlined_call_operand.vmem [shape: f32[2,128], index: 9, kind: input, shape index: {}]   ;;  %s5671_s10 = inlined_call_operand.vmem [shape: f32[16,128], index: 10, kind: output, shape index: {}]  }
   0x1   :  { %v2490_v0 = vld [vmem:[%s5661_s1 + $0x2f8] sm:$0xff]  ;;  %v2489_v4 = vld [vmem:[%s5661_s1 + $0x2f0] sm:$0xff]  ;;  %v2488_v8 = vld [vmem:[%s5661_s1 + $0x2e8] sm:$0xff] }
   0x2   :  { %v2522_v1 = vld [vmem:[%s5661_s1 + $0x3f8] sm:$0xff]  ;;  %2804 = vmatprep.subr.mxu0 %v2490_v0  ;;  %v2521_v5 = vld [vmem:[%s5661_s1 + $0x3f0] sm:$0xff]  ;;  %v2520_v9 = vld [vmem:[%s5661_s1 + $0x3e8] sm:$0xff] }
   0x3   :  { %v2474_v2 = vld [vmem:[%s5661_s1 + $0x278] sm:$0xff]  ;;  %2848 = vmatprep.subr.mxu1 %v2522_v1  ;;  %v2473_v6 = vld [vmem:[%s5661_s1 + $0x270] sm:$0xff]  ;;  %v2472_v10 = vld [vmem:[%s5661_s1 + $0x268] sm:$0xff] }
   0x4   :  { %v2506_v3 = vld [vmem:[%s5661_s1 + $0x378] sm:$0xff]  ;;  %2805 = vmatpush3.msra.mxu0 %v2474_v2  ;;  %v2505_v7 = vld [vmem:[%s5661_s1 + $0x370] sm:$0xff]  ;;  %v2504_v11 = vld [vmem:[%s5661_s1 + $0x368] sm:$0xff] }
   0x5   :  { %2849 = vmatpush3.msra.mxu1 %v2506_v3  ;;  %2806 = vmatprep.subr.mxu0 %v2489_v4  ;;  %v2487_v12 = vld [vmem:[%s5661_s1 + $0x2e0] sm:$0xff]  ;;  %v2486_v16 = vld [vmem:[%s5661_s1 + $0x2d8] sm:$0xff]  ;;  %v2485_v20 = vld [vmem:[%s5661_s1 + $0x2d0] sm:$0xff] }
   0x6   :  { %2850 = vmatprep.subr.mxu1 %v2521_v5  ;;  %2807 = vmatpush3.msra.mxu0 %v2473_v6  ;;  %v2519_v13 = vld [vmem:[%s5661_s1 + $0x3e0] sm:$0xff]  ;;  %v2518_v17 = vld [vmem:[%s5661_s1 + $0x3d8] sm:$0xff]  ;;  %v2517_v21 = vld [vmem:[%s5661_s1 + $0x3d0] sm:$0xff] }
   0x7   :  { %2851 = vmatpush3.msra.mxu1 %v2505_v7  ;;  %2808 = vmatprep.subr.mxu0 %v2488_v8  ;;  %v2471_v14 = vld [vmem:[%s5661_s1 + $0x260] sm:$0xff]  ;;  %v2470_v18 = vld [vmem:[%s5661_s1 + $0x258] sm:$0xff]  ;;  %v2469_v22 = vld [vmem:[%s5661_s1 + $0x250] sm:$0xff] }
   0x8   :  { %2852 = vmatprep.subr.mxu1 %v2520_v9  ;;  %v2503_v15 = vld [vmem:[%s5661_s1 + $0x360] sm:$0xff]  ;;  %2809 = vmatpush3.msra.mxu0 %v2472_v10  ;;  %v2502_v19 = vld [vmem:[%s5661_s1 + $0x358] sm:$0xff]  ;;  %v2501_v23 = vld [vmem:[%s5661_s1 + $0x350] sm:$0xff] }
   0x9   :  { %2853 = vmatpush3.msra.mxu1 %v2504_v11  ;;  %2810 = vmatprep.subr.mxu0 %v2487_v12  ;;  %v2484_v24 = vld [vmem:[%s5661_s1 + $0x2c8] sm:$0xff]  ;;  %v2483_v28 = vld [vmem:[%s5661_s1 + $0x2c0] sm:$0xff]  ;;  %v2482_v32 = vld [vmem:[%s5661_s1 + $0x2b8] sm:$0xff] }
   0xa   :  { %2854 = vmatprep.subr.mxu1 %v2519_v13  ;;  %2811 = vmatpush3.msra.mxu0 %v2471_v14  ;;  %v2516_v25 = vld [vmem:[%s5661_s1 + $0x3c8] sm:$0xff]  ;;  %v2515_v29 = vld [vmem:[%s5661_s1 + $0x3c0] sm:$0xff]  ;;  %v2514_v33 = vld [vmem:[%s5661_s1 + $0x3b8] sm:$0xff] }
   0xb   :  { %2855 = vmatpush3.msra.mxu1 %v2503_v15  ;;  %2812 = vmatprep.subr.mxu0 %v2486_v16  ;;  %v2468_v26 = vld [vmem:[%s5661_s1 + $0x248] sm:$0xff]  ;;  %v2467_v30 = vld [vmem:[%s5661_s1 + $0x240] sm:$0xff]  ;;  %v2466_v34 = vld [vmem:[%s5661_s1 + $0x238] sm:$0xff] }
   0xc   :  { %2856 = vmatprep.subr.mxu1 %v2518_v17  ;;  %2813 = vmatpush3.msra.mxu0 %v2470_v18  ;;  %v2500_v27 = vld [vmem:[%s5661_s1 + $0x348] sm:$0xff]  ;;  %v2499_v31 = vld [vmem:[%s5661_s1 + $0x340] sm:$0xff]  ;;  %v2498_v35 = vld [vmem:[%s5661_s1 + $0x338] sm:$0xff] }
   0xd   :  { %2857 = vmatpush3.msra.mxu1 %v2502_v19  ;;  %2814 = vmatprep.subr.mxu0 %v2485_v20  ;;  %v2481_v36 = vld [vmem:[%s5661_s1 + $0x2b0] sm:$0xff]  ;;  %v2480_v40 = vld [vmem:[%s5661_s1 + $0x2a8] sm:$0xff]  ;;  %v2479_v44 = vld [vmem:[%s5661_s1 + $0x2a0] sm:$0xff] }
   0xe   :  { %2858 = vmatprep.subr.mxu1 %v2517_v21  ;;  %2815 = vmatpush3.msra.mxu0 %v2469_v22  ;;  %v2513_v37 = vld [vmem:[%s5661_s1 + $0x3b0] sm:$0xff]  ;;  %v2512_v41 = vld [vmem:[%s5661_s1 + $0x3a8] sm:$0xff]  ;;  %v2511_v45 = vld [vmem:[%s5661_s1 + $0x3a0] sm:$0xff] }
   0xf   :  { %2859 = vmatpush3.msra.mxu1 %v2501_v23  ;;  %2816 = vmatprep.subr.mxu0 %v2484_v24  ;;  %v2465_v38 = vld [vmem:[%s5661_s1 + $0x230] sm:$0xff]  ;;  %v2464_v42 = vld [vmem:[%s5661_s1 + $0x228] sm:$0xff]  ;;  %v2463_v46 = vld [vmem:[%s5661_s1 + $0x220] sm:$0xff] }
  0x10   :  { %2860 = vmatprep.subr.mxu1 %v2516_v25  ;;  %2817 = vmatpush3.msra.mxu0 %v2468_v26  ;;  %v2497_v39 = vld [vmem:[%s5661_s1 + $0x330] sm:$0xff]  ;;  %v2496_v43 = vld [vmem:[%s5661_s1 + $0x328] sm:$0xff]  ;;  %v2495_v47 = vld [vmem:[%s5661_s1 + $0x320] sm:$0xff] }
  0x11   :  { %2861 = vmatpush3.msra.mxu1 %v2500_v27  ;;  %2818 = vmatprep.subr.mxu0 %v2483_v28  ;;  %v2478_v48 = vld [vmem:[%s5661_s1 + $0x298] sm:$0xff]  ;;  %v2477_v52 = vld [vmem:[%s5661_s1 + $0x290] sm:$0xff]  ;;  %v4129_v54 = vld [vmem:[%s5662_s0 + $0x28] sm:$0xff] }
  0x12   :  { %2862 = vmatprep.subr.mxu1 %v2515_v29  ;;  %2819 = vmatpush3.msra.mxu0 %v2467_v30  ;;  %v2510_v49 = vld [vmem:[%s5661_s1 + $0x398] sm:$0xff]  ;;  %v2509_v53 = vld [vmem:[%s5661_s1 + $0x390] sm:$0xff]  ;;  %v116_v55 = vld [vmem:[%s5662_s0 + $0x8] sm:$0xfe]  ;;  %v209_v1 = vrot.slane %v4129_v54, 1 }
  0x13   :  { %2863 = vmatpush3.msra.mxu1 %v2499_v31  ;;  %2820 = vmatprep.subr.mxu0 %v2482_v32  ;;  %v2462_v50 = vld [vmem:[%s5661_s1 + $0x218] sm:$0xff]  ;;  %v4145_v58 = vld [vmem:[%s5662_s0 + $0x20] sm:$0xff]  ;;  %v4153_v60 = vld [vmem:[%s5662_s0 + $0x30] sm:$0xff]  ;;  %v208_v0 = vrot.slane %v116_v55, 1 }
  0x14   :  { %2864 = vmatprep.subr.mxu1 %v2514_v33  ;;  %2821 = vmatpush3.msra.mxu0 %v2466_v34  ;;  %v2494_v51 = vld [vmem:[%s5661_s1 + $0x318] sm:$0xff]  ;;  %v115_v59 = vld [vmem:[%s5662_s0] sm:$0xfe]  ;;  %v117_v61 = vld [vmem:[%s5662_s0 + $0x10] sm:$0xfe]  ;;  %v206_v9 = vrot.slane %v4145_v58, 1 }
  0x15   :  { %2865 = vmatpush3.msra.mxu1 %v2498_v35  ;;  %2822 = vmatprep.subr.mxu0 %v2481_v36  ;;  %v4137_v56 = vld [vmem:[%s5662_s0 + $0x38] sm:$0xff]  ;;  %v2461_v62 = vld [vmem:[%s5661_s1 + $0x210] sm:$0xff]  ;;  %v2476_v2 = vld [vmem:[%s5661_s1 + $0x288] sm:$0xff]  ;;  %v205_v8 = vrot.slane %v115_v59, 1  ;;  %v211_v10 = vrot.slane %v117_v61, 1  ;;  %v212_v11 = vrot.slane %v4153_v60, 1  ;;  %v210_v15 = vsel %vm204_vm0, %v208_v0, %v209_v1 }
  0x16   :  { %2866 = vmatprep.subr.mxu1 %v2513_v37  ;;  %2823 = vmatpush3.msra.mxu0 %v2465_v38  ;;  %v118_v57 = vld [vmem:[%s5662_s0 + $0x18] sm:$0xfe]  ;;  %v2493_v63 = vld [vmem:[%s5661_s1 + $0x310] sm:$0xff]  ;;  %v2508_v3 = vld [vmem:[%s5661_s1 + $0x388] sm:$0xff]  ;;  %v215_v5 = vrot.slane %v4137_v56, 1 }
  0x17   :  { %2867 = vmatpush3.msra.mxu1 %v2497_v39  ;;  %2824 = vmatprep.subr.mxu0 %v2480_v40  ;;  %v214_v4 = vrot.slane %v118_v57, 1  ;;  %v2460_v6 = vld [vmem:[%s5661_s1 + $0x208] sm:$0xff]  ;;  %v2475_v12 = vld [vmem:[%s5661_s1 + $0x280] sm:$0xff]  ;;  %v207_v18 = vsel %vm204_vm0, %v205_v8, %v206_v9  ;;  %v213_v19 = vsel %vm204_vm0, %v211_v10, %v212_v11  ;;  %v82_v20 = vld [vmem:[%s5661_s1 + $0xf8] sm:$0xff] }
  0x18   :  { %2868 = vmatprep.subr.mxu1 %v2512_v41  ;;  %2825 = vmatpush3.msra.mxu0 %v2464_v42  ;;  %v2492_v7 = vld [vmem:[%s5661_s1 + $0x308] sm:$0xff]  ;;  %v2507_v13 = vld [vmem:[%s5661_s1 + $0x380] sm:$0xff]  ;;  %v114_v21 = vld [vmem:[%s5661_s1 + $0x1f8] sm:$0xff] }
  0x19   :  { %2869 = vmatpush3.msra.mxu1 %v2496_v43  ;;  %2826 = vmatprep.subr.mxu0 %v2479_v44  ;;  %v2459_v14 = vld [vmem:[%s5661_s1 + $0x200] sm:$0xff]  ;;  %v216_v17 = vsel %vm204_vm0, %v214_v4, %v215_v5  ;;  %v66_v22 = vld [vmem:[%s5661_s1 + $0x78] sm:$0xff]  ;;  %v81_v24 = vld [vmem:[%s5661_s1 + $0xf0] sm:$0xff] }
  0x1a   :  { %2870 = vmatprep.subr.mxu1 %v2511_v45  ;;  %2827 = vmatpush3.msra.mxu0 %v2463_v46  ;;  %v2491_v16 = vld [vmem:[%s5661_s1 + $0x300] sm:$0xff]  ;;  %v98_v23 = vld [vmem:[%s5661_s1 + $0x178] sm:$0xff]  ;;  %v113_v25 = vld [vmem:[%s5661_s1 + $0x1f0] sm:$0xff] }
  0x1b   :  { %2871 = vmatpush3.msra.mxu1 %v2495_v47  ;;  %2828 = vmatprep.subr.mxu0 %v2478_v48  ;;  %v65_v26 = vld [vmem:[%s5661_s1 + $0x70] sm:$0xff]  ;;  %v80_v28 = vld [vmem:[%s5661_s1 + $0xe8] sm:$0xff]  ;;  %v79_v32 = vld [vmem:[%s5661_s1 + $0xe0] sm:$0xff] }
  0x1c   :  { %2872 = vmatprep.subr.mxu1 %v2510_v49  ;;  %2829 = vmatpush3.msra.mxu0 %v2462_v50  ;;  %v97_v27 = vld [vmem:[%s5661_s1 + $0x170] sm:$0xff]  ;;  %v112_v29 = vld [vmem:[%s5661_s1 + $0x1e8] sm:$0xff]  ;;  %v111_v33 = vld [vmem:[%s5661_s1 + $0x1e0] sm:$0xff] }
  0x1d   :  { %2873 = vmatpush3.msra.mxu1 %v2494_v51  ;;  %2830 = vmatprep.subr.mxu0 %v2477_v52  ;;  %v64_v30 = vld [vmem:[%s5661_s1 + $0x68] sm:$0xff]  ;;  %v63_v34 = vld [vmem:[%s5661_s1 + $0x60] sm:$0xff]  ;;  %v78_v36 = vld [vmem:[%s5661_s1 + $0xd8] sm:$0xff] }
  0x1e   :  { %2874 = vmatprep.subr.mxu1 %v2509_v53  ;;  %2831 = vmatpush3.msra.mxu0 %v2461_v62  ;;  %v96_v31 = vld [vmem:[%s5661_s1 + $0x168] sm:$0xff]  ;;  %v95_v35 = vld [vmem:[%s5661_s1 + $0x160] sm:$0xff]  ;;  %v110_v37 = vld [vmem:[%s5661_s1 + $0x1d8] sm:$0xff] }
  0x1f   :  { %2875 = vmatpush3.msra.mxu1 %v2493_v63  ;;  %2832 = vmatprep.subr.mxu0 %v2476_v2  ;;  %v62_v38 = vld [vmem:[%s5661_s1 + $0x58] sm:$0xff]  ;;  %v77_v40 = vld [vmem:[%s5661_s1 + $0xd0] sm:$0xff]  ;;  %v4279_v44 = vld [vmem:[%s5662_s0 + $0x48] sm:$0xff] }
  0x20   :  { %2876 = vmatprep.subr.mxu1 %v2508_v3  ;;  %2833 = vmatpush3.msra.mxu0 %v2460_v6  ;;  %v94_v39 = vld [vmem:[%s5661_s1 + $0x158] sm:$0xff]  ;;  %v109_v41 = vld [vmem:[%s5661_s1 + $0x1d0] sm:$0xff]  ;;  %v76_v46 = vld [vmem:[%s5661_s1 + $0xc8] sm:$0xff]  ;;  %v219_v55 = vrot.slane %v4279_v44, 1 }
  0x21   :  { %2877 = vmatpush3.msra.mxu1 %v2492_v7  ;;  %2834 = vmatprep.subr.mxu0 %v2475_v12  ;;  %v61_v42 = vld [vmem:[%s5661_s1 + $0x50] sm:$0xff]  ;;  %v4284_v45 = vld [vmem:[%s5662_s0 + $0x58] sm:$0xff]  ;;  %v108_v47 = vld [vmem:[%s5661_s1 + $0x1c8] sm:$0xff] }
  0x22   :  { %2878 = vmatprep.subr.mxu1 %v2507_v13  ;;  %2835 = vmatpush3.msra.mxu0 %v2459_v14  ;;  %v93_v43 = vld [vmem:[%s5661_s1 + $0x150] sm:$0xff]  ;;  %v60_v48 = vld [vmem:[%s5661_s1 + $0x48] sm:$0xff]  ;;  %v4301_v50 = vld [vmem:[%s5662_s0 + $0x40] sm:$0xff]  ;;  %v223_v57 = vrot.slane %v4284_v45, 1  ;;  %v220_v8 = vsel %vm204_vm0, %v209_v1, %v219_v55 }
  0x23   :  { %313 = vmatprep.mubr.f32.mxu0 %v210_v15  ;;  %2879 = vmatpush3.msra.mxu1 %v2491_v16  ;;  %v92_v49 = vld [vmem:[%s5661_s1 + $0x148] sm:$0xff]  ;;  %v4306_v51 = vld [vmem:[%s5662_s0 + $0x50] sm:$0xff]  ;;  %v75_v52 = vld [vmem:[%s5661_s1 + $0xc0] sm:$0xff]  ;;  %v217_v2 = vrot.slane %v4301_v50, 1 }
  0x24   :  { %398 = vmatprep.mubr.f32.mxu1 %v216_v17  ;;  %314 = vmatmul.mubr.f32.vlgmr.msra.gmra.mxu0 %v207_v18  ;;  %v107_v53 = vld [vmem:[%s5661_s1 + $0x1c0] sm:$0xff]  ;;  %v74_v62 = vld [vmem:[%s5661_s1 + $0xb8] sm:$0xff]  ;;  %v221_v3 = vrot.slane %v4306_v51, 1  ;;  %v4339_v6 = vld [vmem:[%s5662_s0 + $0x68] sm:$0x3f]  ;;  %v224_v10 = vsel %vm204_vm0, %v215_v5, %v223_v57 }
  0x25   :  { %399 = vmatmul.mubr.f32.vlgmr.msra.gmra.mxu1 %v213_v19  ;;  %2892 = vmatprep.subr.mxu0 %v82_v20  ;;  %v59_v59 = vld [vmem:[%s5661_s1 + $0x40] sm:$0xff]  ;;  %v106_v63 = vld [vmem:[%s5661_s1 + $0x1b8] sm:$0xff]  ;;  %v73_v12 = vld [vmem:[%s5661_s1 + $0xb0] sm:$0xff]  ;;  %v218_v5 = vsel %vm204_vm0, %v206_v9, %v217_v2  ;;  %v227_v16 = vrot.slane %v4339_v6, 1 }
  0x26   :  { %2936 = vmatprep.subr.mxu1 %v114_v21  ;;  %2893 = vmatpush3.msra.mxu0 %v66_v22  ;;  %v91_v61 = vld [vmem:[%s5661_s1 + $0x140] sm:$0xff]  ;;  %v58_v0 = vld [vmem:[%s5661_s1 + $0x38] sm:$0xff]  ;;  %v105_v13 = vld [vmem:[%s5661_s1 + $0x1b0] sm:$0xff]  ;;  %v222_v15 = vsel %vm204_vm0, %v212_v11, %v221_v3 }
  0x27   :  { %2937 = vmatpush3.msra.mxu1 %v98_v23  ;;  %2894 = vmatprep.subr.mxu0 %v81_v24  ;;  %v90_v4 = vld [vmem:[%s5661_s1 + $0x138] sm:$0xff]  ;;  %v119_v14 = vld [vmem:[%s5662_s0 + $0x60] sm:$0x3f]  ;;  %v121_v1 = vld [vmem:[%s5662_s0 + $0x70] sm:$0x3f]  ;;  %v228_v24 = vsel %vm204_vm0, %v219_v55, %v227_v16 }
  0x28   :  { %2938 = vmatprep.subr.mxu1 %v113_v25  ;;  %2895 = vmatpush3.msra.mxu0 %v65_v26  ;;  %v4344_v7 = vld [vmem:[%s5662_s0 + $0x78] sm:$0x3f]  ;;  %v57_v18 = vld [vmem:[%s5661_s1 + $0x30] sm:$0xff]  ;;  %v72_v9 = vld [vmem:[%s5661_s1 + $0xa8] sm:$0xff]  ;;  %v225_v20 = vrot.slane %v119_v14, 1  ;;  %v229_v21 = vrot.slane %v121_v1, 1 }
  0x29   :  { %2939 = vmatpush3.msra.mxu1 %v97_v27  ;;  %2896 = vmatprep.subr.mxu0 %v80_v28  ;;  %v231_v17 = vrot.slane %v4344_v7, 1  ;;  %v89_v19 = vld [vmem:[%s5661_s1 + $0x130] sm:$0xff]  ;;  %v104_v11 = vld [vmem:[%s5661_s1 + $0x1a8] sm:$0xff]  ;;  %v71_v26 = vld [vmem:[%s5661_s1 + $0xa0] sm:$0xff]  ;;  %v678_v7 = vrot.slane %v4153_v60, 2 }
  0x2a   :  { %2940 = vmatprep.subr.mxu1 %v112_v29  ;;  %2897 = vmatpush3.msra.mxu0 %v64_v30  ;;  %v56_v22 = vld [vmem:[%s5661_s1 + $0x28] sm:$0xff]  ;;  %v103_v27 = vld [vmem:[%s5661_s1 + $0x1a0] sm:$0xff]  ;;  %v226_v28 = vsel %vm204_vm0, %v217_v2, %v225_v20  ;;  %v230_v29 = vsel %vm204_vm0, %v221_v3, %v229_v21  ;;  %v672_v2 = vrot.slane %v4145_v58, 2  ;;  %v2570_v3 = vld [vmem:[%s5661_s1 + $0x578] sm:$0xff] }
  0x2b   :  { %2941 = vmatpush3.msra.mxu1 %v96_v31  ;;  %2898 = vmatprep.subr.mxu0 %v79_v32  ;;  %v88_v23 = vld [vmem:[%s5661_s1 + $0x128] sm:$0xff]  ;;  %v232_v25 = vsel %vm204_vm0, %v223_v57, %v231_v17  ;;  %v55_v30 = vld [vmem:[%s5661_s1 + $0x20] sm:$0xff]  ;;  %v70_v32 = vld [vmem:[%s5661_s1 + $0x98] sm:$0xff] }
  0x2c   :  { %2942 = vmatprep.subr.mxu1 %v111_v33  ;;  %2899 = vmatpush3.msra.mxu0 %v63_v34  ;;  %v87_v31 = vld [vmem:[%s5661_s1 + $0x120] sm:$0xff]  ;;  %v102_v33 = vld [vmem:[%s5661_s1 + $0x198] sm:$0xff]  ;;  %v37_v57 = vld [vmem:[%s5662_s0 + $0x10] sm:$0xff] }
  0x2d   :  { %2943 = vmatpush3.msra.mxu1 %v95_v35  ;;  %2900 = vmatprep.subr.mxu0 %v78_v36  ;;  %v54_v34 = vld [vmem:[%s5661_s1 + $0x18] sm:$0xff]  ;;  %v69_v36 = vld [vmem:[%s5661_s1 + $0x90] sm:$0xff]  ;;  %v35_v55 = vld [vmem:[%s5662_s0] sm:$0xff] }
  0x2e   :  { %2944 = vmatprep.subr.mxu1 %v110_v37  ;;  %2901 = vmatpush3.msra.mxu0 %v62_v38  ;;  %v86_v35 = vld [vmem:[%s5661_s1 + $0x118] sm:$0xff]  ;;  %v101_v37 = vld [vmem:[%s5661_s1 + $0x190] sm:$0xff] }
  0x2f   :  { %2945 = vmatpush3.msra.mxu1 %v94_v39  ;;  %2902 = vmatprep.subr.mxu0 %v77_v40  ;;  %v53_v38 = vld [vmem:[%s5661_s1 + $0x10] sm:$0xff]  ;;  %v68_v40 = vld [vmem:[%s5661_s1 + $0x88] sm:$0xff]  ;;  %v592_v6 = vld [vmem:[%s5662_s0 + $0x18] sm:$0xfc] }
  0x30   :  { %2946 = vmatprep.subr.mxu1 %v109_v41  ;;  %2903 = vmatpush3.msra.mxu0 %v61_v42  ;;  %v85_v39 = vld [vmem:[%s5661_s1 + $0x110] sm:$0xff]  ;;  %v100_v41 = vld [vmem:[%s5661_s1 + $0x188] sm:$0xff] }
  0x31   :  { %2947 = vmatpush3.msra.mxu1 %v93_v43  ;;  %2904 = vmatprep.subr.mxu0 %v76_v46  ;;  %v52_v42 = vld [vmem:[%s5661_s1 + $0x8] sm:$0xff]  ;;  %v67_v46 = vld [vmem:[%s5661_s1 + $0x80] sm:$0xff]  ;;  %v2553_v14 = vld [vmem:[%s5661_s1 + $0x4f0] sm:$0xff] }
  0x32   :  { %2948 = vmatprep.subr.mxu1 %v108_v47  ;;  %2905 = vmatpush3.msra.mxu0 %v60_v48  ;;  %v84_v43 = vld [vmem:[%s5661_s1 + $0x108] sm:$0xff]  ;;  %v99_v47 = vld [vmem:[%s5661_s1 + $0x180] sm:$0xff]  ;;  %v2585_v1 = vld [vmem:[%s5661_s1 + $0x5f0] sm:$0xff] }
  0x33   :  { %2949 = vmatpush3.msra.mxu1 %v92_v49  ;;  %2906 = vmatprep.subr.mxu0 %v75_v52  ;;  %v51_v48 = vld [vmem:[%s5661_s1] sm:$0xff]  ;;  %v36_v49 = vld [vmem:[%s5662_s0 + $0x8] sm:$0xff] }
  0x34   :  { %2950 = vmatprep.subr.mxu1 %v107_v53  ;;  %2907 = vmatpush3.msra.mxu0 %v59_v59  ;;  %v83_v52 = vld [vmem:[%s5661_s1 + $0x100] sm:$0xff]  ;;  %v38_v53 = vld [vmem:[%s5662_s0 + $0x18] sm:$0xff] }
  0x35   :  { %2951 = vmatpush3.msra.mxu1 %v91_v61  ;;  %2908 = vmatprep.subr.mxu0 %v74_v62  ;;  %v2554_v59 = vld [vmem:[%s5661_s1 + $0x4f8] sm:$0xff] }
  0x36   :  { %2952 = vmatprep.subr.mxu1 %v106_v63  ;;  %2909 = vmatpush3.msra.mxu0 %v58_v0  ;;  %v2586_v61 = vld [vmem:[%s5661_s1 + $0x5f8] sm:$0xff]  ;;  %v675_v63 = vrot.slane %v4129_v54, 2  ;;  %v681_v0 = vrot.slane %v4137_v56, 2 }
  0x37   :  { %2953 = vmatpush3.msra.mxu1 %v90_v4  ;;  %318 = vmatprep.mubr.f32.mxu0 %v220_v8  ;;  %v2538_v62 = vld [vmem:[%s5661_s1 + $0x478] sm:$0xff]  ;;  %v590_v4 = vld [vmem:[%s5662_s0 + $0x8] sm:$0xfc] }
  0x38   :  { %403 = vmatprep.mubr.f32.mxu1 %v224_v10  ;;  %2910 = vmatprep.subr.mxu0 %v73_v12  ;;  %v674_v8 = vrot.slane %v590_v4, 2  ;;  %v680_v10 = vrot.slane %v592_v6, 2  ;;  %v589_v12 = vld [vmem:[%s5662_s0] sm:$0xfc]  ;;  %v2544_v4 = vld [vmem:[%s5661_s1 + $0x4a8] sm:$0xff] }
  0x39   :  { %2954 = vmatprep.subr.mxu1 %v105_v13  ;;  %319 = vmatmul.mubr.f32.gmra.mxu0 %v218_v5  ;;  %v591_v13 = vld [vmem:[%s5662_s0 + $0x10] sm:$0xfc]  ;;  %v671_v5 = vrot.slane %v589_v12, 2  ;;  %v2576_v6 = vld [vmem:[%s5661_s1 + $0x5a8] sm:$0xff]  ;;  %v2543_v12 = vld [vmem:[%s5661_s1 + $0x4a0] sm:$0xff] }
  0x3a   :  { %404 = vmatmul.mubr.f32.gmra.mxu1 %v222_v15  ;;  %2911 = vmatpush3.msra.mxu0 %v57_v18  ;;  %v677_v15 = vrot.slane %v591_v13, 2  ;;  %v4511_v18 = vsel %vm670_vm1, %v680_v10, %v681_v0  ;;  %v2560_v10 = vld [vmem:[%s5661_s1 + $0x528] sm:$0xff]  ;;  %v2575_v13 = vld [vmem:[%s5661_s1 + $0x5a0] sm:$0xff] }
  0x3b   :  { %2955 = vmatpush3.msra.mxu1 %v89_v19  ;;  %2912 = vmatprep.subr.mxu0 %v72_v9  ;;  %v2569_v19 = vld [vmem:[%s5661_s1 + $0x570] sm:$0xff]  ;;  %v4519_v9 = vsel %vm670_vm1, %v671_v5, %v672_v2  ;;  %v2542_v5 = vld [vmem:[%s5661_s1 + $0x498] sm:$0xff] }
  0x3c   :  { %2956 = vmatprep.subr.mxu1 %v104_v11  ;;  %2913 = vmatpush3.msra.mxu0 %v56_v22  ;;  %v4524_v11 = vsel %vm670_vm1, %v677_v15, %v678_v7  ;;  %v2536_v22 = vld [vmem:[%s5661_s1 + $0x468] sm:$0xff]  ;;  %v2574_v15 = vld [vmem:[%s5661_s1 + $0x598] sm:$0xff] }
  0x3d   :  { %2957 = vmatpush3.msra.mxu1 %v88_v23  ;;  %323 = vmatprep.mubr.f32.mxu0 %v228_v24  ;;  %v2568_v23 = vld [vmem:[%s5661_s1 + $0x568] sm:$0xff]  ;;  %v2551_v24 = vld [vmem:[%s5661_s1 + $0x4e0] sm:$0xff] }
  0x3e   :  { %408 = vmatprep.mubr.f32.mxu1 %v232_v25  ;;  %2914 = vmatprep.subr.mxu0 %v71_v26  ;;  %v2583_v25 = vld [vmem:[%s5661_s1 + $0x5e0] sm:$0xff] }
  0x3f   :  { %2958 = vmatprep.subr.mxu1 %v103_v27  ;;  %324 = vmatmul.mubr.f32.gmra.mxu0 %v226_v28  ;;  %v2535_v26 = vld [vmem:[%s5661_s1 + $0x460] sm:$0xff]  ;;  %v2550_v28 = vld [vmem:[%s5661_s1 + $0x4d8] sm:$0xff] }
  0x40   :  { %409 = vmatmul.mubr.f32.gmra.mxu1 %v230_v29  ;;  %2915 = vmatpush3.msra.mxu0 %v55_v30  ;;  %v2567_v27 = vld [vmem:[%s5661_s1 + $0x560] sm:$0xff]  ;;  %v2582_v29 = vld [vmem:[%s5661_s1 + $0x5d8] sm:$0xff] }
  0x41   :  { %2959 = vmatpush3.msra.mxu1 %v87_v31  ;;  %2916 = vmatprep.subr.mxu0 %v70_v32  ;;  %v2534_v30 = vld [vmem:[%s5661_s1 + $0x458] sm:$0xff]  ;;  %v2549_v32 = vld [vmem:[%s5661_s1 + $0x4d0] sm:$0xff] }
  0x42   :  { %2960 = vmatprep.subr.mxu1 %v102_v33  ;;  %2917 = vmatpush3.msra.mxu0 %v54_v34  ;;  %v2566_v31 = vld [vmem:[%s5661_s1 + $0x558] sm:$0xff]  ;;  %v2581_v33 = vld [vmem:[%s5661_s1 + $0x5d0] sm:$0xff]  ;;  %v48_v34 = vld [vmem:[%s5662_s0 + $0x68] sm:$0x1f] }
  0x43   :  { %2961 = vmatpush3.msra.mxu1 %v86_v35  ;;  %328 = vmatprep.mubr.f32.mxu0 %v227_v16  ;;  %v2537_v16 = vld [vmem:[%s5661_s1 + $0x470] sm:$0xff] }
  0x44   :  { %413 = vmatprep.mubr.f32.mxu1 %v231_v17  ;;  %2918 = vmatprep.subr.mxu0 %v69_v36  ;;  %v4506_v17 = vsel %vm670_vm1, %v674_v8, %v675_v63  ;;  %v2533_v35 = vld [vmem:[%s5661_s1 + $0x450] sm:$0xff]  ;;  %v2528_v8 = vld [vmem:[%s5661_s1 + $0x428] sm:$0xff] }
  0x45   :  { %2962 = vmatprep.subr.mxu1 %v101_v37  ;;  %329 = vmatmul.mubr.f32.gmra.mxu0 %v225_v20  ;;  %v2552_v20 = vld [vmem:[%s5661_s1 + $0x4e8] sm:$0xff]  ;;  %v2565_v36 = vld [vmem:[%s5661_s1 + $0x550] sm:$0xff]  ;;  %v47_v37 = vld [vmem:[%s5662_s0 + $0x60] sm:$0x1f] }
  0x46   :  { %414 = vmatmul.mubr.f32.gmra.mxu1 %v229_v21  ;;  %2919 = vmatpush3.msra.mxu0 %v53_v38  ;;  %v2584_v21 = vld [vmem:[%s5661_s1 + $0x5e8] sm:$0xff] }
  0x47   :  { %2963 = vmatpush3.msra.mxu1 %v85_v39  ;;  %2920 = vmatprep.subr.mxu0 %v68_v40  ;;  %v2548_v38 = vld [vmem:[%s5661_s1 + $0x4c8] sm:$0xff]  ;;  %v50_v40 = vld [vmem:[%s5662_s0 + $0x78] sm:$0x1f] }
  0x48   :  { %2964 = vmatprep.subr.mxu1 %v100_v41  ;;  %2921 = vmatpush3.msra.mxu0 %v52_v42  ;;  %v2580_v39 = vld [vmem:[%s5661_s1 + $0x5c8] sm:$0xff] }
  0x49   :  { %2965 = vmatpush3.msra.mxu1 %v84_v43  ;;  %2922 = vmatprep.subr.mxu0 %v67_v46  ;;  %v2532_v41 = vld [vmem:[%s5661_s1 + $0x448] sm:$0xff]  ;;  %v2547_v43 = vld [vmem:[%s5661_s1 + $0x4c0] sm:$0xff]  ;;  %v49_v46 = vld [vmem:[%s5662_s0 + $0x70] sm:$0x1f] }
  0x4a   :  { %2966 = vmatprep.subr.mxu1 %v99_v47  ;;  %2923 = vmatpush3.msra.mxu0 %v51_v48  ;;  %v2564_v42 = vld [vmem:[%s5661_s1 + $0x548] sm:$0xff]  ;;  %v2579_v47 = vld [vmem:[%s5661_s1 + $0x5c0] sm:$0xff] }
  0x4b   :  { %483 = vmatprep.mubr.f32.mxu0 %v36_v49  ;;  %2967 = vmatpush3.msra.mxu1 %v83_v52  ;;  %v2531_v48 = vld [vmem:[%s5661_s1 + $0x440] sm:$0xff]  ;;  %v2546_v52 = vld [vmem:[%s5661_s1 + $0x4b8] sm:$0xff] }
  0x4c   :  { %568 = vmatprep.mubr.f32.mxu1 %v38_v53  ;;  %484 = vmatmul.mubr.f32.vlgmr.msra.gmra.mxu0 %v35_v55  ;;  %v2563_v49 = vld [vmem:[%s5661_s1 + $0x540] sm:$0xff]  ;;  %v2578_v53 = vld [vmem:[%s5661_s1 + $0x5b8] sm:$0xff] }
  0x4d   :  { %569 = vmatmul.mubr.f32.vlgmr.msra.gmra.mxu1 %v37_v57  ;;  %2980 = vmatprep.subr.mxu0 %v2554_v59  ;;  %v2530_v55 = vld [vmem:[%s5661_s1 + $0x438] sm:$0xff]  ;;  %v2545_v59 = vld [vmem:[%s5661_s1 + $0x4b0] sm:$0xff] }
  0x4e   :  { %3024 = vmatprep.subr.mxu1 %v2586_v61  ;;  %2981 = vmatpush3.msra.mxu0 %v2538_v62  ;;  %v2562_v57 = vld [vmem:[%s5661_s1 + $0x538] sm:$0xff]  ;;  %v2577_v61 = vld [vmem:[%s5661_s1 + $0x5b0] sm:$0xff] }
  0x4f   :  { %3025 = vmatpush3.msra.mxu1 %v2570_v3  ;;  %2982 = vmatprep.subr.mxu0 %v2553_v14  ;;  %v2529_v62 = vld [vmem:[%s5661_s1 + $0x430] sm:$0xff]  ;;  %v2527_v14 = vld [vmem:[%s5661_s1 + $0x420] sm:$0xff] }
  0x50   :  { %3026 = vmatprep.subr.mxu1 %v2585_v1  ;;  %488 = vmatprep.mubr.f32.mxu0 %v4129_v54  ;;  %v2561_v3 = vld [vmem:[%s5661_s1 + $0x530] sm:$0xff]  ;;  %v2559_v1 = vld [vmem:[%s5661_s1 + $0x520] sm:$0xff] }
  0x51   :  { %2983 = vmatpush3.msra.mxu0 %v2537_v16  ;;  %3027 = vmatpush3.msra.mxu1 %v2569_v19  ;;  %v2526_v16 = vld [vmem:[%s5661_s1 + $0x418] sm:$0xff] }
  0x52   :  { %489 = vmatmul.mubr.f32.gmra.mxu0 %v4145_v58  ;;  %2984 = vmatprep.subr.mxu0 %v2552_v20  ;;  %v2558_v19 = vld [vmem:[%s5661_s1 + $0x518] sm:$0xff]  ;;  %v2541_v20 = vld [vmem:[%s5661_s1 + $0x490] sm:$0xff] }
  0x53   :  { %3028 = vmatprep.subr.mxu1 %v2584_v21  ;;  %573 = vmatprep.mubr.f32.mxu1 %v4137_v56  ;;  %v2573_v21 = vld [vmem:[%s5661_s1 + $0x590] sm:$0xff] }
  0x54   :  { %2985 = vmatpush3.msra.mxu0 %v2536_v22  ;;  %3029 = vmatpush3.msra.mxu1 %v2568_v23  ;;  %v2525_v22 = vld [vmem:[%s5661_s1 + $0x410] sm:$0xff] }
  0x55   :  { %2986 = vmatprep.subr.mxu0 %v2551_v24  ;;  %574 = vmatmul.mubr.f32.gmra.mxu1 %v4153_v60  ;;  %v2557_v23 = vld [vmem:[%s5661_s1 + $0x510] sm:$0xff]  ;;  %v2540_v24 = vld [vmem:[%s5661_s1 + $0x488] sm:$0xff]  ;;  %v3907_v60 = vmov 0.0  }
  0x56   :  { %3030 = vmatprep.subr.mxu1 %v2583_v25  ;;  %493 = vmatprep.mubr.f32.mxu0 %v4279_v44  ;;  %v2572_v25 = vld [vmem:[%s5661_s1 + $0x588] sm:$0xff] }
  0x57   :  { %2987 = vmatpush3.msra.mxu0 %v2535_v26  ;;  %3031 = vmatpush3.msra.mxu1 %v2567_v27  ;;  %v2524_v26 = vld [vmem:[%s5661_s1 + $0x408] sm:$0xff] }
  0x58   :  { %494 = vmatmul.mubr.f32.gmra.mxu0 %v4301_v50  ;;  %2988 = vmatprep.subr.mxu0 %v2550_v28  ;;  %v2556_v27 = vld [vmem:[%s5661_s1 + $0x508] sm:$0xff]  ;;  %v2539_v28 = vld [vmem:[%s5661_s1 + $0x480] sm:$0xff] }
  0x59   :  { %3032 = vmatprep.subr.mxu1 %v2582_v29  ;;  %578 = vmatprep.mubr.f32.mxu1 %v4284_v45  ;;  %v2571_v29 = vld [vmem:[%s5661_s1 + $0x580] sm:$0xff] }
  0x5a   :  { %2989 = vmatpush3.msra.mxu0 %v2534_v30  ;;  %3033 = vmatpush3.msra.mxu1 %v2566_v31  ;;  %v685_v30 = vrot.slane %v4279_v44, 2  ;;  %v689_v31 = vrot.slane %v4284_v45, 2  ;;  %v2555_v44 = vld [vmem:[%s5661_s1 + $0x500] sm:$0xff]  ;;  %v683_v45 = vrot.slane %v4301_v50, 2  ;;  %v595_v50 = vld [vmem:[%s5662_s0 + $0x70] sm:$0x7f] }
  0x5b   :  { %2990 = vmatprep.subr.mxu0 %v2549_v32  ;;  %579 = vmatmul.mubr.f32.gmra.mxu1 %v4306_v51  ;;  %v2523_v32 = vld [vmem:[%s5661_s1 + $0x400] sm:$0xff] }
  0x5c   :  { %3034 = vmatprep.subr.mxu1 %v2581_v33  ;;  %498 = vmatprep.mubr.f32.mxu0 %v48_v34  ;;  %v594_v33 = vld [vmem:[%s5662_s0 + $0x68] sm:$0x7f]  ;;  %v596_v34 = vld [vmem:[%s5662_s0 + $0x78] sm:$0x7f]  ;;  %v684_v54 = vsel %vm670_vm1, %v672_v2, %v683_v45 }
  0x5d   :  { %2991 = vmatpush3.msra.mxu0 %v2533_v35  ;;  %3035 = vmatpush3.msra.mxu1 %v2565_v36  ;;  %v687_v35 = vrot.slane %v4306_v51, 2  ;;  %v686_v36 = vsel %vm670_vm1, %v675_v63, %v685_v30  ;;  %v695_v63 = vrot.slane %v595_v50, 2  ;;  %v944_v2 = vld [vmem:[%s5663_s4 + $0x78] sm:$0xff] }
  0x5e   :  { %499 = vmatmul.mubr.f32.gmra.mxu0 %v47_v37  ;;  %2992 = vmatprep.subr.mxu0 %v2548_v38  ;;  %v690_v37 = vsel %vm670_vm1, %v681_v0, %v689_v31  ;;  %v693_v38 = vrot.slane %v594_v33, 2 }
  0x5f   :  { %3036 = vmatprep.subr.mxu1 %v2580_v39  ;;  %583 = vmatprep.mubr.f32.mxu1 %v50_v40  ;;  %v697_v39 = vrot.slane %v596_v34, 2  ;;  %v593_v40 = vld [vmem:[%s5662_s0 + $0x60] sm:$0x7f]  ;;  %v688_v56 = vsel %vm670_vm1, %v678_v7, %v687_v35  ;;  %v696_v58 = vsel %vm670_vm1, %v687_v35, %v695_v63  ;;  %v943_v7 = vld [vmem:[%s5663_s4 + $0x70] sm:$0xff] }
  0x60   :  { %2993 = vmatpush3.msra.mxu0 %v2532_v41  ;;  %3037 = vmatpush3.msra.mxu1 %v2564_v42  ;;  %v691_v51 = vrot.slane %v593_v40, 2  ;;  %v694_v0 = vsel %vm670_vm1, %v685_v30, %v693_v38  ;;  %v2604_v41 = vld [vmem:[%s5663_s4 + $0xf0] sm:$0xff]  ;;  %v941_v42 = vld [vmem:[%s5663_s4 + $0x60] sm:$0xff] }
  0x61   :  { %2994 = vmatprep.subr.mxu0 %v2547_v43  ;;  %584 = vmatmul.mubr.f32.gmra.mxu1 %v49_v46  ;;  %v940_v43 = vld [vmem:[%s5663_s4 + $0x58] sm:$0xff]  ;;  %v939_v46 = vld [vmem:[%s5663_s4 + $0x50] sm:$0xff] }
  0x62   :  { %3038 = vmatprep.subr.mxu1 %v2579_v47  ;;  %2995 = vmatpush3.msra.mxu0 %v2531_v48  ;;  %v938_v47 = vld [vmem:[%s5663_s4 + $0x48] sm:$0xff]  ;;  %v937_v48 = vld [vmem:[%s5663_s4 + $0x40] sm:$0xff] }
  0x63   :  { %3039 = vmatpush3.msra.mxu1 %v2563_v49  ;;  %2996 = vmatprep.subr.mxu0 %v2546_v52  ;;  %v2603_v49 = vld [vmem:[%s5663_s4 + $0xe8] sm:$0xff]  ;;  %v936_v52 = vld [vmem:[%s5663_s4 + $0x38] sm:$0xff] }
  0x64   :  { %3040 = vmatprep.subr.mxu1 %v2578_v53  ;;  %2997 = vmatpush3.msra.mxu0 %v2530_v55  ;;  %v2602_v53 = vld [vmem:[%s5663_s4 + $0xe0] sm:$0xff]  ;;  %v935_v55 = vld [vmem:[%s5663_s4 + $0x30] sm:$0xff] }
  0x65   :  { %3041 = vmatpush3.msra.mxu1 %v2562_v57  ;;  %2998 = vmatprep.subr.mxu0 %v2545_v59  ;;  %v2601_v57 = vld [vmem:[%s5663_s4 + $0xd8] sm:$0xff]  ;;  %v934_v59 = vld [vmem:[%s5663_s4 + $0x28] sm:$0xff] }
  0x66   :  { %3042 = vmatprep.subr.mxu1 %v2577_v61  ;;  %2999 = vmatpush3.msra.mxu0 %v2529_v62  ;;  %v2600_v61 = vld [vmem:[%s5663_s4 + $0xd0] sm:$0xff]  ;;  %v933_v62 = vld [vmem:[%s5663_s4 + $0x20] sm:$0xff] }
  0x67   :  { %3043 = vmatpush3.msra.mxu1 %v2561_v3  ;;  %3000 = vmatprep.subr.mxu0 %v2544_v4  ;;  %v2599_v3 = vld [vmem:[%s5663_s4 + $0xc8] sm:$0xff]  ;;  %v932_v4 = vld [vmem:[%s5663_s4 + $0x18] sm:$0xff] }
  0x68   :  { %3044 = vmatprep.subr.mxu1 %v2576_v6  ;;  %3001 = vmatpush3.msra.mxu0 %v2528_v8  ;;  %v2598_v6 = vld [vmem:[%s5663_s4 + $0xc0] sm:$0xff]  ;;  %v931_v8 = vld [vmem:[%s5663_s4 + $0x10] sm:$0xff] }
  0x69   :  { %3045 = vmatpush3.msra.mxu1 %v2560_v10  ;;  %3002 = vmatprep.subr.mxu0 %v2543_v12  ;;  %v2597_v10 = vld [vmem:[%s5663_s4 + $0xb8] sm:$0xff]  ;;  %v930_v12 = vld [vmem:[%s5663_s4 + $0x8] sm:$0xff] }
  0x6a   :  { %3046 = vmatprep.subr.mxu1 %v2575_v13  ;;  %3003 = vmatpush3.msra.mxu0 %v2527_v14  ;;  %v2596_v13 = vld [vmem:[%s5663_s4 + $0xb0] sm:$0xff]  ;;  %v929_v14 = vld [vmem:[%s5663_s4] sm:$0xff] }
  0x6b   :  { %3047 = vmatpush3.msra.mxu1 %v2559_v1  ;;  %3004 = vmatprep.subr.mxu0 %v2542_v5  ;;  %v2595_v1 = vld [vmem:[%s5663_s4 + $0xa8] sm:$0xff]  ;;  %v2594_v5 = vld [vmem:[%s5663_s4 + $0xa0] sm:$0xff] }
  0x6c   :  { %3048 = vmatprep.subr.mxu1 %v2574_v15  ;;  %3005 = vmatpush3.msra.mxu0 %v2526_v16  ;;  %v2593_v15 = vld [vmem:[%s5663_s4 + $0x98] sm:$0xff]  ;;  %v2592_v16 = vld [vmem:[%s5663_s4 + $0x90] sm:$0xff] }
  0x6d   :  { %3049 = vmatpush3.msra.mxu1 %v2558_v19  ;;  %3006 = vmatprep.subr.mxu0 %v2541_v20  ;;  %v2591_v19 = vld [vmem:[%s5663_s4 + $0x88] sm:$0xff]  ;;  %v2590_v20 = vld [vmem:[%s5663_s4 + $0x80] sm:$0xff] }
  0x6e   :  { %3050 = vmatprep.subr.mxu1 %v2573_v21  ;;  %3007 = vmatpush3.msra.mxu0 %v2525_v22 }
  0x6f   :  { %3051 = vmatpush3.msra.mxu1 %v2557_v23  ;;  %3008 = vmatprep.subr.mxu0 %v2540_v24 }
  0x70   :  { %3052 = vmatprep.subr.mxu1 %v2572_v25  ;;  %3009 = vmatpush3.msra.mxu0 %v2524_v26 }
  0x71   :  { %3053 = vmatpush3.msra.mxu1 %v2556_v27  ;;  %3010 = vmatprep.subr.mxu0 %v2539_v28 }
  0x72   :  { %3054 = vmatprep.subr.mxu1 %v2571_v29  ;;  %3011 = vmatpush3.msra.mxu0 %v2523_v32 }
  0x73   :  { %779 = vmatprep.mubr.f32.mxu0 %v4506_v17  ;;  %3055 = vmatpush3.msra.mxu1 %v2555_v44  ;;  %v698_v17 = vsel %vm670_vm1, %v689_v31, %v697_v39 }
  0x74   :  { %864 = vmatprep.mubr.f32.mxu1 %v4511_v18  ;;  %780 = vmatmul.mubr.f32.vlgmr.msra.gmra.mxu0 %v4519_v9  ;;  %v692_v18 = vsel %vm670_vm1, %v683_v45, %v691_v51  ;;  %v2605_v9 = vld [vmem:[%s5663_s4 + $0xf8] sm:$0xff] }
  0x75   :  { %865 = vmatmul.mubr.f32.vlgmr.msra.gmra.mxu1 %v4524_v11  ;;  %784 = vmatprep.mubr.f32.mxu0 %v686_v36  ;;  %v942_v11 = vld [vmem:[%s5663_s4 + $0x68] sm:$0xff] }
  0x76   :  { %869 = vmatprep.mubr.f32.mxu1 %v690_v37  ;;  %3385 = vmatprep.subr.mxu1 %v3907_v60 }
  0x77   :  { %3344 = vmatprep.subr.mxu0 %v3907_v60  ;;  %3386 = vmatpush3.msra.mxu1 %v944_v2 }
  0x78   :  { %785 = vmatmul.mubr.f32.gmra.mxu0 %v684_v54  ;;  %3387 = vmatprep.subr.mxu1 %v3907_v60 }
  0x79   :  { %870 = vmatmul.mubr.f32.gmra.mxu1 %v688_v56  ;;  %789 = vmatprep.mubr.f32.mxu0 %v694_v0 }
  0x7a   :  { %874 = vmatprep.mubr.f32.mxu1 %v698_v17  ;;  %3388 = vmatpush3.msra.mxu1 %v943_v7 }
  0x7b   :  { %3345 = vmatpush3.msra.mxu0 %v2605_v9  ;;  %3389 = vmatprep.subr.mxu1 %v3907_v60 }
  0x7c   :  { %790 = vmatmul.mubr.f32.gmra.mxu0 %v692_v18  ;;  %3346 = vmatprep.subr.mxu0 %v3907_v60 }
  0x7d   :  { %875 = vmatmul.mubr.f32.gmra.mxu1 %v696_v58  ;;  %794 = vmatprep.mubr.f32.mxu0 %v693_v38 }
  0x7e   :  { %879 = vmatprep.mubr.f32.mxu1 %v697_v39  ;;  %3390 = vmatpush3.msra.mxu1 %v942_v11 }
  0x7f   :  { %3347 = vmatpush3.msra.mxu0 %v2604_v41  ;;  %3391 = vmatprep.subr.mxu1 %v3907_v60 }
  0x80   :  { %795 = vmatmul.mubr.f32.gmra.mxu0 %v691_v51  ;;  %3348 = vmatprep.subr.mxu0 %v3907_v60 }
  0x81   :  { %880 = vmatmul.mubr.f32.gmra.mxu1 %v695_v63  ;;  %3349 = vmatpush3.msra.mxu0 %v2603_v49 }
  0x82   :  { %3392 = vmatpush3.msra.mxu1 %v941_v42  ;;  %3350 = vmatprep.subr.mxu0 %v3907_v60 }
  0x83   :  { %3393 = vmatprep.subr.mxu1 %v3907_v60  ;;  %3351 = vmatpush3.msra.mxu0 %v2602_v53 }
  0x84   :  { %3394 = vmatpush3.msra.mxu1 %v940_v43  ;;  %3352 = vmatprep.subr.mxu0 %v3907_v60 }
  0x85   :  { %3395 = vmatprep.subr.mxu1 %v3907_v60  ;;  %3353 = vmatpush3.msra.mxu0 %v2601_v57 }
  0x86   :  { %3396 = vmatpush3.msra.mxu1 %v939_v46  ;;  %3354 = vmatprep.subr.mxu0 %v3907_v60 }
  0x87   :  { %3397 = vmatprep.subr.mxu1 %v3907_v60  ;;  %3355 = vmatpush3.msra.mxu0 %v2600_v61 }
  0x88   :  { %3398 = vmatpush3.msra.mxu1 %v938_v47  ;;  %3356 = vmatprep.subr.mxu0 %v3907_v60 }
  0x89   :  { %3399 = vmatprep.subr.mxu1 %v3907_v60  ;;  %3357 = vmatpush3.msra.mxu0 %v2599_v3 }
  0x8a   :  { %3400 = vmatpush3.msra.mxu1 %v937_v48  ;;  %3358 = vmatprep.subr.mxu0 %v3907_v60 }
  0x8b   :  { %3401 = vmatprep.subr.mxu1 %v3907_v60  ;;  %3359 = vmatpush3.msra.mxu0 %v2598_v6 }
  0x8c   :  { %3402 = vmatpush3.msra.mxu1 %v936_v52  ;;  %3360 = vmatprep.subr.mxu0 %v3907_v60 }
  0x8d   :  { %3403 = vmatprep.subr.mxu1 %v3907_v60  ;;  %3361 = vmatpush3.msra.mxu0 %v2597_v10 }
  0x8e   :  { %3404 = vmatpush3.msra.mxu1 %v935_v55  ;;  %3362 = vmatprep.subr.mxu0 %v3907_v60 }
  0x8f   :  { %3405 = vmatprep.subr.mxu1 %v3907_v60  ;;  %3363 = vmatpush3.msra.mxu0 %v2596_v13 }
  0x90   :  { %3406 = vmatpush3.msra.mxu1 %v934_v59  ;;  %3364 = vmatprep.subr.mxu0 %v3907_v60 }
  0x91   :  { %3407 = vmatprep.subr.mxu1 %v3907_v60  ;;  %3417 = vmatprep.mubr.msk.f32.mxu1 %vm3908_vm2, %v3907_v60 }
  0x92   :  { %3408 = vmatpush3.msra.mxu1 %v933_v62  ;;  %3365 = vmatpush3.msra.mxu0 %v2595_v1  ;;  %v4889_v1 = vld [vmem:[%s5664_s2] ss:$0 sm:$0xff] }
  0x93   :  { %3409 = vmatprep.subr.mxu1 %v3907_v60  ;;  %3366 = vmatprep.subr.mxu0 %v3907_v60 }
  0x94   :  { %3410 = vmatpush3.msra.mxu1 %v932_v4  ;;  %3376 = vmatprep.mubr.msk.f32.mxu0 %vm3908_vm2, %v3907_v60 }
  0x95   :  { %3411 = vmatprep.subr.mxu1 %v3907_v60  ;;  %3367 = vmatpush3.msra.mxu0 %v2594_v5 }
  0x96   :  { %3412 = vmatpush3.msra.mxu1 %v931_v8  ;;  %3368 = vmatprep.subr.mxu0 %v3907_v60 }
  0x97   :  { %3413 = vmatprep.subr.mxu1 %v3907_v60  ;;  %3369 = vmatpush3.msra.mxu0 %v2593_v15 }
  0x98   :  { %3414 = vmatpush3.msra.mxu1 %v930_v12  ;;  %3370 = vmatprep.subr.mxu0 %v3907_v60 }
  0x99   :  { %3415 = vmatprep.subr.mxu1 %v3907_v60  ;;  %3371 = vmatpush3.msra.mxu0 %v2592_v16 }
  0x9a   :  { %3416 = vmatpush3.msra.mxu1 %v929_v14  ;;  %3372 = vmatprep.subr.mxu0 %v3907_v60 }
  0x9b   :  { %3467 = vmatprep.subr.mxu1 %v3907_v60  ;;  %3373 = vmatpush3.msra.mxu0 %v2591_v19 }
  0x9c   :  { %3374 = vmatprep.subr.mxu0 %v3907_v60 }
  0x9d   :  { %3375 = vmatpush3.msra.mxu0 %v2590_v20 }
  0x9e   :  { %3426 = vmatprep.subr.mxu0 %v3907_v60 }
  0xe4   :  { %v2836_v21 = vpop.f32.mrf.mxu0 }
  0xe5   :  { %v2880_v22 = vpop.f32.mrf.mxu1 }
  0xe6   :  { %v2837_v23 = vpop.f32.mrf.mxu0 }
  0xe7   :  { %v2881_v24 = vpop.f32.mrf.mxu1  ;;  %v2838_v58 = vadd.f32 %v2837_v23, %v2836_v21 }
  0xe8   :  { %v2882_v2 = vadd.f32 %v2881_v24, %v2880_v22 }
  0xea   :  { %v401_v43 = vadd.f32 %v2882_v2, %v2838_v58 }
  0xf9   :  { %v2839_v25 = vpop.f32.mrf.mxu0 }
  0xfa   :  { %v2883_v26 = vpop.f32.mrf.mxu1 }
  0xfb   :  { %v2840_v27 = vpop.f32.mrf.mxu0 }
  0xfc   :  { %v2884_v28 = vpop.f32.mrf.mxu1  ;;  %v2841_v9 = vadd.f32 %v2840_v27, %v2839_v25 }
  0xfd   :  { %v2885_v11 = vadd.f32 %v2884_v28, %v2883_v26 }
  0xff   :  { %v2842_v29 = vpop.f32.mrf.mxu0  ;;  %v406_v52 = vadd.f32 %v2885_v11, %v2841_v9 }
 0x100   :  { %v2886_v30 = vpop.f32.mrf.mxu1 }
 0x101   :  { %v2843_v31 = vpop.f32.mrf.mxu0 }
 0x102   :  { %v2887_v32 = vpop.f32.mrf.mxu1  ;;  %v2844_v53 = vadd.f32 %v2843_v31, %v2842_v29 }
 0x103   :  { %v2888_v59 = vadd.f32 %v2887_v32, %v2886_v30  ;;  %v2588_v32 = vld [vmem:[%s5665_s3] ss:$0 sm:$0xff] }
 0x105   :  { %v2845_v33 = vpop.f32.mrf.mxu0  ;;  %v411_v16 = vadd.f32 %v2888_v59, %v2844_v53  ;;  %v2635_v53 = vld [vmem:[%s5663_s4 + $0x1e8] sm:$0xff]  ;;  %v2634_v59 = vld [vmem:[%s5663_s4 + $0x1e0] sm:$0xff] }
 0x106   :  { %v2889_v34 = vpop.f32.mrf.mxu1 }
 0x107   :  { %v2846_v44 = vpop.f32.mrf.mxu0 }
 0x108   :  { %v2890_v45 = vpop.f32.mrf.mxu1  ;;  %v2847_v22 = vadd.f32 %v2846_v44, %v2845_v33  ;;  %v2589_v44 = vld [vmem:[%s5665_s3 + $0x1] ss:$0 sm:$0xff] }
 0x109   :  { %v2891_v23 = vadd.f32 %v2890_v45, %v2889_v34 }
 0x10b   :  { %v416_v34 = vadd.f32 %v2891_v23, %v2847_v22  ;;  %v2628_v22 = vld [vmem:[%s5663_s4 + $0x1b0] sm:$0xff] }
 0x10c   :  { %v2924_v35 = vpop.f32.mrf.mxu0 }
 0x10d   :  { %v2968_v36 = vpop.f32.mrf.mxu1 }
 0x10e   :  { %v2925_v37 = vpop.f32.mrf.mxu0 }
 0x10f   :  { %v2969_v38 = vpop.f32.mrf.mxu1  ;;  %v2926_v7 = vadd.f32 %v2925_v37, %v2924_v35 }
 0x110   :  { %v2970_v61 = vadd.f32 %v2969_v38, %v2968_v36 }
 0x111   :  { %v486_v49 = vadd.f32 %v2926_v7, %v401_v43 }
 0x112   :  { %v2927_v39 = vpop.f32.mrf.mxu0 }
 0x113   :  { %v571_v12 = vadd.f32 %v2970_v61, %v486_v49 }
 0x114   :  { %v2928_v50 = vpop.f32.mrf.mxu0 }
 0x115   :  { %v2971_v40 = vpop.f32.mrf.mxu1  ;;  %v2929_v46 = vadd.f32 %v2928_v50, %v2927_v39 }
 0x117   :  { %v2972_v54 = vpop.f32.mrf.mxu1  ;;  %v491_v4 = vadd.f32 %v2929_v46, %v406_v52 }
 0x118   :  { %v2930_v56 = vpop.f32.mrf.mxu0  ;;  %v2973_v6 = vadd.f32 %v2972_v54, %v2971_v40 }
 0x11a   :  { %v2931_v63 = vpop.f32.mrf.mxu0  ;;  %v576_v24 = vadd.f32 %v2973_v6, %v491_v4  ;;  %v2632_v6 = vld [vmem:[%s5663_s4 + $0x1d0] sm:$0xff] }
 0x11b   :  { %v2974_v51 = vpop.f32.mrf.mxu1  ;;  %v2932_v13 = vadd.f32 %v2931_v63, %v2930_v56 }
 0x11d   :  { %v2975_v0 = vpop.f32.mrf.mxu1  ;;  %v496_v27 = vadd.f32 %v2932_v13, %v411_v16  ;;  %v2630_v16 = vld [vmem:[%s5663_s4 + $0x1c0] sm:$0xff] }
 0x11e   :  { %v2933_v17 = vpop.f32.mrf.mxu0  ;;  %v2976_v28 = vadd.f32 %v2975_v0, %v2974_v51 }
 0x120   :  { %v2934_v41 = vpop.f32.mrf.mxu0  ;;  %v581_v50 = vadd.f32 %v2976_v28, %v496_v27  ;;  %v2626_v27 = vld [vmem:[%s5663_s4 + $0x1a0] sm:$0xff] }
 0x121   :  { %v4884_v18 = vpop.f32.mrf.mxu1  ;;  %v2935_v31 = vadd.f32 %v2934_v41, %v2933_v17  ;;  %v2637_v41 = vld [vmem:[%s5663_s4 + $0x1f8] sm:$0xff]  ;;  %v2614_v28 = vld [vmem:[%s5663_s4 + $0x140] sm:$0xff] }
 0x123   :  { %v2978_v42 = vpop.f32.mrf.mxu1  ;;  %v501_v63 = vadd.f32 %v2935_v31, %v416_v34  ;;  %v2624_v31 = vld [vmem:[%s5663_s4 + $0x190] sm:$0xff]  ;;  %v2609_v34 = vld [vmem:[%s5663_s4 + $0x118] sm:$0xff] }
 0x124   :  { %v2979_v0 = vadd.f32 %v2978_v42, %v4884_v18  ;;  %v2636_v18 = vld [vmem:[%s5663_s4 + $0x1f0] sm:$0xff] }
 0x126   :  { %v586_v42 = vadd.f32 %v2979_v0, %v501_v63  ;;  %v2652_v0 = vld [vmem:[%s5663_s4 + $0x270] sm:$0xff] }
 0x134   :  { %v3012_v47 = vpop.f32.mrf.mxu0 }
 0x135   :  { %v3056_v48 = vpop.f32.mrf.mxu1 }
 0x136   :  { %v3013_v55 = vpop.f32.mrf.mxu0 }
 0x137   :  { %v3057_v57 = vpop.f32.mrf.mxu1  ;;  %v3014_v62 = vadd.f32 %v3013_v55, %v3012_v47 }
 0x138   :  { %v3058_v3 = vadd.f32 %v3057_v57, %v3056_v48  ;;  %v3015_v8 = vpop.f32.mrf.mxu0 }
 0x139   :  { %v3059_v10 = vpop.f32.mrf.mxu1 }
 0x13a   :  { %v867_v14 = vadd.f32 %v3058_v3, %v3014_v62  ;;  %v3016_v5 = vpop.f32.mrf.mxu0  ;;  %v2633_v3 = vld [vmem:[%s5663_s4 + $0x1d8] sm:$0xff] }
 0x13b   :  { %v3060_v15 = vpop.f32.mrf.mxu1  ;;  %v3017_v20 = vadd.f32 %v3016_v5, %v3015_v8  ;;  %v2619_v5 = vld [vmem:[%s5663_s4 + $0x168] sm:$0xff] }
 0x13c   :  { %v885_v19 = vadd.f32 %v867_v14, %v571_v12  ;;  %v3061_v21 = vadd.f32 %v3060_v15, %v3059_v10  ;;  %v3018_v25 = vpop.f32.mrf.mxu0  ;;  %v2621_v10 = vld [vmem:[%s5663_s4 + $0x178] sm:$0xff]  ;;  %v2631_v14 = vld [vmem:[%s5663_s4 + $0x1c8] sm:$0xff] }
 0x13d   :  { %v3062_v26 = vpop.f32.mrf.mxu1 }
 0x13e   :  { %v896_v29 = vadd.f32 %v4889_v1, %v885_v19  ;;  %v872_v30 = vadd.f32 %v3061_v21, %v3017_v20  ;;  %v3019_v35 = vpop.f32.mrf.mxu0  ;;  %v2618_v19 = vld [vmem:[%s5663_s4 + $0x160] sm:$0xff]  ;;  %v2629_v20 = vld [vmem:[%s5663_s4 + $0x1b8] sm:$0xff] }
 0x13f   :  { %v3063_v36 = vpop.f32.mrf.mxu1  ;;  %v3020_v39 = vadd.f32 %v3019_v35, %v3018_v25  ;;  %v2617_v21 = vld [vmem:[%s5663_s4 + $0x158] sm:$0xff]  ;;  %v2627_v25 = vld [vmem:[%s5663_s4 + $0x1a8] sm:$0xff] }
 0x140   :  { %v900_v37 = vmax.f32 %v896_v29, 0.0  ;;  %v886_v38 = vadd.f32 %v872_v30, %v576_v24  ;;  %v3064_v33 = vadd.f32 %v3063_v36, %v3062_v26  ;;  %v3021_v45 = vpop.f32.mrf.mxu0  ;;  %v2616_v24 = vld [vmem:[%s5663_s4 + $0x150] sm:$0xff]  ;;  %v2615_v26 = vld [vmem:[%s5663_s4 + $0x148] sm:$0xff]  ;;  %v2625_v29 = vld [vmem:[%s5663_s4 + $0x198] sm:$0xff] }
 0x141   :  { %v3065_v40 = vpop.f32.mrf.mxu1  ;;  %v2613_v30 = vld [vmem:[%s5663_s4 + $0x138] sm:$0xff]  ;;  %v2623_v35 = vld [vmem:[%s5663_s4 + $0x188] sm:$0xff] }
 0x142   :  { %v909_v54 = vmul.f32 %v2588_v32, %v900_v37  ;;  %v897_v56 = vadd.f32 %v4889_v1, %v886_v38  ;;  %v877_v51 = vadd.f32 %v3064_v33, %v3020_v39  ;;  %v3022_v17 = vpop.f32.mrf.mxu0  ;;  %v2611_v36 = vld [vmem:[%s5663_s4 + $0x128] sm:$0xff]  ;;  %v2622_v37 = vld [vmem:[%s5663_s4 + $0x180] sm:$0xff]  ;;  %v2669_v33 = vld [vmem:[%s5663_s4 + $0x2f8] sm:$0xff] }
 0x143   :  { %v3066_v58 = vpop.f32.mrf.mxu1  ;;  %v3023_v11 = vadd.f32 %v3022_v17, %v3021_v45  ;;  %v2610_v38 = vld [vmem:[%s5663_s4 + $0x120] sm:$0xff]  ;;  %v2668_v45 = vld [vmem:[%s5663_s4 + $0x2f0] sm:$0xff] }
 0x144   :  { %v918_v2 = vadd.f32 %v2589_v44, %v909_v54  ;;  %v901_v7 = vmax.f32 %v897_v56, 0.0  ;;  %v887_v9 = vadd.f32 %v877_v51, %v581_v50  ;;  %v3067_v43 = vadd.f32 %v3066_v58, %v3065_v40  ;;  %v2607_v40 = vld [vmem:[%s5663_s4 + $0x108] sm:$0xff]  ;;  %v2606_v50 = vld [vmem:[%s5663_s4 + $0x100] sm:$0xff]  ;;  %v2653_v51 = vld [vmem:[%s5663_s4 + $0x278] sm:$0xff] }
 0x145   :  { %v2667_v56 = vld [vmem:[%s5663_s4 + $0x2e8] sm:$0xff]  ;;  %v2666_v17 = vld [vmem:[%s5663_s4 + $0x2e0] sm:$0xff] }
 0x146   :  { %922 = vst [vmem:[#allocation2] sm:$0xff] %v918_v2  ;;  %v910_v46 = vmul.f32 %v2588_v32, %v901_v7  ;;  %v898_v47 = vadd.f32 %v4889_v1, %v887_v9  ;;  %3418 = vmatmul.mubr.f32.vlgmr.msra.gmra.mxu1 %v918_v2  ;;  %v882_v48 = vadd.f32 %v3067_v43, %v3023_v11  ;;  %v2651_v2 = vld [vmem:[%s5663_s4 + $0x268] sm:$0xff]  ;;  %v2665_v9 = vld [vmem:[%s5663_s4 + $0x2d8] sm:$0xff]  ;;  %v2650_v11 = vld [vmem:[%s5663_s4 + $0x260] sm:$0xff] }
 0x147   :  { %3468 = vmatpush3.msra.mxu1 %v2637_v41  ;;  %3420 = vmatprep.mubr.msk.f32.mxu1 %vm3908_vm2, %v3907_v60  ;;  %v2664_v41 = vld [vmem:[%s5663_s4 + $0x2d0] sm:$0xff]  ;;  %v2649_v43 = vld [vmem:[%s5663_s4 + $0x258] sm:$0xff] }
 0x148   :  { %v919_v49 = vadd.f32 %v2589_v44, %v910_v46  ;;  %v902_v52 = vmax.f32 %v898_v47, 0.0  ;;  %3469 = vmatprep.subr.mxu1 %v3907_v60  ;;  %v888_v55 = vadd.f32 %v882_v48, %v586_v42  ;;  %v2663_v47 = vld [vmem:[%s5663_s4 + $0x2c8] sm:$0xff]  ;;  %v2662_v42 = vld [vmem:[%s5663_s4 + $0x2c0] sm:$0xff] }
 0x149   :  { %3470 = vmatpush3.msra.mxu1 %v2636_v18  ;;  %v2648_v18 = vld [vmem:[%s5663_s4 + $0x250] sm:$0xff]  ;;  %v2647_v48 = vld [vmem:[%s5663_s4 + $0x248] sm:$0xff] }
 0x14a   :  { %923 = vst [vmem:[#allocation2 + $0x8] sm:$0xff] %v919_v49  ;;  %v911_v57 = vmul.f32 %v2588_v32, %v902_v52  ;;  %3471 = vmatprep.subr.mxu1 %v3907_v60  ;;  %3421 = vmatmul.mubr.f32.gmra.mxu1 %v919_v49  ;;  %v899_v61 = vadd.f32 %v4889_v1, %v888_v55  ;;  %v2620_v1 = vld [vmem:[%s5663_s4 + $0x170] sm:$0xff]  ;;  %v2661_v49 = vld [vmem:[%s5663_s4 + $0x2b8] sm:$0xff]  ;;  %v2646_v52 = vld [vmem:[%s5663_s4 + $0x240] sm:$0xff] }
 0x14b   :  { %3472 = vmatpush3.msra.mxu1 %v2635_v53  ;;  %3423 = vmatprep.mubr.msk.f32.mxu1 %vm3908_vm2, %v3907_v60  ;;  %v2660_v53 = vld [vmem:[%s5663_s4 + $0x2b0] sm:$0xff]  ;;  %v2645_v55 = vld [vmem:[%s5663_s4 + $0x238] sm:$0xff] }
 0x14c   :  { %v920_v62 = vadd.f32 %v2589_v44, %v911_v57  ;;  %3473 = vmatprep.subr.mxu1 %v3907_v60  ;;  %v903_v4 = vmax.f32 %v899_v61, 0.0  ;;  %v2659_v57 = vld [vmem:[%s5663_s4 + $0x2a8] sm:$0xff]  ;;  %v2658_v61 = vld [vmem:[%s5663_s4 + $0x2a0] sm:$0xff] }
 0x14d   :  { %3474 = vmatpush3.msra.mxu1 %v2634_v59  ;;  %v2644_v59 = vld [vmem:[%s5663_s4 + $0x230] sm:$0xff] }
 0x14e   :  { %924 = vst [vmem:[#allocation2 + $0x10] sm:$0xff] %v920_v62  ;;  %3475 = vmatprep.subr.mxu1 %v3907_v60  ;;  %3424 = vmatmul.mubr.f32.gmra.mxu1 %v920_v62  ;;  %v912_v8 = vmul.f32 %v2588_v32, %v903_v4  ;;  %v2612_v32 = vld [vmem:[%s5663_s4 + $0x130] sm:$0xff]  ;;  %v2643_v62 = vld [vmem:[%s5663_s4 + $0x228] sm:$0xff]  ;;  %v2642_v4 = vld [vmem:[%s5663_s4 + $0x220] sm:$0xff] }
 0x14f   :  { %3476 = vmatpush3.msra.mxu1 %v2633_v3  ;;  %3499 = vmatprep.mubr.msk.f32.mxu1 %vm3908_vm2, %v3907_v60  ;;  %v2657_v3 = vld [vmem:[%s5663_s4 + $0x298] sm:$0xff] }
 0x150   :  { %3477 = vmatprep.subr.mxu1 %v3907_v60  ;;  %v921_v12 = vadd.f32 %v2589_v44, %v912_v8  ;;  %v2608_v44 = vld [vmem:[%s5663_s4 + $0x110] sm:$0xff]  ;;  %v2641_v8 = vld [vmem:[%s5663_s4 + $0x218] sm:$0xff] }
 0x151   :  { %v945_v13 = vld [vmem:[#allocation2 + $0x1] sm:$0xff]  ;;  %3478 = vmatpush3.msra.mxu1 %v2632_v6  ;;  %v2656_v6 = vld [vmem:[%s5663_s4 + $0x290] sm:$0xff] }
 0x152   :  { %3377 = vmatmul.mubr.f32.vlgmr.msra.gmra.mxu0 %v945_v13  ;;  %3479 = vmatprep.subr.mxu1 %v3907_v60  ;;  %925 = vst [vmem:[#allocation2 + $0x18] sm:$0x1f] %v921_v12  ;;  %v1228_v39 = vld [vmem:[#allocation2 + $0x3] sm:$0xff]  ;;  %v2640_v12 = vld [vmem:[%s5663_s4 + $0x210] sm:$0xff] }
 0x153   :  { %3427 = vmatpush3.msra.mxu0 %v2621_v10  ;;  %3379 = vmatprep.mubr.msk.f32.mxu0 %vm3908_vm2, %v3907_v60  ;;  %v1125_v63 = vld [vmem:[#allocation2 + $0x2] sm:$0xff] }
 0x154   :  { %3428 = vmatprep.subr.mxu0 %v3907_v60  ;;  %3480 = vmatpush3.msra.mxu1 %v2631_v14  ;;  %v2655_v10 = vld [vmem:[%s5663_s4 + $0x288] sm:$0xff]  ;;  %v2654_v13 = vld [vmem:[%s5663_s4 + $0x280] sm:$0xff] }
 0x155   :  { %3429 = vmatpush3.msra.mxu0 %v2620_v1  ;;  %v946_v15 = vld [vmem:[#allocation2 + $0x9] sm:$0xff]  ;;  %3481 = vmatprep.subr.mxu1 %v3907_v60 }
 0x156   :  { %3430 = vmatprep.subr.mxu0 %v3907_v60  ;;  %3380 = vmatmul.mubr.f32.gmra.mxu0 %v946_v15  ;;  %v1229_v54 = vld [vmem:[#allocation2 + $0xb] sm:$0xff] }
 0x157   :  { %3431 = vmatpush3.msra.mxu0 %v2619_v5  ;;  %3382 = vmatprep.mubr.msk.f32.mxu0 %vm3908_vm2, %v3907_v60  ;;  %v1126_v58 = vld [vmem:[#allocation2 + $0xa] sm:$0xff]  ;;  %v2638_v5 = vld [vmem:[%s5663_s4 + $0x200] sm:$0xff] }
 0x158   :  { %3432 = vmatprep.subr.mxu0 %v3907_v60  ;;  %3482 = vmatpush3.msra.mxu1 %v2630_v16  ;;  %v2639_v14 = vld [vmem:[%s5663_s4 + $0x208] sm:$0xff] }
 0x159   :  { %3433 = vmatpush3.msra.mxu0 %v2618_v19  ;;  %3483 = vmatprep.subr.mxu1 %v3907_v60  ;;  %v947_v23 = vld [vmem:[#allocation2 + $0x11] sm:$0xff]  ;;  %v1434_v1 = vld [vmem:[#allocation2 + $0x5] sm:$0xff] }
 0x15a   :  { %3434 = vmatprep.subr.mxu0 %v3907_v60  ;;  %3484 = vmatpush3.msra.mxu1 %v2629_v20  ;;  %v1230_v7 = vld [vmem:[#allocation2 + $0x13] sm:$0xff]  ;;  %v1331_v15 = vld [vmem:[#allocation2 + $0x4] sm:$0xff] }
 0x15b   :  { %3383 = vmatmul.mubr.f32.gmra.mxu0 %v947_v23  ;;  %3485 = vmatprep.subr.mxu1 %v3907_v60  ;;  %v1127_v46 = vld [vmem:[#allocation2 + $0x12] sm:$0xff] }
 0x15c   :  { %3435 = vmatpush3.msra.mxu0 %v2617_v21  ;;  %3486 = vmatpush3.msra.mxu1 %v2628_v22  ;;  %v1435_v16 = vld [vmem:[#allocation2 + $0xd] sm:$0xff]  ;;  %v1436_v20 = vld [vmem:[#allocation2 + $0x15] sm:$0xff] }
 0x15d   :  { %3436 = vmatprep.subr.mxu0 %v3907_v60  ;;  %3487 = vmatprep.subr.mxu1 %v3907_v60  ;;  %v1332_v19 = vld [vmem:[#allocation2 + $0xc] sm:$0xff]  ;;  %v1333_v21 = vld [vmem:[#allocation2 + $0x14] sm:$0xff] }
 0x15e   :  { %3437 = vmatpush3.msra.mxu0 %v2616_v24  ;;  %3488 = vmatpush3.msra.mxu1 %v2627_v25  ;;  %v1586_v22 = vld [vmem:[%s5666_s7 + $0x78] sm:$0xff]  ;;  %v1585_v23 = vld [vmem:[%s5666_s7 + $0x70] sm:$0xff]  ;;  %v1584_v24 = vld [vmem:[%s5666_s7 + $0x68] sm:$0xff] }
 0x15f   :  { %3438 = vmatprep.subr.mxu0 %v3907_v60  ;;  %3489 = vmatprep.subr.mxu1 %v3907_v60  ;;  %v1583_v25 = vld [vmem:[%s5666_s7 + $0x60] sm:$0xff] }
 0x160   :  { %3439 = vmatpush3.msra.mxu0 %v2615_v26  ;;  %3490 = vmatpush3.msra.mxu1 %v2626_v27  ;;  %v2687_v26 = vld [vmem:[%s5666_s7 + $0xf0] sm:$0xff]  ;;  %v1582_v27 = vld [vmem:[%s5666_s7 + $0x58] sm:$0xff] }
 0x161   :  { %3440 = vmatprep.subr.mxu0 %v3907_v60  ;;  %3491 = vmatprep.subr.mxu1 %v3907_v60 }
 0x162   :  { %3441 = vmatpush3.msra.mxu0 %v2614_v28  ;;  %3492 = vmatpush3.msra.mxu1 %v2625_v29  ;;  %v1581_v28 = vld [vmem:[%s5666_s7 + $0x50] sm:$0xff]  ;;  %v1580_v29 = vld [vmem:[%s5666_s7 + $0x48] sm:$0xff] }
 0x163   :  { %3442 = vmatprep.subr.mxu0 %v3907_v60  ;;  %3493 = vmatprep.subr.mxu1 %v3907_v60 }
 0x164   :  { %3443 = vmatpush3.msra.mxu0 %v2613_v30  ;;  %3494 = vmatpush3.msra.mxu1 %v2624_v31  ;;  %v1579_v30 = vld [vmem:[%s5666_s7 + $0x40] sm:$0xff]  ;;  %v2686_v31 = vld [vmem:[%s5666_s7 + $0xe8] sm:$0xff] }
 0x165   :  { %3444 = vmatprep.subr.mxu0 %v3907_v60  ;;  %3495 = vmatprep.subr.mxu1 %v3907_v60 }
 0x166   :  { %3445 = vmatpush3.msra.mxu0 %v2612_v32  ;;  %3496 = vmatpush3.msra.mxu1 %v2623_v35  ;;  %v1578_v32 = vld [vmem:[%s5666_s7 + $0x38] sm:$0xff]  ;;  %v2685_v35 = vld [vmem:[%s5666_s7 + $0xe0] sm:$0xff] }
 0x167   :  { %3446 = vmatprep.subr.mxu0 %v3907_v60  ;;  %3497 = vmatprep.subr.mxu1 %v3907_v60 }
 0x168   :  { %3447 = vmatpush3.msra.mxu0 %v2611_v36  ;;  %3498 = vmatpush3.msra.mxu1 %v2622_v37  ;;  %v1577_v36 = vld [vmem:[%s5666_s7 + $0x30] sm:$0xff]  ;;  %v2684_v37 = vld [vmem:[%s5666_s7 + $0xd8] sm:$0xff] }
 0x169   :  { %3448 = vmatprep.subr.mxu0 %v3907_v60  ;;  %3500 = vmatmul.mubr.f32.vlgmr.msra.gmra.mxu1 %v1228_v39  ;;  %v2683_v39 = vld [vmem:[%s5666_s7 + $0xd0] sm:$0xff] }
 0x16a   :  { %3449 = vmatpush3.msra.mxu0 %v2610_v38  ;;  %3549 = vmatprep.subr.mxu1 %v3907_v60  ;;  %v1576_v38 = vld [vmem:[%s5666_s7 + $0x28] sm:$0xff] }
 0x16b   :  { %3450 = vmatprep.subr.mxu0 %v3907_v60  ;;  %3550 = vmatpush3.msra.mxu1 %v2669_v33  ;;  %v1575_v33 = vld [vmem:[%s5666_s7 + $0x20] sm:$0xff] }
 0x16c   :  { %3451 = vmatpush3.msra.mxu0 %v2609_v34  ;;  %3551 = vmatprep.subr.mxu1 %v3907_v60  ;;  %v2682_v34 = vld [vmem:[%s5666_s7 + $0xc8] sm:$0xff] }
 0x16d   :  { %3452 = vmatprep.subr.mxu0 %v3907_v60  ;;  %3458 = vmatprep.mubr.msk.f32.mxu0 %vm3908_vm2, %v3907_v60 }
 0x16e   :  { %3453 = vmatpush3.msra.mxu0 %v2608_v44  ;;  %3502 = vmatprep.mubr.msk.f32.mxu1 %vm3908_vm2, %v3907_v60  ;;  %v1574_v44 = vld [vmem:[%s5666_s7 + $0x18] sm:$0xff] }
 0x16f   :  { %3454 = vmatprep.subr.mxu0 %v3907_v60  ;;  %3552 = vmatpush3.msra.mxu1 %v2668_v45  ;;  %v2681_v45 = vld [vmem:[%s5666_s7 + $0xc0] sm:$0xff] }
 0x170   :  { %3455 = vmatpush3.msra.mxu0 %v2607_v40  ;;  %3503 = vmatmul.mubr.f32.gmra.mxu1 %v1229_v54  ;;  %v1573_v40 = vld [vmem:[%s5666_s7 + $0x10] sm:$0xff]  ;;  %v1572_v54 = vld [vmem:[%s5666_s7 + $0x8] sm:$0xff] }
 0x171   :  { %3456 = vmatprep.subr.mxu0 %v3907_v60  ;;  %3553 = vmatprep.subr.mxu1 %v3907_v60 }
 0x172   :  { %3457 = vmatpush3.msra.mxu0 %v2606_v50  ;;  %3554 = vmatpush3.msra.mxu1 %v2667_v56  ;;  %v2680_v50 = vld [vmem:[%s5666_s7 + $0xb8] sm:$0xff]  ;;  %v2679_v56 = vld [vmem:[%s5666_s7 + $0xb0] sm:$0xff] }
 0x173   :  { %3459 = vmatmul.mubr.f32.vlgmr.msra.gmra.mxu0 %v1125_v63  ;;  %3508 = vmatprep.subr.mxu0 %v3907_v60  ;;  %v1571_v63 = vld [vmem:[%s5666_s7] sm:$0xff] }
 0x174   :  { %3509 = vmatpush3.msra.mxu0 %v2653_v51  ;;  %3555 = vmatprep.subr.mxu1 %v3907_v60  ;;  %v2678_v51 = vld [vmem:[%s5666_s7 + $0xa8] sm:$0xff] }
 0x175   :  { %3510 = vmatprep.subr.mxu0 %v3907_v60  ;;  %3461 = vmatprep.mubr.msk.f32.mxu0 %vm3908_vm2, %v3907_v60 }
 0x176   :  { %3505 = vmatprep.mubr.msk.f32.mxu1 %vm3908_vm2, %v3907_v60  ;;  %3511 = vmatpush3.msra.mxu0 %v2652_v0  ;;  %v2677_v0 = vld [vmem:[%s5666_s7 + $0xa0] sm:$0xff] }
 0x177   :  { %3556 = vmatpush3.msra.mxu1 %v2666_v17  ;;  %3462 = vmatmul.mubr.f32.gmra.mxu0 %v1126_v58  ;;  %v5275_v17 = vld [vmem:[%s5666_s7 + $0x1f8] sm:$0xff] }
 0x178   :  { %3506 = vmatmul.mubr.f32.gmra.mxu1 %v1230_v7  ;;  %3512 = vmatprep.subr.mxu0 %v3907_v60  ;;  %v2676_v58 = vld [vmem:[%s5666_s7 + $0x98] sm:$0xff]  ;;  %v2674_v7 = vld [vmem:[%s5666_s7 + $0x88] sm:$0xff] }
 0x179   :  { %3557 = vmatprep.subr.mxu1 %v3907_v60  ;;  %3513 = vmatpush3.msra.mxu0 %v2651_v2  ;;  %v2675_v2 = vld [vmem:[%s5666_s7 + $0x90] sm:$0xff] }
 0x17a   :  { %3558 = vmatpush3.msra.mxu1 %v2665_v9  ;;  %3514 = vmatprep.subr.mxu0 %v3907_v60  ;;  %v2673_v9 = vld [vmem:[%s5666_s7 + $0x80] sm:$0xff] }
 0x17b   :  { %3559 = vmatprep.subr.mxu1 %v3907_v60  ;;  %3464 = vmatprep.mubr.msk.f32.mxu0 %vm3908_vm2, %v3907_v60 }
 0x17c   :  { %3515 = vmatpush3.msra.mxu0 %v2650_v11  ;;  %3560 = vmatpush3.msra.mxu1 %v2664_v41  ;;  %v5293_v11 = vld [vmem:[%s5666_s7 + $0x178] sm:$0xff] }
 0x17d   :  { %3465 = vmatmul.mubr.f32.gmra.mxu0 %v1127_v46  ;;  %3516 = vmatprep.subr.mxu0 %v3907_v60 }
 0x17e   :  { %3561 = vmatprep.subr.mxu1 %v3907_v60  ;;  %3517 = vmatpush3.msra.mxu0 %v2649_v43 }
 0x17f   :  { %3562 = vmatpush3.msra.mxu1 %v2663_v47  ;;  %3518 = vmatprep.subr.mxu0 %v3907_v60 }
 0x180   :  { %3563 = vmatprep.subr.mxu1 %v3907_v60  ;;  %3519 = vmatpush3.msra.mxu0 %v2648_v18 }
 0x181   :  { %3564 = vmatpush3.msra.mxu1 %v2662_v42  ;;  %3520 = vmatprep.subr.mxu0 %v3907_v60 }
 0x182   :  { %3565 = vmatprep.subr.mxu1 %v3907_v60  ;;  %3521 = vmatpush3.msra.mxu0 %v2647_v48 }
 0x183   :  { %3566 = vmatpush3.msra.mxu1 %v2661_v49  ;;  %3522 = vmatprep.subr.mxu0 %v3907_v60 }
 0x184   :  { %3567 = vmatprep.subr.mxu1 %v3907_v60  ;;  %3523 = vmatpush3.msra.mxu0 %v2646_v52 }
 0x185   :  { %3568 = vmatpush3.msra.mxu1 %v2660_v53  ;;  %3524 = vmatprep.subr.mxu0 %v3907_v60 }
 0x186   :  { %3569 = vmatprep.subr.mxu1 %v3907_v60  ;;  %3525 = vmatpush3.msra.mxu0 %v2645_v55 }
 0x187   :  { %3570 = vmatpush3.msra.mxu1 %v2659_v57  ;;  %3526 = vmatprep.subr.mxu0 %v3907_v60 }
 0x188   :  { %3571 = vmatprep.subr.mxu1 %v3907_v60  ;;  %3527 = vmatpush3.msra.mxu0 %v2644_v59 }
 0x189   :  { %3572 = vmatpush3.msra.mxu1 %v2658_v61  ;;  %3528 = vmatprep.subr.mxu0 %v3907_v60 }
 0x18a   :  { %3573 = vmatprep.subr.mxu1 %v3907_v60  ;;  %3529 = vmatpush3.msra.mxu0 %v2643_v62 }
 0x18b   :  { %3574 = vmatpush3.msra.mxu1 %v2657_v3  ;;  %3530 = vmatprep.subr.mxu0 %v3907_v60 }
 0x18c   :  { %3575 = vmatprep.subr.mxu1 %v3907_v60  ;;  %3531 = vmatpush3.msra.mxu0 %v2642_v4 }
 0x18d   :  { %3576 = vmatpush3.msra.mxu1 %v2656_v6  ;;  %3532 = vmatprep.subr.mxu0 %v3907_v60 }
 0x18e   :  { %3577 = vmatprep.subr.mxu1 %v3907_v60  ;;  %3533 = vmatpush3.msra.mxu0 %v2641_v8 }
 0x18f   :  { %3578 = vmatpush3.msra.mxu1 %v2655_v10  ;;  %3534 = vmatprep.subr.mxu0 %v3907_v60 }
 0x190   :  { %3579 = vmatprep.subr.mxu1 %v3907_v60  ;;  %3535 = vmatpush3.msra.mxu0 %v2640_v12 }
 0x191   :  { %3580 = vmatpush3.msra.mxu1 %v2654_v13  ;;  %3581 = vmatprep.mubr.msk.f32.mxu1 %vm3908_vm2, %v3907_v60 }
 0x192   :  { %3536 = vmatprep.subr.mxu0 %v3907_v60  ;;  %3582 = vmatmul.mubr.f32.vlgmr.msra.gmra.mxu1 %v1434_v1 }
 0x193   :  { %3537 = vmatpush3.msra.mxu0 %v2639_v14  ;;  %3540 = vmatprep.mubr.msk.f32.mxu0 %vm3908_vm2, %v3907_v60 }
 0x194   :  { %3538 = vmatprep.subr.mxu0 %v3907_v60  ;;  %3584 = vmatprep.mubr.msk.f32.mxu1 %vm3908_vm2, %v3907_v60 }
 0x195   :  { %3539 = vmatpush3.msra.mxu0 %v2638_v5  ;;  %3625 = vmatprep.subr.mxu1 %v1586_v22 }
 0x196   :  { %3541 = vmatmul.mubr.f32.vlgmr.msra.gmra.mxu0 %v1331_v15  ;;  %3585 = vmatmul.mubr.f32.gmra.mxu1 %v1435_v16 }
 0x197   :  { %3543 = vmatprep.mubr.msk.f32.mxu0 %vm3908_vm2, %v3907_v60  ;;  %3587 = vmatprep.mubr.msk.f32.mxu1 %vm3908_vm2, %v3907_v60 }
 0x198   :  { %3626 = vmatpush3.msra.mxu1 %v1586_v22 }
 0x199   :  { %3627 = vmatprep.subr.mxu1 %v1585_v23 }
 0x19a   :  { %3544 = vmatmul.mubr.f32.gmra.mxu0 %v1332_v19  ;;  %3588 = vmatmul.mubr.f32.gmra.mxu1 %v1436_v20 }
 0x19b   :  { %3546 = vmatprep.mubr.msk.f32.mxu0 %vm3908_vm2, %v3907_v60  ;;  %3628 = vmatpush3.msra.mxu1 %v1585_v23  ;;  %v2688_v60 = vld [vmem:[%s5666_s7 + $0xf8] sm:$0xff] }
 0x19c   :  { %3629 = vmatprep.subr.mxu1 %v1584_v24  ;;  %3590 = vmatprep.subr.mxu0 %v2688_v60 }
 0x19d   :  { %3630 = vmatpush3.msra.mxu1 %v1584_v24  ;;  %3591 = vmatpush3.msra.mxu0 %v2688_v60 }
 0x19e   :  { %3547 = vmatmul.mubr.f32.gmra.mxu0 %v1333_v21  ;;  %3631 = vmatprep.subr.mxu1 %v1583_v25 }
 0x19f   :  { %3592 = vmatprep.subr.mxu0 %v2687_v26  ;;  %3632 = vmatpush3.msra.mxu1 %v1583_v25 }
 0x1a0   :  { %3593 = vmatpush3.msra.mxu0 %v2687_v26  ;;  %3633 = vmatprep.subr.mxu1 %v1582_v27  ;;  %v2670_v26 = vld [vmem:[%s5667_s5] ss:$0 sm:$0xff] }
 0x1a1   :  { %3634 = vmatpush3.msra.mxu1 %v1582_v27  ;;  %3594 = vmatprep.subr.mxu0 %v2686_v31 }
 0x1a2   :  { %3635 = vmatprep.subr.mxu1 %v1581_v28  ;;  %3595 = vmatpush3.msra.mxu0 %v2686_v31 }
 0x1a3   :  { %3636 = vmatpush3.msra.mxu1 %v1581_v28  ;;  %3596 = vmatprep.subr.mxu0 %v2685_v35 }
 0x1a4   :  { %3637 = vmatprep.subr.mxu1 %v1580_v29  ;;  %3597 = vmatpush3.msra.mxu0 %v2685_v35 }
 0x1a5   :  { %3638 = vmatpush3.msra.mxu1 %v1580_v29  ;;  %3598 = vmatprep.subr.mxu0 %v2684_v37 }
 0x1a6   :  { %3639 = vmatprep.subr.mxu1 %v1579_v30  ;;  %3599 = vmatpush3.msra.mxu0 %v2684_v37 }
 0x1a7   :  { %3640 = vmatpush3.msra.mxu1 %v1579_v30  ;;  %3600 = vmatprep.subr.mxu0 %v2683_v39 }
 0x1a8   :  { %3641 = vmatprep.subr.mxu1 %v1578_v32  ;;  %3601 = vmatpush3.msra.mxu0 %v2683_v39 }
 0x1a9   :  { %3642 = vmatpush3.msra.mxu1 %v1578_v32  ;;  %3602 = vmatprep.subr.mxu0 %v2682_v34 }
 0x1aa   :  { %3643 = vmatprep.subr.mxu1 %v1577_v36  ;;  %3603 = vmatpush3.msra.mxu0 %v2682_v34 }
 0x1ab   :  { %3644 = vmatpush3.msra.mxu1 %v1577_v36  ;;  %3604 = vmatprep.subr.mxu0 %v2681_v45 }
 0x1ac   :  { %3645 = vmatprep.subr.mxu1 %v1576_v38  ;;  %3605 = vmatpush3.msra.mxu0 %v2681_v45 }
 0x1ad   :  { %3646 = vmatpush3.msra.mxu1 %v1576_v38  ;;  %3606 = vmatprep.subr.mxu0 %v2680_v50  ;;  %v2671_v38 = vld [vmem:[%s5668_s6] ss:$0 sm:$0xff] }
 0x1ae   :  { %3647 = vmatprep.subr.mxu1 %v1575_v33  ;;  %3607 = vmatpush3.msra.mxu0 %v2680_v50 }
 0x1af   :  { %3648 = vmatpush3.msra.mxu1 %v1575_v33  ;;  %3608 = vmatprep.subr.mxu0 %v2679_v56 }
 0x1b0   :  { %3649 = vmatprep.subr.mxu1 %v1574_v44  ;;  %3609 = vmatpush3.msra.mxu0 %v2679_v56 }
 0x1b1   :  { %3650 = vmatpush3.msra.mxu1 %v1574_v44  ;;  %3610 = vmatprep.subr.mxu0 %v2678_v51 }
 0x1b2   :  { %3651 = vmatprep.subr.mxu1 %v1573_v40  ;;  %3611 = vmatpush3.msra.mxu0 %v2678_v51 }
 0x1b3   :  { %3652 = vmatpush3.msra.mxu1 %v1573_v40  ;;  %3612 = vmatprep.subr.mxu0 %v2677_v0  ;;  %v2672_v40 = vld [vmem:[%s5668_s6 + $0x1] ss:$0 sm:$0xff] }
 0x1b4   :  { %3653 = vmatprep.subr.mxu1 %v1572_v54  ;;  %3613 = vmatpush3.msra.mxu0 %v2677_v0 }
 0x1b5   :  { %3654 = vmatpush3.msra.mxu1 %v1572_v54  ;;  %3614 = vmatprep.subr.mxu0 %v2676_v58 }
 0x1b6   :  { %3655 = vmatprep.subr.mxu1 %v1571_v63  ;;  %3615 = vmatpush3.msra.mxu0 %v2676_v58 }
 0x1b7   :  { %3656 = vmatpush3.msra.mxu1 %v1571_v63  ;;  %3616 = vmatprep.subr.mxu0 %v2675_v2 }
 0x1b8   :  { %3695 = vmatprep.subr.mxu1 %v5275_v17  ;;  %3617 = vmatpush3.msra.mxu0 %v2675_v2 }
 0x1b9   :  { %3618 = vmatprep.subr.mxu0 %v2674_v7 }
 0x1ba   :  { %3619 = vmatpush3.msra.mxu0 %v2674_v7 }
 0x1bb   :  { %3620 = vmatprep.subr.mxu0 %v2673_v9 }
 0x1bc   :  { %3621 = vmatpush3.msra.mxu0 %v2673_v9 }
 0x1bd   :  { %3660 = vmatprep.subr.mxu0 %v5293_v11 }
 0x206   :  { %v1111_v41 = vpop.f32.mrf.mxu1 }
 0x208   :  { %v3419_v43 = vpop.f32.mrf.mxu1 }
 0x20a   :  { %v1116_v46 = vpop.f32.mrf.mxu1 }
 0x20c   :  { %v3422_v47 = vpop.f32.mrf.mxu1 }
 0x20e   :  { %v1121_v18 = vpop.f32.mrf.mxu1 }
 0x210   :  { %v3425_v42 = vpop.f32.mrf.mxu1 }
 0x212   :  { %v1031_v48 = vpop.f32.mrf.mxu0 }
 0x213   :  { %v1112_v5 = vadd.f32 %v1111_v41, %v1031_v48  ;;  %v2717_v48 = vld [vmem:[%s5666_s7 + $0x1e0] sm:$0xff] }
 0x214   :  { %v3378_v49 = vpop.f32.mrf.mxu0 }
 0x216   :  { %v1036_v52 = vpop.f32.mrf.mxu0 }
 0x217   :  { %v1117_v19 = vadd.f32 %v1116_v46, %v1036_v52  ;;  %v2719_v46 = vld [vmem:[%s5666_s7 + $0x1f0] sm:$0xff] }
 0x218   :  { %v3381_v53 = vpop.f32.mrf.mxu0 }
 0x219   :  { %v2715_v53 = vld [vmem:[%s5666_s7 + $0x1d0] sm:$0xff] }
 0x21b   :  { %v1041_v55 = vpop.f32.mrf.mxu0 }
 0x21c   :  { %v1122_v60 = vadd.f32 %v1121_v18, %v1041_v55  ;;  %v2718_v18 = vld [vmem:[%s5666_s7 + $0x1e8] sm:$0xff] }
 0x21d   :  { %v3384_v57 = vpop.f32.mrf.mxu0 }
 0x21e   :  { %v2703_v57 = vld [vmem:[%s5666_s7 + $0x170] sm:$0xff] }
 0x229   :  { %v1314_v59 = vpop.f32.mrf.mxu1 }
 0x22b   :  { %v3501_v61 = vpop.f32.mrf.mxu1 }
 0x230   :  { %v1319_v62 = vpop.f32.mrf.mxu1 }
 0x232   :  { %v3504_v3 = vpop.f32.mrf.mxu1 }
 0x233   :  { %v1211_v4 = vpop.f32.mrf.mxu0  ;;  %v2713_v3 = vld [vmem:[%s5666_s7 + $0x1c0] sm:$0xff] }
 0x234   :  { %v1225_v15 = vadd.f32 %v1211_v4, %v1112_v5  ;;  %v2701_v4 = vld [vmem:[%s5666_s7 + $0x160] sm:$0xff]  ;;  %v2708_v5 = vld [vmem:[%s5666_s7 + $0x198] sm:$0xff] }
 0x235   :  { %v3460_v6 = vpop.f32.mrf.mxu0 }
 0x236   :  { %v1328_v22 = vadd.f32 %v1314_v59, %v1225_v15  ;;  %v2714_v59 = vld [vmem:[%s5666_s7 + $0x1c8] sm:$0xff]  ;;  %v2700_v6 = vld [vmem:[%s5666_s7 + $0x158] sm:$0xff] }
 0x237   :  { %v1216_v8 = vpop.f32.mrf.mxu0  ;;  %v2696_v15 = vld [vmem:[%s5666_s7 + $0x138] sm:$0xff] }
 0x238   :  { %v1324_v10 = vpop.f32.mrf.mxu1  ;;  %v1226_v21 = vadd.f32 %v1216_v8, %v1117_v19  ;;  %v2711_v8 = vld [vmem:[%s5666_s7 + $0x1b0] sm:$0xff] }
 0x239   :  { %v3463_v12 = vpop.f32.mrf.mxu0  ;;  %v2695_v19 = vld [vmem:[%s5666_s7 + $0x130] sm:$0xff] }
 0x23a   :  { %v3507_v13 = vpop.f32.mrf.mxu1  ;;  %v1329_v31 = vadd.f32 %v1319_v62, %v1226_v21  ;;  %v2702_v62 = vld [vmem:[%s5666_s7 + $0x168] sm:$0xff] }
 0x23b   :  { %v2710_v12 = vld [vmem:[%s5666_s7 + $0x1a8] sm:$0xff] }
 0x23c   :  { %v2698_v13 = vld [vmem:[%s5666_s7 + $0x148] sm:$0xff] }
 0x23d   :  { %v1221_v14 = vpop.f32.mrf.mxu0  ;;  %v2694_v21 = vld [vmem:[%s5666_s7 + $0x128] sm:$0xff] }
 0x23e   :  { %v1227_v29 = vadd.f32 %v1221_v14, %v1122_v60  ;;  %v2709_v14 = vld [vmem:[%s5666_s7 + $0x1a0] sm:$0xff]  ;;  %v2692_v60 = vld [vmem:[%s5666_s7 + $0x118] sm:$0xff] }
 0x23f   :  { %v3466_v1 = vpop.f32.mrf.mxu0 }
 0x240   :  { %v1330_v45 = vadd.f32 %v1324_v10, %v1227_v29  ;;  %v2699_v10 = vld [vmem:[%s5666_s7 + $0x150] sm:$0xff]  ;;  %v2697_v1 = vld [vmem:[%s5666_s7 + $0x140] sm:$0xff]  ;;  %v2690_v29 = vld [vmem:[%s5666_s7 + $0x108] sm:$0xff] }
 0x252   :  { %v1520_v16 = vpop.f32.mrf.mxu1 }
 0x254   :  { %v3583_v20 = vpop.f32.mrf.mxu1 }
 0x255   :  { %v2706_v20 = vld [vmem:[%s5666_s7 + $0x188] sm:$0xff] }
 0x256   :  { %v1417_v23 = vpop.f32.mrf.mxu0  ;;  %v1525_v24 = vpop.f32.mrf.mxu1 }
 0x257   :  { %v1431_v25 = vadd.f32 %v1417_v23, %v1328_v22  ;;  %v2705_v22 = vld [vmem:[%s5666_s7 + $0x180] sm:$0xff] }
 0x258   :  { %v3542_v27 = vpop.f32.mrf.mxu0  ;;  %v3586_v28 = vpop.f32.mrf.mxu1  ;;  %v2693_v23 = vld [vmem:[%s5666_s7 + $0x120] sm:$0xff] }
 0x259   :  { %v1534_v30 = vadd.f32 %v1520_v16, %v1431_v25  ;;  %v2707_v16 = vld [vmem:[%s5666_s7 + $0x190] sm:$0xff] }
 0x25a   :  { %v1422_v32 = vpop.f32.mrf.mxu0  ;;  %v1530_v35 = vpop.f32.mrf.mxu1  ;;  %v2751_v27 = vld [vmem:[%s5666_s7 + $0x2f0] sm:$0xff] }
 0x25b   :  { %v1544_v36 = vadd.f32 %v2670_v26, %v1534_v30  ;;  %v1432_v37 = vadd.f32 %v1422_v32, %v1329_v31  ;;  %v2750_v30 = vld [vmem:[%s5666_s7 + $0x2e8] sm:$0xff]  ;;  %v2689_v31 = vld [vmem:[%s5666_s7 + $0x100] sm:$0xff] }
 0x25c   :  { %v3545_v39 = vpop.f32.mrf.mxu0  ;;  %v3589_v33 = vpop.f32.mrf.mxu1  ;;  %v2749_v32 = vld [vmem:[%s5666_s7 + $0x2e0] sm:$0xff] }
 0x25d   :  { %v1547_v34 = vmax.f32 %v1544_v36, 0.0  ;;  %v1535_v44 = vadd.f32 %v1525_v24, %v1432_v37  ;;  %v2752_v24 = vld [vmem:[%s5666_s7 + $0x2f8] sm:$0xff]  ;;  %v2735_v37 = vld [vmem:[%s5666_s7 + $0x270] sm:$0xff]  ;;  %v2734_v33 = vld [vmem:[%s5666_s7 + $0x268] sm:$0xff] }
 0x25e   :  { %v1427_v50 = vpop.f32.mrf.mxu0 }
 0x25f   :  { %v1555_v54 = vmul.f32 %v2671_v38, %v1547_v34  ;;  %v1545_v56 = vadd.f32 %v2670_v26, %v1535_v44  ;;  %v1433_v51 = vadd.f32 %v1427_v50, %v1330_v45  ;;  %v2747_v34 = vld [vmem:[%s5666_s7 + $0x2d0] sm:$0xff]  ;;  %v2733_v44 = vld [vmem:[%s5666_s7 + $0x260] sm:$0xff]  ;;  %v2746_v45 = vld [vmem:[%s5666_s7 + $0x2c8] sm:$0xff] }
 0x260   :  { %v3548_v63 = vpop.f32.mrf.mxu0  ;;  %v2745_v50 = vld [vmem:[%s5666_s7 + $0x2c0] sm:$0xff] }
 0x261   :  { %v1563_v0 = vadd.f32 %v2672_v40, %v1555_v54  ;;  %v1548_v58 = vmax.f32 %v1545_v56, 0.0  ;;  %v1536_v2 = vadd.f32 %v1530_v35, %v1433_v51  ;;  %v2736_v35 = vld [vmem:[%s5666_s7 + $0x278] sm:$0xff]  ;;  %v2731_v54 = vld [vmem:[%s5666_s7 + $0x250] sm:$0xff]  ;;  %v2730_v51 = vld [vmem:[%s5666_s7 + $0x248] sm:$0xff] }
 0x262   :  { %v2744_v56 = vld [vmem:[%s5666_s7 + $0x2b8] sm:$0xff]  ;;  %v2743_v63 = vld [vmem:[%s5666_s7 + $0x2b0] sm:$0xff] }
 0x263   :  { %1566 = vst [vmem:[#allocation3] sm:$0xff] %v1563_v0  ;;  %v1556_v7 = vmul.f32 %v2671_v38, %v1548_v58  ;;  %v1546_v9 = vadd.f32 %v2670_v26, %v1536_v2  ;;  %3657 = vmatprep.mubr.f32.mxu1 %v1563_v0  ;;  %v2691_v26 = vld [vmem:[%s5666_s7 + $0x110] sm:$0xff]  ;;  %v2729_v0 = vld [vmem:[%s5666_s7 + $0x240] sm:$0xff]  ;;  %v2742_v58 = vld [vmem:[%s5666_s7 + $0x2a8] sm:$0xff] }
 0x264   :  { %v2728_v2 = vld [vmem:[%s5666_s7 + $0x238] sm:$0xff] }
 0x265   :  { %v5305_v41 = vadd.f32 %v2672_v40, %v1556_v7  ;;  %v1549_v43 = vmax.f32 %v1546_v9, 0.0  ;;  %v2741_v7 = vld [vmem:[%s5666_s7 + $0x2a0] sm:$0xff]  ;;  %v2727_v9 = vld [vmem:[%s5666_s7 + $0x230] sm:$0xff] }
 0x267   :  { %1567 = vst [vmem:[#allocation3 + $0x8] sm:$0xff] %v5305_v41  ;;  %v1557_v47 = vmul.f32 %v2671_v38, %v1549_v43  ;;  %3658 = vmatmul.mubr.f32.vlgmr.msra.gmra.mxu1 %v5305_v41  ;;  %v2748_v38 = vld [vmem:[%s5666_s7 + $0x2d8] sm:$0xff] }
 0x268   :  { %3696 = vmatpush3.msra.mxu1 %v5275_v17  ;;  %v2716_v17 = vld [vmem:[%s5666_s7 + $0x1d8] sm:$0xff] }
 0x269   :  { %v5316_v42 = vadd.f32 %v2672_v40, %v1557_v47  ;;  %3697 = vmatprep.subr.mxu1 %v2719_v46  ;;  %v2732_v40 = vld [vmem:[%s5666_s7 + $0x258] sm:$0xff]  ;;  %v2739_v47 = vld [vmem:[%s5666_s7 + $0x290] sm:$0xff] }
 0x26a   :  { %3698 = vmatpush3.msra.mxu1 %v2719_v46  ;;  %v2740_v43 = vld [vmem:[%s5666_s7 + $0x298] sm:$0xff]  ;;  %v2726_v46 = vld [vmem:[%s5666_s7 + $0x228] sm:$0xff] }
 0x26b   :  { %1568 = vst [vmem:[#allocation3 + $0x10] sm:$0xff] %v5316_v42  ;;  %3699 = vmatprep.subr.mxu1 %v2718_v18 }
 0x26c   :  { %3700 = vmatpush3.msra.mxu1 %v2718_v18  ;;  %v2725_v18 = vld [vmem:[%s5666_s7 + $0x220] sm:$0xff] }
 0x26d   :  { %3701 = vmatprep.subr.mxu1 %v2717_v48 }
 0x26e   :  { %v1587_v49 = vld [vmem:[#allocation3 + $0x1] sm:$0xff]  ;;  %3702 = vmatpush3.msra.mxu1 %v2717_v48 }
 0x26f   :  { %v1852_v52 = vld [vmem:[#allocation3 + $0x3] sm:$0xff]  ;;  %3622 = vmatprep.mubr.f32.mxu0 %v1587_v49  ;;  %3703 = vmatprep.subr.mxu1 %v2716_v17 }
 0x270   :  { %3727 = vmatprep.mubr.f32.mxu1 %v1852_v52  ;;  %3704 = vmatpush3.msra.mxu1 %v2716_v17  ;;  %v1756_v61 = vld [vmem:[#allocation3 + $0x2] sm:$0xff]  ;;  %v2724_v17 = vld [vmem:[%s5666_s7 + $0x218] sm:$0xff]  ;;  %v2723_v52 = vld [vmem:[%s5666_s7 + $0x210] sm:$0xff] }
 0x271   :  { %3705 = vmatprep.subr.mxu1 %v2715_v53  ;;  %v2044_v28 = vld [vmem:[#allocation3 + $0x5] sm:$0xff] }
 0x272   :  { %v1588_v55 = vld [vmem:[#allocation3 + $0x9] sm:$0xff]  ;;  %3706 = vmatpush3.msra.mxu1 %v2715_v53  ;;  %v2737_v49 = vld [vmem:[%s5666_s7 + $0x280] sm:$0xff]  ;;  %v2784_v53 = vld [vmem:[%s5666_s7 + $0x3f8] sm:$0xff] }
 0x273   :  { %3623 = vmatmul.mubr.f32.vlgmr.msra.gmra.mxu0 %v1588_v55  ;;  %3707 = vmatprep.subr.mxu1 %v2714_v59  ;;  %v1853_v25 = vld [vmem:[#allocation3 + $0xb] sm:$0xff] }
 0x274   :  { %3661 = vmatpush3.msra.mxu0 %v5293_v11  ;;  %3692 = vmatprep.mubr.f32.mxu0 %v1756_v61  ;;  %v2712_v11 = vld [vmem:[%s5666_s7 + $0x1b8] sm:$0xff]  ;;  %v1757_v36 = vld [vmem:[#allocation3 + $0xa] sm:$0xff] }
 0x275   :  { %3662 = vmatprep.subr.mxu0 %v2703_v57  ;;  %3708 = vmatpush3.msra.mxu1 %v2714_v59  ;;  %v1948_v39 = vld [vmem:[#allocation3 + $0x4] sm:$0xff]  ;;  %v2783_v61 = vld [vmem:[%s5666_s7 + $0x3f0] sm:$0xff] }
 0x276   :  { %3663 = vmatpush3.msra.mxu0 %v2703_v57  ;;  %3709 = vmatprep.subr.mxu1 %v2713_v3  ;;  %v2738_v48 = vld [vmem:[%s5666_s7 + $0x288] sm:$0xff]  ;;  %v2721_v59 = vld [vmem:[%s5666_s7 + $0x200] sm:$0xff] }
 0x277   :  { %3664 = vmatprep.subr.mxu0 %v2702_v62  ;;  %3710 = vmatpush3.msra.mxu1 %v2713_v3  ;;  %v2722_v55 = vld [vmem:[%s5666_s7 + $0x208] sm:$0xff]  ;;  %v2768_v3 = vld [vmem:[%s5666_s7 + $0x378] sm:$0xff] }
 0x278   :  { %3665 = vmatpush3.msra.mxu0 %v2702_v62  ;;  %3711 = vmatprep.subr.mxu1 %v2712_v11  ;;  %v2045_v57 = vld [vmem:[#allocation3 + $0xd] sm:$0xff] }
 0x279   :  { %3666 = vmatprep.subr.mxu0 %v2701_v4  ;;  %3712 = vmatpush3.msra.mxu1 %v2712_v11  ;;  %v2236_v62 = vld [vmem:[#allocation3 + $0x7] sm:$0xff] }
 0x27a   :  { %3667 = vmatpush3.msra.mxu0 %v2701_v4  ;;  %3713 = vmatprep.subr.mxu1 %v2711_v8  ;;  %v2782_v4 = vld [vmem:[%s5666_s7 + $0x3e8] sm:$0xff] }
 0x27b   :  { %3668 = vmatprep.subr.mxu0 %v2700_v6  ;;  %3714 = vmatpush3.msra.mxu1 %v2711_v8  ;;  %v1949_v11 = vld [vmem:[#allocation3 + $0xc] sm:$0xff]  ;;  %v2781_v8 = vld [vmem:[%s5666_s7 + $0x3e0] sm:$0xff] }
 0x27c   :  { %3669 = vmatpush3.msra.mxu0 %v2700_v6  ;;  %3715 = vmatprep.subr.mxu1 %v2710_v12  ;;  %v2767_v6 = vld [vmem:[%s5666_s7 + $0x370] sm:$0xff] }
 0x27d   :  { %3670 = vmatprep.subr.mxu0 %v2699_v10  ;;  %3716 = vmatpush3.msra.mxu1 %v2710_v12  ;;  %v2766_v12 = vld [vmem:[%s5666_s7 + $0x368] sm:$0xff] }
 0x27e   :  { %3671 = vmatpush3.msra.mxu0 %v2699_v10  ;;  %3717 = vmatprep.subr.mxu1 %v2709_v14  ;;  %v2140_v10 = vld [vmem:[#allocation3 + $0x6] sm:$0xff] }
 0x27f   :  { %3672 = vmatprep.subr.mxu0 %v2698_v13  ;;  %3718 = vmatpush3.msra.mxu1 %v2709_v14  ;;  %v2765_v14 = vld [vmem:[%s5666_s7 + $0x360] sm:$0xff] }
 0x280   :  { %3673 = vmatpush3.msra.mxu0 %v2698_v13  ;;  %3719 = vmatprep.subr.mxu1 %v2708_v5  ;;  %v2780_v13 = vld [vmem:[%s5666_s7 + $0x3d8] sm:$0xff] }
 0x281   :  { %3674 = vmatprep.subr.mxu0 %v2697_v1  ;;  %3720 = vmatpush3.msra.mxu1 %v2708_v5  ;;  %v2764_v5 = vld [vmem:[%s5666_s7 + $0x358] sm:$0xff] }
 0x282   :  { %3675 = vmatpush3.msra.mxu0 %v2697_v1  ;;  %3721 = vmatprep.subr.mxu1 %v2707_v16  ;;  %v2779_v1 = vld [vmem:[%s5666_s7 + $0x3d0] sm:$0xff] }
 0x283   :  { %3676 = vmatprep.subr.mxu0 %v2696_v15  ;;  %3722 = vmatpush3.msra.mxu1 %v2707_v16  ;;  %v2763_v16 = vld [vmem:[%s5666_s7 + $0x350] sm:$0xff] }
 0x284   :  { %3677 = vmatpush3.msra.mxu0 %v2696_v15  ;;  %3723 = vmatprep.subr.mxu1 %v2706_v20  ;;  %v2778_v15 = vld [vmem:[%s5666_s7 + $0x3c8] sm:$0xff] }
 0x285   :  { %3678 = vmatprep.subr.mxu0 %v2695_v19  ;;  %3724 = vmatpush3.msra.mxu1 %v2706_v20  ;;  %v2762_v20 = vld [vmem:[%s5666_s7 + $0x348] sm:$0xff] }
 0x286   :  { %3679 = vmatpush3.msra.mxu0 %v2695_v19  ;;  %3725 = vmatprep.subr.mxu1 %v2705_v22  ;;  %v2777_v19 = vld [vmem:[%s5666_s7 + $0x3c0] sm:$0xff] }
 0x287   :  { %3680 = vmatprep.subr.mxu0 %v2694_v21  ;;  %3726 = vmatpush3.msra.mxu1 %v2705_v22  ;;  %v2761_v22 = vld [vmem:[%s5666_s7 + $0x340] sm:$0xff] }
 0x288   :  { %3681 = vmatpush3.msra.mxu0 %v2694_v21  ;;  %3728 = vmatmul.mubr.f32.vlgmr.msra.gmra.mxu1 %v1853_v25  ;;  %v2776_v21 = vld [vmem:[%s5666_s7 + $0x3b8] sm:$0xff]  ;;  %v2759_v25 = vld [vmem:[%s5666_s7 + $0x330] sm:$0xff] }
 0x289   :  { %3682 = vmatprep.subr.mxu0 %v2693_v23  ;;  %3765 = vmatprep.subr.mxu1 %v2752_v24 }
 0x28a   :  { %3683 = vmatpush3.msra.mxu0 %v2693_v23  ;;  %3766 = vmatpush3.msra.mxu1 %v2752_v24  ;;  %v2775_v23 = vld [vmem:[%s5666_s7 + $0x3b0] sm:$0xff]  ;;  %v2760_v24 = vld [vmem:[%s5666_s7 + $0x338] sm:$0xff] }
 0x28b   :  { %3684 = vmatprep.subr.mxu0 %v2692_v60  ;;  %3797 = vmatprep.mubr.f32.mxu1 %v2044_v28  ;;  %v2772_v28 = vld [vmem:[%s5666_s7 + $0x398] sm:$0xff] }
 0x28c   :  { %3685 = vmatpush3.msra.mxu0 %v2692_v60  ;;  %3767 = vmatprep.subr.mxu1 %v2751_v27  ;;  %v2774_v60 = vld [vmem:[%s5666_s7 + $0x3a8] sm:$0xff] }
 0x28d   :  { %3686 = vmatprep.subr.mxu0 %v2691_v26  ;;  %3768 = vmatpush3.msra.mxu1 %v2751_v27  ;;  %v2758_v27 = vld [vmem:[%s5666_s7 + $0x328] sm:$0xff] }
 0x28e   :  { %3687 = vmatpush3.msra.mxu0 %v2691_v26  ;;  %3769 = vmatprep.subr.mxu1 %v2750_v30  ;;  %v2773_v26 = vld [vmem:[%s5666_s7 + $0x3a0] sm:$0xff] }
 0x28f   :  { %3688 = vmatprep.subr.mxu0 %v2690_v29  ;;  %3770 = vmatpush3.msra.mxu1 %v2750_v30  ;;  %v2771_v30 = vld [vmem:[%s5666_s7 + $0x390] sm:$0xff] }
 0x290   :  { %3689 = vmatpush3.msra.mxu0 %v2690_v29  ;;  %3771 = vmatprep.subr.mxu1 %v2749_v32  ;;  %v2757_v29 = vld [vmem:[%s5666_s7 + $0x320] sm:$0xff] }
 0x291   :  { %3690 = vmatprep.subr.mxu0 %v2689_v31  ;;  %3772 = vmatpush3.msra.mxu1 %v2749_v32  ;;  %v2770_v32 = vld [vmem:[%s5666_s7 + $0x388] sm:$0xff] }
 0x292   :  { %3691 = vmatpush3.msra.mxu0 %v2689_v31  ;;  %3773 = vmatprep.subr.mxu1 %v2748_v38  ;;  %v2756_v31 = vld [vmem:[%s5666_s7 + $0x318] sm:$0xff] }
 0x293   :  { %3693 = vmatmul.mubr.f32.vlgmr.msra.gmra.mxu0 %v1757_v36  ;;  %3730 = vmatprep.subr.mxu0 %v2736_v35  ;;  %v2769_v36 = vld [vmem:[%s5666_s7 + $0x380] sm:$0xff] }
 0x294   :  { %3731 = vmatpush3.msra.mxu0 %v2736_v35  ;;  %3762 = vmatprep.mubr.f32.mxu0 %v1948_v39  ;;  %v2755_v35 = vld [vmem:[%s5666_s7 + $0x310] sm:$0xff]  ;;  %v2753_v39 = vld [vmem:[%s5666_s7 + $0x300] sm:$0xff] }
 0x295   :  { %3732 = vmatprep.subr.mxu0 %v2735_v37  ;;  %3774 = vmatpush3.msra.mxu1 %v2748_v38  ;;  %v2237_v38 = vld [vmem:[#allocation3 + $0xf] sm:$0xff] }
 0x296   :  { %3733 = vmatpush3.msra.mxu0 %v2735_v37  ;;  %3775 = vmatprep.subr.mxu1 %v2747_v34  ;;  %v2754_v37 = vld [vmem:[%s5666_s7 + $0x308] sm:$0xff] }
 0x297   :  { %3734 = vmatprep.subr.mxu0 %v2734_v33  ;;  %3776 = vmatpush3.msra.mxu1 %v2747_v34  ;;  %v2141_v34 = vld [vmem:[#allocation3 + $0xe] sm:$0xff] }
 0x298   :  { %3735 = vmatpush3.msra.mxu0 %v2734_v33  ;;  %3777 = vmatprep.subr.mxu1 %v2746_v45  ;;  %v2800_v33 = vld [vmem:[%s5666_s7 + $0x478] sm:$0xff] }
 0x299   :  { %3736 = vmatprep.subr.mxu0 %v2733_v44  ;;  %3778 = vmatpush3.msra.mxu1 %v2746_v45  ;;  %v2798_v45 = vld [vmem:[%s5666_s7 + $0x468] sm:$0xff] }
 0x29a   :  { %3737 = vmatpush3.msra.mxu0 %v2733_v44  ;;  %3779 = vmatprep.subr.mxu1 %v2745_v50  ;;  %v2799_v44 = vld [vmem:[%s5666_s7 + $0x470] sm:$0xff] }
 0x29b   :  { %3738 = vmatprep.subr.mxu0 %v2732_v40  ;;  %3780 = vmatpush3.msra.mxu1 %v2745_v50  ;;  %v2796_v50 = vld [vmem:[%s5666_s7 + $0x458] sm:$0xff] }
 0x29c   :  { %3739 = vmatpush3.msra.mxu0 %v2732_v40  ;;  %3781 = vmatprep.subr.mxu1 %v2744_v56  ;;  %v2797_v40 = vld [vmem:[%s5666_s7 + $0x460] sm:$0xff] }
 0x29d   :  { %3740 = vmatprep.subr.mxu0 %v2731_v54  ;;  %3782 = vmatpush3.msra.mxu1 %v2744_v56  ;;  %v2793_v56 = vld [vmem:[%s5666_s7 + $0x440] sm:$0xff] }
 0x29e   :  { %3741 = vmatpush3.msra.mxu0 %v2731_v54  ;;  %3783 = vmatprep.subr.mxu1 %v2743_v63  ;;  %v2794_v54 = vld [vmem:[%s5666_s7 + $0x448] sm:$0xff] }
 0x29f   :  { %3742 = vmatprep.subr.mxu0 %v2730_v51  ;;  %3784 = vmatpush3.msra.mxu1 %v2743_v63  ;;  %v2791_v63 = vld [vmem:[%s5666_s7 + $0x430] sm:$0xff] }
 0x2a0   :  { %3743 = vmatpush3.msra.mxu0 %v2730_v51  ;;  %3785 = vmatprep.subr.mxu1 %v2742_v58  ;;  %v2792_v51 = vld [vmem:[%s5666_s7 + $0x438] sm:$0xff] }
 0x2a1   :  { %3744 = vmatprep.subr.mxu0 %v2729_v0  ;;  %3786 = vmatpush3.msra.mxu1 %v2742_v58  ;;  %v2789_v58 = vld [vmem:[%s5666_s7 + $0x420] sm:$0xff] }
 0x2a2   :  { %3745 = vmatpush3.msra.mxu0 %v2729_v0  ;;  %3787 = vmatprep.subr.mxu1 %v2741_v7  ;;  %v2790_v0 = vld [vmem:[%s5666_s7 + $0x428] sm:$0xff] }
 0x2a3   :  { %3746 = vmatprep.subr.mxu0 %v2728_v2  ;;  %3788 = vmatpush3.msra.mxu1 %v2741_v7  ;;  %v2787_v7 = vld [vmem:[%s5666_s7 + $0x410] sm:$0xff] }
 0x2a4   :  { %3747 = vmatpush3.msra.mxu0 %v2728_v2  ;;  %3789 = vmatprep.subr.mxu1 %v2740_v43  ;;  %v2788_v2 = vld [vmem:[%s5666_s7 + $0x418] sm:$0xff] }
 0x2a5   :  { %3748 = vmatprep.subr.mxu0 %v2727_v9  ;;  %3790 = vmatpush3.msra.mxu1 %v2740_v43  ;;  %v2785_v43 = vld [vmem:[%s5666_s7 + $0x400] sm:$0xff] }
 0x2a6   :  { %3749 = vmatpush3.msra.mxu0 %v2727_v9  ;;  %3791 = vmatprep.subr.mxu1 %v2739_v47  ;;  %v2786_v9 = vld [vmem:[%s5666_s7 + $0x408] sm:$0xff] }
 0x2a7   :  { %3750 = vmatprep.subr.mxu0 %v2726_v46  ;;  %3792 = vmatpush3.msra.mxu1 %v2739_v47 }
 0x2a8   :  { %3751 = vmatpush3.msra.mxu0 %v2726_v46  ;;  %3793 = vmatprep.subr.mxu1 %v2738_v48 }
 0x2a9   :  { %3752 = vmatprep.subr.mxu0 %v2725_v18  ;;  %3794 = vmatpush3.msra.mxu1 %v2738_v48 }
 0x2aa   :  { %3753 = vmatpush3.msra.mxu0 %v2725_v18  ;;  %3795 = vmatprep.subr.mxu1 %v2737_v49 }
 0x2ab   :  { %3754 = vmatprep.subr.mxu0 %v2724_v17  ;;  %3796 = vmatpush3.msra.mxu1 %v2737_v49 }
 0x2ac   :  { %3755 = vmatpush3.msra.mxu0 %v2724_v17  ;;  %3798 = vmatmul.mubr.f32.vlgmr.msra.gmra.mxu1 %v2045_v57 }
 0x2ad   :  { %3756 = vmatprep.subr.mxu0 %v2723_v52  ;;  %3835 = vmatprep.subr.mxu1 %v2784_v53 }
 0x2ae   :  { %3757 = vmatpush3.msra.mxu0 %v2723_v52  ;;  %3836 = vmatpush3.msra.mxu1 %v2784_v53 }
 0x2af   :  { %3758 = vmatprep.subr.mxu0 %v2722_v55  ;;  %3867 = vmatprep.mubr.f32.mxu1 %v2236_v62 }
 0x2b0   :  { %3759 = vmatpush3.msra.mxu0 %v2722_v55  ;;  %3837 = vmatprep.subr.mxu1 %v2783_v61 }
 0x2b1   :  { %3760 = vmatprep.subr.mxu0 %v2721_v59  ;;  %3838 = vmatpush3.msra.mxu1 %v2783_v61 }
 0x2b2   :  { %3761 = vmatpush3.msra.mxu0 %v2721_v59  ;;  %3839 = vmatprep.subr.mxu1 %v2782_v4 }
 0x2b3   :  { %3763 = vmatmul.mubr.f32.vlgmr.msra.gmra.mxu0 %v1949_v11  ;;  %3800 = vmatprep.subr.mxu0 %v2768_v3 }
 0x2b4   :  { %3801 = vmatpush3.msra.mxu0 %v2768_v3  ;;  %3832 = vmatprep.mubr.f32.mxu0 %v2140_v10 }
 0x2b5   :  { %3840 = vmatpush3.msra.mxu1 %v2782_v4  ;;  %3802 = vmatprep.subr.mxu0 %v2767_v6 }
 0x2b6   :  { %3841 = vmatprep.subr.mxu1 %v2781_v8  ;;  %3803 = vmatpush3.msra.mxu0 %v2767_v6 }
 0x2b7   :  { %3842 = vmatpush3.msra.mxu1 %v2781_v8  ;;  %3804 = vmatprep.subr.mxu0 %v2766_v12 }
 0x2b8   :  { %3843 = vmatprep.subr.mxu1 %v2780_v13  ;;  %3805 = vmatpush3.msra.mxu0 %v2766_v12 }
 0x2b9   :  { %3844 = vmatpush3.msra.mxu1 %v2780_v13  ;;  %3806 = vmatprep.subr.mxu0 %v2765_v14 }
 0x2ba   :  { %3845 = vmatprep.subr.mxu1 %v2779_v1  ;;  %3807 = vmatpush3.msra.mxu0 %v2765_v14 }
 0x2bb   :  { %3846 = vmatpush3.msra.mxu1 %v2779_v1  ;;  %3808 = vmatprep.subr.mxu0 %v2764_v5 }
 0x2bc   :  { %3847 = vmatprep.subr.mxu1 %v2778_v15  ;;  %3809 = vmatpush3.msra.mxu0 %v2764_v5 }
 0x2bd   :  { %3848 = vmatpush3.msra.mxu1 %v2778_v15  ;;  %3810 = vmatprep.subr.mxu0 %v2763_v16 }
 0x2be   :  { %3849 = vmatprep.subr.mxu1 %v2777_v19  ;;  %3811 = vmatpush3.msra.mxu0 %v2763_v16 }
 0x2bf   :  { %3850 = vmatpush3.msra.mxu1 %v2777_v19  ;;  %3812 = vmatprep.subr.mxu0 %v2762_v20 }
 0x2c0   :  { %3851 = vmatprep.subr.mxu1 %v2776_v21  ;;  %3813 = vmatpush3.msra.mxu0 %v2762_v20 }
 0x2c1   :  { %3852 = vmatpush3.msra.mxu1 %v2776_v21  ;;  %3814 = vmatprep.subr.mxu0 %v2761_v22 }
 0x2c2   :  { %3853 = vmatprep.subr.mxu1 %v2775_v23  ;;  %3815 = vmatpush3.msra.mxu0 %v2761_v22  ;;  %v2801_v22 = vld [vmem:[%s5669_s8] ss:$0 sm:$0xff] }
 0x2c3   :  { %3854 = vmatpush3.msra.mxu1 %v2775_v23  ;;  %3816 = vmatprep.subr.mxu0 %v2760_v24 }
 0x2c4   :  { %3855 = vmatprep.subr.mxu1 %v2774_v60  ;;  %3817 = vmatpush3.msra.mxu0 %v2760_v24 }
 0x2c5   :  { %3856 = vmatpush3.msra.mxu1 %v2774_v60  ;;  %3818 = vmatprep.subr.mxu0 %v2759_v25 }
 0x2c6   :  { %3857 = vmatprep.subr.mxu1 %v2773_v26  ;;  %3819 = vmatpush3.msra.mxu0 %v2759_v25 }
 0x2c7   :  { %3858 = vmatpush3.msra.mxu1 %v2773_v26  ;;  %3820 = vmatprep.subr.mxu0 %v2758_v27 }
 0x2c8   :  { %3859 = vmatprep.subr.mxu1 %v2772_v28  ;;  %3821 = vmatpush3.msra.mxu0 %v2758_v27  ;;  %v2802_v27 = vld [vmem:[%s5670_s9] ss:$0 sm:$0xff] }
 0x2c9   :  { %3860 = vmatpush3.msra.mxu1 %v2772_v28  ;;  %3822 = vmatprep.subr.mxu0 %v2757_v29 }
 0x2ca   :  { %3861 = vmatprep.subr.mxu1 %v2771_v30  ;;  %3823 = vmatpush3.msra.mxu0 %v2757_v29 }
 0x2cb   :  { %3862 = vmatpush3.msra.mxu1 %v2771_v30  ;;  %3824 = vmatprep.subr.mxu0 %v2756_v31  ;;  %v2803_v30 = vld [vmem:[%s5670_s9 + $0x1] ss:$0 sm:$0xff] }
 0x2cc   :  { %3863 = vmatprep.subr.mxu1 %v2770_v32  ;;  %3825 = vmatpush3.msra.mxu0 %v2756_v31 }
 0x2cd   :  { %3864 = vmatpush3.msra.mxu1 %v2770_v32  ;;  %3826 = vmatprep.subr.mxu0 %v2755_v35 }
 0x2ce   :  { %3865 = vmatprep.subr.mxu1 %v2769_v36  ;;  %3827 = vmatpush3.msra.mxu0 %v2755_v35 }
 0x2cf   :  { %3866 = vmatpush3.msra.mxu1 %v2769_v36  ;;  %3828 = vmatprep.subr.mxu0 %v2754_v37 }
 0x2d0   :  { %3868 = vmatmul.mubr.f32.vlgmr.msra.gmra.mxu1 %v2237_v38  ;;  %3829 = vmatpush3.msra.mxu0 %v2754_v37 }
 0x2d1   :  { %3830 = vmatprep.subr.mxu0 %v2753_v39 }
 0x2d2   :  { %3831 = vmatpush3.msra.mxu0 %v2753_v39 }
 0x2d3   :  { %3833 = vmatmul.mubr.f32.vlgmr.msra.gmra.mxu0 %v2141_v34  ;;  %3870 = vmatprep.subr.mxu0 %v2800_v33 }
 0x2d4   :  { %3871 = vmatpush3.msra.mxu0 %v2800_v33  ;;  %3902 = vmatprep.mubr.f32.mxu0 %v5305_v41  ;;  %v2795_v41 = vld [vmem:[%s5666_s7 + $0x450] sm:$0xff] }
 0x2d5   :  { %3872 = vmatprep.subr.mxu0 %v2799_v44 }
 0x2d6   :  { %3873 = vmatpush3.msra.mxu0 %v2799_v44 }
 0x2d7   :  { %3874 = vmatprep.subr.mxu0 %v2798_v45 }
 0x2d8   :  { %3875 = vmatpush3.msra.mxu0 %v2798_v45 }
 0x2d9   :  { %3876 = vmatprep.subr.mxu0 %v2797_v40 }
 0x2da   :  { %3877 = vmatpush3.msra.mxu0 %v2797_v40 }
 0x2db   :  { %3878 = vmatprep.subr.mxu0 %v2796_v50 }
 0x2dc   :  { %3879 = vmatpush3.msra.mxu0 %v2796_v50 }
 0x2dd   :  { %3880 = vmatprep.subr.mxu0 %v2795_v41 }
 0x2de   :  { %3881 = vmatpush3.msra.mxu0 %v2795_v41 }
 0x2df   :  { %3882 = vmatprep.subr.mxu0 %v2794_v54 }
 0x2e0   :  { %3883 = vmatpush3.msra.mxu0 %v2794_v54 }
 0x2e1   :  { %3884 = vmatprep.subr.mxu0 %v2793_v56 }
 0x2e2   :  { %3885 = vmatpush3.msra.mxu0 %v2793_v56 }
 0x2e3   :  { %3886 = vmatprep.subr.mxu0 %v2792_v51 }
 0x2e4   :  { %3887 = vmatpush3.msra.mxu0 %v2792_v51 }
 0x2e5   :  { %3888 = vmatprep.subr.mxu0 %v2791_v63 }
 0x2e6   :  { %3889 = vmatpush3.msra.mxu0 %v2791_v63 }
 0x2e7   :  { %3890 = vmatprep.subr.mxu0 %v2790_v0 }
 0x2e8   :  { %3891 = vmatpush3.msra.mxu0 %v2790_v0 }
 0x2e9   :  { %3892 = vmatprep.subr.mxu0 %v2789_v58 }
 0x2ea   :  { %3893 = vmatpush3.msra.mxu0 %v2789_v58 }
 0x2eb   :  { %3894 = vmatprep.subr.mxu0 %v2788_v2 }
 0x2ec   :  { %3895 = vmatpush3.msra.mxu0 %v2788_v2 }
 0x2ed   :  { %3896 = vmatprep.subr.mxu0 %v2787_v7 }
 0x2ee   :  { %3897 = vmatpush3.msra.mxu0 %v2787_v7 }
 0x2ef   :  { %3898 = vmatprep.subr.mxu0 %v2786_v9 }
 0x2f0   :  { %3899 = vmatpush3.msra.mxu0 %v2786_v9 }
 0x2f1   :  { %3900 = vmatprep.subr.mxu0 %v2785_v43 }
 0x2f2   :  { %3901 = vmatpush3.msra.mxu0 %v2785_v43 }
 0x2f3   :  { %3903 = vmatmul.mubr.f32.vlgmr.msra.gmra.mxu0 %v5316_v42 }
 0x327   :  { %v3659_v18 = vpop.f32.mrf.mxu1 }
 0x329   :  { %v1747_v49 = vpop.f32.mrf.mxu1 }
 0x333   :  { %v3624_v46 = vpop.f32.mrf.mxu0 }
 0x334   :  { %v1753_v17 = vadd.f32 %v3659_v18, %v3624_v46 }
 0x335   :  { %v1672_v47 = vpop.f32.mrf.mxu0 }
 0x336   :  { %v1748_v53 = vadd.f32 %v1747_v49, %v1672_v47 }
 0x348   :  { %v3729_v57 = vpop.f32.mrf.mxu1 }
 0x34a   :  { %v1937_v3 = vpop.f32.mrf.mxu1 }
 0x353   :  { %v3694_v48 = vpop.f32.mrf.mxu0 }
 0x354   :  { %v1851_v55 = vadd.f32 %v3694_v48, %v1753_v17 }
 0x355   :  { %v1841_v52 = vpop.f32.mrf.mxu0 }
 0x356   :  { %v1850_v61 = vadd.f32 %v1841_v52, %v1748_v53  ;;  %v1947_v62 = vadd.f32 %v3729_v57, %v1851_v55 }
 0x358   :  { %v1946_v6 = vadd.f32 %v1937_v3, %v1850_v61 }
 0x36c   :  { %v3799_v8 = vpop.f32.mrf.mxu1 }
 0x36e   :  { %v2129_v13 = vpop.f32.mrf.mxu1 }
 0x373   :  { %v3764_v59 = vpop.f32.mrf.mxu0 }
 0x374   :  { %v2043_v11 = vadd.f32 %v3764_v59, %v1947_v62 }
 0x375   :  { %v2033_v4 = vpop.f32.mrf.mxu0 }
 0x376   :  { %v2042_v42 = vadd.f32 %v2033_v4, %v1946_v6  ;;  %v2139_v12 = vadd.f32 %v3799_v8, %v2043_v11 }
 0x378   :  { %v2138_v5 = vadd.f32 %v2129_v13, %v2042_v42 }
 0x390   :  { %v3869_v15 = vpop.f32.mrf.mxu1 }
 0x392   :  { %v2321_v20 = vpop.f32.mrf.mxu1 }
 0x393   :  { %v3834_v10 = vpop.f32.mrf.mxu0 }
 0x394   :  { %v2235_v1 = vadd.f32 %v3834_v10, %v2139_v12 }
 0x395   :  { %v2225_v14 = vpop.f32.mrf.mxu0 }
 0x396   :  { %v2234_v16 = vadd.f32 %v2225_v14, %v2138_v5  ;;  %v2331_v19 = vadd.f32 %v3869_v15, %v2235_v1 }
 0x398   :  { %v2330_v24 = vadd.f32 %v2321_v20, %v2234_v16 }
 0x3b3   :  { %v3904_v21 = vpop.f32.mrf.mxu0 }
 0x3b4   :  { %v2427_v23 = vadd.f32 %v3904_v21, %v2331_v19 }
 0x3b5   :  { %v2417_v60 = vpop.f32.mrf.mxu0 }
 0x3b6   :  { %v2436_v25 = vadd.f32 %v2801_v22, %v2427_v23  ;;  %v2426_v26 = vadd.f32 %v2417_v60, %v2330_v24 }
 0x3b8   :  { %v2438_v28 = vmax.f32 %v2436_v25, 0.0  ;;  %v2435_v29 = vadd.f32 %v2801_v22, %v2426_v26 }
 0x3ba   :  { %v2445_v31 = vmul.f32 %v2802_v27, %v2438_v28  ;;  %v2437_v32 = vmax.f32 %v2435_v29, 0.0 }
 0x3bc   :  { %v2452_v35 = vadd.f32 %v2803_v30, %v2445_v31  ;;  %v2444_v36 = vmul.f32 %v2802_v27, %v2437_v32 }
 0x3be   :  { %2454 = vst [vmem:[%s5671_s10 + $0x8] sm:$0xff] %v2452_v35  ;;  %v2451_v37 = vadd.f32 %v2803_v30, %v2444_v36 }
 0x3c0   :  { %2453 = vst [vmem:[%s5671_s10] sm:$0xff] %v2451_v37 }

</bundles_post_ra>
